<compile_context>
chip_gen: v5e
topology: v5e:2x2
jax: 0.10.0
libtpu: 0.0.40
codegen_flags: <defaults>
</compile_context>

<pallas_src>
import jax
import jax.numpy as jnp
from jax import lax
from jax.experimental import pallas as pl
from jax.experimental.pallas import tpu as pltpu

# Module config / small shapes
CIN, COUT = 4, 8
H = W = 16
HO = WO = 8            # stride-2 output spatial size
HW = HO * WO
K1 = 9 * CIN           # 36 : fused conv1 reduction width
NEG = -1e30            # additive "mask" bias (killed by ReLU at padded taps)


def _block_kernel(xt_ref, s1_ref, beff_ref, w1_ref, b1_ref, w2_ref, ws_ref, b2_ref,
                  out_ref, pad2):
    B = xt_ref.shape[0]
    rows = B * HW

    taps = xt_ref[...]                                           # (B, HW, 36) raw im2col of x
    # ReLU(BN1(x)) on the im2col taps; conv zero-padding folded into beff (-1e30 -> ReLU -> 0).
    y = jnp.maximum(taps * s1_ref[...][None] + beff_ref[...][None], 0.0)

    # conv1 (3x3, stride 2, pad 1) as ONE fused matmul; BN2 scale/bias pre-folded into w1/b1.
    z = jnp.maximum(
        jnp.dot(y.reshape(rows, K1), w1_ref[...], preferred_element_type=jnp.float32)
        + b1_ref[...], 0.0)                                      # (rows, COUT)

    # conv2 (3x3, stride 1, pad 1): zero-padded VMEM scratch holds z per image.
    pad2[...] = jnp.zeros_like(pad2)
    pad2[:, pl.ds(1, HO), pl.ds(1, WO), :] = z.reshape(B, HO, WO, COUT)

    # Shortcut Conv1x1-s2 (+ folded BN): its input is exactly the raw centre tap (t=4)
    # of the conv1 im2col matrix, so no separate strided input is needed.
    xc = taps[:, :, 4 * CIN:5 * CIN].reshape(rows, CIN)
    acc = jnp.dot(xc, ws_ref[...], preferred_element_type=jnp.float32)       # (rows, COUT)

    # TODO(synk): could fuse further into a single (rows, 76) matmul by lane-concatenating
    #             the 9 patches + shortcut columns; kept as accumulation for lowering safety.
    for t in range(9):
        di, dj = t // 3, t % 3
        patch = pad2[:, pl.ds(di, HO), pl.ds(dj, WO), :]                     # (B, HO, WO, COUT)
        acc = acc + jnp.dot(patch.reshape(rows, COUT), w2_ref[t],
                            preferred_element_type=jnp.float32)

    out_ref[...] = (acc + b2_ref[...]).reshape(B, HW, COUT)


def pre_res_block_projection(x_nchw, p, block_b=None):
    N = x_nchw.shape[0]
    if block_b is None:
        block_b = min(32, ((N + 7) // 8) * 8)       # batch tile (multiple of 8)
    B = block_b
    n_blocks = -(-N // B)
    N_pad = n_blocks * B

    x = jnp.transpose(x_nchw, (0, 2, 3, 1)).astype(jnp.float32)              # NHWC

    # --- glue: im2col of the stride-2 3x3 taps of the zero-padded input ---
    x_pad = jnp.pad(x, ((0, 0), (1, 1), (1, 1), (0, 0)))
    ii = jnp.arange(HO)
    jj = jnp.arange(WO)
    taps, valid = [], []
    for di in range(3):
        for dj in range(3):
            taps.append(x_pad[:, di:di + 2 * HO:2, dj:dj + 2 * WO:2, :])     # (N, 8, 8, 4)
            vr = (2 * ii + di >= 1) & (2 * ii + di <= H)
            vc = (2 * jj + dj >= 1) & (2 * jj + dj <= W)
            valid.append(vr[:, None] & vc[None, :])                          # (8, 8)
    x_taps = jnp.stack(taps, axis=3).reshape(N, HW, K1)                      # (N, 64, 36)
    if N_pad != N:
        x_taps = jnp.pad(x_taps, ((0, N_pad - N), (0, 0), (0, 0)))
    vmask = jnp.stack(valid, axis=2)                                         # (8, 8, 9)

    # --- one-time parameter folding (parameters only, no per-activation wrapper compute) ---
    s36 = jnp.tile(p['bn1_scale'], 9).reshape(1, K1)
    beff = jnp.where(vmask[..., None], p['bn1_bias'][None, None, None, :],
                     jnp.float32(NEG)).reshape(HW, K1)                       # bn1 bias + pad mask
    w1f = p['w1'].reshape(K1, COUT) * p['bn2_scale'][None, :]                # BN2 folded into conv1
    b1f = (p['b1'] * p['bn2_scale'] + p['bn2_bias']).reshape(1, COUT)
    wsf = p['ws'] * p['sc_scale'][None, :]                                   # shortcut BN folded in
    b2f = (p['b2'] + p['bs'] * p['sc_scale'] + p['sc_bias']).reshape(1, COUT)

    in_specs = [
        pl.BlockSpec((B, HW, K1), lambda b: (b, 0, 0)),        # im2col taps
        pl.BlockSpec((1, K1), lambda b: (0, 0)),               # bn1 scale (tiled to 36)
        pl.BlockSpec((HW, K1), lambda b: (0, 0)),              # bn1 bias with pad mask folded in
        pl.BlockSpec((K1, COUT), lambda b: (0, 0)),            # conv1 weights (BN2 folded)
        pl.BlockSpec((1, COUT), lambda b: (0, 0)),             # conv1 bias (BN2 folded)
        pl.BlockSpec((9, COUT, COUT), lambda b: (0, 0, 0)),    # conv2 weights
        pl.BlockSpec((CIN, COUT), lambda b: (0, 0)),           # shortcut weights (BN folded)
        pl.BlockSpec((1, COUT), lambda b: (0, 0)),             # conv2 bias + shortcut bias
    ]
    out_specs = pl.BlockSpec((B, HW, COUT), lambda b: (b, 0, 0))

    out = pl.pallas_call(
        _block_kernel,
        out_shape=jax.ShapeDtypeStruct((N_pad, HW, COUT), jnp.float32),
        grid_spec=pltpu.PrefetchScalarGridSpec(
            num_scalar_prefetch=0,
            grid=(n_blocks,),
            in_specs=in_specs,
            out_specs=out_specs,
            scratch_shapes=[pltpu.VMEM((B, HO + 2, WO + 2, COUT), jnp.float32)],
        ),
        compiler_params=pltpu.CompilerParams(dimension_semantics=("parallel",)),
    )(x_taps, s36, beff, w1f, b1f, p['w2'], wsf, b2f)

    out = out[:N].reshape(N, HO, WO, COUT)
    return jnp.transpose(out, (0, 3, 1, 2))                                  # back to NCHW


def reference(x_nchw, p):
    """Pure-JAX reference of the same forward (unfolded parameters)."""
    x = jnp.transpose(x_nchw, (0, 2, 3, 1)).astype(jnp.float32)
    dn = ('NHWC', 'HWIO', 'NHWC')
    y = jax.nn.relu(x * p['bn1_scale'] + p['bn1_bias'])
    c1 = lax.conv_general_dilated(y, p['w1'].reshape(3, 3, CIN, COUT), (2, 2),
                                  [(1, 1), (1, 1)], dimension_numbers=dn) + p['b1']
    z = jax.nn.relu(c1 * p['bn2_scale'] + p['bn2_bias'])
    c2 = lax.conv_general_dilated(z, p['w2'].reshape(3, 3, COUT, COUT), (1, 1),
                                  [(1, 1), (1, 1)], dimension_numbers=dn) + p['b2']
    sc = lax.conv_general_dilated(x, p['ws'].reshape(1, 1, CIN, COUT), (2, 2),
                                  [(0, 0), (0, 0)], dimension_numbers=dn) + p['bs']
    sc = sc * p['sc_scale'] + p['sc_bias']
    return jnp.transpose(c2 + sc, (0, 3, 1, 2))


def init_params(key):
    ks = jax.random.split(key, 18)
    eps = 1e-5

    def bn_fold(kg, kb, km, kv, c):
        gamma = 1.0 + 0.1 * jax.random.normal(kg, (c,), jnp.float32)
        beta = 0.1 * jax.random.normal(kb, (c,), jnp.float32)
        mean = 0.1 * jax.random.normal(km, (c,), jnp.float32)
        var = 1.0 + 0.1 * jnp.abs(jax.random.normal(kv, (c,), jnp.float32))
        scale = gamma * lax.rsqrt(var + eps)
        return scale, beta - mean * scale

    bn1_s, bn1_b = bn_fold(ks[6], ks[7], ks[8], ks[9], CIN)
    bn2_s, bn2_b = bn_fold(ks[10], ks[11], ks[12], ks[13], COUT)
    sc_s, sc_b = bn_fold(ks[14], ks[15], ks[16], ks[17], COUT)
    return {
        'w1': 0.1 * jax.random.normal(ks[0], (9, CIN, COUT), jnp.float32),
        'b1': 0.05 * jax.random.normal(ks[1], (COUT,), jnp.float32),
        'w2': 0.1 * jax.random.normal(ks[2], (9, COUT, COUT), jnp.float32),
        'b2': 0.05 * jax.random.normal(ks[3], (COUT,), jnp.float32),
        'ws': 0.1 * jax.random.normal(ks[4], (CIN, COUT), jnp.float32),
        'bs': 0.05 * jax.random.normal(ks[5], (COUT,), jnp.float32),
        'bn1_scale': bn1_s, 'bn1_bias': bn1_b,
        'bn2_scale': bn2_s, 'bn2_bias': bn2_b,
        'sc_scale': sc_s, 'sc_bias': sc_b,
    }


if __name__ == "__main__":
    key = jax.random.PRNGKey(0)
    kx, kp = jax.random.split(key)
    x = jax.random.normal(kx, (2, CIN, H, W), jnp.float32)       # NCHW, like PyTorch
    params = init_params(kp)

    out = jax.block_until_ready(pre_res_block_projection(x, params))
    ref = reference(x, params)
    err = float(jnp.max(jnp.abs(out - ref)))
    if not bool(jnp.allclose(out, ref, atol=1e-4, rtol=1e-4)):
        raise AssertionError(f"kernel/reference mismatch, max abs err = {err}")
    print("KERNEL_OK")
</pallas_src>

<mosaic_0001>
module attributes {stable_mosaic.version = 11 : i64} {
  func.func @_block_kernel(%arg0: i32, %arg1: memref<8x64x36xf32, #tpu.memory_space<vmem>>, %arg2: memref<1x36xf32, #tpu.memory_space<vmem>>, %arg3: memref<64x36xf32, #tpu.memory_space<vmem>>, %arg4: memref<36x8xf32, #tpu.memory_space<vmem>>, %arg5: memref<1x8xf32, #tpu.memory_space<vmem>>, %arg6: memref<9x8x8xf32, #tpu.memory_space<vmem>>, %arg7: memref<4x8xf32, #tpu.memory_space<vmem>>, %arg8: memref<1x8xf32, #tpu.memory_space<vmem>>, %arg9: memref<8x64x8xf32, #tpu.memory_space<vmem>>, %arg10: memref<8x10x10x8xf32, #tpu.memory_space<vmem>>) attributes {dimension_semantics = [#tpu.dimension_semantics<parallel>], iteration_bounds = array<i64: 1>, scalar_prefetch = 0 : i64, scratch_operands = 1 : i64, tpu.core_type = #tpu.core_type<tc>, window_params = [{transform_indices = @transform_0, window_bounds = array<i64: 8, 64, 36>}, {pipeline_mode = #tpu.pipeline_mode<synchronous>, transform_indices = @transform_1, window_bounds = array<i64: 1, 36>}, {pipeline_mode = #tpu.pipeline_mode<synchronous>, transform_indices = @transform_2, window_bounds = array<i64: 64, 36>}, {pipeline_mode = #tpu.pipeline_mode<synchronous>, transform_indices = @transform_3, window_bounds = array<i64: 36, 8>}, {pipeline_mode = #tpu.pipeline_mode<synchronous>, transform_indices = @transform_4, window_bounds = array<i64: 1, 8>}, {pipeline_mode = #tpu.pipeline_mode<synchronous>, transform_indices = @transform_5, window_bounds = array<i64: 9, 8, 8>}, {pipeline_mode = #tpu.pipeline_mode<synchronous>, transform_indices = @transform_6, window_bounds = array<i64: 4, 8>}, {pipeline_mode = #tpu.pipeline_mode<synchronous>, transform_indices = @transform_7, window_bounds = array<i64: 1, 8>}, {transform_indices = @transform_8, window_bounds = array<i64: 8, 64, 8>}]} {
    %c0 = arith.constant 0 : index
    %c0_0 = arith.constant 0 : index
    %c0_1 = arith.constant 0 : index
    %0 = vector.load %arg1[%c0, %c0_0, %c0_1] : memref<8x64x36xf32, #tpu.memory_space<vmem>>, vector<8x64x36xf32>
    %c0_2 = arith.constant 0 : index
    %c0_3 = arith.constant 0 : index
    %1 = vector.load %arg2[%c0_2, %c0_3] : memref<1x36xf32, #tpu.memory_space<vmem>>, vector<1x36xf32>
    %2 = vector.shape_cast %1 : vector<1x36xf32> to vector<1x1x36xf32>
    %3 = vector.broadcast %2 : vector<1x1x36xf32> to vector<8x64x36xf32>
    %4 = arith.mulf %0, %3 : vector<8x64x36xf32>
    %c0_4 = arith.constant 0 : index
    %c0_5 = arith.constant 0 : index
    %5 = vector.load %arg3[%c0_4, %c0_5] : memref<64x36xf32, #tpu.memory_space<vmem>>, vector<64x36xf32>
    %6 = vector.shape_cast %5 : vector<64x36xf32> to vector<1x64x36xf32>
    %7 = vector.broadcast %6 : vector<1x64x36xf32> to vector<8x64x36xf32>
    %8 = arith.addf %4, %7 : vector<8x64x36xf32>
    %cst = arith.constant 0.000000e+00 : f32
    %9 = vector.broadcast %cst : f32 to vector<8x64x36xf32>
    %10 = arith.maximumf %8, %9 : vector<8x64x36xf32>
    %11 = vector.shape_cast %10 : vector<8x64x36xf32> to vector<512x36xf32>
    %c0_6 = arith.constant 0 : index
    %c0_7 = arith.constant 0 : index
    %12 = vector.load %arg4[%c0_6, %c0_7] : memref<36x8xf32, #tpu.memory_space<vmem>>, vector<36x8xf32>
    %cst_8 = arith.constant dense<0.000000e+00> : vector<512x8xf32>
    %13 = tpu.matmul %11, %12, %cst_8 {dimension_numbers = #tpu.dot_dimension_numbers<[1], [0], [0], [1], [0, 0, 1, 1], [], []>} : vector<512x36xf32>, vector<36x8xf32>, vector<512x8xf32> -> vector<512x8xf32>
    %c0_9 = arith.constant 0 : index
    %c0_10 = arith.constant 0 : index
    %14 = vector.load %arg5[%c0_9, %c0_10] : memref<1x8xf32, #tpu.memory_space<vmem>>, vector<1x8xf32>
    %15 = vector.broadcast %14 : vector<1x8xf32> to vector<512x8xf32>
    %16 = arith.addf %13, %15 : vector<512x8xf32>
    %cst_11 = arith.constant 0.000000e+00 : f32
    %17 = vector.broadcast %cst_11 : f32 to vector<512x8xf32>
    %18 = arith.maximumf %16, %17 : vector<512x8xf32>
    %cst_12 = arith.constant 0.000000e+00 : f32
    %19 = vector.broadcast %cst_12 : f32 to vector<8x10x10x8xf32>
    %c0_13 = arith.constant 0 : index
    %c0_14 = arith.constant 0 : index
    %c0_15 = arith.constant 0 : index
    %c0_16 = arith.constant 0 : index
    %20 = vector.load %arg10[%c0_13, %c0_14, %c0_15, %c0_16] : memref<8x10x10x8xf32, #tpu.memory_space<vmem>>, vector<8x10x10x8xf32>
    tpu.vector_store %arg10[%c0_13, %c0_14, %c0_15, %c0_16], %19 {strides = array<i32>} : memref<8x10x10x8xf32, #tpu.memory_space<vmem>>, vector<8x10x10x8xf32>,
    %21 = vector.shape_cast %18 : vector<512x8xf32> to vector<8x8x8x8xf32>
    %c0_17 = arith.constant 0 : index
    %c1 = arith.constant 1 : index
    %c1_18 = arith.constant 1 : index
    %c0_19 = arith.constant 0 : index
    %22 = vector.load %arg10[%c0_17, %c1, %c1_18, %c0_19] : memref<8x10x10x8xf32, #tpu.memory_space<vmem>>, vector<8x8x8x8xf32>
    tpu.vector_store %arg10[%c0_17, %c1, %c1_18, %c0_19], %21 {strides = array<i32>} : memref<8x10x10x8xf32, #tpu.memory_space<vmem>>, vector<8x8x8x8xf32>,
    %23 = vector.extract_strided_slice %0 {offsets = [0, 0, 16], sizes = [8, 64, 4], strides = [1, 1, 1]} : vector<8x64x36xf32> to vector<8x64x4xf32>
    %24 = vector.shape_cast %23 : vector<8x64x4xf32> to vector<512x4xf32>
    %c0_20 = arith.constant 0 : index
    %c0_21 = arith.constant 0 : index
    %25 = vector.load %arg7[%c0_20, %c0_21] : memref<4x8xf32, #tpu.memory_space<vmem>>, vector<4x8xf32>
    %cst_22 = arith.constant dense<0.000000e+00> : vector<512x8xf32>
    %26 = tpu.matmul %24, %25, %cst_22 {dimension_numbers = #tpu.dot_dimension_numbers<[1], [0], [0], [1], [0, 0, 1, 1], [], []>} : vector<512x4xf32>, vector<4x8xf32>, vector<512x8xf32> -> vector<512x8xf32>
    %c0_23 = arith.constant 0 : index
    %c0_24 = arith.constant 0 : index
    %c0_25 = arith.constant 0 : index
    %c0_26 = arith.constant 0 : index
    %27 = vector.load %arg10[%c0_23, %c0_24, %c0_25, %c0_26] : memref<8x10x10x8xf32, #tpu.memory_space<vmem>>, vector<8x8x8x8xf32>
    %28 = vector.shape_cast %27 : vector<8x8x8x8xf32> to vector<512x8xf32>
    %c0_27 = arith.constant 0 : index
    %c0_28 = arith.constant 0 : index
    %c0_29 = arith.constant 0 : index
    %29 = vector.load %arg6[%c0_27, %c0_28, %c0_29] : memref<9x8x8xf32, #tpu.memory_space<vmem>>, vector<1x8x8xf32>
    %30 = vector.shape_cast %29 : vector<1x8x8xf32> to vector<8x8xf32>
    %cst_30 = arith.constant dense<0.000000e+00> : vector<512x8xf32>
    %31 = tpu.matmul %28, %30, %cst_30 {dimension_numbers = #tpu.dot_dimension_numbers<[1], [0], [0], [1], [0, 0, 1, 1], [], []>} : vector<512x8xf32>, vector<8x8xf32>, vector<512x8xf32> -> vector<512x8xf32>
    %32 = arith.addf %26, %31 : vector<512x8xf32>
    %c0_31 = arith.constant 0 : index
    %c0_32 = arith.constant 0 : index
    %c1_33 = arith.constant 1 : index
    %c0_34 = arith.constant 0 : index
    %33 = vector.load %arg10[%c0_31, %c0_32, %c1_33, %c0_34] : memref<8x10x10x8xf32, #tpu.memory_space<vmem>>, vector<8x8x8x8xf32>
    %34 = vector.shape_cast %33 : vector<8x8x8x8xf32> to vector<512x8xf32>
    %c1_35 = arith.constant 1 : index
    %c0_36 = arith.constant 0 : index
    %c0_37 = arith.constant 0 : index
    %35 = vector.load %arg6[%c1_35, %c0_36, %c0_37] : memref<9x8x8xf32, #tpu.memory_space<vmem>>, vector<1x8x8xf32>
    %36 = vector.shape_cast %35 : vector<1x8x8xf32> to vector<8x8xf32>
    %cst_38 = arith.constant dense<0.000000e+00> : vector<512x8xf32>
    %37 = tpu.matmul %34, %36, %cst_38 {dimension_numbers = #tpu.dot_dimension_numbers<[1], [0], [0], [1], [0, 0, 1, 1], [], []>} : vector<512x8xf32>, vector<8x8xf32>, vector<512x8xf32> -> vector<512x8xf32>
    %38 = arith.addf %32, %37 : vector<512x8xf32>
    %c0_39 = arith.constant 0 : index
    %c0_40 = arith.constant 0 : index
    %c2 = arith.constant 2 : index
    %c0_41 = arith.constant 0 : index
    %39 = vector.load %arg10[%c0_39, %c0_40, %c2, %c0_41] : memref<8x10x10x8xf32, #tpu.memory_space<vmem>>, vector<8x8x8x8xf32>
    %40 = vector.shape_cast %39 : vector<8x8x8x8xf32> to vector<512x8xf32>
    %c2_42 = arith.constant 2 : index
    %c0_43 = arith.constant 0 : index
    %c0_44 = arith.constant 0 : index
    %41 = vector.load %arg6[%c2_42, %c0_43, %c0_44] : memref<9x8x8xf32, #tpu.memory_space<vmem>>, vector<1x8x8xf32>
    %42 = vector.shape_cast %41 : vector<1x8x8xf32> to vector<8x8xf32>
    %cst_45 = arith.constant dense<0.000000e+00> : vector<512x8xf32>
    %43 = tpu.matmul %40, %42, %cst_45 {dimension_numbers = #tpu.dot_dimension_numbers<[1], [0], [0], [1], [0, 0, 1, 1], [], []>} : vector<512x8xf32>, vector<8x8xf32>, vector<512x8xf32> -> vector<512x8xf32>
    %44 = arith.addf %38, %43 : vector<512x8xf32>
    %c0_46 = arith.constant 0 : index
    %c1_47 = arith.constant 1 : index
    %c0_48 = arith.constant 0 : index
    %c0_49 = arith.constant 0 : index
    %45 = vector.load %arg10[%c0_46, %c1_47, %c0_48, %c0_49] : memref<8x10x10x8xf32, #tpu.memory_space<vmem>>, vector<8x8x8x8xf32>
    %46 = vector.shape_cast %45 : vector<8x8x8x8xf32> to vector<512x8xf32>
    %c3 = arith.constant 3 : index
    %c0_50 = arith.constant 0 : index
    %c0_51 = arith.constant 0 : index
    %47 = vector.load %arg6[%c3, %c0_50, %c0_51] : memref<9x8x8xf32, #tpu.memory_space<vmem>>, vector<1x8x8xf32>
    %48 = vector.shape_cast %47 : vector<1x8x8xf32> to vector<8x8xf32>
    %cst_52 = arith.constant dense<0.000000e+00> : vector<512x8xf32>
    %49 = tpu.matmul %46, %48, %cst_52 {dimension_numbers = #tpu.dot_dimension_numbers<[1], [0], [0], [1], [0, 0, 1, 1], [], []>} : vector<512x8xf32>, vector<8x8xf32>, vector<512x8xf32> -> vector<512x8xf32>
    %50 = arith.addf %44, %49 : vector<512x8xf32>
    %c0_53 = arith.constant 0 : index
    %c1_54 = arith.constant 1 : index
    %c1_55 = arith.constant 1 : index
    %c0_56 = arith.constant 0 : index
    %51 = vector.load %arg10[%c0_53, %c1_54, %c1_55, %c0_56] : memref<8x10x10x8xf32, #tpu.memory_space<vmem>>, vector<8x8x8x8xf32>
    %52 = vector.shape_cast %51 : vector<8x8x8x8xf32> to vector<512x8xf32>
    %c4 = arith.constant 4 : index
    %c0_57 = arith.constant 0 : index
    %c0_58 = arith.constant 0 : index
    %53 = vector.load %arg6[%c4, %c0_57, %c0_58] : memref<9x8x8xf32, #tpu.memory_space<vmem>>, vector<1x8x8xf32>
    %54 = vector.shape_cast %53 : vector<1x8x8xf32> to vector<8x8xf32>
    %cst_59 = arith.constant dense<0.000000e+00> : vector<512x8xf32>
    %55 = tpu.matmul %52, %54, %cst_59 {dimension_numbers = #tpu.dot_dimension_numbers<[1], [0], [0], [1], [0, 0, 1, 1], [], []>} : vector<512x8xf32>, vector<8x8xf32>, vector<512x8xf32> -> vector<512x8xf32>
    %56 = arith.addf %50, %55 : vector<512x8xf32>
    %c0_60 = arith.constant 0 : index
    %c1_61 = arith.constant 1 : index
    %c2_62 = arith.constant 2 : index
    %c0_63 = arith.constant 0 : index
    %57 = vector.load %arg10[%c0_60, %c1_61, %c2_62, %c0_63] : memref<8x10x10x8xf32, #tpu.memory_space<vmem>>, vector<8x8x8x8xf32>
    %58 = vector.shape_cast %57 : vector<8x8x8x8xf32> to vector<512x8xf32>
    %c5 = arith.constant 5 : index
    %c0_64 = arith.constant 0 : index
    %c0_65 = arith.constant 0 : index
    %59 = vector.load %arg6[%c5, %c0_64, %c0_65] : memref<9x8x8xf32, #tpu.memory_space<vmem>>, vector<1x8x8xf32>
    %60 = vector.shape_cast %59 : vector<1x8x8xf32> to vector<8x8xf32>
    %cst_66 = arith.constant dense<0.000000e+00> : vector<512x8xf32>
    %61 = tpu.matmul %58, %60, %cst_66 {dimension_numbers = #tpu.dot_dimension_numbers<[1], [0], [0], [1], [0, 0, 1, 1], [], []>} : vector<512x8xf32>, vector<8x8xf32>, vector<512x8xf32> -> vector<512x8xf32>
    %62 = arith.addf %56, %61 : vector<512x8xf32>
    %c0_67 = arith.constant 0 : index
    %c2_68 = arith.constant 2 : index
    %c0_69 = arith.constant 0 : index
    %c0_70 = arith.constant 0 : index
    %63 = vector.load %arg10[%c0_67, %c2_68, %c0_69, %c0_70] : memref<8x10x10x8xf32, #tpu.memory_space<vmem>>, vector<8x8x8x8xf32>
    %64 = vector.shape_cast %63 : vector<8x8x8x8xf32> to vector<512x8xf32>
    %c6 = arith.constant 6 : index
    %c0_71 = arith.constant 0 : index
    %c0_72 = arith.constant 0 : index
    %65 = vector.load %arg6[%c6, %c0_71, %c0_72] : memref<9x8x8xf32, #tpu.memory_space<vmem>>, vector<1x8x8xf32>
    %66 = vector.shape_cast %65 : vector<1x8x8xf32> to vector<8x8xf32>
    %cst_73 = arith.constant dense<0.000000e+00> : vector<512x8xf32>
    %67 = tpu.matmul %64, %66, %cst_73 {dimension_numbers = #tpu.dot_dimension_numbers<[1], [0], [0], [1], [0, 0, 1, 1], [], []>} : vector<512x8xf32>, vector<8x8xf32>, vector<512x8xf32> -> vector<512x8xf32>
    %68 = arith.addf %62, %67 : vector<512x8xf32>
    %c0_74 = arith.constant 0 : index
    %c2_75 = arith.constant 2 : index
    %c1_76 = arith.constant 1 : index
    %c0_77 = arith.constant 0 : index
    %69 = vector.load %arg10[%c0_74, %c2_75, %c1_76, %c0_77] : memref<8x10x10x8xf32, #tpu.memory_space<vmem>>, vector<8x8x8x8xf32>
    %70 = vector.shape_cast %69 : vector<8x8x8x8xf32> to vector<512x8xf32>
    %c7 = arith.constant 7 : index
    %c0_78 = arith.constant 0 : index
    %c0_79 = arith.constant 0 : index
    %71 = vector.load %arg6[%c7, %c0_78, %c0_79] : memref<9x8x8xf32, #tpu.memory_space<vmem>>, vector<1x8x8xf32>
    %72 = vector.shape_cast %71 : vector<1x8x8xf32> to vector<8x8xf32>
    %cst_80 = arith.constant dense<0.000000e+00> : vector<512x8xf32>
    %73 = tpu.matmul %70, %72, %cst_80 {dimension_numbers = #tpu.dot_dimension_numbers<[1], [0], [0], [1], [0, 0, 1, 1], [], []>} : vector<512x8xf32>, vector<8x8xf32>, vector<512x8xf32> -> vector<512x8xf32>
    %74 = arith.addf %68, %73 : vector<512x8xf32>
    %c0_81 = arith.constant 0 : index
    %c2_82 = arith.constant 2 : index
    %c2_83 = arith.constant 2 : index
    %c0_84 = arith.constant 0 : index
    %75 = vector.load %arg10[%c0_81, %c2_82, %c2_83, %c0_84] : memref<8x10x10x8xf32, #tpu.memory_space<vmem>>, vector<8x8x8x8xf32>
    %76 = vector.shape_cast %75 : vector<8x8x8x8xf32> to vector<512x8xf32>
    %c8 = arith.constant 8 : index
    %c0_85 = arith.constant 0 : index
    %c0_86 = arith.constant 0 : index
    %77 = vector.load %arg6[%c8, %c0_85, %c0_86] : memref<9x8x8xf32, #tpu.memory_space<vmem>>, vector<1x8x8xf32>
    %78 = vector.shape_cast %77 : vector<1x8x8xf32> to vector<8x8xf32>
    %cst_87 = arith.constant dense<0.000000e+00> : vector<512x8xf32>
    %79 = tpu.matmul %76, %78, %cst_87 {dimension_numbers = #tpu.dot_dimension_numbers<[1], [0], [0], [1], [0, 0, 1, 1], [], []>} : vector<512x8xf32>, vector<8x8xf32>, vector<512x8xf32> -> vector<512x8xf32>
    %80 = arith.addf %74, %79 : vector<512x8xf32>
    %c0_88 = arith.constant 0 : index
    %c0_89 = arith.constant 0 : index
    %81 = vector.load %arg8[%c0_88, %c0_89] : memref<1x8xf32, #tpu.memory_space<vmem>>, vector<1x8xf32>
    %82 = vector.broadcast %81 : vector<1x8xf32> to vector<512x8xf32>
    %83 = arith.addf %80, %82 : vector<512x8xf32>
    %84 = vector.shape_cast %83 : vector<512x8xf32> to vector<8x64x8xf32>
    %c0_90 = arith.constant 0 : index
    %c0_91 = arith.constant 0 : index
    %c0_92 = arith.constant 0 : index
    %85 = vector.load %arg9[%c0_90, %c0_91, %c0_92] : memref<8x64x8xf32, #tpu.memory_space<vmem>>, vector<8x64x8xf32>
    tpu.vector_store %arg9[%c0_90, %c0_91, %c0_92], %84 {strides = array<i32>} : memref<8x64x8xf32, #tpu.memory_space<vmem>>, vector<8x64x8xf32>,
    return
  }
  func.func @transform_0(%arg0: i32) -> (i32, i32, i32) {
    %c0_i32 = arith.constant 0 : i32
    %c0_i32_0 = arith.constant 0 : i32
    %c0_i32_1 = arith.constant 0 : i32
    return %arg0, %c0_i32, %c0_i32_0 : i32, i32, i32
  }
  func.func @transform_1(%arg0: i32) -> (i32, i32) {
    %c0_i32 = arith.constant 0 : i32
    %c0_i32_0 = arith.constant 0 : i32
    %c0_i32_1 = arith.constant 0 : i32
    return %c0_i32, %c0_i32_0 : i32, i32
  }
  func.func @transform_2(%arg0: i32) -> (i32, i32) {
    %c0_i32 = arith.constant 0 : i32
    %c0_i32_0 = arith.constant 0 : i32
    %c0_i32_1 = arith.constant 0 : i32
    return %c0_i32, %c0_i32_0 : i32, i32
  }
  func.func @transform_3(%arg0: i32) -> (i32, i32) {
    %c0_i32 = arith.constant 0 : i32
    %c0_i32_0 = arith.constant 0 : i32
    %c0_i32_1 = arith.constant 0 : i32
    return %c0_i32, %c0_i32_0 : i32, i32
  }
  func.func @transform_4(%arg0: i32) -> (i32, i32) {
    %c0_i32 = arith.constant 0 : i32
    %c0_i32_0 = arith.constant 0 : i32
    %c0_i32_1 = arith.constant 0 : i32
    return %c0_i32, %c0_i32_0 : i32, i32
  }
  func.func @transform_5(%arg0: i32) -> (i32, i32, i32) {
    %c0_i32 = arith.constant 0 : i32
    %c0_i32_0 = arith.constant 0 : i32
    %c0_i32_1 = arith.constant 0 : i32
    %c0_i32_2 = arith.constant 0 : i32
    return %c0_i32, %c0_i32_0, %c0_i32_1 : i32, i32, i32
  }
  func.func @transform_6(%arg0: i32) -> (i32, i32) {
    %c0_i32 = arith.constant 0 : i32
    %c0_i32_0 = arith.constant 0 : i32
    %c0_i32_1 = arith.constant 0 : i32
    return %c0_i32, %c0_i32_0 : i32, i32
  }
  func.func @transform_7(%arg0: i32) -> (i32, i32) {
    %c0_i32 = arith.constant 0 : i32
    %c0_i32_0 = arith.constant 0 : i32
    %c0_i32_1 = arith.constant 0 : i32
    return %c0_i32, %c0_i32_0 : i32, i32
  }
  func.func @transform_8(%arg0: i32) -> (i32, i32, i32) {
    %c0_i32 = arith.constant 0 : i32
    %c0_i32_0 = arith.constant 0 : i32
    %c0_i32_1 = arith.constant 0 : i32
    return %arg0, %c0_i32, %c0_i32_0 : i32, i32, i32
  }
}

</mosaic_0001>

<bundles_post_ra>
// kernel: tpu_custom_call.1
= control target key start
LH: loop header
LB: loop body
LE: loop exit
PB: predicated region body
PF: predicated region fallthrough
CT: control target
= control target key end

     0   :  { %vm499_vm0 = vcmask 1043456   ;;  %s7140_s11 = smov 112   ;;  %vm306_vm1 = vcmask 293888   ;;  %vm776_vm2 = vcmask 64512   ;;  %vm778_vm3 = vcmask 58368   ;;  %s11021_s3 = inlined_call_operand.vmem [shape: f32[36,8], index: 3, kind: input, shape index: {}]   ;;  %s11022_s0 = inlined_call_operand.vmem [shape: f32[8,64,36], index: 0, kind: input, shape index: {}]   ;;  %s11023_s1 = inlined_call_operand.vmem [shape: f32[1,36], index: 1, kind: input, shape index: {}]   ;;  %s11024_s2 = inlined_call_operand.vmem [shape: f32[64,36], index: 2, kind: input, shape index: {}]   ;;  %s11025_s4 = inlined_call_operand.vmem [shape: f32[1,8], index: 4, kind: input, shape index: {}]   ;;  %s11026_s6 = inlined_call_operand.vmem [shape: f32[4,8], index: 6, kind: input, shape index: {}]   ;;  %s11027_s5 = inlined_call_operand.vmem [shape: f32[9,8,8], index: 5, kind: input, shape index: {}]   ;;  %s11028_s7 = inlined_call_operand.vmem [shape: f32[1,8], index: 7, kind: input, shape index: {}]   ;;  %s11029_s8 = inlined_call_operand.vmem [shape: f32[8,64,8], index: 8, kind: output, shape index: {}]  }
   0x1   :  { %v301_v0 = vld [vmem:[%s11021_s3 + $0x20] sm:$0xf]  ;;  %v7193_v1 = vld [vmem:[%s11022_s0 + $0x78] sm:$0xff]  ;;  %v299_v4 = vld [vmem:[%s11021_s3 + $0x10] sm:$0xff]  ;;  %vm1662_vm4 = vcmask 31744  }
   0x2   :  { %6388 = vmatpush.msk.msra.mxu0 %vm499_vm0, %v301_v0  ;;  %v7199_v2 = vld [vmem:[%s11023_s1] ss:$0 sm:$0xff]  ;;  %1564 = vrot.lane.b32.xlu0 %v7193_v1, %s7140_s11  ;;  %v300_v3 = vld [vmem:[%s11021_s3 + $0x18] sm:$0xff]  ;;  %v298_v7 = vld [vmem:[%s11021_s3 + $0x8] sm:$0xff] }
   0x3   :  { %v29_v5 = vld [vmem:[%s11022_s0] sm:$0xff]  ;;  %v7224_v9 = vld [vmem:[%s11022_s0 + $0x88] sm:$0xff]  ;;  %v7253_v18 = vld [vmem:[%s11022_s0 + $0x90] sm:$0xff] }
   0x4   :  { %515 = vmatpush.msra.mxu0 %v300_v3  ;;  %v7215_v6 = vld [vmem:[%s11024_s2] sm:$0xff]  ;;  %v97_v8 = vmul.f32 %v7199_v2, %v29_v5  ;;  %v30_v10 = vld [vmem:[%s11022_s0 + $0x8] sm:$0xff]  ;;  %1568 = vrot.lane.b32.xlu1 %v7224_v9, %s7140_s11  ;;  %v31_v19 = vld [vmem:[%s11022_s0 + $0x10] sm:$0xff] }
   0x5   :  { %v297_v11 = vld [vmem:[%s11021_s3] sm:$0xff]  ;;  %v98_v14 = vmul.f32 %v7199_v2, %v30_v10  ;;  %v7244_v15 = vld [vmem:[%s11024_s2 + $0x8] sm:$0xff]  ;;  %v99_v21 = vmul.f32 %v7199_v2, %v31_v19  ;;  %v7269_v23 = vld [vmem:[%s11024_s2 + $0x10] sm:$0xff] }
   0x6   :  { %516 = vmatpush.msra.mxu0 %v299_v4  ;;  %v7237_v12 = vld [vmem:[%s11022_s0 + $0x80] sm:$0xff]  ;;  %v169_v13 = vadd.f32 %v7215_v6, %v97_v8  ;;  %v7264_v22 = vld [vmem:[%s11022_s0 + $0xa8] sm:$0xff]  ;;  %v7278_v25 = vld [vmem:[%s11022_s0 + $0x98] sm:$0xff] }
   0x7   :  { %v170_v17 = vadd.f32 %v7244_v15, %v98_v14  ;;  %v171_v24 = vadd.f32 %v7269_v23, %v99_v21  ;;  %v7283_v26 = vld [vmem:[%s11022_s0 + $0xb0] sm:$0xff]  ;;  %v32_v27 = vld [vmem:[%s11022_s0 + $0x18] sm:$0xff]  ;;  %1572 = vrot.lane.b32.xlu2 %v7278_v25, %s7140_s11  ;;  %v7303_v32 = vld [vmem:[%s11022_s0 + $0xa0] sm:$0xff] }
   0x8   :  { %517 = vmatpush.msra.mxu0 %v298_v7  ;;  %v233_v16 = vmax.f32 %v169_v13, 0.0  ;;  %v100_v29 = vmul.f32 %v7199_v2, %v32_v27  ;;  %v7296_v30 = vld [vmem:[%s11024_s2 + $0x18] sm:$0xff]  ;;  %v33_v33 = vld [vmem:[%s11022_s0 + $0x20] sm:$0xff]  ;;  %v34_v39 = vld [vmem:[%s11022_s0 + $0x28] sm:$0xff] }
   0x9   :  { %v234_v20 = vmax.f32 %v170_v17, 0.0  ;;  %v235_v28 = vmax.f32 %v171_v24, 0.0  ;;  %v101_v35 = vmul.f32 %v7199_v2, %v33_v33  ;;  %v7314_v36 = vld [vmem:[%s11024_s2 + $0x20] sm:$0xff]  ;;  %v102_v41 = vmul.f32 %v7199_v2, %v34_v39  ;;  %v7332_v42 = vld [vmem:[%s11024_s2 + $0x28] sm:$0xff]  ;;  %v35_v45 = vld [vmem:[%s11022_s0 + $0x30] sm:$0xff] }
   0xa   :  { %518 = vmatpush.msra.mxu0 %v297_v11  ;;  %1566 = vrot.lane.b32.xlu0 %v7237_v12, %s7140_s11  ;;  %v172_v31 = vadd.f32 %v7296_v30, %v100_v29  ;;  %v7321_v38 = vld [vmem:[%s11022_s0 + $0xc0] sm:$0xff]  ;;  %v7339_v44 = vld [vmem:[%s11022_s0 + $0xc8] sm:$0xff]  ;;  %v103_v47 = vmul.f32 %v7199_v2, %v35_v45  ;;  %v7350_v48 = vld [vmem:[%s11024_s2 + $0x30] sm:$0xff]  ;;  %v7141_v39 = vmov 0.0  }
   0xb   :  { %6389 = vmatmul.msk.f32.vlgmr.msra.gmra.mxu0 %vm306_vm1, %v233_v16  ;;  %v173_v37 = vadd.f32 %v7314_v36, %v101_v35  ;;  %v174_v43 = vadd.f32 %v7332_v42, %v102_v41  ;;  %v7357_v50 = vld [vmem:[%s11022_s0 + $0xb8] sm:$0xff]  ;;  %v37_v57 = vld [vmem:[%s11022_s0 + $0x40] sm:$0xff]  ;;  %v38_v62 = vld [vmem:[%s11022_s0 + $0x48] sm:$0xff]  ;;  %780 = vst.msk [vmem:[#allocation2 + $0x10] sm:$0xff] %vm776_vm2, %v7141_v39 }
   0xc   :  { %1570 = vrot.lane.b32.xlu1 %v7253_v18, %s7140_s11  ;;  %v236_v34 = vmax.f32 %v172_v31, 0.0  ;;  %v175_v49 = vadd.f32 %v7350_v48, %v103_v47  ;;  %v36_v51 = vld [vmem:[%s11022_s0 + $0x38] sm:$0xff]  ;;  %v105_v59 = vmul.f32 %v7199_v2, %v37_v57  ;;  %v7388_v61 = vld [vmem:[%s11022_s0 + $0xe0] sm:$0xff]  ;;  %v106_v0 = vmul.f32 %v7199_v2, %v38_v62  ;;  %v7401_v4 = vld [vmem:[%s11022_s0 + $0xd0] sm:$0xff]  ;;  %781 = vst.msk [vmem:[#allocation2 + $0x18] sm:$0x3] %vm778_vm3, %v7141_v39 }
   0xd   :  { %v237_v40 = vmax.f32 %v173_v37, 0.0  ;;  %v238_v46 = vmax.f32 %v174_v43, 0.0  ;;  %v104_v53 = vmul.f32 %v7199_v2, %v36_v51  ;;  %v7368_v54 = vld [vmem:[%s11024_s2 + $0x38] sm:$0xff]  ;;  %v39_v5 = vld [vmem:[%s11022_s0 + $0x50] sm:$0xff]  ;;  %v7414_v11 = vld [vmem:[%s11026_s6] sm:$0xf]  ;;  %v113_v51 = vmul.f32 %v7199_v2, %v7237_v12 }
   0xe   :  { %v239_v52 = vmax.f32 %v175_v49, 0.0  ;;  %v7375_v56 = vld [vmem:[%s11022_s0 + $0xd8] sm:$0xff]  ;;  %v177_v60 = vadd.f32 %v7215_v6, %v105_v59  ;;  %v178_v3 = vadd.f32 %v7244_v15, %v106_v0  ;;  %v107_v8 = vmul.f32 %v7199_v2, %v39_v5  ;;  %7103 = vmatpush.msk.msra.mxu2 %vm499_vm0, %v7414_v11  ;;  %v7424_v14 = vld [vmem:[%s11022_s0 + $0xf0] sm:$0xff]  ;;  %v42_v29 = vld [vmem:[%s11022_s0 + $0x68] sm:$0xff]  ;;  %777 = vst.msk [vmem:[#allocation2] sm:$0xff] %vm776_vm2, %v7141_v39 }
   0xf   :  { %1574 = vrot.lane.b32.xlu2 %v7303_v32, %s7140_s11  ;;  %v176_v55 = vadd.f32 %v7368_v54, %v104_v53  ;;  %v40_v13 = vld [vmem:[%s11022_s0 + $0x58] sm:$0xff]  ;;  %v110_v33 = vmul.f32 %v7199_v2, %v42_v29  ;;  %v43_v37 = vld [vmem:[%s11022_s0 + $0x70] sm:$0xff]  ;;  %779 = vst.msk [vmem:[#allocation2 + $0x8] sm:$0x3] %vm778_vm3, %v7141_v39  ;;  %v185_v12 = vadd.f32 %v7215_v6, %v113_v51 }
  0x10   :  { %v241_v63 = vmax.f32 %v177_v60, 0.0  ;;  %v242_v7 = vmax.f32 %v178_v3, 0.0  ;;  %v179_v10 = vadd.f32 %v7269_v23, %v107_v8  ;;  %v108_v17 = vmul.f32 %v7199_v2, %v40_v13  ;;  %v7437_v21 = vld [vmem:[%s11022_s0 + $0xf8] sm:$0xff]  ;;  %782 = vst.msk [vmem:[#allocation2 + $0x20] sm:$0xff] %vm776_vm2, %v7141_v39 }
  0x11   :  { %v240_v58 = vmax.f32 %v176_v55, 0.0  ;;  %v182_v35 = vadd.f32 %v7332_v42, %v110_v33  ;;  %v111_v41 = vmul.f32 %v7199_v2, %v43_v37  ;;  %783 = vst.msk [vmem:[#allocation2 + $0x28] sm:$0x3] %vm778_vm3, %v7141_v39  ;;  %v7527_v55 = vld [vmem:[%s11025_s4] ss:$0 sm:$0xff]  ;;  %v249_v57 = vmax.f32 %v185_v12, 0.0 }
  0x12   :  { %1576 = vrot.lane.b32.xlu0 %v7264_v22, %s7140_s11  ;;  %v243_v16 = vmax.f32 %v179_v10, 0.0  ;;  %v180_v19 = vadd.f32 %v7296_v30, %v108_v17  ;;  %784 = vst.msk [vmem:[#allocation2 + $0x30] sm:$0xff] %vm776_vm2, %v7141_v39  ;;  %v7764_v10 = vld [vmem:[%s11022_s0 + $0x110] sm:$0xff]  ;;  %v7776_v17 = vld [vmem:[%s11022_s0 + $0x100] sm:$0xff]  ;;  %v7810_v29 = vld [vmem:[%s11022_s0 + $0x118] sm:$0xff]  ;;  %v119_v51 = vmul.f32 %v7199_v2, %v7283_v26 }
  0x13   :  { %6390 = vmatmul.msk.f32.gmra.mxu0 %vm306_vm1, %v234_v20  ;;  %v41_v20 = vld [vmem:[%s11022_s0 + $0x60] sm:$0xff]  ;;  %v183_v43 = vadd.f32 %v7350_v48, %v111_v41  ;;  %785 = vst.msk [vmem:[#allocation2 + $0x38] sm:$0x3] %vm778_vm3, %v7141_v39  ;;  %v118_v41 = vmul.f32 %v7199_v2, %v7264_v22 }
  0x14   :  { %1578 = vrot.lane.b32.xlu1 %v7283_v26, %s7140_s11  ;;  %v244_v24 = vmax.f32 %v180_v19, 0.0  ;;  %v109_v27 = vmul.f32 %v7199_v2, %v41_v20  ;;  %786 = vst.msk [vmem:[#allocation2 + $0x40] sm:$0xff] %vm776_vm2, %v7141_v39 }
  0x15   :  { %787 = vst.msk [vmem:[#allocation2 + $0x48] sm:$0x3] %vm778_vm3, %v7141_v39  ;;  %v247_v47 = vmax.f32 %v183_v43, 0.0  ;;  %v190_v22 = vadd.f32 %v7332_v42, %v118_v41 }
  0x16   :  { %788 = vst.msk [vmem:[#allocation2 + $0x50] sm:$0xff] %vm776_vm2, %v7141_v39 }
  0x17   :  { %1580 = vrot.lane.b32.xlu2 %v7357_v50, %s7140_s11  ;;  %789 = vst.msk [vmem:[#allocation2 + $0x58] sm:$0x3] %vm778_vm3, %v7141_v39 }
  0x18   :  { %790 = vst.msk [vmem:[#allocation2 + $0x60] sm:$0xff] %vm776_vm2, %v7141_v39 }
  0x19   :  { %791 = vst.msk [vmem:[#allocation2 + $0x68] sm:$0x3] %vm778_vm3, %v7141_v39 }
  0x1a   :  { %1582 = vrot.lane.b32.xlu0 %v7321_v38, %s7140_s11  ;;  %792 = vst.msk [vmem:[#allocation2 + $0x70] sm:$0xff] %vm776_vm2, %v7141_v39 }
  0x1b   :  { %6391 = vmatmul.msk.f32.gmra.mxu0 %vm306_vm1, %v235_v28  ;;  %v181_v28 = vadd.f32 %v7314_v36, %v109_v27  ;;  %793 = vst.msk [vmem:[#allocation2 + $0x78] sm:$0x3] %vm778_vm3, %v7141_v39  ;;  %v7802_v27 = vld [vmem:[%s11022_s0 + $0x128] sm:$0xff] }
  0x1c   :  { %1584 = vrot.lane.b32.xlu1 %v7339_v44, %s7140_s11  ;;  %794 = vst.msk [vmem:[#allocation2 + $0x80] sm:$0xff] %vm776_vm2, %v7141_v39 }
  0x1d   :  { %v245_v31 = vmax.f32 %v181_v28, 0.0  ;;  %795 = vst.msk [vmem:[#allocation2 + $0x88] sm:$0x3] %vm778_vm3, %v7141_v39 }
  0x1e   :  { %796 = vst.msk [vmem:[#allocation2 + $0x90] sm:$0xff] %vm776_vm2, %v7141_v39 }
  0x1f   :  { %1586 = vrot.lane.b32.xlu2 %v7401_v4, %s7140_s11  ;;  %797 = vst.msk [vmem:[#allocation2 + $0x98] sm:$0x3] %vm778_vm3, %v7141_v39 }
  0x20   :  { %798 = vst.msk [vmem:[#allocation2 + $0xa0] sm:$0xff] %vm776_vm2, %v7141_v39 }
  0x21   :  { %799 = vst.msk [vmem:[#allocation2 + $0xa8] sm:$0x3] %vm778_vm3, %v7141_v39 }
  0x22   :  { %1588 = vrot.lane.b32.xlu0 %v7375_v56, %s7140_s11  ;;  %800 = vst.msk [vmem:[#allocation2 + $0xb0] sm:$0xff] %vm776_vm2, %v7141_v39 }
  0x23   :  { %6392 = vmatmul.msk.f32.gmra.mxu0 %vm306_vm1, %v236_v34  ;;  %v7451_v34 = vld [vmem:[%s11022_s0 + $0xe8] sm:$0xff]  ;;  %801 = vst.msk [vmem:[#allocation2 + $0xb8] sm:$0x3] %vm778_vm3, %v7141_v39 }
  0x24   :  { %1590 = vrot.lane.b32.xlu1 %v7388_v61, %s7140_s11  ;;  %802 = vst.msk [vmem:[#allocation2 + $0xc0] sm:$0xff] %vm776_vm2, %v7141_v39 }
  0x25   :  { %803 = vst.msk [vmem:[#allocation2 + $0xc8] sm:$0x3] %vm778_vm3, %v7141_v39 }
  0x26   :  { %804 = vst.msk [vmem:[#allocation2 + $0xd0] sm:$0xff] %vm776_vm2, %v7141_v39 }
  0x27   :  { %1592 = vrot.lane.b32.xlu2 %v7451_v34, %s7140_s11  ;;  %805 = vst.msk [vmem:[#allocation2 + $0xd8] sm:$0x3] %vm778_vm3, %v7141_v39 }
  0x28   :  { %806 = vst.msk [vmem:[#allocation2 + $0xe0] sm:$0xff] %vm776_vm2, %v7141_v39 }
  0x29   :  { %807 = vst.msk [vmem:[#allocation2 + $0xe8] sm:$0x3] %vm778_vm3, %v7141_v39 }
  0x2a   :  { %1594 = vrot.lane.b32.xlu0 %v7424_v14, %s7140_s11  ;;  %808 = vst.msk [vmem:[#allocation2 + $0xf0] sm:$0xff] %vm776_vm2, %v7141_v39 }
  0x2b   :  { %6393 = vmatmul.msk.f32.gmra.mxu0 %vm306_vm1, %v237_v40  ;;  %v246_v40 = vmax.f32 %v182_v35, 0.0  ;;  %809 = vst.msk [vmem:[#allocation2 + $0xf8] sm:$0x3] %vm778_vm3, %v7141_v39  ;;  %v7831_v35 = vld [vmem:[%s11022_s0 + $0x138] sm:$0xff] }
  0x2c   :  { %1596 = vrot.lane.b32.xlu1 %v7437_v21, %s7140_s11  ;;  %810 = vst.msk [vmem:[#allocation2 + $0x100] sm:$0xff] %vm776_vm2, %v7141_v39 }
  0x2d   :  { %811 = vst.msk [vmem:[#allocation2 + $0x108] sm:$0x3] %vm778_vm3, %v7141_v39 }
  0x2e   :  { %812 = vst.msk [vmem:[#allocation2 + $0x110] sm:$0xff] %vm776_vm2, %v7141_v39 }
  0x2f   :  { %813 = vst.msk [vmem:[#allocation2 + $0x118] sm:$0x3] %vm778_vm3, %v7141_v39  ;;  %1598 = vrot.lane.b32.xlu2 %v7776_v17, %s7140_s11 }
  0x30   :  { %814 = vst.msk [vmem:[#allocation2 + $0x120] sm:$0xff] %vm776_vm2, %v7141_v39 }
  0x31   :  { %815 = vst.msk [vmem:[#allocation2 + $0x128] sm:$0x3] %vm778_vm3, %v7141_v39 }
  0x32   :  { %816 = vst.msk [vmem:[#allocation2 + $0x130] sm:$0xff] %vm776_vm2, %v7141_v39 }
  0x33   :  { %6394 = vmatmul.msk.f32.gmra.mxu0 %vm306_vm1, %v238_v46  ;;  %v112_v46 = vmul.f32 %v7199_v2, %v7193_v1  ;;  %817 = vst.msk [vmem:[#allocation2 + $0x138] sm:$0x3] %vm778_vm3, %v7141_v39 }
  0x34   :  { %818 = vst.msk [vmem:[#allocation2 + $0x140] sm:$0xff] %vm776_vm2, %v7141_v39  ;;  %1602 = vrot.lane.b32.xlu1 %v7764_v10, %s7140_s11 }
  0x35   :  { %v184_v49 = vadd.f32 %v7368_v54, %v112_v46  ;;  %819 = vst.msk [vmem:[#allocation2 + $0x148] sm:$0x3] %vm778_vm3, %v7141_v39  ;;  %v7859_v46 = vld [vmem:[%s11022_s0 + $0x140] sm:$0xff] }
  0x36   :  { %820 = vst.msk [vmem:[#allocation2 + $0x150] sm:$0xff] %vm776_vm2, %v7141_v39 }
  0x37   :  { %821 = vst.msk [vmem:[#allocation2 + $0x158] sm:$0x3] %vm778_vm3, %v7141_v39  ;;  %1604 = vrot.lane.b32.xlu2 %v7810_v29, %s7140_s11 }
  0x38   :  { %822 = vst.msk [vmem:[#allocation2 + $0x160] sm:$0xff] %vm776_vm2, %v7141_v39 }
  0x39   :  { %823 = vst.msk [vmem:[#allocation2 + $0x168] sm:$0x3] %vm778_vm3, %v7141_v39 }
  0x3a   :  { %824 = vst.msk [vmem:[#allocation2 + $0x170] sm:$0xff] %vm776_vm2, %v7141_v39 }
  0x3b   :  { %6395 = vmatmul.msk.f32.gmra.mxu0 %vm306_vm1, %v239_v52  ;;  %v248_v52 = vmax.f32 %v184_v49, 0.0  ;;  %825 = vst.msk [vmem:[#allocation2 + $0x178] sm:$0x3] %vm778_vm3, %v7141_v39 }
  0x3c   :  { %826 = vst.msk [vmem:[#allocation2 + $0x180] sm:$0xff] %vm776_vm2, %v7141_v39  ;;  %1608 = vrot.lane.b32.xlu1 %v7802_v27, %s7140_s11 }
  0x3d   :  { %827 = vst.msk [vmem:[#allocation2 + $0x188] sm:$0x3] %vm778_vm3, %v7141_v39 }
  0x3e   :  { %828 = vst.msk [vmem:[#allocation2 + $0x190] sm:$0xff] %vm776_vm2, %v7141_v39 }
  0x3f   :  { %829 = vst.msk [vmem:[#allocation2 + $0x198] sm:$0x3] %vm778_vm3, %v7141_v39 }
  0x40   :  { %830 = vst.msk [vmem:[#allocation2 + $0x1a0] sm:$0xff] %vm776_vm2, %v7141_v39 }
  0x41   :  { %831 = vst.msk [vmem:[#allocation2 + $0x1a8] sm:$0x3] %vm778_vm3, %v7141_v39 }
  0x42   :  { %832 = vst.msk [vmem:[#allocation2 + $0x1b0] sm:$0xff] %vm776_vm2, %v7141_v39 }
  0x43   :  { %6396 = vmatmul.msk.f32.gmra.mxu0 %vm306_vm1, %v240_v58  ;;  %833 = vst.msk [vmem:[#allocation2 + $0x1b8] sm:$0x3] %vm778_vm3, %v7141_v39 }
  0x44   :  { %834 = vst.msk [vmem:[#allocation2 + $0x1c0] sm:$0xff] %vm776_vm2, %v7141_v39  ;;  %1614 = vrot.lane.b32.xlu1 %v7859_v46, %s7140_s11 }
  0x45   :  { %835 = vst.msk [vmem:[#allocation2 + $0x1c8] sm:$0x3] %vm778_vm3, %v7141_v39 }
  0x46   :  { %836 = vst.msk [vmem:[#allocation2 + $0x1d0] sm:$0xff] %vm776_vm2, %v7141_v39 }
  0x47   :  { %837 = vst.msk [vmem:[#allocation2 + $0x1d8] sm:$0x3] %vm778_vm3, %v7141_v39 }
  0x48   :  { %838 = vst.msk [vmem:[#allocation2 + $0x1e0] sm:$0xff] %vm776_vm2, %v7141_v39 }
  0x49   :  { %839 = vst.msk [vmem:[#allocation2 + $0x1e8] sm:$0x3] %vm778_vm3, %v7141_v39 }
  0x4a   :  { %840 = vst.msk [vmem:[#allocation2 + $0x1f0] sm:$0xff] %vm776_vm2, %v7141_v39 }
  0x4b   :  { %6397 = vmatmul.msk.f32.gmra.mxu0 %vm306_vm1, %v241_v63  ;;  %841 = vst.msk [vmem:[#allocation2 + $0x1f8] sm:$0x3] %vm778_vm3, %v7141_v39  ;;  %v114_v63 = vmul.f32 %v7199_v2, %v7224_v9  ;;  %v7741_v9 = vld [vmem:[%s11022_s0 + $0x108] sm:$0xff] }
  0x4c   :  { %842 = vst.msk [vmem:[#allocation2 + $0x200] sm:$0xff] %vm776_vm2, %v7141_v39  ;;  %1600 = vrot.lane.b32.xlu0 %v7741_v9, %s7140_s11 }
  0x4d   :  { %843 = vst.msk [vmem:[#allocation2 + $0x208] sm:$0x3] %vm778_vm3, %v7141_v39  ;;  %v186_v3 = vadd.f32 %v7244_v15, %v114_v63  ;;  %v191_v63 = vadd.f32 %v7350_v48, %v119_v51  ;;  %v123_v51 = vmul.f32 %v7199_v2, %v7401_v4 }
  0x4e   :  { %844 = vst.msk [vmem:[#allocation2 + $0x210] sm:$0xff] %vm776_vm2, %v7141_v39 }
  0x4f   :  { %845 = vst.msk [vmem:[#allocation2 + $0x218] sm:$0x3] %vm778_vm3, %v7141_v39  ;;  %v250_v5 = vmax.f32 %v186_v3, 0.0 }
  0x50   :  { %846 = vst.msk [vmem:[#allocation2 + $0x220] sm:$0xff] %vm776_vm2, %v7141_v39 }
  0x51   :  { %847 = vst.msk [vmem:[#allocation2 + $0x228] sm:$0x3] %vm778_vm3, %v7141_v39 }
  0x52   :  { %848 = vst.msk [vmem:[#allocation2 + $0x230] sm:$0xff] %vm776_vm2, %v7141_v39 }
  0x53   :  { %6398 = vmatmul.msk.f32.gmra.mxu0 %vm306_vm1, %v242_v7  ;;  %849 = vst.msk [vmem:[#allocation2 + $0x238] sm:$0x3] %vm778_vm3, %v7141_v39  ;;  %v115_v7 = vmul.f32 %v7199_v2, %v7253_v18 }
  0x54   :  { %850 = vst.msk [vmem:[#allocation2 + $0x240] sm:$0xff] %vm776_vm2, %v7141_v39 }
  0x55   :  { %851 = vst.msk [vmem:[#allocation2 + $0x248] sm:$0x3] %vm778_vm3, %v7141_v39  ;;  %v187_v13 = vadd.f32 %v7269_v23, %v115_v7 }
  0x56   :  { %852 = vst.msk [vmem:[#allocation2 + $0x250] sm:$0xff] %vm776_vm2, %v7141_v39 }
  0x57   :  { %853 = vst.msk [vmem:[#allocation2 + $0x258] sm:$0x3] %vm778_vm3, %v7141_v39  ;;  %v251_v19 = vmax.f32 %v187_v13, 0.0 }
  0x58   :  { %854 = vst.msk [vmem:[#allocation2 + $0x260] sm:$0xff] %vm776_vm2, %v7141_v39 }
  0x59   :  { %855 = vst.msk [vmem:[#allocation2 + $0x268] sm:$0x3] %vm778_vm3, %v7141_v39 }
  0x5a   :  { %856 = vst.msk [vmem:[#allocation2 + $0x270] sm:$0xff] %vm776_vm2, %v7141_v39 }
  0x5b   :  { %6399 = vmatmul.msk.f32.gmra.mxu0 %vm306_vm1, %v243_v16  ;;  %857 = vst.msk [vmem:[#allocation2 + $0x278] sm:$0x3] %vm778_vm3, %v7141_v39  ;;  %v116_v16 = vmul.f32 %v7199_v2, %v7278_v25  ;;  %v7785_v25 = vld [vmem:[%s11022_s0 + $0x120] sm:$0xff] }
  0x5c   :  { %858 = vst.msk [vmem:[#allocation2 + $0x280] sm:$0xff] %vm776_vm2, %v7141_v39  ;;  %1606 = vrot.lane.b32.xlu0 %v7785_v25, %s7140_s11 }
  0x5d   :  { %859 = vst.msk [vmem:[#allocation2 + $0x288] sm:$0x3] %vm778_vm3, %v7141_v39  ;;  %v188_v20 = vadd.f32 %v7296_v30, %v116_v16  ;;  %v7917_v16 = vld [vmem:[%s11022_s0 + $0x150] sm:$0xff] }
  0x5e   :  { %860 = vst.msk [vmem:[#allocation2 + $0x290] sm:$0xff] %vm776_vm2, %v7141_v39 }
  0x5f   :  { %861 = vst.msk [vmem:[#allocation2 + $0x298] sm:$0x3] %vm778_vm3, %v7141_v39  ;;  %v252_v33 = vmax.f32 %v188_v20, 0.0 }
  0x60   :  { %862 = vst.msk [vmem:[#allocation2 + $0x2a0] sm:$0xff] %vm776_vm2, %v7141_v39 }
  0x61   :  { %863 = vst.msk [vmem:[#allocation2 + $0x2a8] sm:$0x3] %vm778_vm3, %v7141_v39  ;;  %v1573_v8 = vpop.permute.xlu2 %1572 }
  0x62   :  { %864 = vst.msk [vmem:[#allocation2 + $0x2b0] sm:$0xff] %vm776_vm2, %v7141_v39 }
  0x63   :  { %6400 = vmatmul.msk.f32.gmra.mxu0 %vm306_vm1, %v244_v24  ;;  %865 = vst.msk [vmem:[#allocation2 + $0x2b8] sm:$0x3] %vm778_vm3, %v7141_v39 }
  0x64   :  { %866 = vst.msk [vmem:[#allocation2 + $0x2c0] sm:$0xff] %vm776_vm2, %v7141_v39  ;;  %1612 = vrot.lane.b32.xlu0 %v7831_v35, %s7140_s11 }
  0x65   :  { %867 = vst.msk [vmem:[#allocation2 + $0x2c8] sm:$0x3] %vm778_vm3, %v7141_v39 }
  0x66   :  { %868 = vst.msk [vmem:[#allocation2 + $0x2d0] sm:$0xff] %vm776_vm2, %v7141_v39 }
  0x67   :  { %869 = vst.msk [vmem:[#allocation2 + $0x2d8] sm:$0x3] %vm778_vm3, %v7141_v39 }
  0x68   :  { %870 = vst.msk [vmem:[#allocation2 + $0x2e0] sm:$0xff] %vm776_vm2, %v7141_v39 }
  0x69   :  { %871 = vst.msk [vmem:[#allocation2 + $0x2e8] sm:$0x3] %vm778_vm3, %v7141_v39  ;;  %v1575_v24 = vpop.permute.xlu2 %1574 }
  0x6a   :  { %872 = vst.msk [vmem:[#allocation2 + $0x2f0] sm:$0xff] %vm776_vm2, %v7141_v39 }
  0x6b   :  { %6401 = vmatmul.msk.f32.gmra.mxu0 %vm306_vm1, %v245_v31  ;;  %873 = vst.msk [vmem:[#allocation2 + $0x2f8] sm:$0x3] %vm778_vm3, %v7141_v39  ;;  %v117_v31 = vmul.f32 %v7199_v2, %v7303_v32 }
  0x6c   :  { %874 = vst.msk [vmem:[#allocation2 + $0x300] sm:$0xff] %vm776_vm2, %v7141_v39  ;;  %1618 = vrot.lane.b32.xlu0 %v7917_v16, %s7140_s11 }
  0x6d   :  { %875 = vst.msk [vmem:[#allocation2 + $0x308] sm:$0x3] %vm778_vm3, %v7141_v39  ;;  %v189_v37 = vadd.f32 %v7314_v36, %v117_v31 }
  0x6e   :  { %876 = vst.msk [vmem:[#allocation2 + $0x310] sm:$0xff] %vm776_vm2, %v7141_v39 }
  0x6f   :  { %877 = vst.msk [vmem:[#allocation2 + $0x318] sm:$0x3] %vm778_vm3, %v7141_v39  ;;  %v253_v43 = vmax.f32 %v189_v37, 0.0 }
  0x70   :  { %878 = vst.msk [vmem:[#allocation2 + $0x320] sm:$0xff] %vm776_vm2, %v7141_v39 }
  0x71   :  { %879 = vst.msk [vmem:[#allocation2 + $0x328] sm:$0x3] %vm778_vm3, %v7141_v39 }
  0x72   :  { %880 = vst.msk [vmem:[#allocation2 + $0x330] sm:$0xff] %vm776_vm2, %v7141_v39 }
  0x73   :  { %6402 = vmatmul.msk.f32.gmra.mxu0 %vm306_vm1, %v246_v40  ;;  %881 = vst.msk [vmem:[#allocation2 + $0x338] sm:$0x3] %vm778_vm3, %v7141_v39 }
  0x74   :  { %v1565_v45 = vpop.permute.xlu0 %1564  ;;  %882 = vst.msk [vmem:[#allocation2 + $0x340] sm:$0xff] %vm776_vm2, %v7141_v39 }
  0x75   :  { %6533 = vmatmul.msk.f32.vlgmr.msra.gmra.mxu2 %vm1662_vm4, %v1565_v45  ;;  %883 = vst.msk [vmem:[#allocation2 + $0x348] sm:$0x3] %vm778_vm3, %v7141_v39 }
  0x76   :  { %v1569_v53 = vpop.permute.xlu1 %1568  ;;  %884 = vst.msk [vmem:[#allocation2 + $0x350] sm:$0xff] %vm776_vm2, %v7141_v39 }
  0x77   :  { %885 = vst.msk [vmem:[#allocation2 + $0x358] sm:$0x3] %vm778_vm3, %v7141_v39 }
  0x78   :  { %886 = vst.msk [vmem:[#allocation2 + $0x360] sm:$0xff] %vm776_vm2, %v7141_v39 }
  0x79   :  { %887 = vst.msk [vmem:[#allocation2 + $0x368] sm:$0x3] %vm778_vm3, %v7141_v39 }
  0x7a   :  { %888 = vst.msk [vmem:[#allocation2 + $0x370] sm:$0xff] %vm776_vm2, %v7141_v39 }
  0x7b   :  { %6403 = vmatmul.msk.f32.gmra.mxu0 %vm306_vm1, %v247_v47  ;;  %889 = vst.msk [vmem:[#allocation2 + $0x378] sm:$0x3] %vm778_vm3, %v7141_v39 }
  0x7c   :  { %v1567_v1 = vpop.permute.xlu0 %1566  ;;  %890 = vst.msk [vmem:[#allocation2 + $0x380] sm:$0xff] %vm776_vm2, %v7141_v39 }
  0x7d   :  { %6534 = vmatmul.msk.f32.gmra.mxu2 %vm1662_vm4, %v1567_v1  ;;  %891 = vst.msk [vmem:[#allocation2 + $0x388] sm:$0x3] %vm778_vm3, %v7141_v39 }
  0x7e   :  { %v1571_v60 = vpop.permute.xlu1 %1570  ;;  %892 = vst.msk [vmem:[#allocation2 + $0x390] sm:$0xff] %vm776_vm2, %v7141_v39 }
  0x7f   :  { %893 = vst.msk [vmem:[#allocation2 + $0x398] sm:$0x3] %vm778_vm3, %v7141_v39 }
  0x80   :  { %894 = vst.msk [vmem:[#allocation2 + $0x3a0] sm:$0xff] %vm776_vm2, %v7141_v39 }
  0x81   :  { %895 = vst.msk [vmem:[#allocation2 + $0x3a8] sm:$0x3] %vm778_vm3, %v7141_v39 }
  0x82   :  { %896 = vst.msk [vmem:[#allocation2 + $0x3b0] sm:$0xff] %vm776_vm2, %v7141_v39 }
  0x83   :  { %6404 = vmatmul.msk.f32.gmra.mxu0 %vm306_vm1, %v248_v52  ;;  %897 = vst.msk [vmem:[#allocation2 + $0x3b8] sm:$0x3] %vm778_vm3, %v7141_v39 }
  0x84   :  { %898 = vst.msk [vmem:[#allocation2 + $0x3c0] sm:$0xff] %vm776_vm2, %v7141_v39  ;;  %v1577_v32 = vpop.permute.xlu0 %1576 }
  0x85   :  { %6535 = vmatmul.msk.f32.gmra.mxu2 %vm1662_vm4, %v1569_v53  ;;  %899 = vst.msk [vmem:[#allocation2 + $0x3c8] sm:$0x3] %vm778_vm3, %v7141_v39  ;;  %v254_v53 = vmax.f32 %v190_v22, 0.0 }
  0x86   :  { %900 = vst.msk [vmem:[#allocation2 + $0x3d0] sm:$0xff] %vm776_vm2, %v7141_v39  ;;  %v1579_v45 = vpop.permute.xlu1 %1578 }
  0x87   :  { %901 = vst.msk [vmem:[#allocation2 + $0x3d8] sm:$0x3] %vm778_vm3, %v7141_v39 }
  0x88   :  { %v520_v58 = vpop.f32.mrf.mxu0  ;;  %902 = vst.msk [vmem:[#allocation2 + $0x3e0] sm:$0xff] %vm776_vm2, %v7141_v39 }
  0x89   :  { %v521_v59 = vadd.f32 %v7527_v55, %v520_v58  ;;  %903 = vst.msk [vmem:[#allocation2 + $0x3e8] sm:$0x3] %vm778_vm3, %v7141_v39 }
  0x8a   :  { %904 = vst.msk [vmem:[#allocation2 + $0x3f0] sm:$0xff] %vm776_vm2, %v7141_v39 }
  0x8b   :  { %v712_v62 = vmax.f32 %v521_v59, 0.0  ;;  %6405 = vmatmul.msk.f32.gmra.mxu0 %vm306_vm1, %v249_v57  ;;  %905 = vst.msk [vmem:[#allocation2 + $0x3f8] sm:$0x3] %vm778_vm3, %v7141_v39  ;;  %v1581_v59 = vpop.permute.xlu2 %1580 }
  0x8c   :  { %906 = vst.msk [vmem:[#allocation2 + $0x400] sm:$0xff] %vm776_vm2, %v7141_v39  ;;  %v1583_v13 = vpop.permute.xlu0 %1582 }
  0x8d   :  { %939 = vst.msk [vmem:[#allocation2 + $0x11] sm:$0xff] %vm776_vm2, %v712_v62  ;;  %6536 = vmatmul.msk.f32.gmra.mxu2 %vm1662_vm4, %v1571_v60  ;;  %v7894_v60 = vld [vmem:[%s11022_s0 + $0x130] sm:$0xff] }
  0x8e   :  { %907 = vst.msk [vmem:[#allocation2 + $0x408] sm:$0x3] %vm778_vm3, %v7141_v39  ;;  %1610 = vrot.lane.b32.xlu2 %v7894_v60, %s7140_s11 }
  0x8f   :  { %908 = vst.msk [vmem:[#allocation2 + $0x410] sm:$0xff] %vm776_vm2, %v7141_v39 }
  0x90   :  { %v7723_v0 = vpop.f32.mrf.mxu0  ;;  %909 = vst.msk [vmem:[#allocation2 + $0x418] sm:$0x3] %vm778_vm3, %v7141_v39 }
  0x91   :  { %910 = vst.msk [vmem:[#allocation2 + $0x420] sm:$0xff] %vm776_vm2, %v7141_v39  ;;  %v524_v47 = vadd.f32 %v7527_v55, %v7723_v0 }
  0x92   :  { %911 = vst.msk [vmem:[#allocation2 + $0x428] sm:$0x3] %vm778_vm3, %v7141_v39 }
  0x93   :  { %6406 = vmatmul.msk.f32.gmra.mxu0 %vm306_vm1, %v250_v5  ;;  %912 = vst.msk [vmem:[#allocation2 + $0x430] sm:$0xff] %vm776_vm2, %v7141_v39  ;;  %v713_v57 = vmax.f32 %v524_v47, 0.0  ;;  %v1587_v22 = vpop.permute.xlu2 %1586 }
  0x94   :  { %913 = vst.msk [vmem:[#allocation2 + $0x438] sm:$0x3] %vm778_vm3, %v7141_v39 }
  0x95   :  { %6537 = vmatmul.msk.f32.gmra.mxu2 %vm1662_vm4, %v1573_v8  ;;  %914 = vst.msk [vmem:[#allocation2 + $0x440] sm:$0xff] %vm776_vm2, %v7141_v39  ;;  %v120_v8 = vmul.f32 %v7199_v2, %v7357_v50 }
  0x96   :  { %915 = vst.msk [vmem:[#allocation2 + $0x448] sm:$0x3] %vm778_vm3, %v7141_v39 }
  0x97   :  { %916 = vst.msk [vmem:[#allocation2 + $0x450] sm:$0xff] %vm776_vm2, %v7141_v39  ;;  %v192_v50 = vadd.f32 %v7368_v54, %v120_v8 }
  0x98   :  { %v7757_v18 = vpop.f32.mrf.mxu0  ;;  %917 = vst.msk [vmem:[#allocation2 + $0x458] sm:$0x3] %vm778_vm3, %v7141_v39 }
  0x99   :  { %918 = vst.msk [vmem:[#allocation2 + $0x460] sm:$0xff] %vm776_vm2, %v7141_v39  ;;  %v527_v1 = vadd.f32 %v7527_v55, %v7757_v18  ;;  %v255_v18 = vmax.f32 %v191_v63, 0.0 }
  0x9a   :  { %919 = vst.msk [vmem:[#allocation2 + $0x468] sm:$0x3] %vm778_vm3, %v7141_v39 }
  0x9b   :  { %6407 = vmatmul.msk.f32.gmra.mxu0 %vm306_vm1, %v251_v19  ;;  %920 = vst.msk [vmem:[#allocation2 + $0x470] sm:$0xff] %vm776_vm2, %v7141_v39  ;;  %v714_v26 = vmax.f32 %v527_v1, 0.0  ;;  %v1593_v8 = vpop.permute.xlu2 %1592 }
  0x9c   :  { %921 = vst.msk [vmem:[#allocation2 + $0x478] sm:$0x3] %vm778_vm3, %v7141_v39 }
  0x9d   :  { %6538 = vmatmul.msk.f32.gmra.mxu2 %vm1662_vm4, %v1575_v24  ;;  %922 = vst.msk [vmem:[#allocation2 + $0x480] sm:$0xff] %vm776_vm2, %v7141_v39  ;;  %v121_v24 = vmul.f32 %v7199_v2, %v7321_v38 }
  0x9e   :  { %923 = vst.msk [vmem:[#allocation2 + $0x488] sm:$0x3] %vm778_vm3, %v7141_v39 }
  0x9f   :  { %924 = vst.msk [vmem:[#allocation2 + $0x490] sm:$0xff] %vm776_vm2, %v7141_v39  ;;  %v193_v37 = vadd.f32 %v7215_v6, %v121_v24  ;;  %v7945_v6 = vld [vmem:[%s11022_s0 + $0x148] sm:$0xff] }
  0xa0   :  { %v529_v28 = vpop.f32.mrf.mxu0  ;;  %925 = vst.msk [vmem:[#allocation2 + $0x498] sm:$0x3] %vm778_vm3, %v7141_v39  ;;  %1616 = vrot.lane.b32.xlu2 %v7945_v6, %s7140_s11 }
  0xa1   :  { %926 = vst.msk [vmem:[#allocation2 + $0x4a0] sm:$0xff] %vm776_vm2, %v7141_v39  ;;  %v530_v52 = vadd.f32 %v7527_v55, %v529_v28  ;;  %v256_v28 = vmax.f32 %v192_v50, 0.0  ;;  %v257_v41 = vmax.f32 %v193_v37, 0.0  ;;  %v6777_v50 = vld [vmem:[%s11027_s5 + $0x20] sm:$0xff] }
  0xa2   :  { %927 = vst.msk [vmem:[#allocation2 + $0x4a8] sm:$0x3] %vm778_vm3, %v7141_v39  ;;  %v8018_v37 = vld [vmem:[%s11022_s0 + $0x180] sm:$0xff] }
  0xa3   :  { %6408 = vmatmul.msk.f32.gmra.mxu0 %vm306_vm1, %v252_v33  ;;  %928 = vst.msk [vmem:[#allocation2 + $0x4b0] sm:$0xff] %vm776_vm2, %v7141_v39  ;;  %v715_v62 = vmax.f32 %v530_v52, 0.0  ;;  %v1585_v33 = vpop.permute.xlu1 %1584 }
  0xa4   :  { %929 = vst.msk [vmem:[#allocation2 + $0x4b8] sm:$0x3] %vm778_vm3, %v7141_v39 }
  0xa5   :  { %6539 = vmatmul.msk.f32.gmra.mxu2 %vm1662_vm4, %v1577_v32  ;;  %930 = vst.msk [vmem:[#allocation2 + $0x4c0] sm:$0xff] %vm776_vm2, %v7141_v39  ;;  %v7931_v32 = vld [vmem:[%s11022_s0 + $0x158] sm:$0xff] }
  0xa6   :  { %931 = vst.msk [vmem:[#allocation2 + $0x4c8] sm:$0x3] %vm778_vm3, %v7141_v39  ;;  %1620 = vrot.lane.b32.xlu1 %v7931_v32, %s7140_s11 }
  0xa7   :  { %932 = vst.msk [vmem:[#allocation2 + $0x4d0] sm:$0xff] %vm776_vm2, %v7141_v39 }
  0xa8   :  { %v532_v40 = vpop.f32.mrf.mxu0  ;;  %933 = vst.msk [vmem:[#allocation2 + $0x4d8] sm:$0x3] %vm778_vm3, %v7141_v39 }
  0xa9   :  { %v533_v12 = vadd.f32 %v7527_v55, %v532_v40  ;;  %934 = vst.msk [vmem:[#allocation2 + $0x4e0] sm:$0xff] %vm776_vm2, %v7141_v39 }
  0xaa   :  { %935 = vst.msk [vmem:[#allocation2 + $0x4e8] sm:$0x3] %vm778_vm3, %v7141_v39 }
  0xab   :  { %6409 = vmatmul.msk.f32.gmra.mxu0 %vm306_vm1, %v253_v43  ;;  %936 = vst.msk [vmem:[#allocation2 + $0x4f0] sm:$0xff] %vm776_vm2, %v7141_v39  ;;  %v716_v0 = vmax.f32 %v533_v12, 0.0  ;;  %v122_v43 = vmul.f32 %v7199_v2, %v7339_v44  ;;  %v195_v12 = vadd.f32 %v7269_v23, %v123_v51  ;;  %v7973_v23 = vld [vmem:[%s11022_s0 + $0x170] sm:$0xff]  ;;  %v1599_v51 = vpop.permute.xlu2 %1598 }
  0xac   :  { %937 = vst.msk [vmem:[#allocation2 + $0x4f8] sm:$0x3] %vm778_vm3, %v7141_v39 }
  0xad   :  { %6540 = vmatmul.msk.f32.gmra.mxu2 %vm1662_vm4, %v1579_v45  ;;  %940 = vst.msk [vmem:[#allocation2 + $0x21] sm:$0xff] %vm776_vm2, %v713_v57  ;;  %v194_v47 = vadd.f32 %v7244_v15, %v122_v43  ;;  %v7959_v15 = vld [vmem:[%s11022_s0 + $0x168] sm:$0xff] }
  0xae   :  { %941 = vst.msk [vmem:[#allocation2 + $0x31] sm:$0xff] %vm776_vm2, %v714_v26  ;;  %1624 = vrot.lane.b32.xlu0 %v7959_v15, %s7140_s11  ;;  %v259_v26 = vmax.f32 %v195_v12, 0.0  ;;  %1626 = vrot.lane.b32.xlu1 %v7973_v23, %s7140_s11 }
  0xaf   :  { %942 = vst.msk [vmem:[#allocation2 + $0x41] sm:$0xff] %vm776_vm2, %v715_v62  ;;  %v258_v1 = vmax.f32 %v194_v47, 0.0  ;;  %v1591_v62 = vpop.permute.xlu1 %1590 }
  0xb0   :  { %v535_v49 = vpop.f32.mrf.mxu0  ;;  %943 = vst.msk [vmem:[#allocation2 + $0x51] sm:$0xff] %vm776_vm2, %v716_v0 }
  0xb1   :  { %v536_v58 = vadd.f32 %v7527_v55, %v535_v49 }
  0xb3   :  { %6410 = vmatmul.msk.f32.gmra.mxu0 %vm306_vm1, %v254_v53  ;;  %v717_v3 = vmax.f32 %v536_v58, 0.0  ;;  %v1589_v53 = vpop.permute.xlu0 %1588  ;;  %v124_v58 = vmul.f32 %v7199_v2, %v7375_v56 }
  0xb5   :  { %6541 = vmatmul.msk.f32.gmra.mxu2 %vm1662_vm4, %v1581_v59  ;;  %944 = vst.msk [vmem:[#allocation2 + $0x61] sm:$0xff] %vm776_vm2, %v717_v3  ;;  %v196_v63 = vadd.f32 %v7296_v30, %v124_v58  ;;  %v7987_v30 = vld [vmem:[%s11022_s0 + $0x160] sm:$0xff] }
  0xb6   :  { %1622 = vrot.lane.b32.xlu2 %v7987_v30, %s7140_s11  ;;  %1630 = vrot.lane.b32.xlu0 %v8018_v37, %s7140_s11 }
  0xb7   :  { %v260_v3 = vmax.f32 %v196_v63, 0.0 }
  0xb8   :  { %v538_v5 = vpop.f32.mrf.mxu0 }
  0xb9   :  { %v539_v7 = vadd.f32 %v7527_v55, %v538_v5  ;;  %v125_v5 = vmul.f32 %v7199_v2, %v7388_v61  ;;  %v6712_v61 = vld [vmem:[%s11027_s5 + $0x18] sm:$0xff] }
  0xba   :  { %3338 = vmatpush.msrb.mxu2 %v6712_v61  ;;  %v2019_v61 = vld [vmem:[#allocation2 + $0x141] sm:$0xff] }
  0xbb   :  { %v718_v39 = vmax.f32 %v539_v7, 0.0  ;;  %6411 = vmatmul.msk.f32.gmra.mxu0 %vm306_vm1, %v255_v18  ;;  %v197_v18 = vadd.f32 %v7314_v36, %v125_v5 }
  0xbd   :  { %945 = vst.msk [vmem:[#allocation2 + $0x71] sm:$0xff] %vm776_vm2, %v718_v39  ;;  %6542 = vmatmul.msk.f32.gmra.mxu2 %vm1662_vm4, %v1583_v13  ;;  %v1068_v39 = vld [vmem:[%s11027_s5] sm:$0xff]  ;;  %v6582_v13 = vld [vmem:[%s11027_s5 + $0x8] sm:$0xff]  ;;  %v261_v24 = vmax.f32 %v197_v18, 0.0 }
  0xbe   :  { %7102 = vmatpush.msra.mxu1 %v1068_v39  ;;  %7104 = vmatpush.msra.mxu3 %v6582_v13  ;;  %v1020_v18 = vld [vmem:[#allocation2 + $0x140] sm:$0xff] }
  0xbf   :  { %1276 = vmatpush.msrb.mxu0 %v1068_v39 }
  0xc0   :  { %v541_v19 = vpop.f32.mrf.mxu0  ;;  %3869 = vmatpush.msrb.mxu3 %v6777_v50 }
  0xc1   :  { %v542_v20 = vadd.f32 %v7527_v55, %v541_v19  ;;  %v6647_v19 = vld [vmem:[%s11027_s5 + $0x10] sm:$0xff]  ;;  %6517 = vmatpush.msk.msra.mxu0 %vm499_vm0, %v7414_v11 }
  0xc2   :  { %2807 = vmatpush.msrb.mxu1 %v6647_v19 }
  0xc3   :  { %v719_v31 = vmax.f32 %v542_v20, 0.0  ;;  %6412 = vmatmul.msk.f32.gmra.mxu0 %vm306_vm1, %v256_v28  ;;  %v126_v28 = vmul.f32 %v7199_v2, %v7451_v34 }
  0xc5   :  { %946 = vst.msk [vmem:[#allocation2 + $0x81] sm:$0xff] %vm776_vm2, %v719_v31  ;;  %6543 = vmatmul.msk.f32.gmra.mxu2 %vm1662_vm4, %v1585_v33  ;;  %v1595_v33 = vpop.permute.xlu0 %1594 }
  0xc8   :  { %v544_v38 = vpop.f32.mrf.mxu0 }
  0xc9   :  { %v545_v40 = vadd.f32 %v7527_v55, %v544_v38  ;;  %v198_v38 = vadd.f32 %v7332_v42, %v126_v28  ;;  %v1597_v42 = vpop.permute.xlu1 %1596 }
  0xcb   :  { %v720_v45 = vmax.f32 %v545_v40, 0.0  ;;  %6413 = vmatmul.msk.f32.gmra.mxu0 %vm306_vm1, %v257_v41  ;;  %v127_v40 = vmul.f32 %v7199_v2, %v7424_v14  ;;  %v262_v41 = vmax.f32 %v198_v38, 0.0 }
  0xcd   :  { %947 = vst.msk [vmem:[#allocation2 + $0xb1] sm:$0xff] %vm776_vm2, %v720_v45  ;;  %6544 = vmatmul.msk.f32.gmra.mxu2 %vm1662_vm4, %v1587_v22  ;;  %v199_v22 = vadd.f32 %v7350_v48, %v127_v40 }
  0xd0   :  { %v547_v49 = vpop.f32.mrf.mxu0 }
  0xd1   :  { %v548_v44 = vadd.f32 %v7527_v55, %v547_v49  ;;  %v8037_v49 = vld [vmem:[%s11022_s0 + $0x188] sm:$0xff]  ;;  %v1603_v13 = vpop.permute.xlu1 %1602 }
  0xd2   :  { %1632 = vrot.lane.b32.xlu1 %v8037_v49, %s7140_s11 }
  0xd3   :  { %v721_v52 = vmax.f32 %v548_v44, 0.0  ;;  %6414 = vmatmul.msk.f32.gmra.mxu0 %vm306_vm1, %v258_v1  ;;  %v263_v44 = vmax.f32 %v199_v22, 0.0  ;;  %v128_v1 = vmul.f32 %v7199_v2, %v7437_v21 }
  0xd5   :  { %948 = vst.msk [vmem:[#allocation2 + $0xc1] sm:$0xff] %vm776_vm2, %v721_v52  ;;  %6545 = vmatmul.msk.f32.gmra.mxu2 %vm1662_vm4, %v1589_v53  ;;  %v200_v53 = vadd.f32 %v7368_v54, %v128_v1  ;;  %v8061_v54 = vld [vmem:[%s11023_s1] ss:$0 sm:$0xff]  ;;  %v8137_v1 = vld [vmem:[%s11024_s2 + $0x18] sm:$0xff] }
  0xd7   :  { %v264_v21 = vmax.f32 %v200_v53, 0.0 }
  0xd8   :  { %v550_v57 = vpop.f32.mrf.mxu0 }
  0xd9   :  { %v551_v4 = vadd.f32 %v7527_v55, %v550_v57  ;;  %v8053_v57 = vld [vmem:[%s11022_s0 + $0x178] sm:$0xff] }
  0xda   :  { %1628 = vrot.lane.b32.xlu2 %v8053_v57, %s7140_s11 }
  0xdb   :  { %v722_v59 = vmax.f32 %v551_v4, 0.0  ;;  %6415 = vmatmul.msk.f32.gmra.mxu0 %vm306_vm1, %v259_v26  ;;  %v129_v4 = vmul.f32 %v8061_v54, %v7776_v17 }
  0xdd   :  { %949 = vst.msk [vmem:[#allocation2 + $0xd1] sm:$0xff] %vm776_vm2, %v722_v59  ;;  %6546 = vmatmul.msk.f32.gmra.mxu2 %vm1662_vm4, %v1591_v62  ;;  %v8071_v62 = vld [vmem:[%s11024_s2] sm:$0xff] }
  0xde   :  { %v201_v63 = vadd.f32 %v8071_v62, %v129_v4 }
  0xe0   :  { %v553_v56 = vpop.f32.mrf.mxu0 }
  0xe1   :  { %v554_v0 = vadd.f32 %v7527_v55, %v553_v56  ;;  %v1601_v56 = vpop.permute.xlu0 %1600 }
  0xe3   :  { %v723_v7 = vmax.f32 %v554_v0, 0.0  ;;  %6416 = vmatmul.msk.f32.gmra.mxu0 %vm306_vm1, %v260_v3  ;;  %v8081_v3 = vld [vmem:[%s11022_s0 + $0x198] sm:$0xff] }
  0xe4   :  { %1636 = vrot.lane.b32.xlu0 %v8081_v3, %s7140_s11 }
  0xe5   :  { %950 = vst.msk [vmem:[#allocation2 + $0xe1] sm:$0xff] %vm776_vm2, %v723_v7  ;;  %6547 = vmatmul.msk.f32.gmra.mxu2 %vm1662_vm4, %v1593_v8  ;;  %v130_v7 = vmul.f32 %v8061_v54, %v7741_v9  ;;  %v265_v8 = vmax.f32 %v201_v63, 0.0  ;;  %v8102_v9 = vld [vmem:[%s11022_s0 + $0x1a0] sm:$0xff] }
  0xe6   :  { %1638 = vrot.lane.b32.xlu1 %v8102_v9, %s7140_s11  ;;  %v8160_v63 = vld [vmem:[%s11024_s2 + $0x20] sm:$0xff] }
  0xe8   :  { %v556_v36 = vpop.f32.mrf.mxu0 }
  0xe9   :  { %v557_v20 = vadd.f32 %v7527_v55, %v556_v36  ;;  %v8094_v36 = vld [vmem:[%s11024_s2 + $0x8] sm:$0xff] }
  0xea   :  { %v202_v50 = vadd.f32 %v8094_v36, %v130_v7 }
  0xeb   :  { %v724_v31 = vmax.f32 %v557_v20, 0.0  ;;  %6417 = vmatmul.msk.f32.gmra.mxu0 %vm306_vm1, %v261_v24  ;;  %v131_v24 = vmul.f32 %v8061_v54, %v7764_v10  ;;  %v8125_v10 = vld [vmem:[%s11022_s0 + $0x190] sm:$0xff] }
  0xec   :  { %v266_v20 = vmax.f32 %v202_v50, 0.0  ;;  %1634 = vrot.lane.b32.xlu2 %v8125_v10, %s7140_s11 }
  0xed   :  { %951 = vst.msk [vmem:[#allocation2 + $0xf1] sm:$0xff] %vm776_vm2, %v724_v31  ;;  %6548 = vmatmul.msk.f32.gmra.mxu2 %vm1662_vm4, %v1595_v33 }
  0xf0   :  { %v559_v34 = vpop.f32.mrf.mxu0 }
  0xf1   :  { %v560_v11 = vadd.f32 %v7527_v55, %v559_v34  ;;  %v1605_v34 = vpop.permute.xlu2 %1604 }
  0xf3   :  { %v725_v43 = vmax.f32 %v560_v11, 0.0  ;;  %6418 = vmatmul.msk.f32.gmra.mxu0 %vm306_vm1, %v262_v41  ;;  %v8116_v11 = vld [vmem:[%s11024_s2 + $0x10] sm:$0xff] }
  0xf4   :  { %v203_v40 = vadd.f32 %v8116_v11, %v131_v24 }
  0xf5   :  { %952 = vst.msk [vmem:[#allocation2 + $0x101] sm:$0xff] %vm776_vm2, %v725_v43  ;;  %6549 = vmatmul.msk.f32.gmra.mxu2 %vm1662_vm4, %v1597_v42  ;;  %v132_v42 = vmul.f32 %v8061_v54, %v7810_v29  ;;  %v8147_v29 = vld [vmem:[%s11022_s0 + $0x1b0] sm:$0xff] }
  0xf6   :  { %v267_v43 = vmax.f32 %v203_v40, 0.0  ;;  %1642 = vrot.lane.b32.xlu0 %v8147_v29, %s7140_s11 }
  0xf8   :  { %v8028_v45 = vpop.f32.mrf.mxu2  ;;  %v562_v47 = vpop.f32.mrf.mxu0 }
  0xf9   :  { %v563_v14 = vadd.f32 %v7527_v55, %v562_v47  ;;  %v1611_v50 = vpop.permute.xlu2 %1610 }
  0xfb   :  { %v726_v48 = vmax.f32 %v563_v14, 0.0  ;;  %6419 = vmatmul.msk.f32.gmra.mxu0 %vm306_vm1, %v263_v44  ;;  %v1607_v44 = vpop.permute.xlu0 %1606 }
  0xfd   :  { %953 = vst.msk [vmem:[#allocation2 + $0x111] sm:$0xff] %vm776_vm2, %v726_v48  ;;  %6550 = vmatmul.msk.f32.gmra.mxu2 %vm1662_vm4, %v1599_v51  ;;  %v204_v48 = vadd.f32 %v8137_v1, %v132_v42 }
 0x100   :  { %v8045_v52 = vpop.f32.mrf.mxu2  ;;  %v565_v12 = vpop.f32.mrf.mxu0 }
 0x101   :  { %v566_v2 = vadd.f32 %v7527_v55, %v565_v12 }
 0x103   :  { %v727_v58 = vmax.f32 %v566_v2, 0.0  ;;  %6420 = vmatmul.msk.f32.gmra.mxu0 %vm306_vm1, %v264_v21  ;;  %v133_v2 = vmul.f32 %v8061_v54, %v7785_v25  ;;  %v268_v21 = vmax.f32 %v204_v48, 0.0  ;;  %v8170_v25 = vld [vmem:[%s11022_s0 + $0x1b8] sm:$0xff]  ;;  %v1613_v42 = vpop.permute.xlu0 %1612 }
 0x104   :  { %v1019_v26 = vld [vmem:[#allocation2 + $0x110] sm:$0xff]  ;;  %1644 = vrot.lane.b32.xlu1 %v8170_v25, %s7140_s11 }
 0x105   :  { %v2018_v59 = vld [vmem:[#allocation2 + $0x111] sm:$0xff]  ;;  %954 = vst.msk [vmem:[#allocation2 + $0x121] sm:$0xff] %vm776_vm2, %v727_v58  ;;  %6468 = vmatmul.msk.f32.vlgmr.msra.gmra.mxu1 %vm776_vm2, %v1019_v26  ;;  %6551 = vmatmul.msk.f32.gmra.mxu2 %vm1662_vm4, %v1601_v56  ;;  %v205_v56 = vadd.f32 %v8160_v63, %v133_v2 }
 0x106   :  { %6598 = vmatmul.msk.f32.vlgmr.msra.gmra.mxu3 %vm776_vm2, %v2018_v59  ;;  %v1609_v59 = vpop.permute.xlu1 %1608 }
 0x108   :  { %v8075_v17 = vpop.f32.mrf.mxu2  ;;  %v568_v0 = vpop.f32.mrf.mxu0 }
 0x109   :  { %v569_v5 = vadd.f32 %v7527_v55, %v568_v0 }
 0x10b   :  { %v728_v39 = vmax.f32 %v569_v5, 0.0  ;;  %6421 = vmatmul.msk.f32.gmra.mxu0 %vm306_vm1, %v265_v8  ;;  %v269_v8 = vmax.f32 %v205_v56, 0.0 }
 0x10d   :  { %955 = vst.msk [vmem:[#allocation2 + $0x151] sm:$0xff] %vm776_vm2, %v728_v39  ;;  %6469 = vmatmul.msk.f32.gmra.mxu1 %vm776_vm2, %v1020_v18  ;;  %6552 = vmatmul.msk.f32.gmra.mxu2 %vm1662_vm4, %v1603_v13  ;;  %v134_v18 = vmul.f32 %v8061_v54, %v7802_v27  ;;  %v8193_v27 = vld [vmem:[%s11022_s0 + $0x1a8] sm:$0xff] }
 0x10e   :  { %6599 = vmatmul.msk.f32.gmra.mxu3 %vm776_vm2, %v2019_v61  ;;  %1640 = vrot.lane.b32.xlu2 %v8193_v27, %s7140_s11 }
 0x110   :  { %v8104_v19 = vpop.f32.mrf.mxu2  ;;  %v571_v28 = vpop.f32.mrf.mxu0 }
 0x111   :  { %v572_v31 = vadd.f32 %v7527_v55, %v571_v28 }
 0x113   :  { %v729_v41 = vmax.f32 %v572_v31, 0.0  ;;  %6422 = vmatmul.msk.f32.gmra.mxu0 %vm306_vm1, %v266_v20  ;;  %v8183_v20 = vld [vmem:[%s11024_s2 + $0x28] sm:$0xff] }
 0x114   :  { %v1021_v33 = vld [vmem:[#allocation2 + $0x150] sm:$0xff]  ;;  %v206_v24 = vadd.f32 %v8183_v20, %v134_v18  ;;  %v137_v18 = vmul.f32 %v8061_v54, %v7859_v46  ;;  %v8257_v46 = vld [vmem:[%s11022_s0 + $0x1c0] sm:$0xff] }
 0x115   :  { %v2020_v38 = vld [vmem:[#allocation2 + $0x151] sm:$0xff]  ;;  %6470 = vmatmul.msk.f32.gmra.mxu1 %vm776_vm2, %v1021_v33  ;;  %956 = vst.msk [vmem:[#allocation2 + $0x161] sm:$0xff] %vm776_vm2, %v729_v41  ;;  %6553 = vmatmul.msk.f32.gmra.mxu2 %vm1662_vm4, %v1605_v34  ;;  %v135_v34 = vmul.f32 %v8061_v54, %v7894_v60  ;;  %v8216_v60 = vld [vmem:[%s11022_s0 + $0x1c8] sm:$0xff] }
 0x116   :  { %6600 = vmatmul.msk.f32.gmra.mxu3 %vm776_vm2, %v2020_v38  ;;  %v270_v38 = vmax.f32 %v206_v24, 0.0  ;;  %1648 = vrot.lane.b32.xlu0 %v8216_v60, %s7140_s11  ;;  %v1617_v24 = vpop.permute.xlu2 %1616 }
 0x117   :  { %1646 = vrot.lane.b32.xlu2 %v8257_v46, %s7140_s11 }
 0x118   :  { %v574_v22 = vpop.f32.mrf.mxu0  ;;  %v8131_v47 = vpop.f32.mrf.mxu2 }
 0x119   :  { %v575_v14 = vadd.f32 %v7527_v55, %v574_v22  ;;  %v8206_v22 = vld [vmem:[%s11024_s2 + $0x30] sm:$0xff] }
 0x11b   :  { %v730_v51 = vmax.f32 %v575_v14, 0.0  ;;  %6423 = vmatmul.msk.f32.gmra.mxu0 %vm306_vm1, %v267_v43  ;;  %v207_v14 = vadd.f32 %v8206_v22, %v135_v34 }
 0x11c   :  { %v1022_v53 = vld [vmem:[#allocation2 + $0x160] sm:$0xff] }
 0x11d   :  { %v2021_v12 = vld [vmem:[#allocation2 + $0x161] sm:$0xff]  ;;  %957 = vst.msk [vmem:[#allocation2 + $0x171] sm:$0xff] %vm776_vm2, %v730_v51  ;;  %6471 = vmatmul.msk.f32.gmra.mxu1 %vm776_vm2, %v1022_v53  ;;  %6554 = vmatmul.msk.f32.gmra.mxu2 %vm1662_vm4, %v1607_v44  ;;  %v136_v53 = vmul.f32 %v8061_v54, %v7831_v35  ;;  %v8239_v35 = vld [vmem:[%s11022_s0 + $0x1d0] sm:$0xff] }
 0x11e   :  { %6601 = vmatmul.msk.f32.gmra.mxu3 %vm776_vm2, %v2021_v12  ;;  %v271_v12 = vmax.f32 %v207_v14, 0.0  ;;  %1650 = vrot.lane.b32.xlu1 %v8239_v35, %s7140_s11 }
 0x120   :  { %v577_v4 = vpop.f32.mrf.mxu0  ;;  %v8154_v58 = vpop.f32.mrf.mxu2 }
 0x121   :  { %v578_v26 = vadd.f32 %v7527_v55, %v577_v4 }
 0x123   :  { %v731_v0 = vmax.f32 %v578_v26, 0.0  ;;  %6424 = vmatmul.msk.f32.gmra.mxu0 %vm306_vm1, %v268_v21  ;;  %v1615_v26 = vpop.permute.xlu1 %1614 }
 0x124   :  { %v1023_v5 = vld [vmem:[#allocation2 + $0x170] sm:$0xff] }
 0x125   :  { %v2022_v7 = vld [vmem:[#allocation2 + $0x171] sm:$0xff]  ;;  %958 = vst.msk [vmem:[#allocation2 + $0x181] sm:$0xff] %vm776_vm2, %v731_v0  ;;  %6472 = vmatmul.msk.f32.gmra.mxu1 %vm776_vm2, %v1023_v5  ;;  %6555 = vmatmul.msk.f32.gmra.mxu2 %vm1662_vm4, %v1609_v59 }
 0x126   :  { %6602 = vmatmul.msk.f32.gmra.mxu3 %vm776_vm2, %v2022_v7  ;;  %v8229_v59 = vld [vmem:[%s11024_s2 + $0x38] sm:$0xff] }
 0x127   :  { %v208_v56 = vadd.f32 %v8229_v59, %v136_v53 }
 0x128   :  { %v580_v61 = vpop.f32.mrf.mxu0  ;;  %v8177_v39 = vpop.f32.mrf.mxu2 }
 0x129   :  { %v581_v13 = vadd.f32 %v7527_v55, %v580_v61 }
 0x12b   :  { %v732_v28 = vmax.f32 %v581_v13, 0.0  ;;  %6425 = vmatmul.msk.f32.gmra.mxu0 %vm306_vm1, %v269_v8  ;;  %v272_v8 = vmax.f32 %v208_v56, 0.0 }
 0x12c   :  { %v1024_v31 = vld [vmem:[#allocation2 + $0x180] sm:$0xff] }
 0x12d   :  { %v2023_v33 = vld [vmem:[#allocation2 + $0x181] sm:$0xff]  ;;  %959 = vst.msk [vmem:[#allocation2 + $0x191] sm:$0xff] %vm776_vm2, %v732_v28  ;;  %6473 = vmatmul.msk.f32.gmra.mxu1 %vm776_vm2, %v1024_v31  ;;  %6556 = vmatmul.msk.f32.gmra.mxu2 %vm1662_vm4, %v1611_v50  ;;  %v209_v28 = vadd.f32 %v8071_v62, %v137_v18 }
 0x12e   :  { %6603 = vmatmul.msk.f32.gmra.mxu3 %vm776_vm2, %v2023_v33 }
 0x12f   :  { %v273_v34 = vmax.f32 %v209_v28, 0.0 }
 0x130   :  { %v583_v40 = vpop.f32.mrf.mxu0  ;;  %v8200_v41 = vpop.f32.mrf.mxu2 }
 0x131   :  { %v584_v43 = vadd.f32 %v7527_v55, %v583_v40  ;;  %v138_v40 = vmul.f32 %v8061_v54, %v7945_v6  ;;  %v8275_v6 = vld [vmem:[%s11022_s0 + $0x1e0] sm:$0xff] }
 0x132   :  { %1654 = vrot.lane.b32.xlu0 %v8275_v6, %s7140_s11 }
 0x133   :  { %v733_v44 = vmax.f32 %v584_v43, 0.0  ;;  %6426 = vmatmul.msk.f32.gmra.mxu0 %vm306_vm1, %v270_v38 }
 0x134   :  { %v1025_v48 = vld [vmem:[#allocation2 + $0x190] sm:$0xff] }
 0x135   :  { %v2024_v51 = vld [vmem:[#allocation2 + $0x191] sm:$0xff]  ;;  %960 = vst.msk [vmem:[#allocation2 + $0x1a1] sm:$0xff] %vm776_vm2, %v733_v44  ;;  %6474 = vmatmul.msk.f32.gmra.mxu1 %vm776_vm2, %v1025_v48  ;;  %6557 = vmatmul.msk.f32.gmra.mxu2 %vm1662_vm4, %v1613_v42  ;;  %v1619_v44 = vpop.permute.xlu0 %1618  ;;  %v1028_v48 = vld [vmem:[#allocation2 + $0x1e0] sm:$0xff] }
 0x136   :  { %6604 = vmatmul.msk.f32.gmra.mxu3 %vm776_vm2, %v2024_v51  ;;  %v210_v51 = vadd.f32 %v8094_v36, %v138_v40 }
 0x138   :  { %v586_v2 = vpop.f32.mrf.mxu0  ;;  %v8223_v21 = vpop.f32.mrf.mxu2 }
 0x139   :  { %v587_v4 = vadd.f32 %v7527_v55, %v586_v2  ;;  %v139_v2 = vmul.f32 %v8061_v54, %v7917_v16  ;;  %v8293_v16 = vld [vmem:[%s11022_s0 + $0x1e8] sm:$0xff] }
 0x13a   :  { %1656 = vrot.lane.b32.xlu1 %v8293_v16, %s7140_s11 }
 0x13b   :  { %v734_v0 = vmax.f32 %v587_v4, 0.0  ;;  %6427 = vmatmul.msk.f32.gmra.mxu0 %vm306_vm1, %v271_v12  ;;  %v2027_v12 = vld [vmem:[#allocation2 + $0x1e1] sm:$0xff]  ;;  %v274_v4 = vmax.f32 %v210_v51, 0.0 }
 0x13c   :  { %v1026_v5 = vld [vmem:[#allocation2 + $0x1a0] sm:$0xff] }
 0x13d   :  { %v2025_v7 = vld [vmem:[#allocation2 + $0x1a1] sm:$0xff]  ;;  %961 = vst.msk [vmem:[#allocation2 + $0x1b1] sm:$0xff] %vm776_vm2, %v734_v0  ;;  %6475 = vmatmul.msk.f32.gmra.mxu1 %vm776_vm2, %v1026_v5  ;;  %6558 = vmatmul.msk.f32.gmra.mxu2 %vm1662_vm4, %v1615_v26  ;;  %v1621_v5 = vpop.permute.xlu1 %1620 }
 0x13e   :  { %6605 = vmatmul.msk.f32.gmra.mxu3 %vm776_vm2, %v2025_v7  ;;  %v211_v7 = vadd.f32 %v8116_v11, %v139_v2  ;;  %v7120_v51 = vld [vmem:[%s11022_s0] sm:$0xff] }
 0x140   :  { %v589_v61 = vpop.f32.mrf.mxu0  ;;  %v8246_v13 = vpop.f32.mrf.mxu2 }
 0x141   :  { %v590_v50 = vadd.f32 %v7527_v55, %v589_v61 }
 0x142   :  { %1534 = vrot.lane.b32.xlu1 %v7120_v51, %s7140_s11 }
 0x143   :  { %v735_v31 = vmax.f32 %v590_v50, 0.0  ;;  %6428 = vmatmul.msk.f32.gmra.mxu0 %vm306_vm1, %v272_v8  ;;  %v140_v50 = vmul.f32 %v8061_v54, %v7931_v32  ;;  %v8316_v32 = vld [vmem:[%s11022_s0 + $0x1d8] sm:$0xff] }
 0x144   :  { %v1027_v33 = vld [vmem:[#allocation2 + $0x1b0] sm:$0xff]  ;;  %1652 = vrot.lane.b32.xlu2 %v8316_v32, %s7140_s11 }
 0x145   :  { %v2026_v38 = vld [vmem:[#allocation2 + $0x1b1] sm:$0xff]  ;;  %962 = vst.msk [vmem:[#allocation2 + $0x1c1] sm:$0xff] %vm776_vm2, %v735_v31  ;;  %6476 = vmatmul.msk.f32.gmra.mxu1 %vm776_vm2, %v1027_v33  ;;  %6559 = vmatmul.msk.f32.gmra.mxu2 %vm1662_vm4, %v1617_v24  ;;  %v8305_v31 = vld [vmem:[%s11025_s4] ss:$0 sm:$0xff] }
 0x146   :  { %6606 = vmatmul.msk.f32.gmra.mxu3 %vm776_vm2, %v2026_v38  ;;  %v1623_v38 = vpop.permute.xlu2 %1622 }
 0x148   :  { %v592_v43 = vpop.f32.mrf.mxu0  ;;  %v8264_v42 = vpop.f32.mrf.mxu2 }
 0x149   :  { %11049 = vst [vmem:[#allocation3_spill] sm:$0xff] %v8264_v42  ;;  %v593_v14 = vadd.f32 %v7527_v55, %v592_v43 }
 0x14b   :  { %v736_v53 = vmax.f32 %v593_v14, 0.0  ;;  %6429 = vmatmul.msk.f32.gmra.mxu0 %vm306_vm1, %v273_v34  ;;  %v212_v34 = vadd.f32 %v8137_v1, %v140_v50 }
 0x14d   :  { %963 = vst.msk [vmem:[#allocation2 + $0x1f1] sm:$0xff] %vm776_vm2, %v736_v53  ;;  %6477 = vmatmul.msk.f32.gmra.mxu1 %vm776_vm2, %v1028_v48  ;;  %6560 = vmatmul.msk.f32.gmra.mxu2 %vm1662_vm4, %v1619_v44  ;;  %v276_v44 = vmax.f32 %v212_v34, 0.0  ;;  %v141_v48 = vmul.f32 %v8061_v54, %v7987_v30  ;;  %v8338_v30 = vld [vmem:[%s11022_s0 + $0x1f8] sm:$0xff] }
 0x14e   :  { %6607 = vmatmul.msk.f32.gmra.mxu3 %vm776_vm2, %v2027_v12  ;;  %1660 = vrot.lane.b32.xlu0 %v8338_v30, %s7140_s11 }
 0x150   :  { %v595_v26 = vpop.f32.mrf.mxu0  ;;  %v8282_v56 = vpop.f32.mrf.mxu2 }
 0x151   :  { %11050 = vst [vmem:[#allocation4_spill] sm:$0xff] %v8282_v56  ;;  %v596_v0 = vadd.f32 %v7527_v55, %v595_v26  ;;  %v275_v55 = vmax.f32 %v211_v7, 0.0  ;;  %v213_v26 = vadd.f32 %v8160_v63, %v141_v48  ;;  %v7123_v48 = vld [vmem:[%s11022_s0 + $0x30] sm:$0xff] }
 0x152   :  { %v9133_v56 = vld [vmem:[#allocation2 + $0xf2] sm:$0xff] }
 0x153   :  { %v737_v8 = vmax.f32 %v596_v0, 0.0  ;;  %6430 = vmatmul.msk.f32.gmra.mxu0 %vm306_vm1, %v274_v4  ;;  %v1625_v4 = vpop.permute.xlu0 %1624  ;;  %11191 = vst [vmem:[#allocation145_spill] sm:$0xff] %v9133_v56 }
 0x154   :  { %v1029_v18 = vld [vmem:[#allocation2 + $0x1f0] sm:$0xff] }
 0x155   :  { %v2028_v61 = vld [vmem:[#allocation2 + $0x1f1] sm:$0xff]  ;;  %964 = vst.msk [vmem:[#allocation2 + $0x201] sm:$0xff] %vm776_vm2, %v737_v8  ;;  %6478 = vmatmul.msk.f32.gmra.mxu1 %vm776_vm2, %v1029_v18  ;;  %6561 = vmatmul.msk.f32.gmra.mxu2 %vm1662_vm4, %v1621_v5  ;;  %v142_v8 = vmul.f32 %v8061_v54, %v7959_v15  ;;  %v277_v18 = vmax.f32 %v213_v26, 0.0 }
 0x156   :  { %6608 = vmatmul.msk.f32.gmra.mxu3 %vm776_vm2, %v2028_v61  ;;  %v7121_v61 = vld [vmem:[%s11022_s0 + $0x18] sm:$0xff] }
 0x157   :  { %1540 = vrot.lane.b32.xlu1 %v7121_v61, %s7140_s11  ;;  %v7124_v61 = vld [vmem:[%s11022_s0 + $0x28] sm:$0xff] }
 0x158   :  { %v598_v24 = vpop.f32.mrf.mxu0  ;;  %v8300_v28 = vpop.f32.mrf.mxu2 }
 0x159   :  { %11051 = vst [vmem:[#allocation5_spill] sm:$0xff] %v8300_v28  ;;  %v599_v33 = vadd.f32 %v8305_v31, %v598_v24 }
 0x15b   :  { %v738_v40 = vmax.f32 %v599_v33, 0.0  ;;  %6431 = vmatmul.msk.f32.gmra.mxu0 %vm306_vm1, %v275_v55  ;;  %v1627_v33 = vpop.permute.xlu1 %1626 }
 0x15c   :  { %v1030_v43 = vld [vmem:[#allocation2 + $0x200] sm:$0xff] }
 0x15d   :  { %v2029_v14 = vld [vmem:[#allocation2 + $0x201] sm:$0xff]  ;;  %965 = vst.msk [vmem:[#allocation2 + $0x211] sm:$0xff] %vm776_vm2, %v738_v40  ;;  %6479 = vmatmul.msk.f32.gmra.mxu1 %vm776_vm2, %v1030_v43  ;;  %6562 = vmatmul.msk.f32.gmra.mxu2 %vm1662_vm4, %v1623_v38  ;;  %v214_v38 = vadd.f32 %v8183_v20, %v142_v8  ;;  %v7122_v43 = vld [vmem:[%s11022_s0 + $0x10] sm:$0xff] }
 0x15e   :  { %6609 = vmatmul.msk.f32.gmra.mxu3 %vm776_vm2, %v2029_v14  ;;  %1538 = vrot.lane.b32.xlu0 %v7122_v43, %s7140_s11 }
 0x15f   :  { %v278_v14 = vmax.f32 %v214_v38, 0.0  ;;  %1546 = vrot.lane.b32.xlu1 %v7123_v48, %s7140_s11 }
 0x160   :  { %v601_v53 = vpop.f32.mrf.mxu0  ;;  %v8327_v12 = vpop.f32.mrf.mxu2 }
 0x161   :  { %11052 = vst [vmem:[#allocation6_spill] sm:$0xff] %v8327_v12  ;;  %v602_v2 = vadd.f32 %v8305_v31, %v601_v53  ;;  %v9079_v12 = vld [vmem:[#allocation2 + $0xc2] sm:$0xff] }
 0x163   :  { %v739_v0 = vmax.f32 %v602_v2, 0.0  ;;  %6432 = vmatmul.msk.f32.gmra.mxu0 %vm306_vm1, %v276_v44  ;;  %v143_v44 = vmul.f32 %v8061_v54, %v7973_v23  ;;  %v8379_v23 = vld [vmem:[%s11022_s0 + $0x1f0] sm:$0xff] }
 0x164   :  { %v1031_v5 = vld [vmem:[#allocation2 + $0x210] sm:$0xff]  ;;  %1658 = vrot.lane.b32.xlu2 %v8379_v23, %s7140_s11 }
 0x165   :  { %v2030_v7 = vld [vmem:[#allocation2 + $0x211] sm:$0xff]  ;;  %966 = vst.msk [vmem:[#allocation2 + $0x221] sm:$0xff] %vm776_vm2, %v739_v0  ;;  %6480 = vmatmul.msk.f32.gmra.mxu1 %vm776_vm2, %v1031_v5  ;;  %6563 = vmatmul.msk.f32.gmra.mxu2 %vm1662_vm4, %v1625_v4  ;;  %v1629_v4 = vpop.permute.xlu2 %1628  ;;  %v215_v26 = vadd.f32 %v8206_v22, %v143_v44  ;;  %v145_v44 = vmul.f32 %v8061_v54, %v8018_v37 }
 0x166   :  { %6610 = vmatmul.msk.f32.gmra.mxu3 %vm776_vm2, %v2030_v7  ;;  %1544 = vrot.lane.b32.xlu0 %v7124_v61, %s7140_s11 }
 0x167   :  { %v279_v8 = vmax.f32 %v215_v26, 0.0 }
 0x168   :  { %v604_v55 = vpop.f32.mrf.mxu0  ;;  %v8349_v50 = vpop.f32.mrf.mxu2 }
 0x169   :  { %11053 = vst [vmem:[#allocation7_spill] sm:$0xff] %v8349_v50  ;;  %v605_v24 = vadd.f32 %v8305_v31, %v604_v55  ;;  %v7125_v55 = vld [vmem:[%s11022_s0 + $0x48] sm:$0xff]  ;;  %v3090_v50 = vld [vmem:[#allocation2 + $0x200] sm:$0xff] }
 0x16a   :  { %1552 = vrot.lane.b32.xlu1 %v7125_v55, %s7140_s11 }
 0x16b   :  { %v740_v34 = vmax.f32 %v605_v24, 0.0  ;;  %6433 = vmatmul.msk.f32.gmra.mxu0 %vm306_vm1, %v277_v18  ;;  %v144_v18 = vmul.f32 %v8061_v54, %v8053_v57 }
 0x16c   :  { %v1032_v40 = vld [vmem:[#allocation2 + $0x220] sm:$0xff] }
 0x16d   :  { %v2031_v15 = vld [vmem:[#allocation2 + $0x221] sm:$0xff]  ;;  %967 = vst.msk [vmem:[#allocation2 + $0x231] sm:$0xff] %vm776_vm2, %v740_v34  ;;  %6481 = vmatmul.msk.f32.gmra.mxu1 %vm776_vm2, %v1032_v40  ;;  %6564 = vmatmul.msk.f32.gmra.mxu2 %vm1662_vm4, %v1627_v33  ;;  %v1631_v34 = vpop.permute.xlu0 %1630  ;;  %v216_v57 = vadd.f32 %v8229_v59, %v144_v18 }
 0x16e   :  { %6611 = vmatmul.msk.f32.gmra.mxu3 %vm776_vm2, %v2031_v15 }
 0x16f   :  { %v280_v48 = vmax.f32 %v216_v57, 0.0 }
 0x170   :  { %v607_v51 = vpop.f32.mrf.mxu0  ;;  %v8368_v53 = vpop.f32.mrf.mxu2 }
 0x171   :  { %11054 = vst [vmem:[#allocation8_spill] sm:$0xff] %v8368_v53  ;;  %v608_v2 = vadd.f32 %v8305_v31, %v607_v51  ;;  %v9013_v53 = vld [vmem:[#allocation2 + $0x62] sm:$0xff] }
 0x173   :  { %v741_v0 = vmax.f32 %v608_v2, 0.0  ;;  %6434 = vmatmul.msk.f32.gmra.mxu0 %vm306_vm1, %v278_v14  ;;  %v7126_v14 = vld [vmem:[%s11022_s0 + $0x8] sm:$0xff]  ;;  %v7127_v2 = vld [vmem:[%s11022_s0 + $0x40] sm:$0xff] }
 0x174   :  { %v1033_v5 = vld [vmem:[#allocation2 + $0x230] sm:$0xff]  ;;  %1536 = vrot.lane.b32.xlu2 %v7126_v14, %s7140_s11  ;;  %1550 = vrot.lane.b32.xlu0 %v7127_v2, %s7140_s11 }
 0x175   :  { %v2032_v7 = vld [vmem:[#allocation2 + $0x231] sm:$0xff]  ;;  %968 = vst.msk [vmem:[#allocation2 + $0x241] sm:$0xff] %vm776_vm2, %v741_v0  ;;  %6482 = vmatmul.msk.f32.gmra.mxu1 %vm776_vm2, %v1033_v5  ;;  %6565 = vmatmul.msk.f32.gmra.mxu2 %vm1662_vm4, %v1629_v4  ;;  %v7128_v4 = vld [vmem:[%s11022_s0 + $0x60] sm:$0xff]  ;;  %v1633_v5 = vpop.permute.xlu1 %1632 }
 0x176   :  { %6612 = vmatmul.msk.f32.gmra.mxu3 %vm776_vm2, %v2032_v7  ;;  %1558 = vrot.lane.b32.xlu1 %v7128_v4, %s7140_s11  ;;  %v217_v7 = vadd.f32 %v8071_v62, %v145_v44  ;;  %v1635_v44 = vpop.permute.xlu2 %1634 }
 0x178   :  { %v610_v24 = vpop.f32.mrf.mxu0  ;;  %v8394_v33 = vpop.f32.mrf.mxu2 }
 0x179   :  { %11055 = vst [vmem:[#allocation9_spill] sm:$0xff] %v8394_v33  ;;  %v611_v38 = vadd.f32 %v8305_v31, %v610_v24  ;;  %v7129_v24 = vld [vmem:[%s11022_s0 + $0x20] sm:$0xff] }
 0x17a   :  { %v3068_v33 = vld [vmem:[#allocation2 + $0x40] sm:$0xff] }
 0x17b   :  { %v742_v40 = vmax.f32 %v611_v38, 0.0  ;;  %6435 = vmatmul.msk.f32.gmra.mxu0 %vm306_vm1, %v279_v8  ;;  %v281_v38 = vmax.f32 %v217_v7, 0.0  ;;  %v147_v7 = vmul.f32 %v8061_v54, %v8125_v10 }
 0x17c   :  { %v1034_v15 = vld [vmem:[#allocation2 + $0x240] sm:$0xff]  ;;  %1542 = vrot.lane.b32.xlu2 %v7129_v24, %s7140_s11 }
 0x17d   :  { %v2033_v43 = vld [vmem:[#allocation2 + $0x241] sm:$0xff]  ;;  %969 = vst.msk [vmem:[#allocation2 + $0x251] sm:$0xff] %vm776_vm2, %v742_v40  ;;  %6483 = vmatmul.msk.f32.gmra.mxu1 %vm776_vm2, %v1034_v15  ;;  %6566 = vmatmul.msk.f32.gmra.mxu2 %vm1662_vm4, %v1631_v34  ;;  %v146_v34 = vmul.f32 %v8061_v54, %v8037_v49  ;;  %v7130_v40 = vld [vmem:[%s11022_s0 + $0x58] sm:$0xff] }
 0x17e   :  { %6613 = vmatmul.msk.f32.gmra.mxu3 %vm776_vm2, %v2033_v43  ;;  %1556 = vrot.lane.b32.xlu0 %v7130_v40, %s7140_s11  ;;  %v2035_v49 = vld [vmem:[#allocation2 + $0x281] sm:$0xff]  ;;  %v219_v40 = vadd.f32 %v8116_v11, %v147_v7 }
 0x17f   :  { %v218_v2 = vadd.f32 %v8094_v36, %v146_v34  ;;  %v1637_v34 = vpop.permute.xlu0 %1636  ;;  %v3094_v28 = vld [vmem:[#allocation2 + $0x240] sm:$0xff] }
 0x180   :  { %v613_v26 = vpop.f32.mrf.mxu0  ;;  %v8419_v0 = vpop.f32.mrf.mxu2 }
 0x181   :  { %11056 = vst [vmem:[#allocation10_spill] sm:$0xff] %v8419_v0  ;;  %v614_v37 = vadd.f32 %v8305_v31, %v613_v26 }
 0x182   :  { %v8409_v51 = vpop.f32.mrf.mxu1 }
 0x183   :  { %v743_v8 = vmax.f32 %v614_v37, 0.0  ;;  %6436 = vmatmul.msk.f32.gmra.mxu0 %vm306_vm1, %v280_v48  ;;  %v1036_v48 = vld [vmem:[#allocation2 + $0x280] sm:$0xff]  ;;  %v7131_v37 = vld [vmem:[%s11022_s0 + $0x38] sm:$0xff] }
 0x184   :  { %v1035_v18 = vld [vmem:[#allocation2 + $0x250] sm:$0xff]  ;;  %1548 = vrot.lane.b32.xlu2 %v7131_v37, %s7140_s11 }
 0x185   :  { %v2034_v61 = vld [vmem:[#allocation2 + $0x251] sm:$0xff]  ;;  %970 = vst.msk [vmem:[#allocation2 + $0x261] sm:$0xff] %vm776_vm2, %v743_v8  ;;  %6484 = vmatmul.msk.f32.gmra.mxu1 %vm776_vm2, %v1035_v18  ;;  %6567 = vmatmul.msk.f32.gmra.mxu2 %vm1662_vm4, %v1633_v5  ;;  %v282_v5 = vmax.f32 %v218_v2, 0.0  ;;  %v283_v2 = vmax.f32 %v219_v40, 0.0 }
 0x186   :  { %6614 = vmatmul.msk.f32.gmra.mxu3 %vm776_vm2, %v2034_v61  ;;  %v7132_v18 = vld [vmem:[%s11022_s0 + $0x70] sm:$0xff] }
 0x187   :  { %1562 = vrot.lane.b32.xlu0 %v7132_v18, %s7140_s11  ;;  %v1639_v18 = vpop.permute.xlu1 %1638 }
 0x188   :  { %v616_v15 = vpop.f32.mrf.mxu0  ;;  %v8442_v43 = vpop.f32.mrf.mxu2 }
 0x189   :  { %v8427_v55 = vpop.f32.mrf.mxu3  ;;  %11057 = vst [vmem:[#allocation11_spill] sm:$0xff] %v8442_v43  ;;  %v617_v14 = vadd.f32 %v8305_v31, %v616_v15 }
 0x18a   :  { %v8436_v57 = vpop.f32.mrf.mxu1 }
 0x18b   :  { %v744_v4 = vmax.f32 %v617_v14, 0.0  ;;  %6437 = vmatmul.msk.f32.gmra.mxu0 %vm306_vm1, %v281_v38 }
 0x18d   :  { %971 = vst.msk [vmem:[#allocation2 + $0x291] sm:$0xff] %vm776_vm2, %v744_v4  ;;  %6485 = vmatmul.msk.f32.gmra.mxu1 %vm776_vm2, %v1036_v48  ;;  %6568 = vmatmul.msk.f32.gmra.mxu2 %vm1662_vm4, %v1635_v44  ;;  %v7133_v44 = vld [vmem:[%s11022_s0 + $0x50] sm:$0xff]  ;;  %v148_v48 = vmul.f32 %v8061_v54, %v8081_v3  ;;  %v7134_v3 = vld [vmem:[%s11022_s0 + $0x68] sm:$0xff] }
 0x18e   :  { %6615 = vmatmul.msk.f32.gmra.mxu3 %vm776_vm2, %v2035_v49  ;;  %1554 = vrot.lane.b32.xlu2 %v7133_v44, %s7140_s11 }
 0x190   :  { %v619_v61 = vpop.f32.mrf.mxu0  ;;  %v8465_v24 = vpop.f32.mrf.mxu2 }
 0x191   :  { %v8450_v26 = vpop.f32.mrf.mxu3  ;;  %11058 = vst [vmem:[#allocation12_spill] sm:$0xff] %v8465_v24  ;;  %v620_v38 = vadd.f32 %v8305_v31, %v619_v61  ;;  %v220_v61 = vadd.f32 %v8137_v1, %v148_v48 }
 0x192   :  { %v8459_v8 = vpop.f32.mrf.mxu1 }
 0x193   :  { %v745_v15 = vmax.f32 %v620_v38, 0.0  ;;  %6438 = vmatmul.msk.f32.gmra.mxu0 %vm306_vm1, %v282_v5  ;;  %v284_v40 = vmax.f32 %v220_v61, 0.0 }
 0x194   :  { %v1037_v10 = vld [vmem:[#allocation2 + $0x290] sm:$0xff] }
 0x195   :  { %v2036_v14 = vld [vmem:[#allocation2 + $0x291] sm:$0xff]  ;;  %972 = vst.msk [vmem:[#allocation2 + $0x2a1] sm:$0xff] %vm776_vm2, %v745_v15  ;;  %6486 = vmatmul.msk.f32.gmra.mxu1 %vm776_vm2, %v1037_v10  ;;  %6569 = vmatmul.msk.f32.gmra.mxu2 %vm1662_vm4, %v1637_v34  ;;  %v149_v10 = vmul.f32 %v8061_v54, %v8102_v9 }
 0x196   :  { %6616 = vmatmul.msk.f32.gmra.mxu3 %vm776_vm2, %v2036_v14  ;;  %1560 = vrot.lane.b32.xlu2 %v7134_v3, %s7140_s11 }
 0x198   :  { %v622_v49 = vpop.f32.mrf.mxu0  ;;  %v8482_v37 = vpop.f32.mrf.mxu2 }
 0x199   :  { %v8480_v4 = vpop.f32.mrf.mxu3  ;;  %11059 = vst [vmem:[#allocation13_spill] sm:$0xff] %v8482_v37  ;;  %v623_v5 = vadd.f32 %v8305_v31, %v622_v49 }
 0x19a   :  { %v8485_v7 = vpop.f32.mrf.mxu1 }
 0x19b   :  { %v746_v38 = vmax.f32 %v623_v5, 0.0  ;;  %6439 = vmatmul.msk.f32.gmra.mxu0 %vm306_vm1, %v283_v2  ;;  %v1641_v5 = vpop.permute.xlu2 %1640 }
 0x19c   :  { %v1038_v34 = vld [vmem:[#allocation2 + $0x2a0] sm:$0xff] }
 0x19d   :  { %v2037_v15 = vld [vmem:[#allocation2 + $0x2a1] sm:$0xff]  ;;  %973 = vst.msk [vmem:[#allocation2 + $0x2b1] sm:$0xff] %vm776_vm2, %v746_v38  ;;  %6487 = vmatmul.msk.f32.gmra.mxu1 %vm776_vm2, %v1038_v34  ;;  %6570 = vmatmul.msk.f32.gmra.mxu2 %vm1662_vm4, %v1639_v18  ;;  %v221_v18 = vadd.f32 %v8160_v63, %v149_v10 }
 0x19e   :  { %6617 = vmatmul.msk.f32.gmra.mxu3 %vm776_vm2, %v2037_v15  ;;  %v150_v15 = vmul.f32 %v8061_v54, %v8193_v27  ;;  %v151_v27 = vmul.f32 %v8061_v54, %v8147_v29 }
 0x19f   :  { %v285_v9 = vmax.f32 %v221_v18, 0.0 }
 0x1a0   :  { %v625_v14 = vpop.f32.mrf.mxu0  ;;  %v8499_v44 = vpop.f32.mrf.mxu2 }
 0x1a1   :  { %11060 = vst [vmem:[#allocation14_spill] sm:$0xff] %v8499_v44  ;;  %v626_v48 = vadd.f32 %v8305_v31, %v625_v14  ;;  %v8502_v2 = vpop.f32.mrf.mxu3 }
 0x1a2   :  { %v8504_v49 = vpop.f32.mrf.mxu1 }
 0x1a3   :  { %v747_v38 = vmax.f32 %v626_v48, 0.0  ;;  %6440 = vmatmul.msk.f32.gmra.mxu0 %vm306_vm1, %v284_v40 }
 0x1a4   :  { %v1039_v34 = vld [vmem:[#allocation2 + $0x2b0] sm:$0xff] }
 0x1a5   :  { %v2038_v61 = vld [vmem:[#allocation2 + $0x2b1] sm:$0xff]  ;;  %974 = vst.msk [vmem:[#allocation2 + $0x2c1] sm:$0xff] %vm776_vm2, %v747_v38  ;;  %6488 = vmatmul.msk.f32.gmra.mxu1 %vm776_vm2, %v1039_v34  ;;  %6571 = vmatmul.msk.f32.gmra.mxu2 %vm1662_vm4, %v1641_v5  ;;  %v1643_v38 = vpop.permute.xlu0 %1642  ;;  %v222_v34 = vadd.f32 %v8183_v20, %v150_v15 }
 0x1a6   :  { %6618 = vmatmul.msk.f32.gmra.mxu3 %vm776_vm2, %v2038_v61 }
 0x1a7   :  { %v286_v61 = vmax.f32 %v222_v34, 0.0  ;;  %v152_v34 = vmul.f32 %v8061_v54, %v8170_v25 }
 0x1a8   :  { %v628_v3 = vpop.f32.mrf.mxu0  ;;  %v8514_v14 = vpop.f32.mrf.mxu2 }
 0x1a9   :  { %11061 = vst [vmem:[#allocation15_spill] sm:$0xff] %v8514_v14  ;;  %v629_v10 = vadd.f32 %v8305_v31, %v628_v3  ;;  %v8517_v40 = vpop.f32.mrf.mxu3 }
 0x1aa   :  { %v8519_v48 = vpop.f32.mrf.mxu1 }
 0x1ab   :  { %v748_v44 = vmax.f32 %v629_v10, 0.0  ;;  %6441 = vmatmul.msk.f32.gmra.mxu0 %vm306_vm1, %v285_v9 }
 0x1ac   :  { %v1040_v5 = vld [vmem:[#allocation2 + $0x2c0] sm:$0xff] }
 0x1ad   :  { %v2039_v18 = vld [vmem:[#allocation2 + $0x2c1] sm:$0xff]  ;;  %975 = vst.msk [vmem:[#allocation2 + $0x2d1] sm:$0xff] %vm776_vm2, %v748_v44  ;;  %6489 = vmatmul.msk.f32.gmra.mxu1 %vm776_vm2, %v1040_v5  ;;  %6572 = vmatmul.msk.f32.gmra.mxu2 %vm1662_vm4, %v1643_v38  ;;  %v1645_v44 = vpop.permute.xlu1 %1644  ;;  %v223_v5 = vadd.f32 %v8206_v22, %v151_v27 }
 0x1ae   :  { %6619 = vmatmul.msk.f32.gmra.mxu3 %vm776_vm2, %v2039_v18 }
 0x1af   :  { %v287_v29 = vmax.f32 %v223_v5, 0.0 }
 0x1b0   :  { %v631_v3 = vpop.f32.mrf.mxu0  ;;  %v8529_v14 = vpop.f32.mrf.mxu2 }
 0x1b1   :  { %11062 = vst [vmem:[#allocation16_spill] sm:$0xff] %v8529_v14  ;;  %v632_v15 = vadd.f32 %v8305_v31, %v631_v3  ;;  %v8532_v9 = vpop.f32.mrf.mxu3 }
 0x1b2   :  { %v8534_v10 = vpop.f32.mrf.mxu1 }
 0x1b3   :  { %v749_v37 = vmax.f32 %v632_v15, 0.0  ;;  %6442 = vmatmul.msk.f32.gmra.mxu0 %vm306_vm1, %v286_v61 }
 0x1b4   :  { %v1041_v38 = vld [vmem:[#allocation2 + $0x2d0] sm:$0xff] }
 0x1b5   :  { %v2040_v18 = vld [vmem:[#allocation2 + $0x2d1] sm:$0xff]  ;;  %976 = vst.msk [vmem:[#allocation2 + $0x2e1] sm:$0xff] %vm776_vm2, %v749_v37  ;;  %6490 = vmatmul.msk.f32.gmra.mxu1 %vm776_vm2, %v1041_v38  ;;  %6573 = vmatmul.msk.f32.gmra.mxu2 %vm1662_vm4, %v1645_v44  ;;  %v1647_v37 = vpop.permute.xlu2 %1646  ;;  %v224_v38 = vadd.f32 %v8229_v59, %v152_v34 }
 0x1b6   :  { %6620 = vmatmul.msk.f32.gmra.mxu3 %vm776_vm2, %v2040_v18  ;;  %v153_v18 = vmul.f32 %v8061_v54, %v8257_v46  ;;  %v154_v46 = vmul.f32 %v8061_v54, %v8216_v60 }
 0x1b7   :  { %v288_v25 = vmax.f32 %v224_v38, 0.0 }
 0x1b8   :  { %v634_v3 = vpop.f32.mrf.mxu0  ;;  %v8544_v14 = vpop.f32.mrf.mxu2 }
 0x1b9   :  { %11063 = vst [vmem:[#allocation17_spill] sm:$0xff] %v8544_v14  ;;  %v635_v27 = vadd.f32 %v8305_v31, %v634_v3  ;;  %v8547_v61 = vpop.f32.mrf.mxu3 }
 0x1ba   :  { %v8549_v15 = vpop.f32.mrf.mxu1 }
 0x1bb   :  { %v750_v24 = vmax.f32 %v635_v27, 0.0  ;;  %6443 = vmatmul.msk.f32.gmra.mxu0 %vm306_vm1, %v287_v29 }
 0x1bc   :  { %v1042_v44 = vld [vmem:[#allocation2 + $0x2e0] sm:$0xff] }
 0x1bd   :  { %v2041_v5 = vld [vmem:[#allocation2 + $0x2e1] sm:$0xff]  ;;  %977 = vst.msk [vmem:[#allocation2 + $0x2f1] sm:$0xff] %vm776_vm2, %v750_v24  ;;  %6491 = vmatmul.msk.f32.gmra.mxu1 %vm776_vm2, %v1042_v44  ;;  %6574 = vmatmul.msk.f32.gmra.mxu2 %vm1662_vm4, %v1647_v37  ;;  %v1649_v24 = vpop.permute.xlu0 %1648  ;;  %v225_v44 = vadd.f32 %v8071_v62, %v153_v18 }
 0x1be   :  { %6621 = vmatmul.msk.f32.gmra.mxu3 %vm776_vm2, %v2041_v5 }
 0x1bf   :  { %v289_v5 = vmax.f32 %v225_v44, 0.0  ;;  %v155_v44 = vmul.f32 %v8061_v54, %v8239_v35 }
 0x1c0   :  { %v637_v3 = vpop.f32.mrf.mxu0  ;;  %v8559_v14 = vpop.f32.mrf.mxu2 }
 0x1c1   :  { %11064 = vst [vmem:[#allocation18_spill] sm:$0xff] %v8559_v14  ;;  %v638_v34 = vadd.f32 %v8305_v31, %v637_v3  ;;  %v8562_v29 = vpop.f32.mrf.mxu3 }
 0x1c2   :  { %v8564_v27 = vpop.f32.mrf.mxu1 }
 0x1c3   :  { %v751_v43 = vmax.f32 %v638_v34, 0.0  ;;  %6444 = vmatmul.msk.f32.gmra.mxu0 %vm306_vm1, %v288_v25  ;;  %v1044_v34 = vld [vmem:[#allocation2 + $0x320] sm:$0xff] }
 0x1c4   :  { %v1043_v37 = vld [vmem:[#allocation2 + $0x2f0] sm:$0xff] }
 0x1c5   :  { %v2042_v38 = vld [vmem:[#allocation2 + $0x2f1] sm:$0xff]  ;;  %978 = vst.msk [vmem:[#allocation2 + $0x301] sm:$0xff] %vm776_vm2, %v751_v43  ;;  %6492 = vmatmul.msk.f32.gmra.mxu1 %vm776_vm2, %v1043_v37  ;;  %6575 = vmatmul.msk.f32.gmra.mxu2 %vm1662_vm4, %v1649_v24  ;;  %v1651_v43 = vpop.permute.xlu1 %1650  ;;  %v226_v37 = vadd.f32 %v8094_v36, %v154_v46 }
 0x1c6   :  { %6622 = vmatmul.msk.f32.gmra.mxu3 %vm776_vm2, %v2042_v38  ;;  %v2043_v38 = vld [vmem:[#allocation2 + $0x321] sm:$0xff] }
 0x1c7   :  { %v290_v60 = vmax.f32 %v226_v37, 0.0 }
 0x1c8   :  { %v640_v3 = vpop.f32.mrf.mxu0  ;;  %v8574_v14 = vpop.f32.mrf.mxu2 }
 0x1c9   :  { %11065 = vst [vmem:[#allocation19_spill] sm:$0xff] %v8574_v14  ;;  %v641_v62 = vadd.f32 %v8305_v31, %v640_v3  ;;  %v8577_v25 = vpop.f32.mrf.mxu3 }
 0x1ca   :  { %v8579_v18 = vpop.f32.mrf.mxu1 }
 0x1cb   :  { %v752_v24 = vmax.f32 %v641_v62, 0.0  ;;  %6445 = vmatmul.msk.f32.gmra.mxu0 %vm306_vm1, %v289_v5  ;;  %v1653_v62 = vpop.permute.xlu2 %1652 }
 0x1cd   :  { %979 = vst.msk [vmem:[#allocation2 + $0x331] sm:$0xff] %vm776_vm2, %v752_v24  ;;  %6493 = vmatmul.msk.f32.gmra.mxu1 %vm776_vm2, %v1044_v34  ;;  %6576 = vmatmul.msk.f32.gmra.mxu2 %vm1662_vm4, %v1651_v43  ;;  %v227_v34 = vadd.f32 %v8116_v11, %v155_v44 }
 0x1ce   :  { %6623 = vmatmul.msk.f32.gmra.mxu3 %vm776_vm2, %v2043_v38  ;;  %v156_v38 = vmul.f32 %v8061_v54, %v8316_v32  ;;  %v157_v32 = vmul.f32 %v8061_v54, %v8275_v6 }
 0x1cf   :  { %v291_v35 = vmax.f32 %v227_v34, 0.0 }
 0x1d0   :  { %v643_v3 = vpop.f32.mrf.mxu0  ;;  %v8589_v14 = vpop.f32.mrf.mxu2 }
 0x1d1   :  { %11066 = vst [vmem:[#allocation20_spill] sm:$0xff] %v8589_v14  ;;  %v644_v36 = vadd.f32 %v8305_v31, %v643_v3  ;;  %v8592_v46 = vpop.f32.mrf.mxu3 }
 0x1d2   :  { %v8594_v5 = vpop.f32.mrf.mxu1 }
 0x1d3   :  { %11067 = vst [vmem:[#allocation21_spill] sm:$0xff] %v8594_v5  ;;  %v753_v24 = vmax.f32 %v644_v36, 0.0  ;;  %6446 = vmatmul.msk.f32.gmra.mxu0 %vm306_vm1, %v290_v60  ;;  %v1655_v36 = vpop.permute.xlu0 %1654  ;;  %v3098_v5 = vld [vmem:[#allocation2 + $0x2a0] sm:$0xff] }
 0x1d4   :  { %v1045_v43 = vld [vmem:[#allocation2 + $0x330] sm:$0xff] }
 0x1d5   :  { %v2044_v37 = vld [vmem:[#allocation2 + $0x331] sm:$0xff]  ;;  %980 = vst.msk [vmem:[#allocation2 + $0x341] sm:$0xff] %vm776_vm2, %v753_v24  ;;  %6494 = vmatmul.msk.f32.gmra.mxu1 %vm776_vm2, %v1045_v43  ;;  %6577 = vmatmul.msk.f32.gmra.mxu2 %vm1662_vm4, %v1653_v62  ;;  %v228_v24 = vadd.f32 %v8137_v1, %v156_v38 }
 0x1d6   :  { %6624 = vmatmul.msk.f32.gmra.mxu3 %vm776_vm2, %v2044_v37 }
 0x1d7   :  { %v292_v37 = vmax.f32 %v228_v24, 0.0  ;;  %v158_v24 = vmul.f32 %v8061_v54, %v8293_v16  ;;  %v7135_v16 = vld [vmem:[%s11023_s1] ss:$0 sm:$0xff] }
 0x1d8   :  { %v646_v3 = vpop.f32.mrf.mxu0  ;;  %v8604_v14 = vpop.f32.mrf.mxu2 }
 0x1d9   :  { %11068 = vst [vmem:[#allocation22_spill] sm:$0xff] %v8604_v14  ;;  %v647_v11 = vadd.f32 %v8305_v31, %v646_v3  ;;  %v8607_v60 = vpop.f32.mrf.mxu3 }
 0x1da   :  { %11069 = vst [vmem:[#allocation23_spill] sm:$0xff] %v8607_v60  ;;  %v8609_v44 = vpop.f32.mrf.mxu1  ;;  %v9151_v60 = vld [vmem:[#allocation2 + $0x102] sm:$0xff] }
 0x1db   :  { %11070 = vst [vmem:[#allocation24_spill] sm:$0xff] %v8609_v44  ;;  %v754_v43 = vmax.f32 %v647_v11, 0.0  ;;  %6447 = vmatmul.msk.f32.gmra.mxu0 %vm306_vm1, %v291_v35  ;;  %v1657_v11 = vpop.permute.xlu1 %1656  ;;  %v3096_v44 = vld [vmem:[#allocation2 + $0x260] sm:$0xff] }
 0x1dc   :  { %v1046_v62 = vld [vmem:[#allocation2 + $0x340] sm:$0xff]  ;;  %11195 = vst [vmem:[#allocation149_spill] sm:$0xff] %v9151_v60 }
 0x1dd   :  { %v2045_v34 = vld [vmem:[#allocation2 + $0x341] sm:$0xff]  ;;  %981 = vst.msk [vmem:[#allocation2 + $0x351] sm:$0xff] %vm776_vm2, %v754_v43  ;;  %6495 = vmatmul.msk.f32.gmra.mxu1 %vm776_vm2, %v1046_v62  ;;  %6578 = vmatmul.msk.f32.gmra.mxu2 %vm1662_vm4, %v1655_v36  ;;  %v229_v43 = vadd.f32 %v8160_v63, %v157_v32 }
 0x1de   :  { %6625 = vmatmul.msk.f32.gmra.mxu3 %vm776_vm2, %v2045_v34 }
 0x1df   :  { %v293_v6 = vmax.f32 %v229_v43, 0.0 }
 0x1e0   :  { %v649_v3 = vpop.f32.mrf.mxu0  ;;  %v8619_v14 = vpop.f32.mrf.mxu2 }
 0x1e1   :  { %11071 = vst [vmem:[#allocation25_spill] sm:$0xff] %v8619_v14  ;;  %v650_v1 = vadd.f32 %v8305_v31, %v649_v3  ;;  %v8622_v35 = vpop.f32.mrf.mxu3 }
 0x1e2   :  { %11072 = vst [vmem:[#allocation26_spill] sm:$0xff] %v8622_v35  ;;  %v8624_v38 = vpop.f32.mrf.mxu1  ;;  %v3095_v35 = vld [vmem:[#allocation2 + $0x250] sm:$0xff] }
 0x1e3   :  { %11073 = vst [vmem:[#allocation27_spill] sm:$0xff] %v8624_v38  ;;  %v755_v62 = vmax.f32 %v650_v1, 0.0  ;;  %6448 = vmatmul.msk.f32.gmra.mxu0 %vm306_vm1, %v292_v37  ;;  %v1659_v1 = vpop.permute.xlu2 %1658  ;;  %v9115_v38 = vld [vmem:[#allocation2 + $0xe2] sm:$0xff] }
 0x1e4   :  { %v1047_v36 = vld [vmem:[#allocation2 + $0x350] sm:$0xff]  ;;  %11186 = vst [vmem:[#allocation140_spill] sm:$0xff] %v9115_v38 }
 0x1e5   :  { %v2046_v34 = vld [vmem:[#allocation2 + $0x351] sm:$0xff]  ;;  %982 = vst.msk [vmem:[#allocation2 + $0x361] sm:$0xff] %vm776_vm2, %v755_v62  ;;  %6496 = vmatmul.msk.f32.gmra.mxu1 %vm776_vm2, %v1047_v36  ;;  %6579 = vmatmul.msk.f32.gmra.mxu2 %vm1662_vm4, %v1657_v11  ;;  %v230_v62 = vadd.f32 %v8183_v20, %v158_v24  ;;  %v159_v20 = vmul.f32 %v7135_v16, %v8379_v23 }
 0x1e6   :  { %6626 = vmatmul.msk.f32.gmra.mxu3 %vm776_vm2, %v2046_v34  ;;  %v160_v23 = vmul.f32 %v7135_v16, %v8338_v30 }
 0x1e7   :  { %v294_v54 = vmax.f32 %v230_v62, 0.0 }
 0x1e8   :  { %v652_v3 = vpop.f32.mrf.mxu0  ;;  %v8634_v14 = vpop.f32.mrf.mxu2 }
 0x1e9   :  { %11074 = vst [vmem:[#allocation28_spill] sm:$0xff] %v8634_v14  ;;  %v653_v63 = vadd.f32 %v8305_v31, %v652_v3  ;;  %v8637_v32 = vpop.f32.mrf.mxu3 }
 0x1ea   :  { %11075 = vst [vmem:[#allocation29_spill] sm:$0xff] %v8637_v32  ;;  %v8639_v37 = vpop.f32.mrf.mxu1  ;;  %v9097_v32 = vld [vmem:[#allocation2 + $0xd2] sm:$0xff] }
 0x1eb   :  { %11076 = vst [vmem:[#allocation30_spill] sm:$0xff] %v8639_v37  ;;  %v756_v36 = vmax.f32 %v653_v63, 0.0  ;;  %6449 = vmatmul.msk.f32.gmra.mxu0 %vm306_vm1, %v293_v6  ;;  %v3093_v37 = vld [vmem:[#allocation2 + $0x230] sm:$0xff] }
 0x1ec   :  { %v1048_v11 = vld [vmem:[#allocation2 + $0x360] sm:$0xff] }
 0x1ed   :  { %v2047_v43 = vld [vmem:[#allocation2 + $0x361] sm:$0xff]  ;;  %983 = vst.msk [vmem:[#allocation2 + $0x371] sm:$0xff] %vm776_vm2, %v756_v36  ;;  %6497 = vmatmul.msk.f32.gmra.mxu1 %vm776_vm2, %v1048_v11  ;;  %6580 = vmatmul.msk.f32.gmra.mxu2 %vm1662_vm4, %v1659_v1  ;;  %v1661_v36 = vpop.permute.xlu0 %1660  ;;  %v231_v1 = vadd.f32 %v8206_v22, %v159_v20 }
 0x1ee   :  { %6627 = vmatmul.msk.f32.gmra.mxu3 %vm776_vm2, %v2047_v43 }
 0x1f0   :  { %v655_v34 = vpop.f32.mrf.mxu0  ;;  %v8651_v24 = vpop.f32.mrf.mxu2 }
 0x1f1   :  { %11077 = vst [vmem:[#allocation31_spill] sm:$0xff] %v8651_v24  ;;  %v656_v6 = vadd.f32 %v8305_v31, %v655_v34  ;;  %v8654_v3 = vpop.f32.mrf.mxu3  ;;  %v295_v34 = vmax.f32 %v231_v1, 0.0 }
 0x1f2   :  { %11078 = vst [vmem:[#allocation32_spill] sm:$0xff] %v8654_v3  ;;  %v8656_v63 = vpop.f32.mrf.mxu1  ;;  %v3091_v3 = vld [vmem:[#allocation2 + $0x210] sm:$0xff] }
 0x1f3   :  { %11079 = vst [vmem:[#allocation33_spill] sm:$0xff] %v8656_v63  ;;  %v757_v11 = vmax.f32 %v656_v6, 0.0  ;;  %6450 = vmatmul.msk.f32.gmra.mxu0 %vm306_vm1, %v294_v54  ;;  %v232_v6 = vadd.f32 %v8229_v59, %v160_v23 }
 0x1f4   :  { %v1049_v62 = vld [vmem:[#allocation2 + $0x370] sm:$0xff] }
 0x1f5   :  { %v2048_v43 = vld [vmem:[#allocation2 + $0x371] sm:$0xff]  ;;  %984 = vst.msk [vmem:[#allocation2 + $0x381] sm:$0xff] %vm776_vm2, %v757_v11  ;;  %6498 = vmatmul.msk.f32.gmra.mxu1 %vm776_vm2, %v1049_v62  ;;  %6581 = vmatmul.msk.f32.gmra.mxu2 %vm1662_vm4, %v1661_v36  ;;  %v296_v30 = vmax.f32 %v232_v6, 0.0 }
 0x1f6   :  { %6628 = vmatmul.msk.f32.gmra.mxu3 %vm776_vm2, %v2048_v43  ;;  %v3065_v43 = vld [vmem:[#allocation2 + $0x10] sm:$0xff] }
 0x1f8   :  { %v658_v24 = vpop.f32.mrf.mxu0  ;;  %v8665_v14 = vpop.f32.mrf.mxu2 }
 0x1f9   :  { %11080 = vst [vmem:[#allocation34_spill] sm:$0xff] %v8665_v14  ;;  %v659_v22 = vadd.f32 %v8305_v31, %v658_v24  ;;  %v8668_v20 = vpop.f32.mrf.mxu3  ;;  %v1052_v14 = vld [vmem:[#allocation2 + $0x3c0] sm:$0xff] }
 0x1fa   :  { %11081 = vst [vmem:[#allocation35_spill] sm:$0xff] %v8668_v20  ;;  %v8670_v54 = vpop.f32.mrf.mxu1  ;;  %v9031_v20 = vld [vmem:[#allocation2 + $0x72] sm:$0xff] }
 0x1fb   :  { %11082 = vst [vmem:[#allocation36_spill] sm:$0xff] %v8670_v54  ;;  %v758_v11 = vmax.f32 %v659_v22, 0.0  ;;  %6451 = vmatmul.msk.f32.gmra.mxu0 %vm306_vm1, %v295_v34  ;;  %v3089_v54 = vld [vmem:[#allocation2 + $0x1f0] sm:$0xff] }
 0x1fc   :  { %v1050_v36 = vld [vmem:[#allocation2 + $0x380] sm:$0xff] }
 0x1fd   :  { %v2049_v62 = vld [vmem:[#allocation2 + $0x381] sm:$0xff]  ;;  %985 = vst.msk [vmem:[#allocation2 + $0x391] sm:$0xff] %vm776_vm2, %v758_v11  ;;  %6499 = vmatmul.msk.f32.gmra.mxu1 %vm776_vm2, %v1050_v36  ;;  %6713 = vmatmul.msk.f32.vlgmr.msrb.gmra.mxu2 %vm776_vm2, %v3065_v43 }
 0x1fe   :  { %6629 = vmatmul.msk.f32.gmra.mxu3 %vm776_vm2, %v2049_v62  ;;  %v3066_v36 = vld [vmem:[#allocation2 + $0x20] sm:$0xff] }
 0x200   :  { %v661_v16 = vpop.f32.mrf.mxu0  ;;  %v8678_v24 = vpop.f32.mrf.mxu2 }
 0x201   :  { %11083 = vst [vmem:[#allocation37_spill] sm:$0xff] %v8678_v24  ;;  %v662_v59 = vadd.f32 %v8305_v31, %v661_v16  ;;  %v8681_v1 = vpop.f32.mrf.mxu3  ;;  %v1004_v16 = vld [vmem:[#allocation2] sm:$0xff] }
 0x202   :  { %11084 = vst [vmem:[#allocation38_spill] sm:$0xff] %v8681_v1  ;;  %v8683_v23 = vpop.f32.mrf.mxu1  ;;  %v3088_v1 = vld [vmem:[#allocation2 + $0x1c0] sm:$0xff] }
 0x203   :  { %11085 = vst [vmem:[#allocation39_spill] sm:$0xff] %v8683_v23  ;;  %v759_v34 = vmax.f32 %v662_v59, 0.0  ;;  %6452 = vmatmul.msk.f32.gmra.mxu0 %vm306_vm1, %v296_v30  ;;  %v8995_v23 = vld [vmem:[#allocation2 + $0x52] sm:$0xff] }
 0x204   :  { %v1051_v22 = vld [vmem:[#allocation2 + $0x390] sm:$0xff] }
 0x205   :  { %v2050_v11 = vld [vmem:[#allocation2 + $0x391] sm:$0xff]  ;;  %986 = vst.msk [vmem:[#allocation2 + $0x3a1] sm:$0xff] %vm776_vm2, %v759_v34  ;;  %6500 = vmatmul.msk.f32.gmra.mxu1 %vm776_vm2, %v1051_v22  ;;  %6714 = vmatmul.msk.f32.gmra.mxu2 %vm776_vm2, %v3066_v36  ;;  %v2051_v34 = vld [vmem:[#allocation2 + $0x3c1] sm:$0xff] }
 0x206   :  { %6630 = vmatmul.msk.f32.gmra.mxu3 %vm776_vm2, %v2050_v11  ;;  %v3067_v22 = vld [vmem:[#allocation2 + $0x30] sm:$0xff]  ;;  %v7136_v11 = vld [vmem:[%s11027_s5 + $0x8] sm:$0xff] }
 0x208   :  { %v664_v6 = vpop.f32.mrf.mxu0  ;;  %v8690_v62 = vpop.f32.mrf.mxu2 }
 0x209   :  { %11086 = vst [vmem:[#allocation40_spill] sm:$0xff] %v8690_v62  ;;  %v665_v24 = vadd.f32 %v8305_v31, %v664_v6  ;;  %v8693_v59 = vpop.f32.mrf.mxu3 }
 0x20a   :  { %11087 = vst [vmem:[#allocation41_spill] sm:$0xff] %v8693_v59  ;;  %v8695_v30 = vpop.f32.mrf.mxu1 }
 0x20b   :  { %11088 = vst [vmem:[#allocation42_spill] sm:$0xff] %v8695_v30  ;;  %v760_v0 = vmax.f32 %v665_v24, 0.0  ;;  %6453 = vmatmul.msk.f32.vlgmr.msrb.gmra.mxu0 %vm776_vm2, %v1004_v16 }
 0x20c   :  { %2276 = vmatpush.msrb.mxu0 %v7136_v11 }
 0x20d   :  { %987 = vst.msk [vmem:[#allocation2 + $0x3d1] sm:$0xff] %vm776_vm2, %v760_v0  ;;  %6501 = vmatmul.msk.f32.gmra.mxu1 %vm776_vm2, %v1052_v14  ;;  %6715 = vmatmul.msk.f32.gmra.mxu2 %vm776_vm2, %v3067_v22 }
 0x20e   :  { %6631 = vmatmul.msk.f32.gmra.mxu3 %vm776_vm2, %v2051_v34 }
 0x210   :  { %v8705_v6 = vpop.f32.mrf.mxu2  ;;  %v667_v24 = vpop.f32.mrf.mxu0 }
 0x211   :  { %11089 = vst [vmem:[#allocation43_spill] sm:$0xff] %v8705_v6  ;;  %v668_v16 = vadd.f32 %v8305_v31, %v667_v24  ;;  %v8708_v62 = vpop.f32.mrf.mxu3 }
 0x212   :  { %11090 = vst [vmem:[#allocation44_spill] sm:$0xff] %v8708_v62  ;;  %v8710_v30 = vpop.f32.mrf.mxu1  ;;  %v3069_v62 = vld [vmem:[#allocation2 + $0x50] sm:$0xff] }
 0x213   :  { %11091 = vst [vmem:[#allocation45_spill] sm:$0xff] %v8710_v30  ;;  %v761_v59 = vmax.f32 %v668_v16, 0.0  ;;  %6454 = vmatmul.msk.f32.gmra.mxu0 %vm776_vm2, %v3065_v43 }
 0x214   :  { %v1053_v11 = vld [vmem:[#allocation2 + $0x3d0] sm:$0xff] }
 0x215   :  { %v2052_v0 = vld [vmem:[#allocation2 + $0x3d1] sm:$0xff]  ;;  %988 = vst.msk [vmem:[#allocation2 + $0x3e1] sm:$0xff] %vm776_vm2, %v761_v59  ;;  %6502 = vmatmul.msk.f32.gmra.mxu1 %vm776_vm2, %v1053_v11  ;;  %6716 = vmatmul.msk.f32.gmra.mxu2 %vm776_vm2, %v3068_v33 }
 0x216   :  { %6632 = vmatmul.msk.f32.gmra.mxu3 %vm776_vm2, %v2052_v0 }
 0x218   :  { %v670_v14 = vpop.f32.mrf.mxu0  ;;  %v8717_v34 = vpop.f32.mrf.mxu2 }
 0x219   :  { %11092 = vst [vmem:[#allocation46_spill] sm:$0xff] %v8717_v34  ;;  %v671_v24 = vadd.f32 %v8305_v31, %v670_v14  ;;  %v8720_v6 = vpop.f32.mrf.mxu3 }
 0x21a   :  { %11093 = vst [vmem:[#allocation47_spill] sm:$0xff] %v8720_v6  ;;  %v8722_v16 = vpop.f32.mrf.mxu1  ;;  %v3070_v6 = vld [vmem:[#allocation2 + $0x60] sm:$0xff] }
 0x21b   :  { %11094 = vst [vmem:[#allocation48_spill] sm:$0xff] %v8722_v16  ;;  %v762_v43 = vmax.f32 %v671_v24, 0.0  ;;  %6455 = vmatmul.msk.f32.gmra.mxu0 %vm776_vm2, %v3066_v36 }
 0x21c   :  { %v1054_v30 = vld [vmem:[#allocation2 + $0x3e0] sm:$0xff] }
 0x21d   :  { %v2053_v59 = vld [vmem:[#allocation2 + $0x3e1] sm:$0xff]  ;;  %989 = vst.msk [vmem:[#allocation2 + $0x3f1] sm:$0xff] %vm776_vm2, %v762_v43  ;;  %6503 = vmatmul.msk.f32.gmra.mxu1 %vm776_vm2, %v1054_v30  ;;  %6717 = vmatmul.msk.f32.gmra.mxu2 %vm776_vm2, %v3069_v62 }
 0x21e   :  { %6633 = vmatmul.msk.f32.gmra.mxu3 %vm776_vm2, %v2053_v59 }
 0x220   :  { %v8729_v11 = vpop.f32.mrf.mxu2  ;;  %v673_v0 = vpop.f32.mrf.mxu0 }
 0x221   :  { %11095 = vst [vmem:[#allocation49_spill] sm:$0xff] %v8729_v11  ;;  %v674_v14 = vadd.f32 %v8305_v31, %v673_v0  ;;  %v8732_v34 = vpop.f32.mrf.mxu3 }
 0x222   :  { %11096 = vst [vmem:[#allocation50_spill] sm:$0xff] %v8732_v34  ;;  %v8734_v24 = vpop.f32.mrf.mxu1  ;;  %v3071_v34 = vld [vmem:[#allocation2 + $0x70] sm:$0xff] }
 0x223   :  { %11097 = vst [vmem:[#allocation51_spill] sm:$0xff] %v8734_v24  ;;  %v763_v36 = vmax.f32 %v674_v14, 0.0  ;;  %6456 = vmatmul.msk.f32.gmra.mxu0 %vm776_vm2, %v3067_v22 }
 0x224   :  { %v1055_v16 = vld [vmem:[#allocation2 + $0x3f0] sm:$0xff] }
 0x225   :  { %v2054_v43 = vld [vmem:[#allocation2 + $0x3f1] sm:$0xff]  ;;  %990 = vst.msk [vmem:[#allocation2 + $0x401] sm:$0xff] %vm776_vm2, %v763_v36  ;;  %6504 = vmatmul.msk.f32.gmra.mxu1 %vm776_vm2, %v1055_v16  ;;  %6718 = vmatmul.msk.f32.gmra.mxu2 %vm776_vm2, %v3070_v6 }
 0x226   :  { %6634 = vmatmul.msk.f32.gmra.mxu3 %vm776_vm2, %v2054_v43 }
 0x228   :  { %v8741_v30 = vpop.f32.mrf.mxu2  ;;  %v676_v59 = vpop.f32.mrf.mxu0 }
 0x229   :  { %11098 = vst [vmem:[#allocation52_spill] sm:$0xff] %v8741_v30  ;;  %v677_v0 = vadd.f32 %v8305_v31, %v676_v59  ;;  %v8744_v11 = vpop.f32.mrf.mxu3 }
 0x22a   :  { %11099 = vst [vmem:[#allocation53_spill] sm:$0xff] %v8744_v11  ;;  %v8746_v14 = vpop.f32.mrf.mxu1  ;;  %v3072_v11 = vld [vmem:[#allocation2 + $0x80] sm:$0xff] }
 0x22b   :  { %11100 = vst [vmem:[#allocation54_spill] sm:$0xff] %v8746_v14  ;;  %v764_v22 = vmax.f32 %v677_v0, 0.0  ;;  %6457 = vmatmul.msk.f32.gmra.mxu0 %vm776_vm2, %v3068_v33 }
 0x22c   :  { %v1056_v24 = vld [vmem:[#allocation2 + $0x400] sm:$0xff] }
 0x22d   :  { %v2055_v36 = vld [vmem:[#allocation2 + $0x401] sm:$0xff]  ;;  %991 = vst.msk [vmem:[#allocation2 + $0x411] sm:$0xff] %vm776_vm2, %v764_v22  ;;  %6505 = vmatmul.msk.f32.gmra.mxu1 %vm776_vm2, %v1056_v24  ;;  %6719 = vmatmul.msk.f32.gmra.mxu2 %vm776_vm2, %v3071_v34 }
 0x22e   :  { %6635 = vmatmul.msk.f32.gmra.mxu3 %vm776_vm2, %v2055_v36 }
 0x230   :  { %v8753_v16 = vpop.f32.mrf.mxu2  ;;  %v679_v43 = vpop.f32.mrf.mxu0 }
 0x231   :  { %11101 = vst [vmem:[#allocation55_spill] sm:$0xff] %v8753_v16  ;;  %v680_v59 = vadd.f32 %v8305_v31, %v679_v43  ;;  %v8756_v30 = vpop.f32.mrf.mxu3 }
 0x232   :  { %11102 = vst [vmem:[#allocation56_spill] sm:$0xff] %v8756_v30  ;;  %v8758_v0 = vpop.f32.mrf.mxu1  ;;  %v3073_v30 = vld [vmem:[#allocation2 + $0xb0] sm:$0xff] }
 0x233   :  { %11103 = vst [vmem:[#allocation57_spill] sm:$0xff] %v8758_v0  ;;  %v765_v33 = vmax.f32 %v680_v59, 0.0  ;;  %6458 = vmatmul.msk.f32.gmra.mxu0 %vm776_vm2, %v3069_v62 }
 0x234   :  { %v1057_v14 = vld [vmem:[#allocation2 + $0x410] sm:$0xff] }
 0x235   :  { %v2056_v22 = vld [vmem:[#allocation2 + $0x411] sm:$0xff]  ;;  %992 = vst.msk [vmem:[#allocation2 + $0x421] sm:$0xff] %vm776_vm2, %v765_v33  ;;  %6506 = vmatmul.msk.f32.gmra.mxu1 %vm776_vm2, %v1057_v14  ;;  %6720 = vmatmul.msk.f32.gmra.mxu2 %vm776_vm2, %v3072_v11 }
 0x236   :  { %6636 = vmatmul.msk.f32.gmra.mxu3 %vm776_vm2, %v2056_v22 }
 0x238   :  { %v8765_v24 = vpop.f32.mrf.mxu2  ;;  %v682_v36 = vpop.f32.mrf.mxu0 }
 0x239   :  { %11104 = vst [vmem:[#allocation58_spill] sm:$0xff] %v8765_v24  ;;  %v683_v43 = vadd.f32 %v8305_v31, %v682_v36  ;;  %v8768_v16 = vpop.f32.mrf.mxu3 }
 0x23a   :  { %11105 = vst [vmem:[#allocation59_spill] sm:$0xff] %v8768_v16  ;;  %v8770_v59 = vpop.f32.mrf.mxu1  ;;  %v3076_v16 = vld [vmem:[#allocation2 + $0xe0] sm:$0xff] }
 0x23b   :  { %11106 = vst [vmem:[#allocation60_spill] sm:$0xff] %v8770_v59  ;;  %v766_v62 = vmax.f32 %v683_v43, 0.0  ;;  %6459 = vmatmul.msk.f32.gmra.mxu0 %vm776_vm2, %v3070_v6  ;;  %v3074_v59 = vld [vmem:[#allocation2 + $0xc0] sm:$0xff] }
 0x23c   :  { %v1058_v0 = vld [vmem:[#allocation2 + $0x420] sm:$0xff] }
 0x23d   :  { %v2057_v33 = vld [vmem:[#allocation2 + $0x421] sm:$0xff]  ;;  %993 = vst.msk [vmem:[#allocation2 + $0x431] sm:$0xff] %vm776_vm2, %v766_v62  ;;  %6507 = vmatmul.msk.f32.gmra.mxu1 %vm776_vm2, %v1058_v0  ;;  %6721 = vmatmul.msk.f32.gmra.mxu2 %vm776_vm2, %v3073_v30 }
 0x23e   :  { %6637 = vmatmul.msk.f32.gmra.mxu3 %vm776_vm2, %v2057_v33 }
 0x240   :  { %v8777_v11 = vpop.f32.mrf.mxu2  ;;  %v685_v14 = vpop.f32.mrf.mxu0 }
 0x241   :  { %11107 = vst [vmem:[#allocation61_spill] sm:$0xff] %v8777_v11  ;;  %v686_v22 = vadd.f32 %v8305_v31, %v685_v14  ;;  %v8780_v36 = vpop.f32.mrf.mxu3  ;;  %v1012_v14 = vld [vmem:[#allocation2 + $0xa0] sm:$0xff] }
 0x242   :  { %11108 = vst [vmem:[#allocation62_spill] sm:$0xff] %v8780_v36  ;;  %v8782_v43 = vpop.f32.mrf.mxu1 }
 0x243   :  { %11109 = vst [vmem:[#allocation63_spill] sm:$0xff] %v8782_v43  ;;  %v767_v6 = vmax.f32 %v686_v22, 0.0  ;;  %6460 = vmatmul.msk.f32.gmra.mxu0 %vm776_vm2, %v3071_v34  ;;  %v1060_v43 = vld [vmem:[#allocation2 + $0x460] sm:$0xff] }
 0x244   :  { %v1059_v24 = vld [vmem:[#allocation2 + $0x430] sm:$0xff] }
 0x245   :  { %v2058_v62 = vld [vmem:[#allocation2 + $0x431] sm:$0xff]  ;;  %994 = vst.msk [vmem:[#allocation2 + $0x441] sm:$0xff] %vm776_vm2, %v767_v6  ;;  %6508 = vmatmul.msk.f32.gmra.mxu1 %vm776_vm2, %v1059_v24  ;;  %6722 = vmatmul.msk.f32.gmra.mxu2 %vm776_vm2, %v3074_v59  ;;  %v2059_v6 = vld [vmem:[#allocation2 + $0x461] sm:$0xff] }
 0x246   :  { %6638 = vmatmul.msk.f32.gmra.mxu3 %vm776_vm2, %v2058_v62  ;;  %v3075_v24 = vld [vmem:[#allocation2 + $0xd0] sm:$0xff] }
 0x248   :  { %v8789_v0 = vpop.f32.mrf.mxu2  ;;  %v688_v33 = vpop.f32.mrf.mxu0 }
 0x249   :  { %11110 = vst [vmem:[#allocation64_spill] sm:$0xff] %v8789_v0  ;;  %v689_v11 = vadd.f32 %v8305_v31, %v688_v33  ;;  %v8792_v22 = vpop.f32.mrf.mxu3 }
 0x24a   :  { %11111 = vst [vmem:[#allocation65_spill] sm:$0xff] %v8792_v22  ;;  %v8794_v34 = vpop.f32.mrf.mxu1 }
 0x24b   :  { %11112 = vst [vmem:[#allocation66_spill] sm:$0xff] %v8794_v34  ;;  %v768_v36 = vmax.f32 %v689_v11, 0.0  ;;  %6461 = vmatmul.msk.f32.gmra.mxu0 %vm776_vm2, %v1012_v14 }
 0x24d   :  { %995 = vst.msk [vmem:[#allocation2 + $0x471] sm:$0xff] %vm776_vm2, %v768_v36  ;;  %6509 = vmatmul.msk.f32.gmra.mxu1 %vm776_vm2, %v1060_v43  ;;  %6723 = vmatmul.msk.f32.gmra.mxu2 %vm776_vm2, %v3075_v24 }
 0x24e   :  { %6639 = vmatmul.msk.f32.gmra.mxu3 %vm776_vm2, %v2059_v6 }
 0x250   :  { %v8801_v62 = vpop.f32.mrf.mxu2  ;;  %v691_v33 = vpop.f32.mrf.mxu0 }
 0x251   :  { %11113 = vst [vmem:[#allocation67_spill] sm:$0xff] %v8801_v62  ;;  %v692_v0 = vadd.f32 %v8305_v31, %v691_v33  ;;  %v8804_v34 = vpop.f32.mrf.mxu3 }
 0x252   :  { %11114 = vst [vmem:[#allocation68_spill] sm:$0xff] %v8804_v34  ;;  %v8806_v11 = vpop.f32.mrf.mxu1  ;;  %v3078_v34 = vld [vmem:[#allocation2 + $0x100] sm:$0xff] }
 0x253   :  { %11115 = vst [vmem:[#allocation69_spill] sm:$0xff] %v8806_v11  ;;  %v769_v14 = vmax.f32 %v692_v0, 0.0  ;;  %6462 = vmatmul.msk.f32.gmra.mxu0 %vm776_vm2, %v3073_v30  ;;  %v8818_v0 = vld [vmem:[%s11025_s4] ss:$0 sm:$0xff] }
 0x254   :  { %v1061_v22 = vld [vmem:[#allocation2 + $0x470] sm:$0xff] }
 0x255   :  { %v2060_v36 = vld [vmem:[#allocation2 + $0x471] sm:$0xff]  ;;  %996 = vst.msk [vmem:[#allocation2 + $0x481] sm:$0xff] %vm776_vm2, %v769_v14  ;;  %6510 = vmatmul.msk.f32.gmra.mxu1 %vm776_vm2, %v1061_v22  ;;  %6724 = vmatmul.msk.f32.gmra.mxu2 %vm776_vm2, %v3076_v16 }
 0x256   :  { %6640 = vmatmul.msk.f32.gmra.mxu3 %vm776_vm2, %v2060_v36  ;;  %v3077_v36 = vld [vmem:[#allocation2 + $0xf0] sm:$0xff] }
 0x258   :  { %v8813_v43 = vpop.f32.mrf.mxu2  ;;  %v694_v31 = vpop.f32.mrf.mxu0 }
 0x259   :  { %11116 = vst [vmem:[#allocation70_spill] sm:$0xff] %v8813_v43  ;;  %v695_v30 = vadd.f32 %v8818_v0, %v694_v31  ;;  %v8821_v6 = vpop.f32.mrf.mxu3 }
 0x25a   :  { %11117 = vst [vmem:[#allocation71_spill] sm:$0xff] %v8821_v6  ;;  %v8823_v33 = vpop.f32.mrf.mxu1 }
 0x25b   :  { %11118 = vst [vmem:[#allocation72_spill] sm:$0xff] %v8823_v33  ;;  %v770_v14 = vmax.f32 %v695_v30, 0.0  ;;  %6463 = vmatmul.msk.f32.gmra.mxu0 %vm776_vm2, %v3074_v59 }
 0x25c   :  { %v1062_v22 = vld [vmem:[#allocation2 + $0x480] sm:$0xff] }
 0x25d   :  { %v2061_v62 = vld [vmem:[#allocation2 + $0x481] sm:$0xff]  ;;  %997 = vst.msk [vmem:[#allocation2 + $0x491] sm:$0xff] %vm776_vm2, %v770_v14  ;;  %6511 = vmatmul.msk.f32.gmra.mxu1 %vm776_vm2, %v1062_v22  ;;  %6725 = vmatmul.msk.f32.gmra.mxu2 %vm776_vm2, %v3077_v36 }
 0x25e   :  { %6641 = vmatmul.msk.f32.gmra.mxu3 %vm776_vm2, %v2061_v62 }
 0x260   :  { %v8830_v43 = vpop.f32.mrf.mxu2  ;;  %v697_v31 = vpop.f32.mrf.mxu0 }
 0x261   :  { %11119 = vst [vmem:[#allocation73_spill] sm:$0xff] %v8830_v43  ;;  %v698_v6 = vadd.f32 %v8818_v0, %v697_v31  ;;  %v8833_v33 = vpop.f32.mrf.mxu3 }
 0x262   :  { %11120 = vst [vmem:[#allocation74_spill] sm:$0xff] %v8833_v33  ;;  %v8835_v30 = vpop.f32.mrf.mxu1  ;;  %v3079_v33 = vld [vmem:[#allocation2 + $0x110] sm:$0xff] }
 0x263   :  { %11121 = vst [vmem:[#allocation75_spill] sm:$0xff] %v8835_v30  ;;  %v771_v59 = vmax.f32 %v698_v6, 0.0  ;;  %6464 = vmatmul.msk.f32.gmra.mxu0 %vm776_vm2, %v3075_v24 }
 0x264   :  { %v1063_v11 = vld [vmem:[#allocation2 + $0x490] sm:$0xff] }
 0x265   :  { %v2062_v14 = vld [vmem:[#allocation2 + $0x491] sm:$0xff]  ;;  %998 = vst.msk [vmem:[#allocation2 + $0x4a1] sm:$0xff] %vm776_vm2, %v771_v59  ;;  %6512 = vmatmul.msk.f32.gmra.mxu1 %vm776_vm2, %v1063_v11  ;;  %6726 = vmatmul.msk.f32.gmra.mxu2 %vm776_vm2, %v3078_v34 }
 0x266   :  { %6642 = vmatmul.msk.f32.gmra.mxu3 %vm776_vm2, %v2062_v14  ;;  %v6972_v11 = vld [vmem:[%s11027_s5 + $0x38] sm:$0xff]  ;;  %v6907_v14 = vld [vmem:[%s11027_s5 + $0x30] sm:$0xff] }
 0x267   :  { %5463 = vmatpush.msra.mxu2 %v6972_v11  ;;  %4932 = vmatpush.msra.mxu1 %v6907_v14 }
 0x268   :  { %v8842_v62 = vpop.f32.mrf.mxu2  ;;  %v700_v22 = vpop.f32.mrf.mxu0 }
 0x269   :  { %11122 = vst [vmem:[#allocation76_spill] sm:$0xff] %v8842_v62  ;;  %v701_v31 = vadd.f32 %v8818_v0, %v700_v22  ;;  %v8845_v43 = vpop.f32.mrf.mxu3 }
 0x26a   :  { %11123 = vst [vmem:[#allocation77_spill] sm:$0xff] %v8845_v43  ;;  %v8847_v6 = vpop.f32.mrf.mxu1  ;;  %v3087_v43 = vld [vmem:[#allocation2 + $0x1b0] sm:$0xff] }
 0x26b   :  { %11124 = vst [vmem:[#allocation78_spill] sm:$0xff] %v8847_v6  ;;  %v772_v24 = vmax.f32 %v701_v31, 0.0  ;;  %6465 = vmatmul.msk.f32.gmra.mxu0 %vm776_vm2, %v3076_v16  ;;  %v7037_v16 = vld [vmem:[%s11027_s5 + $0x40] sm:$0xff] }
 0x26c   :  { %v1064_v59 = vld [vmem:[#allocation2 + $0x4a0] sm:$0xff]  ;;  %5994 = vmatpush.msra.mxu3 %v7037_v16 }
 0x26d   :  { %v2063_v30 = vld [vmem:[#allocation2 + $0x4a1] sm:$0xff]  ;;  %999 = vst.msk [vmem:[#allocation2 + $0x4b1] sm:$0xff] %vm776_vm2, %v772_v24  ;;  %6513 = vmatmul.msk.f32.gmra.mxu1 %vm776_vm2, %v1064_v59  ;;  %6727 = vmatmul.msk.f32.gmra.mxu2 %vm776_vm2, %v3079_v33 }
 0x26e   :  { %6643 = vmatmul.msk.f32.gmra.mxu3 %vm776_vm2, %v2063_v30  ;;  %v3080_v6 = vld [vmem:[#allocation2 + $0x120] sm:$0xff] }
 0x270   :  { %v8863_v22 = vpop.f32.mrf.mxu2  ;;  %v703_v31 = vpop.f32.mrf.mxu0 }
 0x271   :  { %11125 = vst [vmem:[#allocation79_spill] sm:$0xff] %v8863_v22  ;;  %v704_v24 = vadd.f32 %v8818_v0, %v703_v31  ;;  %v8866_v11 = vpop.f32.mrf.mxu3 }
 0x272   :  { %11126 = vst [vmem:[#allocation80_spill] sm:$0xff] %v8866_v11  ;;  %v8868_v33 = vpop.f32.mrf.mxu1  ;;  %v3081_v11 = vld [vmem:[#allocation2 + $0x150] sm:$0xff] }
 0x273   :  { %11127 = vst [vmem:[#allocation81_spill] sm:$0xff] %v8868_v33  ;;  %v773_v30 = vmax.f32 %v704_v24, 0.0  ;;  %6466 = vmatmul.msk.f32.gmra.mxu0 %vm776_vm2, %v3077_v36 }
 0x274   :  { %v1065_v59 = vld [vmem:[#allocation2 + $0x4b0] sm:$0xff] }
 0x275   :  { %v2064_v62 = vld [vmem:[#allocation2 + $0x4b1] sm:$0xff]  ;;  %1000 = vst.msk [vmem:[#allocation2 + $0x4c1] sm:$0xff] %vm776_vm2, %v773_v30  ;;  %6514 = vmatmul.msk.f32.gmra.mxu1 %vm776_vm2, %v1065_v59  ;;  %6728 = vmatmul.msk.f32.gmra.mxu2 %vm776_vm2, %v3080_v6 }
 0x276   :  { %6644 = vmatmul.msk.f32.gmra.mxu3 %vm776_vm2, %v2064_v62  ;;  %v1535_v62 = vpop.permute.xlu1 %1534 }
 0x278   :  { %v8875_v16 = vpop.f32.mrf.mxu2  ;;  %v706_v14 = vpop.f32.mrf.mxu0 }
 0x279   :  { %11128 = vst [vmem:[#allocation82_spill] sm:$0xff] %v8875_v16  ;;  %v707_v31 = vadd.f32 %v8818_v0, %v706_v14  ;;  %v8878_v22 = vpop.f32.mrf.mxu3 }
 0x27a   :  { %11129 = vst [vmem:[#allocation83_spill] sm:$0xff] %v8878_v22  ;;  %v8880_v24 = vpop.f32.mrf.mxu1  ;;  %v8977_v22 = vld [vmem:[#allocation2 + $0x42] sm:$0xff] }
 0x27b   :  { %11130 = vst [vmem:[#allocation84_spill] sm:$0xff] %v8880_v24  ;;  %v774_v36 = vmax.f32 %v707_v31, 0.0  ;;  %6467 = vmatmul.msk.f32.gmra.mxu0 %vm776_vm2, %v3078_v34 }
 0x27c   :  { %v1066_v33 = vld [vmem:[#allocation2 + $0x4c0] sm:$0xff] }
 0x27d   :  { %v2065_v30 = vld [vmem:[#allocation2 + $0x4c1] sm:$0xff]  ;;  %1001 = vst.msk [vmem:[#allocation2 + $0x4d1] sm:$0xff] %vm776_vm2, %v774_v36  ;;  %6515 = vmatmul.msk.f32.gmra.mxu1 %vm776_vm2, %v1066_v33  ;;  %6729 = vmatmul.msk.f32.gmra.mxu2 %vm776_vm2, %v3081_v11  ;;  %v1537_v11 = vpop.permute.xlu2 %1536 }
 0x27e   :  { %6645 = vmatmul.msk.f32.gmra.mxu3 %vm776_vm2, %v2065_v30  ;;  %v3082_v33 = vld [vmem:[#allocation2 + $0x160] sm:$0xff] }
 0x280   :  { %v709_v6 = vpop.f32.mrf.mxu0  ;;  %v8887_v59 = vpop.f32.mrf.mxu2 }
 0x281   :  { %11131 = vst [vmem:[#allocation85_spill] sm:$0xff] %v8887_v59  ;;  %v710_v14 = vadd.f32 %v8818_v0, %v709_v6  ;;  %v8890_v31 = vpop.f32.mrf.mxu3  ;;  %v3083_v59 = vld [vmem:[#allocation2 + $0x170] sm:$0xff] }
 0x282   :  { %11132 = vst [vmem:[#allocation86_spill] sm:$0xff] %v8890_v31  ;;  %v8892_v34 = vpop.f32.mrf.mxu1  ;;  %v3086_v31 = vld [vmem:[#allocation2 + $0x1a0] sm:$0xff] }
 0x283   :  { %11133 = vst [vmem:[#allocation87_spill] sm:$0xff] %v8892_v34  ;;  %v775_v16 = vmax.f32 %v710_v14, 0.0  ;;  %6518 = vmatmul.msk.f32.vlgmr.msra.gmra.mxu0 %vm1662_vm4, %v1535_v62  ;;  %v2534_v62 = vld [vmem:[#allocation2 + $0x2] sm:$0xff]  ;;  %v8959_v34 = vld [vmem:[#allocation2 + $0x32] sm:$0xff] }
 0x284   :  { %v1067_v36 = vld [vmem:[#allocation2 + $0x4d0] sm:$0xff] }
 0x285   :  { %v2066_v24 = vld [vmem:[#allocation2 + $0x4d1] sm:$0xff]  ;;  %1002 = vst.msk [vmem:[#allocation2 + $0x4e1] sm:$0xff] %vm776_vm2, %v775_v16  ;;  %6516 = vmatmul.msk.f32.gmra.mxu1 %vm776_vm2, %v1067_v36  ;;  %6730 = vmatmul.msk.f32.gmra.mxu2 %vm776_vm2, %v3082_v33 }
 0x286   :  { %6646 = vmatmul.msk.f32.gmra.mxu3 %vm776_vm2, %v2066_v24  ;;  %v8910_v16 = vld [vmem:[#allocation2 + $0x11] sm:$0xff]  ;;  %v1539_v24 = vpop.permute.xlu0 %1538 }
 0x288   :  { %v8899_v0 = vpop.f32.mrf.mxu0  ;;  %v8901_v30 = vpop.f32.mrf.mxu2 }
 0x289   :  { %11134 = vst [vmem:[#allocation88_spill] sm:$0xff] %v8899_v0  ;;  %v8903_v6 = vpop.f32.mrf.mxu3 }
 0x28a   :  { %11135 = vst [vmem:[#allocation89_spill] sm:$0xff] %v8901_v30  ;;  %v8905_v14 = vpop.f32.mrf.mxu1 }
 0x28b   :  { %11136 = vst [vmem:[#allocation90_spill] sm:$0xff] %v8903_v6  ;;  %6519 = vmatmul.msk.f32.gmra.mxu0 %vm1662_vm4, %v1537_v11  ;;  %v8923_v11 = vld [vmem:[#allocation2 + $0x12] sm:$0xff] }
 0x28c   :  { %11137 = vst [vmem:[#allocation91_spill] sm:$0xff] %v8905_v14  ;;  %v8941_v14 = vld [vmem:[#allocation2 + $0x22] sm:$0xff]  ;;  %v3085_v6 = vld [vmem:[#allocation2 + $0x190] sm:$0xff] }
 0x28d   :  { %6648 = vmatmul.msk.f32.vlgmr.msrb.gmra.mxu1 %vm776_vm2, %v2534_v62  ;;  %6731 = vmatmul.msk.f32.gmra.mxu2 %vm776_vm2, %v3083_v59  ;;  %v3084_v62 = vld [vmem:[#allocation2 + $0x180] sm:$0xff] }
 0x28e   :  { %6778 = vmatmul.msk.f32.vlgmr.msrb.gmra.mxu3 %vm776_vm2, %v8910_v16  ;;  %v8928_v59 = vld [vmem:[#allocation2 + $0x21] sm:$0xff] }
 0x290   :  { %v8914_v36 = vpop.f32.mrf.mxu0  ;;  %v8916_v33 = vpop.f32.mrf.mxu2 }
 0x291   :  { %11138 = vst [vmem:[#allocation92_spill] sm:$0xff] %v8914_v36  ;;  %v8918_v30 = vpop.f32.mrf.mxu3 }
 0x292   :  { %11139 = vst [vmem:[#allocation93_spill] sm:$0xff] %v8916_v33  ;;  %v8920_v0 = vpop.f32.mrf.mxu1  ;;  %v1541_v33 = vpop.permute.xlu1 %1540 }
 0x293   :  { %11140 = vst [vmem:[#allocation94_spill] sm:$0xff] %v8918_v30  ;;  %6520 = vmatmul.msk.f32.gmra.mxu0 %vm1662_vm4, %v1539_v24 }
 0x294   :  { %11141 = vst [vmem:[#allocation95_spill] sm:$0xff] %v8920_v0 }
 0x295   :  { %6649 = vmatmul.msk.f32.gmra.mxu1 %vm776_vm2, %v8923_v11  ;;  %6732 = vmatmul.msk.f32.gmra.mxu2 %vm776_vm2, %v3084_v62  ;;  %v8946_v62 = vld [vmem:[#allocation2 + $0x31] sm:$0xff] }
 0x296   :  { %6779 = vmatmul.msk.f32.gmra.mxu3 %vm776_vm2, %v8928_v59 }
 0x298   :  { %v8932_v36 = vpop.f32.mrf.mxu0  ;;  %v8934_v30 = vpop.f32.mrf.mxu2 }
 0x299   :  { %11142 = vst [vmem:[#allocation96_spill] sm:$0xff] %v8932_v36  ;;  %v8936_v0 = vpop.f32.mrf.mxu3 }
 0x29a   :  { %11143 = vst [vmem:[#allocation97_spill] sm:$0xff] %v8934_v30  ;;  %v8938_v24 = vpop.f32.mrf.mxu1  ;;  %v1543_v30 = vpop.permute.xlu2 %1542 }
 0x29b   :  { %11144 = vst [vmem:[#allocation98_spill] sm:$0xff] %v8936_v0  ;;  %6521 = vmatmul.msk.f32.gmra.mxu0 %vm1662_vm4, %v1541_v33 }
 0x29c   :  { %11145 = vst [vmem:[#allocation99_spill] sm:$0xff] %v8938_v24 }
 0x29d   :  { %6650 = vmatmul.msk.f32.gmra.mxu1 %vm776_vm2, %v8941_v14  ;;  %6733 = vmatmul.msk.f32.gmra.mxu2 %vm776_vm2, %v3085_v6  ;;  %v8964_v6 = vld [vmem:[#allocation2 + $0x41] sm:$0xff] }
 0x29e   :  { %6780 = vmatmul.msk.f32.gmra.mxu3 %vm776_vm2, %v8946_v62 }
 0x2a0   :  { %v8950_v36 = vpop.f32.mrf.mxu0  ;;  %v8952_v0 = vpop.f32.mrf.mxu2 }
 0x2a1   :  { %11146 = vst [vmem:[#allocation100_spill] sm:$0xff] %v8950_v36  ;;  %v8954_v24 = vpop.f32.mrf.mxu3 }
 0x2a2   :  { %11147 = vst [vmem:[#allocation101_spill] sm:$0xff] %v8952_v0  ;;  %v8956_v33 = vpop.f32.mrf.mxu1  ;;  %v1545_v0 = vpop.permute.xlu0 %1544 }
 0x2a3   :  { %11148 = vst [vmem:[#allocation102_spill] sm:$0xff] %v8954_v24  ;;  %6522 = vmatmul.msk.f32.gmra.mxu0 %vm1662_vm4, %v1543_v30 }
 0x2a4   :  { %11149 = vst [vmem:[#allocation103_spill] sm:$0xff] %v8956_v33 }
 0x2a5   :  { %6651 = vmatmul.msk.f32.gmra.mxu1 %vm776_vm2, %v8959_v34  ;;  %6734 = vmatmul.msk.f32.gmra.mxu2 %vm776_vm2, %v3086_v31  ;;  %v8982_v31 = vld [vmem:[#allocation2 + $0x51] sm:$0xff] }
 0x2a6   :  { %6781 = vmatmul.msk.f32.gmra.mxu3 %vm776_vm2, %v8964_v6 }
 0x2a8   :  { %v8968_v36 = vpop.f32.mrf.mxu0  ;;  %v8970_v24 = vpop.f32.mrf.mxu2 }
 0x2a9   :  { %11150 = vst [vmem:[#allocation104_spill] sm:$0xff] %v8968_v36  ;;  %v8972_v33 = vpop.f32.mrf.mxu3 }
 0x2aa   :  { %11151 = vst [vmem:[#allocation105_spill] sm:$0xff] %v8970_v24  ;;  %v8974_v30 = vpop.f32.mrf.mxu1  ;;  %v1547_v24 = vpop.permute.xlu1 %1546 }
 0x2ab   :  { %11152 = vst [vmem:[#allocation106_spill] sm:$0xff] %v8972_v33  ;;  %6523 = vmatmul.msk.f32.gmra.mxu0 %vm1662_vm4, %v1545_v0 }
 0x2ac   :  { %11153 = vst [vmem:[#allocation107_spill] sm:$0xff] %v8974_v30 }
 0x2ad   :  { %6652 = vmatmul.msk.f32.gmra.mxu1 %vm776_vm2, %v8977_v22  ;;  %6735 = vmatmul.msk.f32.gmra.mxu2 %vm776_vm2, %v3087_v43  ;;  %v9000_v43 = vld [vmem:[#allocation2 + $0x61] sm:$0xff] }
 0x2ae   :  { %6782 = vmatmul.msk.f32.gmra.mxu3 %vm776_vm2, %v8982_v31 }
 0x2b0   :  { %v8986_v36 = vpop.f32.mrf.mxu0  ;;  %v8988_v33 = vpop.f32.mrf.mxu2 }
 0x2b1   :  { %11154 = vst [vmem:[#allocation108_spill] sm:$0xff] %v8986_v36  ;;  %v8990_v30 = vpop.f32.mrf.mxu3 }
 0x2b2   :  { %11155 = vst [vmem:[#allocation109_spill] sm:$0xff] %v8988_v33  ;;  %v8992_v0 = vpop.f32.mrf.mxu1  ;;  %v1549_v33 = vpop.permute.xlu2 %1548 }
 0x2b3   :  { %11156 = vst [vmem:[#allocation110_spill] sm:$0xff] %v8990_v30  ;;  %6524 = vmatmul.msk.f32.gmra.mxu0 %vm1662_vm4, %v1547_v24 }
 0x2b4   :  { %11157 = vst [vmem:[#allocation111_spill] sm:$0xff] %v8992_v0 }
 0x2b5   :  { %6653 = vmatmul.msk.f32.gmra.mxu1 %vm776_vm2, %v8995_v23  ;;  %6736 = vmatmul.msk.f32.gmra.mxu2 %vm776_vm2, %v3088_v1  ;;  %v9018_v1 = vld [vmem:[#allocation2 + $0x71] sm:$0xff] }
 0x2b6   :  { %6783 = vmatmul.msk.f32.gmra.mxu3 %vm776_vm2, %v9000_v43 }
 0x2b8   :  { %v9004_v36 = vpop.f32.mrf.mxu0  ;;  %v9006_v30 = vpop.f32.mrf.mxu2 }
 0x2b9   :  { %11158 = vst [vmem:[#allocation112_spill] sm:$0xff] %v9004_v36  ;;  %v9008_v0 = vpop.f32.mrf.mxu3 }
 0x2ba   :  { %11159 = vst [vmem:[#allocation113_spill] sm:$0xff] %v9006_v30  ;;  %v9010_v24 = vpop.f32.mrf.mxu1  ;;  %v1551_v30 = vpop.permute.xlu0 %1550 }
 0x2bb   :  { %11160 = vst [vmem:[#allocation114_spill] sm:$0xff] %v9008_v0  ;;  %6525 = vmatmul.msk.f32.gmra.mxu0 %vm1662_vm4, %v1549_v33 }
 0x2bc   :  { %11161 = vst [vmem:[#allocation115_spill] sm:$0xff] %v9010_v24 }
 0x2bd   :  { %6654 = vmatmul.msk.f32.gmra.mxu1 %vm776_vm2, %v9013_v53  ;;  %6737 = vmatmul.msk.f32.gmra.mxu2 %vm776_vm2, %v3089_v54  ;;  %v3603_v54 = vld [vmem:[#allocation2 + $0x81] sm:$0xff] }
 0x2be   :  { %6784 = vmatmul.msk.f32.gmra.mxu3 %vm776_vm2, %v9018_v1 }
 0x2c0   :  { %v9022_v36 = vpop.f32.mrf.mxu0  ;;  %v9024_v0 = vpop.f32.mrf.mxu2 }
 0x2c1   :  { %11162 = vst [vmem:[#allocation116_spill] sm:$0xff] %v9022_v36  ;;  %v9026_v24 = vpop.f32.mrf.mxu3  ;;  %v1553_v36 = vpop.permute.xlu1 %1552 }
 0x2c2   :  { %11163 = vst [vmem:[#allocation117_spill] sm:$0xff] %v9024_v0  ;;  %v9028_v33 = vpop.f32.mrf.mxu1 }
 0x2c3   :  { %11164 = vst [vmem:[#allocation118_spill] sm:$0xff] %v9026_v24  ;;  %6526 = vmatmul.msk.f32.gmra.mxu0 %vm1662_vm4, %v1551_v30  ;;  %v2542_v30 = vld [vmem:[#allocation2 + $0xa2] sm:$0xff] }
 0x2c4   :  { %11165 = vst [vmem:[#allocation119_spill] sm:$0xff] %v9028_v33 }
 0x2c5   :  { %6655 = vmatmul.msk.f32.gmra.mxu1 %vm776_vm2, %v9031_v20  ;;  %6738 = vmatmul.msk.f32.gmra.mxu2 %vm776_vm2, %v3090_v50  ;;  %v9048_v50 = vld [vmem:[#allocation2 + $0xb1] sm:$0xff] }
 0x2c6   :  { %6785 = vmatmul.msk.f32.gmra.mxu3 %vm776_vm2, %v3603_v54  ;;  %v1555_v54 = vpop.permute.xlu2 %1554 }
 0x2c8   :  { %v9037_v63 = vpop.f32.mrf.mxu0  ;;  %v9039_v0 = vpop.f32.mrf.mxu2 }
 0x2c9   :  { %11166 = vst [vmem:[#allocation120_spill] sm:$0xff] %v9037_v63  ;;  %v9041_v24 = vpop.f32.mrf.mxu3 }
 0x2ca   :  { %11167 = vst [vmem:[#allocation121_spill] sm:$0xff] %v9039_v0  ;;  %v9043_v33 = vpop.f32.mrf.mxu1 }
 0x2cb   :  { %11168 = vst [vmem:[#allocation122_spill] sm:$0xff] %v9041_v24  ;;  %6527 = vmatmul.msk.f32.gmra.mxu0 %vm1662_vm4, %v1553_v36  ;;  %v9061_v36 = vld [vmem:[#allocation2 + $0xb2] sm:$0xff] }
 0x2cc   :  { %11169 = vst [vmem:[#allocation123_spill] sm:$0xff] %v9043_v33 }
 0x2cd   :  { %6656 = vmatmul.msk.f32.gmra.mxu1 %vm776_vm2, %v2542_v30  ;;  %6739 = vmatmul.msk.f32.gmra.mxu2 %vm776_vm2, %v3091_v3  ;;  %v3092_v30 = vld [vmem:[#allocation2 + $0x220] sm:$0xff] }
 0x2ce   :  { %6786 = vmatmul.msk.f32.gmra.mxu3 %vm776_vm2, %v9048_v50  ;;  %v9066_v3 = vld [vmem:[#allocation2 + $0xc1] sm:$0xff] }
 0x2d0   :  { %v9052_v63 = vpop.f32.mrf.mxu0  ;;  %v9054_v0 = vpop.f32.mrf.mxu2 }
 0x2d1   :  { %11170 = vst [vmem:[#allocation124_spill] sm:$0xff] %v9052_v63  ;;  %v9056_v24 = vpop.f32.mrf.mxu3 }
 0x2d2   :  { %11171 = vst [vmem:[#allocation125_spill] sm:$0xff] %v9054_v0  ;;  %v9058_v33 = vpop.f32.mrf.mxu1  ;;  %v1557_v0 = vpop.permute.xlu0 %1556 }
 0x2d3   :  { %11172 = vst [vmem:[#allocation126_spill] sm:$0xff] %v9056_v24  ;;  %6528 = vmatmul.msk.f32.gmra.mxu0 %vm1662_vm4, %v1555_v54 }
 0x2d4   :  { %11173 = vst [vmem:[#allocation127_spill] sm:$0xff] %v9058_v33 }
 0x2d5   :  { %6657 = vmatmul.msk.f32.gmra.mxu1 %vm776_vm2, %v9061_v36  ;;  %6740 = vmatmul.msk.f32.gmra.mxu2 %vm776_vm2, %v3092_v30  ;;  %v9084_v30 = vld [vmem:[#allocation2 + $0xd1] sm:$0xff] }
 0x2d6   :  { %6787 = vmatmul.msk.f32.gmra.mxu3 %vm776_vm2, %v9066_v3 }
 0x2d8   :  { %v9070_v63 = vpop.f32.mrf.mxu0  ;;  %v9072_v24 = vpop.f32.mrf.mxu2 }
 0x2d9   :  { %11174 = vst [vmem:[#allocation128_spill] sm:$0xff] %v9070_v63  ;;  %v9074_v33 = vpop.f32.mrf.mxu3 }
 0x2da   :  { %11175 = vst [vmem:[#allocation129_spill] sm:$0xff] %v9072_v24  ;;  %v9076_v54 = vpop.f32.mrf.mxu1  ;;  %v1559_v24 = vpop.permute.xlu1 %1558 }
 0x2db   :  { %11176 = vst [vmem:[#allocation130_spill] sm:$0xff] %v9074_v33  ;;  %6529 = vmatmul.msk.f32.gmra.mxu0 %vm1662_vm4, %v1557_v0 }
 0x2dc   :  { %11177 = vst [vmem:[#allocation131_spill] sm:$0xff] %v9076_v54 }
 0x2dd   :  { %6658 = vmatmul.msk.f32.gmra.mxu1 %vm776_vm2, %v9079_v12  ;;  %6741 = vmatmul.msk.f32.gmra.mxu2 %vm776_vm2, %v3093_v37  ;;  %v9102_v37 = vld [vmem:[#allocation2 + $0xe1] sm:$0xff] }
 0x2de   :  { %6788 = vmatmul.msk.f32.gmra.mxu3 %vm776_vm2, %v9084_v30 }
 0x2e0   :  { %v9088_v63 = vpop.f32.mrf.mxu0  ;;  %v9090_v33 = vpop.f32.mrf.mxu2 }
 0x2e1   :  { %11178 = vst [vmem:[#allocation132_spill] sm:$0xff] %v9088_v63  ;;  %v9092_v54 = vpop.f32.mrf.mxu3 }
 0x2e2   :  { %11179 = vst [vmem:[#allocation133_spill] sm:$0xff] %v9090_v33  ;;  %v9094_v0 = vpop.f32.mrf.mxu1  ;;  %v1561_v33 = vpop.permute.xlu2 %1560 }
 0x2e3   :  { %11180 = vst [vmem:[#allocation134_spill] sm:$0xff] %v9092_v54  ;;  %6530 = vmatmul.msk.f32.gmra.mxu0 %vm1662_vm4, %v1559_v24 }
 0x2e4   :  { %11181 = vst [vmem:[#allocation135_spill] sm:$0xff] %v9094_v0 }
 0x2e5   :  { %6659 = vmatmul.msk.f32.gmra.mxu1 %vm776_vm2, %v9097_v32  ;;  %6742 = vmatmul.msk.f32.gmra.mxu2 %vm776_vm2, %v3094_v28  ;;  %v9120_v28 = vld [vmem:[#allocation2 + $0xf1] sm:$0xff] }
 0x2e6   :  { %6789 = vmatmul.msk.f32.gmra.mxu3 %vm776_vm2, %v9102_v37 }
 0x2e8   :  { %v9106_v63 = vpop.f32.mrf.mxu0  ;;  %v9108_v54 = vpop.f32.mrf.mxu2 }
 0x2e9   :  { %11182 = vst [vmem:[#allocation136_spill] sm:$0xff] %v9106_v63  ;;  %v9110_v0 = vpop.f32.mrf.mxu3 }
 0x2ea   :  { %11183 = vst [vmem:[#allocation137_spill] sm:$0xff] %v9108_v54  ;;  %v9112_v24 = vpop.f32.mrf.mxu1  ;;  %v1563_v54 = vpop.permute.xlu0 %1562 }
 0x2eb   :  { %11184 = vst [vmem:[#allocation138_spill] sm:$0xff] %v9110_v0  ;;  %6531 = vmatmul.msk.f32.gmra.mxu0 %vm1662_vm4, %v1561_v33 }
 0x2ec   :  { %11185 = vst [vmem:[#allocation139_spill] sm:$0xff] %v9112_v24 }
 0x2ed   :  { %6660 = vmatmul.msk.f32.gmra.mxu1 %vm776_vm2, %v9115_v38  ;;  %6743 = vmatmul.msk.f32.gmra.mxu2 %vm776_vm2, %v3095_v35  ;;  %v9138_v35 = vld [vmem:[#allocation2 + $0x101] sm:$0xff]  ;;  %v3105_v38 = vld [vmem:[#allocation2 + $0x330] sm:$0xff] }
 0x2ee   :  { %6790 = vmatmul.msk.f32.gmra.mxu3 %vm776_vm2, %v9120_v28 }
 0x2f0   :  { %v9124_v63 = vpop.f32.mrf.mxu0  ;;  %v9126_v0 = vpop.f32.mrf.mxu2 }
 0x2f1   :  { %11187 = vst [vmem:[#allocation141_spill] sm:$0xff] %v9124_v63  ;;  %v9128_v24 = vpop.f32.mrf.mxu3 }
 0x2f2   :  { %11188 = vst [vmem:[#allocation142_spill] sm:$0xff] %v9126_v0  ;;  %v9130_v33 = vpop.f32.mrf.mxu1 }
 0x2f3   :  { %11189 = vst [vmem:[#allocation143_spill] sm:$0xff] %v9128_v24  ;;  %6532 = vmatmul.msk.f32.gmra.mxu0 %vm1662_vm4, %v1563_v54 }
 0x2f4   :  { %11190 = vst [vmem:[#allocation144_spill] sm:$0xff] %v9130_v33  ;;  %v2003_v33 = vld [vmem:[#allocation2 + $0x1] sm:$0xff] }
 0x2f5   :  { %6661 = vmatmul.msk.f32.gmra.mxu1 %vm776_vm2, %v9133_v56  ;;  %6744 = vmatmul.msk.f32.gmra.mxu2 %vm776_vm2, %v3096_v44  ;;  %v3097_v56 = vld [vmem:[#allocation2 + $0x290] sm:$0xff] }
 0x2f6   :  { %6791 = vmatmul.msk.f32.gmra.mxu3 %vm776_vm2, %v9138_v35  ;;  %v3610_v44 = vld [vmem:[#allocation2 + $0x111] sm:$0xff] }
 0x2f8   :  { %v9142_v0 = vpop.f32.mrf.mxu0  ;;  %v9144_v63 = vpop.f32.mrf.mxu2 }
 0x2f9   :  { %11192 = vst [vmem:[#allocation146_spill] sm:$0xff] %v9142_v0  ;;  %v9146_v24 = vpop.f32.mrf.mxu3 }
 0x2fa   :  { %11193 = vst [vmem:[#allocation147_spill] sm:$0xff] %v9146_v24  ;;  %v9148_v54 = vpop.f32.mrf.mxu1 }
 0x2fb   :  { %11194 = vst [vmem:[#allocation148_spill] sm:$0xff] %v9148_v54  ;;  %6583 = vmatmul.msk.f32.vlgmr.msrb.gmra.mxu0 %vm776_vm2, %v2003_v33  ;;  %v9167_v33 = vld [vmem:[#allocation2 + $0x112] sm:$0xff] }
 0x2fc   :  { %11199 = vst [vmem:[#allocation153_spill] sm:$0xff] %v9167_v33 }
 0x2fd   :  { %6662 = vmatmul.msk.f32.gmra.mxu1 %vm776_vm2, %v9151_v60  ;;  %6745 = vmatmul.msk.f32.gmra.mxu2 %vm776_vm2, %v3097_v56  ;;  %v3611_v56 = vld [vmem:[#allocation2 + $0x121] sm:$0xff]  ;;  %v3099_v60 = vld [vmem:[#allocation2 + $0x2b0] sm:$0xff] }
 0x2fe   :  { %6792 = vmatmul.msk.f32.gmra.mxu3 %vm776_vm2, %v3610_v44 }
 0x300   :  { %v9157_v0 = vpop.f32.mrf.mxu0  ;;  %v9159_v42 = vpop.f32.mrf.mxu2 }
 0x301   :  { %11196 = vst [vmem:[#allocation150_spill] sm:$0xff] %v9157_v0  ;;  %v9161_v24 = vpop.f32.mrf.mxu3 }
 0x302   :  { %11197 = vst [vmem:[#allocation151_spill] sm:$0xff] %v9161_v24  ;;  %v9163_v54 = vpop.f32.mrf.mxu1 }
 0x303   :  { %11198 = vst [vmem:[#allocation152_spill] sm:$0xff] %v9163_v54  ;;  %6584 = vmatmul.msk.f32.gmra.mxu0 %vm776_vm2, %v8910_v16  ;;  %v2550_v16 = vld [vmem:[#allocation2 + $0x142] sm:$0xff] }
 0x305   :  { %6663 = vmatmul.msk.f32.gmra.mxu1 %vm776_vm2, %v9167_v33  ;;  %6746 = vmatmul.msk.f32.gmra.mxu2 %vm776_vm2, %v3098_v5  ;;  %v3612_v5 = vld [vmem:[#allocation2 + $0x151] sm:$0xff] }
 0x306   :  { %6793 = vmatmul.msk.f32.gmra.mxu3 %vm776_vm2, %v3611_v56 }
 0x308   :  { %v9173_v44 = vpop.f32.mrf.mxu0  ;;  %v9175_v0 = vpop.f32.mrf.mxu2 }
 0x309   :  { %11200 = vst [vmem:[#allocation154_spill] sm:$0xff] %v9173_v44  ;;  %v9177_v24 = vpop.f32.mrf.mxu3 }
 0x30a   :  { %11201 = vst [vmem:[#allocation155_spill] sm:$0xff] %v9177_v24  ;;  %v9179_v54 = vpop.f32.mrf.mxu1 }
 0x30b   :  { %11202 = vst [vmem:[#allocation156_spill] sm:$0xff] %v9179_v54  ;;  %6585 = vmatmul.msk.f32.gmra.mxu0 %vm776_vm2, %v8928_v59  ;;  %v9196_v59 = vld [vmem:[#allocation2 + $0x152] sm:$0xff]  ;;  %v3100_v54 = vld [vmem:[#allocation2 + $0x2c0] sm:$0xff] }
 0x30c   :  { %11206 = vst [vmem:[#allocation160_spill] sm:$0xff] %v9196_v59 }
 0x30d   :  { %6664 = vmatmul.msk.f32.gmra.mxu1 %vm776_vm2, %v2550_v16  ;;  %6747 = vmatmul.msk.f32.gmra.mxu2 %vm776_vm2, %v3099_v60  ;;  %v3613_v60 = vld [vmem:[#allocation2 + $0x161] sm:$0xff] }
 0x30e   :  { %6794 = vmatmul.msk.f32.gmra.mxu3 %vm776_vm2, %v3612_v5 }
 0x310   :  { %v9186_v56 = vpop.f32.mrf.mxu0  ;;  %v9188_v44 = vpop.f32.mrf.mxu2 }
 0x311   :  { %11203 = vst [vmem:[#allocation157_spill] sm:$0xff] %v9186_v56  ;;  %v9190_v33 = vpop.f32.mrf.mxu3 }
 0x312   :  { %11204 = vst [vmem:[#allocation158_spill] sm:$0xff] %v9190_v33  ;;  %v9192_v24 = vpop.f32.mrf.mxu1 }
 0x313   :  { %11205 = vst [vmem:[#allocation159_spill] sm:$0xff] %v9192_v24  ;;  %6586 = vmatmul.msk.f32.gmra.mxu0 %vm776_vm2, %v8946_v62  ;;  %v9212_v62 = vld [vmem:[#allocation2 + $0x162] sm:$0xff]  ;;  %v3101_v24 = vld [vmem:[#allocation2 + $0x2d0] sm:$0xff] }
 0x314   :  { %11210 = vst [vmem:[#allocation164_spill] sm:$0xff] %v9212_v62 }
 0x315   :  { %6665 = vmatmul.msk.f32.gmra.mxu1 %vm776_vm2, %v9196_v59  ;;  %6748 = vmatmul.msk.f32.gmra.mxu2 %vm776_vm2, %v3100_v54  ;;  %v3614_v54 = vld [vmem:[#allocation2 + $0x171] sm:$0xff]  ;;  %v3102_v59 = vld [vmem:[#allocation2 + $0x2e0] sm:$0xff] }
 0x316   :  { %6795 = vmatmul.msk.f32.gmra.mxu3 %vm776_vm2, %v3613_v60 }
 0x318   :  { %v9202_v16 = vpop.f32.mrf.mxu0  ;;  %v9204_v5 = vpop.f32.mrf.mxu2 }
 0x319   :  { %11207 = vst [vmem:[#allocation161_spill] sm:$0xff] %v9202_v16  ;;  %v9206_v56 = vpop.f32.mrf.mxu3 }
 0x31a   :  { %11208 = vst [vmem:[#allocation162_spill] sm:$0xff] %v9206_v56  ;;  %v9208_v33 = vpop.f32.mrf.mxu1 }
 0x31b   :  { %11209 = vst [vmem:[#allocation163_spill] sm:$0xff] %v9208_v33  ;;  %6587 = vmatmul.msk.f32.gmra.mxu0 %vm776_vm2, %v8964_v6  ;;  %v9228_v6 = vld [vmem:[#allocation2 + $0x172] sm:$0xff] }
 0x31c   :  { %11214 = vst [vmem:[#allocation168_spill] sm:$0xff] %v9228_v6 }
 0x31d   :  { %6666 = vmatmul.msk.f32.gmra.mxu1 %vm776_vm2, %v9212_v62  ;;  %6749 = vmatmul.msk.f32.gmra.mxu2 %vm776_vm2, %v3101_v24  ;;  %v3615_v24 = vld [vmem:[#allocation2 + $0x181] sm:$0xff]  ;;  %v3103_v62 = vld [vmem:[#allocation2 + $0x2f0] sm:$0xff] }
 0x31e   :  { %6796 = vmatmul.msk.f32.gmra.mxu3 %vm776_vm2, %v3614_v54 }
 0x320   :  { %v9218_v60 = vpop.f32.mrf.mxu0  ;;  %v9220_v16 = vpop.f32.mrf.mxu2 }
 0x321   :  { %11211 = vst [vmem:[#allocation165_spill] sm:$0xff] %v9218_v60  ;;  %v9222_v56 = vpop.f32.mrf.mxu3 }
 0x322   :  { %11212 = vst [vmem:[#allocation166_spill] sm:$0xff] %v9222_v56  ;;  %v9224_v33 = vpop.f32.mrf.mxu1 }
 0x323   :  { %11213 = vst [vmem:[#allocation167_spill] sm:$0xff] %v9224_v33  ;;  %6588 = vmatmul.msk.f32.gmra.mxu0 %vm776_vm2, %v8982_v31  ;;  %v9244_v31 = vld [vmem:[#allocation2 + $0x182] sm:$0xff] }
 0x324   :  { %11218 = vst [vmem:[#allocation172_spill] sm:$0xff] %v9244_v31 }
 0x325   :  { %6667 = vmatmul.msk.f32.gmra.mxu1 %vm776_vm2, %v9228_v6  ;;  %6750 = vmatmul.msk.f32.gmra.mxu2 %vm776_vm2, %v3102_v59  ;;  %v3616_v59 = vld [vmem:[#allocation2 + $0x191] sm:$0xff]  ;;  %v3104_v6 = vld [vmem:[#allocation2 + $0x300] sm:$0xff] }
 0x326   :  { %6797 = vmatmul.msk.f32.gmra.mxu3 %vm776_vm2, %v3615_v24 }
 0x328   :  { %v9234_v54 = vpop.f32.mrf.mxu0  ;;  %v9236_v60 = vpop.f32.mrf.mxu2 }
 0x329   :  { %11215 = vst [vmem:[#allocation169_spill] sm:$0xff] %v9234_v54  ;;  %v9238_v56 = vpop.f32.mrf.mxu3 }
 0x32a   :  { %11216 = vst [vmem:[#allocation170_spill] sm:$0xff] %v9238_v56  ;;  %v9240_v33 = vpop.f32.mrf.mxu1 }
 0x32b   :  { %11217 = vst [vmem:[#allocation171_spill] sm:$0xff] %v9240_v33  ;;  %6589 = vmatmul.msk.f32.gmra.mxu0 %vm776_vm2, %v9000_v43  ;;  %v9260_v43 = vld [vmem:[#allocation2 + $0x192] sm:$0xff] }
 0x32c   :  { %11222 = vst [vmem:[#allocation176_spill] sm:$0xff] %v9260_v43 }
 0x32d   :  { %6668 = vmatmul.msk.f32.gmra.mxu1 %vm776_vm2, %v9244_v31  ;;  %6751 = vmatmul.msk.f32.gmra.mxu2 %vm776_vm2, %v3103_v62  ;;  %v3617_v62 = vld [vmem:[#allocation2 + $0x1a1] sm:$0xff] }
 0x32e   :  { %6798 = vmatmul.msk.f32.gmra.mxu3 %vm776_vm2, %v3616_v59 }
 0x330   :  { %v9250_v24 = vpop.f32.mrf.mxu0  ;;  %v9252_v54 = vpop.f32.mrf.mxu2 }
 0x331   :  { %11219 = vst [vmem:[#allocation173_spill] sm:$0xff] %v9250_v24  ;;  %v9254_v56 = vpop.f32.mrf.mxu3 }
 0x332   :  { %11220 = vst [vmem:[#allocation174_spill] sm:$0xff] %v9254_v56  ;;  %v9256_v33 = vpop.f32.mrf.mxu1  ;;  %v2011_v56 = vld [vmem:[#allocation2 + $0xa1] sm:$0xff] }
 0x333   :  { %11221 = vst [vmem:[#allocation175_spill] sm:$0xff] %v9256_v33  ;;  %6590 = vmatmul.msk.f32.gmra.mxu0 %vm776_vm2, %v9018_v1  ;;  %v9275_v1 = vld [vmem:[#allocation2 + $0x1a2] sm:$0xff] }
 0x334   :  { %11226 = vst [vmem:[#allocation180_spill] sm:$0xff] %v9275_v1 }
 0x335   :  { %6669 = vmatmul.msk.f32.gmra.mxu1 %vm776_vm2, %v9260_v43  ;;  %6752 = vmatmul.msk.f32.gmra.mxu2 %vm776_vm2, %v3104_v6  ;;  %v3618_v6 = vld [vmem:[#allocation2 + $0x1b1] sm:$0xff]  ;;  %v3106_v43 = vld [vmem:[#allocation2 + $0x340] sm:$0xff] }
 0x336   :  { %6799 = vmatmul.msk.f32.gmra.mxu3 %vm776_vm2, %v3617_v62 }
 0x338   :  { %v9266_v59 = vpop.f32.mrf.mxu0  ;;  %v9268_v24 = vpop.f32.mrf.mxu2 }
 0x339   :  { %11223 = vst [vmem:[#allocation177_spill] sm:$0xff] %v9266_v59  ;;  %v9270_v33 = vpop.f32.mrf.mxu3 }
 0x33a   :  { %11224 = vst [vmem:[#allocation178_spill] sm:$0xff] %v9270_v33  ;;  %v9272_v31 = vpop.f32.mrf.mxu1 }
 0x33b   :  { %11225 = vst [vmem:[#allocation179_spill] sm:$0xff] %v9272_v31  ;;  %6591 = vmatmul.msk.f32.gmra.mxu0 %vm776_vm2, %v2011_v56  ;;  %v9291_v56 = vld [vmem:[#allocation2 + $0x1b2] sm:$0xff] }
 0x33c   :  { %11230 = vst [vmem:[#allocation184_spill] sm:$0xff] %v9291_v56 }
 0x33d   :  { %6670 = vmatmul.msk.f32.gmra.mxu1 %vm776_vm2, %v9275_v1  ;;  %6753 = vmatmul.msk.f32.gmra.mxu2 %vm776_vm2, %v3105_v38  ;;  %v3619_v38 = vld [vmem:[#allocation2 + $0x1c1] sm:$0xff]  ;;  %v3107_v1 = vld [vmem:[#allocation2 + $0x350] sm:$0xff] }
 0x33e   :  { %6800 = vmatmul.msk.f32.gmra.mxu3 %vm776_vm2, %v3618_v6 }
 0x340   :  { %v9281_v62 = vpop.f32.mrf.mxu0  ;;  %v9283_v59 = vpop.f32.mrf.mxu2 }
 0x341   :  { %11227 = vst [vmem:[#allocation181_spill] sm:$0xff] %v9281_v62  ;;  %v9285_v33 = vpop.f32.mrf.mxu3 }
 0x342   :  { %11228 = vst [vmem:[#allocation182_spill] sm:$0xff] %v9285_v33  ;;  %v9287_v31 = vpop.f32.mrf.mxu1 }
 0x343   :  { %11229 = vst [vmem:[#allocation183_spill] sm:$0xff] %v9287_v31  ;;  %6592 = vmatmul.msk.f32.gmra.mxu0 %vm776_vm2, %v9048_v50  ;;  %v2558_v50 = vld [vmem:[#allocation2 + $0x1e2] sm:$0xff] }
 0x345   :  { %6671 = vmatmul.msk.f32.gmra.mxu1 %vm776_vm2, %v9291_v56  ;;  %6754 = vmatmul.msk.f32.gmra.mxu2 %vm776_vm2, %v3106_v43  ;;  %v3620_v43 = vld [vmem:[#allocation2 + $0x1f1] sm:$0xff] }
 0x346   :  { %6801 = vmatmul.msk.f32.gmra.mxu3 %vm776_vm2, %v3619_v38 }
 0x348   :  { %v9297_v6 = vpop.f32.mrf.mxu0  ;;  %v9299_v62 = vpop.f32.mrf.mxu2 }
 0x349   :  { %11231 = vst [vmem:[#allocation185_spill] sm:$0xff] %v9297_v6  ;;  %v9301_v33 = vpop.f32.mrf.mxu3 }
 0x34a   :  { %11232 = vst [vmem:[#allocation186_spill] sm:$0xff] %v9301_v33  ;;  %v9303_v31 = vpop.f32.mrf.mxu1 }
 0x34b   :  { %11233 = vst [vmem:[#allocation187_spill] sm:$0xff] %v9303_v31  ;;  %6593 = vmatmul.msk.f32.gmra.mxu0 %vm776_vm2, %v9066_v3  ;;  %v6842_v3 = vld [vmem:[%s11027_s5 + $0x28] sm:$0xff] }
 0x34c   :  { %4400 = vmatpush.msra.mxu0 %v6842_v3  ;;  %v3109_v3 = vld [vmem:[#allocation2 + $0x370] sm:$0xff] }
 0x34d   :  { %6672 = vmatmul.msk.f32.gmra.mxu1 %vm776_vm2, %v2558_v50  ;;  %6755 = vmatmul.msk.f32.gmra.mxu2 %vm776_vm2, %v3107_v1  ;;  %v9323_v50 = vld [vmem:[#allocation2 + $0x1f2] sm:$0xff]  ;;  %v3108_v1 = vld [vmem:[#allocation2 + $0x360] sm:$0xff] }
 0x34e   :  { %6802 = vmatmul.msk.f32.gmra.mxu3 %vm776_vm2, %v3620_v43  ;;  %11237 = vst [vmem:[#allocation191_spill] sm:$0xff] %v9323_v50  ;;  %v3621_v43 = vld [vmem:[#allocation2 + $0x201] sm:$0xff] }
 0x350   :  { %v9310_v38 = vpop.f32.mrf.mxu0  ;;  %v9312_v6 = vpop.f32.mrf.mxu2 }
 0x351   :  { %11234 = vst [vmem:[#allocation188_spill] sm:$0xff] %v9310_v38  ;;  %v9314_v56 = vpop.f32.mrf.mxu3 }
 0x352   :  { %11235 = vst [vmem:[#allocation189_spill] sm:$0xff] %v9314_v56  ;;  %v9316_v33 = vpop.f32.mrf.mxu1 }
 0x353   :  { %11236 = vst [vmem:[#allocation190_spill] sm:$0xff] %v9316_v33  ;;  %6594 = vmatmul.msk.f32.gmra.mxu0 %vm776_vm2, %v9084_v30  ;;  %v9339_v30 = vld [vmem:[#allocation2 + $0x202] sm:$0xff] }
 0x354   :  { %11241 = vst [vmem:[#allocation195_spill] sm:$0xff] %v9339_v30 }
 0x355   :  { %6673 = vmatmul.msk.f32.gmra.mxu1 %vm776_vm2, %v9323_v50  ;;  %6756 = vmatmul.msk.f32.gmra.mxu2 %vm776_vm2, %v3108_v1  ;;  %v3622_v1 = vld [vmem:[#allocation2 + $0x211] sm:$0xff]  ;;  %v3110_v50 = vld [vmem:[#allocation2 + $0x380] sm:$0xff] }
 0x356   :  { %6803 = vmatmul.msk.f32.gmra.mxu3 %vm776_vm2, %v3621_v43 }
 0x358   :  { %v9329_v38 = vpop.f32.mrf.mxu0  ;;  %v9331_v56 = vpop.f32.mrf.mxu2 }
 0x359   :  { %11238 = vst [vmem:[#allocation192_spill] sm:$0xff] %v9329_v38  ;;  %v9333_v33 = vpop.f32.mrf.mxu3 }
 0x35a   :  { %11239 = vst [vmem:[#allocation193_spill] sm:$0xff] %v9333_v33  ;;  %v9335_v31 = vpop.f32.mrf.mxu1 }
 0x35b   :  { %11240 = vst [vmem:[#allocation194_spill] sm:$0xff] %v9335_v31  ;;  %6595 = vmatmul.msk.f32.gmra.mxu0 %vm776_vm2, %v9102_v37  ;;  %v9355_v37 = vld [vmem:[#allocation2 + $0x212] sm:$0xff] }
 0x35c   :  { %11245 = vst [vmem:[#allocation199_spill] sm:$0xff] %v9355_v37 }
 0x35d   :  { %6674 = vmatmul.msk.f32.gmra.mxu1 %vm776_vm2, %v9339_v30  ;;  %6757 = vmatmul.msk.f32.gmra.mxu2 %vm776_vm2, %v3109_v3  ;;  %v3623_v3 = vld [vmem:[#allocation2 + $0x221] sm:$0xff]  ;;  %v3111_v30 = vld [vmem:[#allocation2 + $0x390] sm:$0xff] }
 0x35e   :  { %6804 = vmatmul.msk.f32.gmra.mxu3 %vm776_vm2, %v3622_v1 }
 0x360   :  { %v9345_v43 = vpop.f32.mrf.mxu0  ;;  %v9347_v38 = vpop.f32.mrf.mxu2 }
 0x361   :  { %11242 = vst [vmem:[#allocation196_spill] sm:$0xff] %v9345_v43  ;;  %v9349_v33 = vpop.f32.mrf.mxu3 }
 0x362   :  { %11243 = vst [vmem:[#allocation197_spill] sm:$0xff] %v9349_v33  ;;  %v9351_v31 = vpop.f32.mrf.mxu1 }
 0x363   :  { %11244 = vst [vmem:[#allocation198_spill] sm:$0xff] %v9351_v31  ;;  %6596 = vmatmul.msk.f32.gmra.mxu0 %vm776_vm2, %v9120_v28  ;;  %v9371_v28 = vld [vmem:[#allocation2 + $0x222] sm:$0xff] }
 0x364   :  { %11249 = vst [vmem:[#allocation203_spill] sm:$0xff] %v9371_v28 }
 0x365   :  { %6675 = vmatmul.msk.f32.gmra.mxu1 %vm776_vm2, %v9355_v37  ;;  %6758 = vmatmul.msk.f32.gmra.mxu2 %vm776_vm2, %v3110_v50  ;;  %v3624_v50 = vld [vmem:[#allocation2 + $0x231] sm:$0xff]  ;;  %v3112_v37 = vld [vmem:[#allocation2 + $0x3a0] sm:$0xff] }
 0x366   :  { %6805 = vmatmul.msk.f32.gmra.mxu3 %vm776_vm2, %v3623_v3 }
 0x368   :  { %v9361_v1 = vpop.f32.mrf.mxu0  ;;  %v9363_v43 = vpop.f32.mrf.mxu2 }
 0x369   :  { %11246 = vst [vmem:[#allocation200_spill] sm:$0xff] %v9361_v1  ;;  %v9365_v33 = vpop.f32.mrf.mxu3 }
 0x36a   :  { %11247 = vst [vmem:[#allocation201_spill] sm:$0xff] %v9365_v33  ;;  %v9367_v31 = vpop.f32.mrf.mxu1 }
 0x36b   :  { %11248 = vst [vmem:[#allocation202_spill] sm:$0xff] %v9367_v31  ;;  %6597 = vmatmul.msk.f32.gmra.mxu0 %vm776_vm2, %v9138_v35  ;;  %v9387_v35 = vld [vmem:[#allocation2 + $0x232] sm:$0xff] }
 0x36c   :  { %11253 = vst [vmem:[#allocation207_spill] sm:$0xff] %v9387_v35 }
 0x36d   :  { %6676 = vmatmul.msk.f32.gmra.mxu1 %vm776_vm2, %v9371_v28  ;;  %6759 = vmatmul.msk.f32.gmra.mxu2 %vm776_vm2, %v3111_v30  ;;  %v3625_v30 = vld [vmem:[#allocation2 + $0x241] sm:$0xff]  ;;  %v3113_v28 = vld [vmem:[#allocation2 + $0x3d0] sm:$0xff] }
 0x36e   :  { %6806 = vmatmul.msk.f32.gmra.mxu3 %vm776_vm2, %v3624_v50 }
 0x370   :  { %v9377_v3 = vpop.f32.mrf.mxu0  ;;  %v9379_v1 = vpop.f32.mrf.mxu2 }
 0x371   :  { %11250 = vst [vmem:[#allocation204_spill] sm:$0xff] %v9377_v3  ;;  %v9381_v33 = vpop.f32.mrf.mxu3 }
 0x372   :  { %11251 = vst [vmem:[#allocation205_spill] sm:$0xff] %v9381_v33  ;;  %v9383_v31 = vpop.f32.mrf.mxu1 }
 0x373   :  { %11252 = vst [vmem:[#allocation206_spill] sm:$0xff] %v9383_v31  ;;  %6843 = vmatmul.msk.f32.vlgmr.msra.gmra.mxu0 %vm776_vm2, %v8923_v11  ;;  %v9403_v11 = vld [vmem:[#allocation2 + $0x242] sm:$0xff] }
 0x374   :  { %11258 = vst [vmem:[#allocation212_spill] sm:$0xff] %v9403_v11 }
 0x375   :  { %6677 = vmatmul.msk.f32.gmra.mxu1 %vm776_vm2, %v9387_v35  ;;  %6760 = vmatmul.msk.f32.gmra.mxu2 %vm776_vm2, %v3112_v37  ;;  %v3626_v37 = vld [vmem:[#allocation2 + $0x251] sm:$0xff] }
 0x376   :  { %6807 = vmatmul.msk.f32.gmra.mxu3 %vm776_vm2, %v3625_v30  ;;  %v1857_v30 = vadd.f32 %v8028_v45, %v8409_v51  ;;  %v3627_v45 = vld [vmem:[#allocation2 + $0x261] sm:$0xff]  ;;  %v1860_v51 = vadd.f32 %v8045_v52, %v8436_v57  ;;  %v3628_v52 = vld [vmem:[#allocation2 + $0x291] sm:$0xff]  ;;  %v1863_v57 = vadd.f32 %v8075_v17, %v8459_v8 }
 0x377   :  { %v3629_v17 = vld [vmem:[#allocation2 + $0x2a1] sm:$0xff] }
 0x378   :  { %v9393_v50 = vpop.f32.mrf.mxu0  ;;  %v9395_v3 = vpop.f32.mrf.mxu2 }
 0x379   :  { %11254 = vst [vmem:[#allocation208_spill] sm:$0xff] %v9393_v50  ;;  %v9397_v33 = vpop.f32.mrf.mxu3 }
 0x37a   :  { %11255 = vst [vmem:[#allocation209_spill] sm:$0xff] %v9395_v3  ;;  %v9399_v31 = vpop.f32.mrf.mxu1  ;;  %v3114_v3 = vld [vmem:[#allocation2 + $0x3e0] sm:$0xff] }
 0x37b   :  { %11256 = vst [vmem:[#allocation210_spill] sm:$0xff] %v9397_v33  ;;  %6844 = vmatmul.msk.f32.gmra.mxu0 %vm776_vm2, %v8941_v14  ;;  %v2485_v14 = vadd.f32 %v8427_v55, %v1857_v30  ;;  %v2486_v30 = vadd.f32 %v8450_v26, %v1860_v51 }
 0x37c   :  { %11257 = vst [vmem:[#allocation211_spill] sm:$0xff] %v9399_v31 }
 0x37d   :  { %6678 = vmatmul.msk.f32.gmra.mxu1 %vm776_vm2, %v9403_v11  ;;  %6761 = vmatmul.msk.f32.gmra.mxu2 %vm776_vm2, %v3113_v28  ;;  %v9420_v28 = vld [vmem:[#allocation2 + $0x252] sm:$0xff] }
 0x37e   :  { %6808 = vmatmul.msk.f32.gmra.mxu3 %vm776_vm2, %v3626_v37 }
 0x380   :  { %v9411_v33 = vpop.f32.mrf.mxu0  ;;  %v9413_v31 = vpop.f32.mrf.mxu2 }
 0x381   :  { %11259 = vst [vmem:[#allocation213_spill] sm:$0xff] %v9411_v33  ;;  %v9415_v50 = vpop.f32.mrf.mxu3  ;;  %v2566_v33 = vld [vmem:[#allocation2 + $0x282] sm:$0xff] }
 0x382   :  { %11260 = vst [vmem:[#allocation214_spill] sm:$0xff] %v9415_v50  ;;  %v2854_v35 = vpop.f32.mrf.mxu1 }
 0x383   :  { %6845 = vmatmul.msk.f32.gmra.mxu0 %vm776_vm2, %v8959_v34  ;;  %v3016_v11 = vadd.f32 %v2854_v35, %v2485_v14 }
 0x385   :  { %6679 = vmatmul.msk.f32.gmra.mxu1 %vm776_vm2, %v9420_v28  ;;  %6762 = vmatmul.msk.f32.gmra.mxu2 %vm776_vm2, %v3114_v3  ;;  %v3547_v34 = vadd.f32 %v9144_v63, %v3016_v11 }
 0x386   :  { %6809 = vmatmul.msk.f32.gmra.mxu3 %vm776_vm2, %v3627_v45  ;;  %v3115_v45 = vld [vmem:[#allocation2 + $0x3f0] sm:$0xff] }
 0x388   :  { %v9428_v55 = vpop.f32.mrf.mxu0  ;;  %v9430_v37 = vpop.f32.mrf.mxu2 }
 0x389   :  { %v3916_v35 = vpop.f32.mrf.mxu3 }
 0x38a   :  { %v9434_v14 = vadd.f32 %v3916_v35, %v3547_v34  ;;  %v2857_v50 = vpop.f32.mrf.mxu1  ;;  %v9453_v35 = vld [vmem:[#allocation2 + $0x292] sm:$0xff] }
 0x38b   :  { %6846 = vmatmul.msk.f32.gmra.mxu0 %vm776_vm2, %v8977_v22  ;;  %v3017_v3 = vadd.f32 %v2857_v50, %v2486_v30  ;;  %v2487_v22 = vadd.f32 %v8480_v4, %v1863_v57  ;;  %v3116_v30 = vld [vmem:[#allocation2 + $0x400] sm:$0xff] }
 0x38c   :  { %11261 = vst [vmem:[#allocation215_spill] sm:$0xff] %v9434_v14  ;;  %v2582_v14 = vld [vmem:[#allocation2 + $0x3c2] sm:$0xff] }
 0x38d   :  { %6680 = vmatmul.msk.f32.gmra.mxu1 %vm776_vm2, %v2566_v33  ;;  %6763 = vmatmul.msk.f32.gmra.mxu2 %vm776_vm2, %v3115_v45  ;;  %v3548_v11 = vadd.f32 %v9159_v42, %v3017_v3  ;;  %v1866_v42 = vadd.f32 %v8104_v19, %v8485_v7  ;;  %v3630_v19 = vld [vmem:[#allocation2 + $0x2b1] sm:$0xff]  ;;  %v1869_v7 = vadd.f32 %v8131_v47, %v8504_v49  ;;  %v3631_v47 = vld [vmem:[#allocation2 + $0x2c1] sm:$0xff] }
 0x38e   :  { %6810 = vmatmul.msk.f32.gmra.mxu3 %vm776_vm2, %v3628_v52  ;;  %v1872_v49 = vadd.f32 %v8154_v58, %v8519_v48  ;;  %v3632_v58 = vld [vmem:[#allocation2 + $0x2d1] sm:$0xff]  ;;  %v1875_v48 = vadd.f32 %v8177_v39, %v8534_v10  ;;  %v3633_v39 = vld [vmem:[#allocation2 + $0x2e1] sm:$0xff]  ;;  %v1878_v10 = vadd.f32 %v8200_v41, %v8549_v15  ;;  %v1881_v15 = vadd.f32 %v8223_v21, %v8564_v27 }
 0x38f   :  { %v2488_v45 = vadd.f32 %v8502_v2, %v1866_v42  ;;  %v3634_v41 = vld [vmem:[#allocation2 + $0x2f1] sm:$0xff]  ;;  %v3635_v21 = vld [vmem:[#allocation2 + $0x301] sm:$0xff]  ;;  %v1884_v27 = vadd.f32 %v8246_v13, %v8579_v18 }
 0x390   :  { %v9443_v26 = vpop.f32.mrf.mxu0  ;;  %v9445_v63 = vpop.f32.mrf.mxu2  ;;  %v3636_v13 = vld [vmem:[#allocation2 + $0x331] sm:$0xff] }
 0x391   :  { %v3919_v51 = vpop.f32.mrf.mxu3  ;;  %v11276_v18 = vld [vmem:[#allocation21_spill] sm:$0xff] }
 0x392   :  { %v9449_v50 = vadd.f32 %v3919_v51, %v3548_v11  ;;  %v2860_v33 = vpop.f32.mrf.mxu1  ;;  %v9471_v51 = vld [vmem:[#allocation2 + $0x2a2] sm:$0xff] }
 0x393   :  { %6847 = vmatmul.msk.f32.gmra.mxu0 %vm776_vm2, %v8995_v23  ;;  %v3018_v34 = vadd.f32 %v2860_v33, %v2487_v22  ;;  %v3117_v22 = vld [vmem:[#allocation2 + $0x410] sm:$0xff] }
 0x394   :  { %11262 = vst [vmem:[#allocation216_spill] sm:$0xff] %v9449_v50 }
 0x395   :  { %6681 = vmatmul.msk.f32.gmra.mxu1 %vm776_vm2, %v9453_v35  ;;  %6764 = vmatmul.msk.f32.gmra.mxu2 %vm776_vm2, %v3116_v30  ;;  %v3549_v23 = vadd.f32 %v9175_v0, %v3018_v34  ;;  %v2489_v34 = vadd.f32 %v8517_v40, %v1869_v7 }
 0x396   :  { %6811 = vmatmul.msk.f32.gmra.mxu3 %vm776_vm2, %v3629_v17 }
 0x398   :  { %v9461_v8 = vpop.f32.mrf.mxu0  ;;  %v9463_v4 = vpop.f32.mrf.mxu2 }
 0x399   :  { %v3922_v3 = vpop.f32.mrf.mxu3 }
 0x39a   :  { %v9467_v52 = vadd.f32 %v3922_v3, %v3549_v23  ;;  %v2863_v57 = vpop.f32.mrf.mxu1  ;;  %v9489_v23 = vld [vmem:[#allocation2 + $0x2b2] sm:$0xff]  ;;  %v3118_v3 = vld [vmem:[#allocation2 + $0x420] sm:$0xff] }
 0x39b   :  { %6848 = vmatmul.msk.f32.gmra.mxu0 %vm776_vm2, %v9013_v53  ;;  %v3019_v11 = vadd.f32 %v2863_v57, %v2488_v45  ;;  %v2490_v57 = vadd.f32 %v8532_v9, %v1872_v49 }
 0x39c   :  { %11263 = vst [vmem:[#allocation217_spill] sm:$0xff] %v9467_v52  ;;  %v5191_v52 = vld [vmem:[#allocation2 + $0x31] sm:$0xff] }
 0x39d   :  { %6682 = vmatmul.msk.f32.gmra.mxu1 %vm776_vm2, %v9471_v51  ;;  %6765 = vmatmul.msk.f32.gmra.mxu2 %vm776_vm2, %v3117_v22  ;;  %v3550_v53 = vadd.f32 %v9188_v44, %v3019_v11 }
 0x39e   :  { %6812 = vmatmul.msk.f32.gmra.mxu3 %vm776_vm2, %v3630_v19  ;;  %v4134_v19 = vld [vmem:[#allocation2 + $0x82] sm:$0xff] }
 0x3a0   :  { %v9479_v2 = vpop.f32.mrf.mxu0  ;;  %v9481_v0 = vpop.f32.mrf.mxu2 }
 0x3a1   :  { %v3925_v33 = vpop.f32.mrf.mxu3 }
 0x3a2   :  { %v9485_v30 = vadd.f32 %v3925_v33, %v3550_v53  ;;  %v2866_v17 = vpop.f32.mrf.mxu1  ;;  %v9506_v53 = vld [vmem:[#allocation2 + $0x2c2] sm:$0xff]  ;;  %v3119_v33 = vld [vmem:[#allocation2 + $0x430] sm:$0xff] }
 0x3a3   :  { %6849 = vmatmul.msk.f32.gmra.mxu0 %vm776_vm2, %v9031_v20  ;;  %v3020_v42 = vadd.f32 %v2866_v17, %v2489_v34 }
 0x3a4   :  { %11264 = vst [vmem:[#allocation218_spill] sm:$0xff] %v9485_v30  ;;  %v11313_v30 = vld [vmem:[#allocation168_spill] sm:$0xff] }
 0x3a5   :  { %6683 = vmatmul.msk.f32.gmra.mxu1 %vm776_vm2, %v9489_v23  ;;  %6766 = vmatmul.msk.f32.gmra.mxu2 %vm776_vm2, %v3118_v3  ;;  %v3551_v20 = vadd.f32 %v9204_v5, %v3020_v42  ;;  %v2491_v42 = vadd.f32 %v8547_v61, %v1875_v48  ;;  %v3121_v48 = vld [vmem:[#allocation2 + $0x470] sm:$0xff] }
 0x3a6   :  { %6813 = vmatmul.msk.f32.gmra.mxu3 %vm776_vm2, %v3631_v47 }
 0x3a8   :  { %v9497_v40 = vpop.f32.mrf.mxu0  ;;  %v9499_v44 = vpop.f32.mrf.mxu2 }
 0x3a9   :  { %11265 = vst [vmem:[#allocation219_spill] sm:$0xff] %v9497_v40  ;;  %v3928_v45 = vpop.f32.mrf.mxu3  ;;  %v2590_v40 = vld [vmem:[#allocation2 + $0x462] sm:$0xff] }
 0x3aa   :  { %v9503_v11 = vadd.f32 %v3928_v45, %v3551_v20  ;;  %v2869_v22 = vpop.f32.mrf.mxu1  ;;  %v9524_v20 = vld [vmem:[#allocation2 + $0x2d2] sm:$0xff]  ;;  %v3120_v45 = vld [vmem:[#allocation2 + $0x440] sm:$0xff] }
 0x3ab   :  { %6850 = vmatmul.msk.f32.gmra.mxu0 %vm776_vm2, %v4134_v19  ;;  %v3021_v7 = vadd.f32 %v2869_v22, %v2490_v57  ;;  %v2492_v22 = vadd.f32 %v8562_v29, %v1878_v10 }
 0x3ac   :  { %11266 = vst [vmem:[#allocation220_spill] sm:$0xff] %v9503_v11  ;;  %v5190_v11 = vld [vmem:[#allocation2 + $0x21] sm:$0xff] }
 0x3ad   :  { %6684 = vmatmul.msk.f32.gmra.mxu1 %vm776_vm2, %v9506_v53  ;;  %6767 = vmatmul.msk.f32.gmra.mxu2 %vm776_vm2, %v3119_v33  ;;  %v3552_v34 = vadd.f32 %v9220_v16, %v3021_v7 }
 0x3ae   :  { %6814 = vmatmul.msk.f32.gmra.mxu3 %vm776_vm2, %v3632_v58  ;;  %v9542_v58 = vld [vmem:[#allocation2 + $0x2e2] sm:$0xff] }
 0x3b0   :  { %v9514_v9 = vpop.f32.mrf.mxu0  ;;  %v9516_v5 = vpop.f32.mrf.mxu2 }
 0x3b1   :  { %11267 = vst [vmem:[#allocation221_spill] sm:$0xff] %v9514_v9  ;;  %v3931_v17 = vpop.f32.mrf.mxu3  ;;  %v9804_v9 = vld [vmem:[#allocation2 + $0x412] sm:$0xff] }
 0x3b2   :  { %v9520_v3 = vadd.f32 %v3931_v17, %v3552_v34  ;;  %v2872_v47 = vpop.f32.mrf.mxu1  ;;  %v2493_v17 = vadd.f32 %v8577_v25, %v1881_v15 }
 0x3b3   :  { %6851 = vmatmul.msk.f32.gmra.mxu0 %vm776_vm2, %v9061_v36  ;;  %v3022_v49 = vadd.f32 %v2872_v47, %v2491_v42 }
 0x3b4   :  { %11268 = vst [vmem:[#allocation222_spill] sm:$0xff] %v9520_v3  ;;  %v11308_v3 = vld [vmem:[#allocation164_spill] sm:$0xff] }
 0x3b5   :  { %6685 = vmatmul.msk.f32.gmra.mxu1 %vm776_vm2, %v9524_v20  ;;  %6768 = vmatmul.msk.f32.gmra.mxu2 %vm776_vm2, %v3120_v45  ;;  %v3553_v36 = vadd.f32 %v9236_v60, %v3022_v49  ;;  %v9560_v45 = vld [vmem:[#allocation2 + $0x2f2] sm:$0xff] }
 0x3b6   :  { %6815 = vmatmul.msk.f32.gmra.mxu3 %vm776_vm2, %v3633_v39  ;;  %v3122_v39 = vld [vmem:[#allocation2 + $0x480] sm:$0xff] }
 0x3b8   :  { %v9532_v61 = vpop.f32.mrf.mxu0  ;;  %v9534_v16 = vpop.f32.mrf.mxu2 }
 0x3b9   :  { %11269 = vst [vmem:[#allocation223_spill] sm:$0xff] %v9532_v61  ;;  %v3934_v57 = vpop.f32.mrf.mxu3  ;;  %v4150_v61 = vld [vmem:[#allocation2 + $0x1c2] sm:$0xff] }
 0x3ba   :  { %v9538_v19 = vadd.f32 %v3934_v57, %v3553_v36  ;;  %v2875_v7 = vpop.f32.mrf.mxu1  ;;  %v2494_v36 = vadd.f32 %v8592_v46, %v1884_v27  ;;  %v11281_v27 = vld [vmem:[#allocation145_spill] sm:$0xff] }
 0x3bb   :  { %6852 = vmatmul.msk.f32.gmra.mxu0 %vm776_vm2, %v9079_v12  ;;  %v3023_v33 = vadd.f32 %v2875_v7, %v2492_v22  ;;  %v2574_v7 = vld [vmem:[#allocation2 + $0x322] sm:$0xff] }
 0x3bc   :  { %11270 = vst [vmem:[#allocation224_spill] sm:$0xff] %v9538_v19  ;;  %v3128_v19 = vld [vmem:[#allocation2 + $0x4e0] sm:$0xff] }
 0x3bd   :  { %6686 = vmatmul.msk.f32.gmra.mxu1 %vm776_vm2, %v9542_v58  ;;  %6769 = vmatmul.msk.f32.gmra.mxu2 %vm776_vm2, %v3121_v48  ;;  %v3554_v12 = vadd.f32 %v9252_v54, %v3023_v33  ;;  %v11275_v33 = vld [vmem:[#allocation140_spill] sm:$0xff] }
 0x3be   :  { %6816 = vmatmul.msk.f32.gmra.mxu3 %vm776_vm2, %v3634_v41  ;;  %v3123_v41 = vld [vmem:[#allocation2 + $0x490] sm:$0xff] }
 0x3c0   :  { %v9550_v29 = vpop.f32.mrf.mxu0  ;;  %v9552_v60 = vpop.f32.mrf.mxu2 }
 0x3c1   :  { %11271 = vst [vmem:[#allocation225_spill] sm:$0xff] %v9550_v29  ;;  %v3937_v34 = vpop.f32.mrf.mxu3  ;;  %v5195_v29 = vld [vmem:[#allocation2 + $0x71] sm:$0xff] }
 0x3c2   :  { %v9556_v42 = vadd.f32 %v3937_v34, %v3554_v12  ;;  %v2878_v47 = vpop.f32.mrf.mxu1 }
 0x3c3   :  { %6853 = vmatmul.msk.f32.gmra.mxu0 %vm776_vm2, %v9097_v32  ;;  %v3024_v49 = vadd.f32 %v2878_v47, %v2493_v17  ;;  %v11279_v47 = vld [vmem:[#allocation23_spill] sm:$0xff] }
 0x3c4   :  { %11272 = vst [vmem:[#allocation226_spill] sm:$0xff] %v9556_v42  ;;  %v11303_v42 = vld [vmem:[#allocation160_spill] sm:$0xff] }
 0x3c5   :  { %6687 = vmatmul.msk.f32.gmra.mxu1 %vm776_vm2, %v9560_v45  ;;  %6770 = vmatmul.msk.f32.gmra.mxu2 %vm776_vm2, %v3122_v39  ;;  %v3555_v32 = vadd.f32 %v9268_v24, %v3024_v49  ;;  %v11277_v24 = vld [vmem:[#allocation3_spill] sm:$0xff] }
 0x3c6   :  { %6817 = vmatmul.msk.f32.gmra.mxu3 %vm776_vm2, %v3635_v21  ;;  %v1887_v15 = vadd.f32 %v11277_v24, %v11276_v18  ;;  %v11285_v24 = vld [vmem:[#allocation26_spill] sm:$0xff] }
 0x3c8   :  { %v9568_v25 = vpop.f32.mrf.mxu0  ;;  %v9570_v54 = vpop.f32.mrf.mxu2  ;;  %v2495_v49 = vadd.f32 %v11279_v47, %v1887_v15  ;;  %v11287_v47 = vld [vmem:[#allocation149_spill] sm:$0xff] }
 0x3c9   :  { %11273 = vst [vmem:[#allocation227_spill] sm:$0xff] %v9568_v25  ;;  %v3940_v10 = vpop.f32.mrf.mxu3  ;;  %v11337_v25 = vld [vmem:[#allocation184_spill] sm:$0xff] }
 0x3ca   :  { %v9574_v57 = vadd.f32 %v3940_v10, %v3555_v32  ;;  %v2881_v22 = vpop.f32.mrf.mxu1  ;;  %v9593_v10 = vld [vmem:[#allocation2 + $0x332] sm:$0xff] }
 0x3cb   :  { %6854 = vmatmul.msk.f32.gmra.mxu0 %vm776_vm2, %v11275_v33  ;;  %v3025_v48 = vadd.f32 %v2881_v22, %v2494_v36  ;;  %v3124_v36 = vld [vmem:[#allocation2 + $0x4a0] sm:$0xff] }
 0x3cc   :  { %11274 = vst [vmem:[#allocation228_spill] sm:$0xff] %v9574_v57  ;;  %v3637_v22 = vld [vmem:[#allocation2 + $0x341] sm:$0xff]  ;;  %v3127_v57 = vld [vmem:[#allocation2 + $0x4d0] sm:$0xff] }
 0x3cd   :  { %6688 = vmatmul.msk.f32.gmra.mxu1 %vm776_vm2, %v2574_v7  ;;  %6771 = vmatmul.msk.f32.gmra.mxu2 %vm776_vm2, %v3123_v41  ;;  %v3556_v34 = vadd.f32 %v9283_v59, %v3025_v48  ;;  %v11282_v59 = vld [vmem:[#allocation24_spill] sm:$0xff] }
 0x3ce   :  { %6818 = vmatmul.msk.f32.gmra.mxu3 %vm776_vm2, %v3636_v13  ;;  %v11283_v7 = vld [vmem:[#allocation4_spill] sm:$0xff] }
 0x3cf   :  { %v1890_v33 = vadd.f32 %v11283_v7, %v11282_v59 }
 0x3d0   :  { %v9583_v46 = vpop.f32.mrf.mxu0  ;;  %v9585_v12 = vpop.f32.mrf.mxu2 }
 0x3d1   :  { %11278 = vst [vmem:[#allocation140_spill] sm:$0xff] %v9583_v46  ;;  %v3943_v17 = vpop.f32.mrf.mxu3  ;;  %v2496_v15 = vadd.f32 %v11285_v24, %v1890_v33  ;;  %v5194_v46 = vld [vmem:[#allocation2 + $0x61] sm:$0xff] }
 0x3d2   :  { %v9589_v39 = vadd.f32 %v3943_v17, %v3556_v34  ;;  %v2884_v21 = vpop.f32.mrf.mxu1 }
 0x3d3   :  { %6855 = vmatmul.msk.f32.gmra.mxu0 %vm776_vm2, %v11281_v27  ;;  %v3026_v32 = vadd.f32 %v2884_v21, %v2495_v49  ;;  %v9611_v21 = vld [vmem:[#allocation2 + $0x342] sm:$0xff]  ;;  %v3125_v27 = vld [vmem:[#allocation2 + $0x4b0] sm:$0xff] }
 0x3d4   :  { %11280 = vst [vmem:[#allocation21_spill] sm:$0xff] %v9589_v39  ;;  %v4142_v39 = vld [vmem:[#allocation2 + $0x122] sm:$0xff] }
 0x3d5   :  { %6689 = vmatmul.msk.f32.gmra.mxu1 %vm776_vm2, %v9593_v10  ;;  %6772 = vmatmul.msk.f32.gmra.mxu2 %vm776_vm2, %v3124_v36  ;;  %v3557_v13 = vadd.f32 %v9299_v62, %v3026_v32  ;;  %v3638_v36 = vld [vmem:[#allocation2 + $0x351] sm:$0xff]  ;;  %v11288_v62 = vld [vmem:[#allocation27_spill] sm:$0xff] }
 0x3d6   :  { %6819 = vmatmul.msk.f32.gmra.mxu3 %vm776_vm2, %v3637_v22  ;;  %v11289_v32 = vld [vmem:[#allocation5_spill] sm:$0xff] }
 0x3d7   :  { %v1893_v22 = vadd.f32 %v11289_v32, %v11288_v62  ;;  %v3639_v62 = vld [vmem:[#allocation2 + $0x361] sm:$0xff] }
 0x3d8   :  { %v9601_v48 = vpop.f32.mrf.mxu0  ;;  %v9603_v41 = vpop.f32.mrf.mxu2 }
 0x3d9   :  { %11284 = vst [vmem:[#allocation3_spill] sm:$0xff] %v9601_v48  ;;  %v3946_v18 = vpop.f32.mrf.mxu3  ;;  %v11331_v48 = vld [vmem:[#allocation180_spill] sm:$0xff] }
 0x3da   :  { %v9607_v34 = vadd.f32 %v3946_v18, %v3557_v13  ;;  %v2887_v17 = vpop.f32.mrf.mxu1  ;;  %v11291_v18 = vld [vmem:[#allocation29_spill] sm:$0xff] }
 0x3db   :  { %6856 = vmatmul.msk.f32.gmra.mxu0 %vm776_vm2, %v11287_v47  ;;  %v3027_v49 = vadd.f32 %v2887_v17, %v2496_v15  ;;  %v2497_v24 = vadd.f32 %v11291_v18, %v1893_v22  ;;  %v11293_v47 = vld [vmem:[#allocation153_spill] sm:$0xff] }
 0x3dc   :  { %11286 = vst [vmem:[#allocation23_spill] sm:$0xff] %v9607_v34  ;;  %v3126_v34 = vld [vmem:[#allocation2 + $0x4c0] sm:$0xff] }
 0x3dd   :  { %6690 = vmatmul.msk.f32.gmra.mxu1 %vm776_vm2, %v9611_v21  ;;  %6773 = vmatmul.msk.f32.gmra.mxu2 %vm776_vm2, %v3125_v27  ;;  %v3558_v33 = vadd.f32 %v9312_v6, %v3027_v49  ;;  %v11294_v6 = vld [vmem:[#allocation30_spill] sm:$0xff] }
 0x3de   :  { %6820 = vmatmul.msk.f32.gmra.mxu3 %vm776_vm2, %v3638_v36  ;;  %v9629_v36 = vld [vmem:[#allocation2 + $0x352] sm:$0xff] }
 0x3df   :  { %v11295_v49 = vld [vmem:[#allocation6_spill] sm:$0xff] }
 0x3e0   :  { %v9619_v59 = vpop.f32.mrf.mxu0  ;;  %v9621_v7 = vpop.f32.mrf.mxu2  ;;  %v1896_v32 = vadd.f32 %v11295_v49, %v11294_v6  ;;  %v3640_v6 = vld [vmem:[#allocation2 + $0x371] sm:$0xff] }
 0x3e1   :  { %11290 = vst [vmem:[#allocation145_spill] sm:$0xff] %v9619_v59  ;;  %v3949_v13 = vpop.f32.mrf.mxu3  ;;  %v5193_v59 = vld [vmem:[#allocation2 + $0x51] sm:$0xff] }
 0x3e2   :  { %v9625_v15 = vadd.f32 %v3949_v13, %v3558_v33  ;;  %v2890_v17 = vpop.f32.mrf.mxu1 }
 0x3e3   :  { %6857 = vmatmul.msk.f32.gmra.mxu0 %vm776_vm2, %v11293_v47  ;;  %v3028_v27 = vadd.f32 %v2890_v17, %v2497_v24  ;;  %v11297_v24 = vld [vmem:[#allocation32_spill] sm:$0xff] }
 0x3e4   :  { %11292 = vst [vmem:[#allocation24_spill] sm:$0xff] %v9625_v15  ;;  %v2498_v17 = vadd.f32 %v11297_v24, %v1896_v32 }
 0x3e5   :  { %6691 = vmatmul.msk.f32.gmra.mxu1 %vm776_vm2, %v9629_v36  ;;  %6774 = vmatmul.msk.f32.gmra.mxu2 %vm776_vm2, %v3126_v34  ;;  %v3559_v13 = vadd.f32 %v9331_v56, %v3028_v27  ;;  %v11299_v56 = vld [vmem:[#allocation33_spill] sm:$0xff]  ;;  %v11300_v27 = vld [vmem:[#allocation7_spill] sm:$0xff] }
 0x3e6   :  { %6821 = vmatmul.msk.f32.gmra.mxu3 %vm776_vm2, %v3639_v62  ;;  %v9646_v62 = vld [vmem:[#allocation2 + $0x362] sm:$0xff]  ;;  %v1899_v49 = vadd.f32 %v11300_v27, %v11299_v56 }
 0x3e7   :  { %v11305_v56 = vld [vmem:[#allocation8_spill] sm:$0xff] }
 0x3e8   :  { %v9637_v22 = vpop.f32.mrf.mxu0  ;;  %v9639_v33 = vpop.f32.mrf.mxu2 }
 0x3e9   :  { %11296 = vst [vmem:[#allocation4_spill] sm:$0xff] %v9637_v22  ;;  %v3952_v18 = vpop.f32.mrf.mxu3  ;;  %v11319_v22 = vld [vmem:[#allocation172_spill] sm:$0xff] }
 0x3ea   :  { %v9643_v47 = vadd.f32 %v3952_v18, %v3559_v13  ;;  %v2893_v15 = vpop.f32.mrf.mxu1  ;;  %v11301_v18 = vld [vmem:[#allocation35_spill] sm:$0xff] }
 0x3eb   :  { %6858 = vmatmul.msk.f32.gmra.mxu0 %vm776_vm2, %v4142_v39  ;;  %v3029_v34 = vadd.f32 %v2893_v15, %v2498_v17  ;;  %v2499_v24 = vadd.f32 %v11301_v18, %v1899_v49 }
 0x3ec   :  { %11298 = vst [vmem:[#allocation26_spill] sm:$0xff] %v9643_v47 }
 0x3ed   :  { %6692 = vmatmul.msk.f32.gmra.mxu1 %vm776_vm2, %v9646_v62  ;;  %6775 = vmatmul.msk.f32.gmra.mxu2 %vm776_vm2, %v3127_v57  ;;  %v3560_v13 = vadd.f32 %v9347_v38, %v3029_v34  ;;  %v3641_v38 = vld [vmem:[#allocation2 + $0x381] sm:$0xff] }
 0x3ee   :  { %6822 = vmatmul.msk.f32.gmra.mxu3 %vm776_vm2, %v3640_v6  ;;  %v9664_v6 = vld [vmem:[#allocation2 + $0x372] sm:$0xff]  ;;  %v11304_v34 = vld [vmem:[#allocation36_spill] sm:$0xff] }
 0x3ef   :  { %v1902_v27 = vadd.f32 %v11305_v56, %v11304_v34  ;;  %v3642_v34 = vld [vmem:[#allocation2 + $0x391] sm:$0xff] }
 0x3f0   :  { %v9654_v32 = vpop.f32.mrf.mxu2  ;;  %v9657_v39 = vpop.f32.mrf.mxu0 }
 0x3f1   :  { %v3955_v15 = vpop.f32.mrf.mxu3 }
 0x3f2   :  { %v9660_v17 = vadd.f32 %v3955_v15, %v3560_v13  ;;  %v2896_v47 = vpop.f32.mrf.mxu1  ;;  %v11306_v15 = vld [vmem:[#allocation38_spill] sm:$0xff] }
 0x3f3   :  { %6859 = vmatmul.msk.f32.gmra.mxu0 %vm776_vm2, %v11303_v42  ;;  %v3030_v57 = vadd.f32 %v2896_v47, %v2499_v24  ;;  %v2500_v18 = vadd.f32 %v11306_v15, %v1902_v27 }
 0x3f4   :  { %11302 = vst [vmem:[#allocation149_spill] sm:$0xff] %v9660_v17 }
 0x3f5   :  { %6693 = vmatmul.msk.f32.gmra.mxu1 %vm776_vm2, %v9664_v6  ;;  %6776 = vmatmul.msk.f32.gmra.mxu2 %vm776_vm2, %v3128_v19  ;;  %v3561_v13 = vadd.f32 %v9363_v43, %v3030_v57  ;;  %v11309_v43 = vld [vmem:[#allocation39_spill] sm:$0xff]  ;;  %v11310_v57 = vld [vmem:[#allocation9_spill] sm:$0xff] }
 0x3f6   :  { %6823 = vmatmul.msk.f32.gmra.mxu3 %vm776_vm2, %v3641_v38  ;;  %v9682_v38 = vld [vmem:[#allocation2 + $0x382] sm:$0xff]  ;;  %v1905_v56 = vadd.f32 %v11310_v57, %v11309_v43 }
 0x3f7   :  { %v3643_v43 = vld [vmem:[#allocation2 + $0x3a1] sm:$0xff] }
 0x3f8   :  { %v9672_v49 = vpop.f32.mrf.mxu2  ;;  %v9675_v42 = vpop.f32.mrf.mxu0 }
 0x3f9   :  { %v3958_v47 = vpop.f32.mrf.mxu3 }
 0x3fa   :  { %v9678_v24 = vadd.f32 %v3958_v47, %v3561_v13  ;;  %v2899_v17 = vpop.f32.mrf.mxu1  ;;  %v11311_v47 = vld [vmem:[#allocation41_spill] sm:$0xff] }
 0x3fb   :  { %6860 = vmatmul.msk.f32.gmra.mxu0 %vm776_vm2, %v11308_v3  ;;  %v3031_v19 = vadd.f32 %v2899_v17, %v2500_v18  ;;  %v2501_v15 = vadd.f32 %v11311_v47, %v1905_v56  ;;  %v11317_v47 = vld [vmem:[#allocation44_spill] sm:$0xff] }
 0x3fc   :  { %11307 = vst [vmem:[#allocation27_spill] sm:$0xff] %v9678_v24 }
 0x3fd   :  { %6694 = vmatmul.msk.f32.gmra.mxu1 %vm776_vm2, %v9682_v38  ;;  %6973 = vmatmul.msk.f32.vlgmr.msra.gmra.mxu2 %vm776_vm2, %v5190_v11  ;;  %v3562_v13 = vadd.f32 %v9379_v1, %v3031_v19  ;;  %v11314_v1 = vld [vmem:[#allocation42_spill] sm:$0xff] }
 0x3fe   :  { %6824 = vmatmul.msk.f32.gmra.mxu3 %vm776_vm2, %v3642_v34  ;;  %v9700_v34 = vld [vmem:[#allocation2 + $0x392] sm:$0xff] }
 0x3ff   :  { %v11315_v19 = vld [vmem:[#allocation10_spill] sm:$0xff] }
 0x400   :  { %v9690_v27 = vpop.f32.mrf.mxu2  ;;  %v9693_v3 = vpop.f32.mrf.mxu0  ;;  %v1908_v57 = vadd.f32 %v11315_v19, %v11314_v1  ;;  %v3644_v1 = vld [vmem:[#allocation2 + $0x3d1] sm:$0xff]  ;;  %v11321_v19 = vld [vmem:[#allocation11_spill] sm:$0xff] }
 0x401   :  { %v3961_v17 = vpop.f32.mrf.mxu3 }
 0x402   :  { %v9696_v18 = vadd.f32 %v3961_v17, %v3562_v13  ;;  %v2902_v24 = vpop.f32.mrf.mxu1  ;;  %v11316_v13 = vld [vmem:[#allocation209_spill] sm:$0xff] }
 0x403   :  { %6861 = vmatmul.msk.f32.gmra.mxu0 %vm776_vm2, %v11313_v30  ;;  %v3032_v11 = vadd.f32 %v2902_v24, %v2501_v15  ;;  %v2502_v15 = vadd.f32 %v11317_v47, %v1908_v57 }
 0x404   :  { %11312 = vst [vmem:[#allocation5_spill] sm:$0xff] %v9696_v18 }
 0x405   :  { %6695 = vmatmul.msk.f32.gmra.mxu1 %vm776_vm2, %v9700_v34  ;;  %6974 = vmatmul.msk.f32.gmra.mxu2 %vm776_vm2, %v5191_v52  ;;  %v3563_v17 = vadd.f32 %v11316_v13, %v3032_v11  ;;  %v11320_v11 = vld [vmem:[#allocation45_spill] sm:$0xff] }
 0x406   :  { %6825 = vmatmul.msk.f32.gmra.mxu3 %vm776_vm2, %v3643_v43  ;;  %v5192_v43 = vld [vmem:[#allocation2 + $0x41] sm:$0xff]  ;;  %v1911_v13 = vadd.f32 %v11321_v19, %v11320_v11 }
 0x407   :  { %v3645_v11 = vld [vmem:[#allocation2 + $0x3e1] sm:$0xff] }
 0x408   :  { %v9708_v56 = vpop.f32.mrf.mxu2  ;;  %v9711_v30 = vpop.f32.mrf.mxu0 }
 0x409   :  { %v3964_v24 = vpop.f32.mrf.mxu3 }
 0x40a   :  { %v9714_v18 = vadd.f32 %v3964_v24, %v3563_v17  ;;  %v2905_v50 = vpop.f32.mrf.mxu1 }
 0x40b   :  { %6862 = vmatmul.msk.f32.gmra.mxu0 %vm776_vm2, %v11319_v22  ;;  %v3033_v52 = vadd.f32 %v2905_v50, %v2502_v15  ;;  %v11323_v22 = vld [vmem:[#allocation47_spill] sm:$0xff] }
 0x40c   :  { %11318 = vst [vmem:[#allocation29_spill] sm:$0xff] %v9714_v18  ;;  %v2503_v50 = vadd.f32 %v11323_v22, %v1911_v13  ;;  %v11325_v18 = vld [vmem:[#allocation176_spill] sm:$0xff]  ;;  %v11329_v22 = vld [vmem:[#allocation50_spill] sm:$0xff] }
 0x40d   :  { %6696 = vmatmul.msk.f32.gmra.mxu1 %vm776_vm2, %v2582_v14  ;;  %6975 = vmatmul.msk.f32.gmra.mxu2 %vm776_vm2, %v5192_v43  ;;  %v3564_v17 = vadd.f32 %v9413_v31, %v3033_v52  ;;  %v11326_v31 = vld [vmem:[#allocation48_spill] sm:$0xff] }
 0x40e   :  { %6826 = vmatmul.msk.f32.gmra.mxu3 %vm776_vm2, %v3644_v1  ;;  %v9733_v1 = vld [vmem:[#allocation2 + $0x3d2] sm:$0xff]  ;;  %v11327_v52 = vld [vmem:[#allocation12_spill] sm:$0xff] }
 0x40f   :  { %v1914_v19 = vadd.f32 %v11327_v52, %v11326_v31  ;;  %v3646_v31 = vld [vmem:[#allocation2 + $0x3f1] sm:$0xff] }
 0x410   :  { %v9723_v57 = vpop.f32.mrf.mxu2  ;;  %v9726_v24 = vpop.f32.mrf.mxu0 }
 0x411   :  { %11322 = vst [vmem:[#allocation153_spill] sm:$0xff] %v9726_v24  ;;  %v3967_v47 = vpop.f32.mrf.mxu3  ;;  %v11365_v24 = vld [vmem:[#allocation203_spill] sm:$0xff] }
 0x412   :  { %v9729_v15 = vadd.f32 %v3967_v47, %v3564_v17  ;;  %v2908_v14 = vpop.f32.mrf.mxu1 }
 0x413   :  { %6863 = vmatmul.msk.f32.gmra.mxu0 %vm776_vm2, %v11325_v18  ;;  %v3034_v43 = vadd.f32 %v2908_v14, %v2503_v50  ;;  %v2504_v50 = vadd.f32 %v11329_v22, %v1914_v19 }
 0x414   :  { %11324 = vst [vmem:[#allocation30_spill] sm:$0xff] %v9729_v15 }
 0x415   :  { %6697 = vmatmul.msk.f32.gmra.mxu1 %vm776_vm2, %v9733_v1  ;;  %6976 = vmatmul.msk.f32.gmra.mxu2 %vm776_vm2, %v5193_v59  ;;  %v3565_v17 = vadd.f32 %v9430_v37, %v3034_v43  ;;  %v11332_v37 = vld [vmem:[#allocation51_spill] sm:$0xff]  ;;  %v11333_v43 = vld [vmem:[#allocation13_spill] sm:$0xff] }
 0x416   :  { %6827 = vmatmul.msk.f32.gmra.mxu3 %vm776_vm2, %v3645_v11  ;;  %v9751_v11 = vld [vmem:[#allocation2 + $0x3e2] sm:$0xff]  ;;  %v1917_v52 = vadd.f32 %v11333_v43, %v11332_v37 }
 0x417   :  { %v3647_v37 = vld [vmem:[#allocation2 + $0x401] sm:$0xff] }
 0x418   :  { %v9741_v13 = vpop.f32.mrf.mxu2  ;;  %v9744_v18 = vpop.f32.mrf.mxu0 }
 0x419   :  { %11328 = vst [vmem:[#allocation6_spill] sm:$0xff] %v9744_v18  ;;  %v3970_v47 = vpop.f32.mrf.mxu3  ;;  %v11359_v18 = vld [vmem:[#allocation199_spill] sm:$0xff] }
 0x41a   :  { %v9747_v14 = vadd.f32 %v3970_v47, %v3565_v17  ;;  %v2911_v15 = vpop.f32.mrf.mxu1  ;;  %v11335_v47 = vld [vmem:[#allocation53_spill] sm:$0xff] }
 0x41b   :  { %6864 = vmatmul.msk.f32.gmra.mxu0 %vm776_vm2, %v11331_v48  ;;  %v3035_v59 = vadd.f32 %v2911_v15, %v2504_v50  ;;  %v2505_v22 = vadd.f32 %v11335_v47, %v1917_v52 }
 0x41c   :  { %11330 = vst [vmem:[#allocation32_spill] sm:$0xff] %v9747_v14 }
 0x41d   :  { %6698 = vmatmul.msk.f32.gmra.mxu1 %vm776_vm2, %v9751_v11  ;;  %6977 = vmatmul.msk.f32.gmra.mxu2 %vm776_vm2, %v5194_v46  ;;  %v3566_v17 = vadd.f32 %v9445_v63, %v3035_v59  ;;  %v11338_v63 = vld [vmem:[#allocation54_spill] sm:$0xff] }
 0x41e   :  { %6828 = vmatmul.msk.f32.gmra.mxu3 %vm776_vm2, %v3646_v31  ;;  %v9769_v31 = vld [vmem:[#allocation2 + $0x3f2] sm:$0xff] }
 0x41f   :  { %v11339_v59 = vld [vmem:[#allocation14_spill] sm:$0xff] }
 0x420   :  { %v9759_v19 = vpop.f32.mrf.mxu2  ;;  %v9762_v48 = vpop.f32.mrf.mxu0  ;;  %v1920_v43 = vadd.f32 %v11339_v59, %v11338_v63  ;;  %v3648_v63 = vld [vmem:[#allocation2 + $0x411] sm:$0xff] }
 0x421   :  { %11334 = vst [vmem:[#allocation33_spill] sm:$0xff] %v9762_v48  ;;  %v3973_v15 = vpop.f32.mrf.mxu3  ;;  %v5196_v48 = vld [vmem:[#allocation2 + $0x81] sm:$0xff] }
 0x422   :  { %v9765_v50 = vadd.f32 %v3973_v15, %v3566_v17  ;;  %v2914_v14 = vpop.f32.mrf.mxu1 }
 0x423   :  { %6865 = vmatmul.msk.f32.gmra.mxu0 %vm776_vm2, %v11337_v25  ;;  %v3036_v46 = vadd.f32 %v2914_v14, %v2505_v22  ;;  %v11340_v14 = vld [vmem:[#allocation56_spill] sm:$0xff] }
 0x424   :  { %11336 = vst [vmem:[#allocation7_spill] sm:$0xff] %v9765_v50  ;;  %v2506_v15 = vadd.f32 %v11340_v14, %v1920_v43 }
 0x425   :  { %6699 = vmatmul.msk.f32.gmra.mxu1 %vm776_vm2, %v9769_v31  ;;  %6978 = vmatmul.msk.f32.gmra.mxu2 %vm776_vm2, %v5195_v29  ;;  %v3567_v17 = vadd.f32 %v9463_v4, %v3036_v46  ;;  %v11343_v4 = vld [vmem:[#allocation57_spill] sm:$0xff]  ;;  %v11344_v46 = vld [vmem:[#allocation15_spill] sm:$0xff] }
 0x426   :  { %6829 = vmatmul.msk.f32.gmra.mxu3 %vm776_vm2, %v3647_v37  ;;  %v9786_v37 = vld [vmem:[#allocation2 + $0x402] sm:$0xff]  ;;  %v1923_v59 = vadd.f32 %v11344_v46, %v11343_v4 }
 0x427   :  { %v3649_v4 = vld [vmem:[#allocation2 + $0x421] sm:$0xff] }
 0x428   :  { %v9777_v52 = vpop.f32.mrf.mxu2  ;;  %v9783_v22 = vpop.f32.mrf.mxu0 }
 0x429   :  { %v3976_v25 = vpop.f32.mrf.mxu3  ;;  %11342 = vst [vmem:[#allocation160_spill] sm:$0xff] %v9783_v22  ;;  %v11347_v22 = vld [vmem:[#allocation191_spill] sm:$0xff] }
 0x42a   :  { %v9781_v47 = vadd.f32 %v3976_v25, %v3567_v17  ;;  %v2917_v50 = vpop.f32.mrf.mxu1 }
 0x42b   :  { %6866 = vmatmul.msk.f32.gmra.mxu0 %vm776_vm2, %v4150_v61  ;;  %v3037_v29 = vadd.f32 %v2917_v50, %v2506_v15  ;;  %v11345_v50 = vld [vmem:[#allocation59_spill] sm:$0xff] }
 0x42c   :  { %11341 = vst [vmem:[#allocation35_spill] sm:$0xff] %v9781_v47  ;;  %v2507_v25 = vadd.f32 %v11345_v50, %v1923_v59  ;;  %v5197_v47 = vld [vmem:[#allocation2 + $0x91] sm:$0xff] }
 0x42d   :  { %6700 = vmatmul.msk.f32.gmra.mxu1 %vm776_vm2, %v9786_v37  ;;  %6979 = vmatmul.msk.f32.gmra.mxu2 %vm776_vm2, %v5196_v48  ;;  %v3568_v17 = vadd.f32 %v9481_v0, %v3037_v29  ;;  %v11349_v0 = vld [vmem:[#allocation60_spill] sm:$0xff] }
 0x42e   :  { %6830 = vmatmul.msk.f32.gmra.mxu3 %vm776_vm2, %v3648_v63  ;;  %v11350_v29 = vld [vmem:[#allocation16_spill] sm:$0xff] }
 0x42f   :  { %v1926_v46 = vadd.f32 %v11350_v29, %v11349_v0  ;;  %v3650_v0 = vld [vmem:[#allocation2 + $0x431] sm:$0xff] }
 0x430   :  { %v9794_v43 = vpop.f32.mrf.mxu2  ;;  %v9802_v48 = vpop.f32.mrf.mxu0  ;;  %v11356_v29 = vld [vmem:[#allocation17_spill] sm:$0xff] }
 0x431   :  { %v3979_v61 = vpop.f32.mrf.mxu3  ;;  %11348 = vst [vmem:[#allocation8_spill] sm:$0xff] %v9802_v48 }
 0x432   :  { %v9798_v14 = vadd.f32 %v3979_v61, %v3568_v17  ;;  %v2920_v15 = vpop.f32.mrf.mxu1  ;;  %v11351_v61 = vld [vmem:[#allocation62_spill] sm:$0xff] }
 0x433   :  { %6867 = vmatmul.msk.f32.gmra.mxu0 %vm776_vm2, %v11347_v22  ;;  %v3038_v63 = vadd.f32 %v2920_v15, %v2507_v25  ;;  %v2508_v50 = vadd.f32 %v11351_v61, %v1926_v46  ;;  %v11357_v61 = vld [vmem:[#allocation65_spill] sm:$0xff] }
 0x434   :  { %11346 = vst [vmem:[#allocation36_spill] sm:$0xff] %v9798_v14  ;;  %v11353_v14 = vld [vmem:[#allocation195_spill] sm:$0xff] }
 0x435   :  { %6701 = vmatmul.msk.f32.gmra.mxu1 %vm776_vm2, %v9804_v9  ;;  %6980 = vmatmul.msk.f32.gmra.mxu2 %vm776_vm2, %v5197_v47  ;;  %v3569_v22 = vadd.f32 %v9499_v44, %v3038_v63  ;;  %v9820_v47 = vld [vmem:[#allocation2 + $0x422] sm:$0xff] }
 0x436   :  { %6831 = vmatmul.msk.f32.gmra.mxu3 %vm776_vm2, %v3649_v4  ;;  %v5198_v4 = vld [vmem:[#allocation2 + $0xc1] sm:$0xff] }
 0x437   :  { %v11355_v63 = vld [vmem:[#allocation63_spill] sm:$0xff] }
 0x438   :  { %v9812_v59 = vpop.f32.mrf.mxu2  ;;  %v9825_v44 = vpop.f32.mrf.mxu0  ;;  %v1929_v46 = vadd.f32 %v11356_v29, %v11355_v63  ;;  %v3651_v63 = vld [vmem:[#allocation2 + $0x441] sm:$0xff] }
 0x439   :  { %v3982_v17 = vpop.f32.mrf.mxu3  ;;  %11354 = vst [vmem:[#allocation164_spill] sm:$0xff] %v9825_v44  ;;  %v9838_v44 = vld [vmem:[#allocation2 + $0x432] sm:$0xff] }
 0x43a   :  { %v9816_v25 = vadd.f32 %v3982_v17, %v3569_v22  ;;  %v2923_v15 = vpop.f32.mrf.mxu1 }
 0x43b   :  { %6868 = vmatmul.msk.f32.gmra.mxu0 %vm776_vm2, %v11353_v14  ;;  %v3039_v48 = vadd.f32 %v2923_v15, %v2508_v50  ;;  %v2509_v50 = vadd.f32 %v11357_v61, %v1929_v46 }
 0x43c   :  { %11352 = vst [vmem:[#allocation38_spill] sm:$0xff] %v9816_v25 }
 0x43d   :  { %6702 = vmatmul.msk.f32.gmra.mxu1 %vm776_vm2, %v9820_v47  ;;  %6981 = vmatmul.msk.f32.gmra.mxu2 %vm776_vm2, %v5198_v4  ;;  %v3570_v14 = vadd.f32 %v9516_v5, %v3039_v48  ;;  %v11360_v5 = vld [vmem:[#allocation66_spill] sm:$0xff] }
 0x43e   :  { %6832 = vmatmul.msk.f32.gmra.mxu3 %vm776_vm2, %v3650_v0  ;;  %v5199_v0 = vld [vmem:[#allocation2 + $0xd1] sm:$0xff] }
 0x43f   :  { %v11361_v48 = vld [vmem:[#allocation18_spill] sm:$0xff] }
 0x440   :  { %v9830_v22 = vpop.f32.mrf.mxu2  ;;  %v1932_v29 = vadd.f32 %v11361_v48, %v11360_v5  ;;  %v9846_v46 = vpop.f32.mrf.mxu0  ;;  %v3652_v5 = vld [vmem:[#allocation2 + $0x471] sm:$0xff] }
 0x441   :  { %v3985_v17 = vpop.f32.mrf.mxu3  ;;  %11362 = vst [vmem:[#allocation9_spill] sm:$0xff] %v9846_v46  ;;  %v5201_v46 = vld [vmem:[#allocation2 + $0xf1] sm:$0xff] }
 0x442   :  { %v9834_v15 = vadd.f32 %v3985_v17, %v3570_v14  ;;  %v2926_v25 = vpop.f32.mrf.mxu1  ;;  %v11363_v17 = vld [vmem:[#allocation68_spill] sm:$0xff] }
 0x443   :  { %6869 = vmatmul.msk.f32.gmra.mxu0 %vm776_vm2, %v11359_v18  ;;  %v3040_v4 = vadd.f32 %v2926_v25, %v2509_v50  ;;  %v2510_v61 = vadd.f32 %v11363_v17, %v1932_v29  ;;  %v11368_v17 = vld [vmem:[#allocation71_spill] sm:$0xff] }
 0x444   :  { %11358 = vst [vmem:[#allocation39_spill] sm:$0xff] %v9834_v15 }
 0x445   :  { %6703 = vmatmul.msk.f32.gmra.mxu1 %vm776_vm2, %v9838_v44  ;;  %6982 = vmatmul.msk.f32.gmra.mxu2 %vm776_vm2, %v5199_v0  ;;  %v3571_v18 = vadd.f32 %v9534_v16, %v3040_v4  ;;  %v11366_v16 = vld [vmem:[#allocation69_spill] sm:$0xff]  ;;  %v11367_v4 = vld [vmem:[#allocation19_spill] sm:$0xff] }
 0x446   :  { %6833 = vmatmul.msk.f32.gmra.mxu3 %vm776_vm2, %v3651_v63  ;;  %v5200_v63 = vld [vmem:[#allocation2 + $0xe1] sm:$0xff]  ;;  %v1935_v48 = vadd.f32 %v11367_v4, %v11366_v16 }
 0x447   :  { %v3653_v16 = vld [vmem:[#allocation2 + $0x481] sm:$0xff] }
 0x448   :  { %v9848_v14 = vpop.f32.mrf.mxu2 }
 0x449   :  { %v3988_v25 = vpop.f32.mrf.mxu3 }
 0x44a   :  { %v9852_v50 = vadd.f32 %v3988_v25, %v3571_v18  ;;  %v2929_v15 = vpop.f32.mrf.mxu1 }
 0x44b   :  { %6870 = vmatmul.msk.f32.gmra.mxu0 %vm776_vm2, %v11365_v24  ;;  %v3041_v0 = vadd.f32 %v2929_v15, %v2510_v61  ;;  %v9865_v24 = vpop.f32.mrf.mxu0  ;;  %v11371_v61 = vld [vmem:[#allocation207_spill] sm:$0xff] }
 0x44c   :  { %11364 = vst [vmem:[#allocation41_spill] sm:$0xff] %v9852_v50  ;;  %v2511_v50 = vadd.f32 %v11368_v17, %v1935_v48 }
 0x44d   :  { %6704 = vmatmul.msk.f32.gmra.mxu1 %vm776_vm2, %v2590_v40  ;;  %6983 = vmatmul.msk.f32.gmra.mxu2 %vm776_vm2, %v5200_v63  ;;  %v3572_v18 = vadd.f32 %v9552_v60, %v3041_v0  ;;  %11369 = vst [vmem:[#allocation168_spill] sm:$0xff] %v9865_v24  ;;  %v11373_v60 = vld [vmem:[#allocation72_spill] sm:$0xff] }
 0x44e   :  { %6834 = vmatmul.msk.f32.gmra.mxu3 %vm776_vm2, %v3652_v5  ;;  %v9871_v5 = vld [vmem:[#allocation2 + $0x472] sm:$0xff]  ;;  %v11374_v0 = vld [vmem:[#allocation20_spill] sm:$0xff] }
 0x44f   :  { %11372 = vst [vmem:[#allocation10_spill] sm:$0xff] %v9871_v5  ;;  %v1938_v4 = vadd.f32 %v11374_v0, %v11373_v60  ;;  %v3654_v60 = vld [vmem:[#allocation2 + $0x491] sm:$0xff] }
 0x450   :  { %v9861_v29 = vpop.f32.mrf.mxu2 }
 0x451   :  { %v3991_v25 = vpop.f32.mrf.mxu3 }
 0x452   :  { %v9867_v15 = vadd.f32 %v3991_v25, %v3572_v18  ;;  %v2932_v40 = vpop.f32.mrf.mxu1 }
 0x453   :  { %6871 = vmatmul.msk.f32.gmra.mxu0 %vm776_vm2, %v11371_v61  ;;  %v3042_v63 = vadd.f32 %v2932_v40, %v2511_v50  ;;  %v11375_v50 = vld [vmem:[#allocation74_spill] sm:$0xff]  ;;  %v9887_v24 = vpop.f32.mrf.mxu0 }
 0x454   :  { %11370 = vst [vmem:[#allocation42_spill] sm:$0xff] %v9867_v15  ;;  %v2512_v17 = vadd.f32 %v11375_v50, %v1938_v4  ;;  %v11377_v15 = vld [vmem:[#allocation212_spill] sm:$0xff] }
 0x455   :  { %6705 = vmatmul.msk.f32.gmra.mxu1 %vm776_vm2, %v9871_v5  ;;  %6984 = vmatmul.msk.f32.gmra.mxu2 %vm776_vm2, %v5201_v46  ;;  %v3573_v18 = vadd.f32 %v9570_v54, %v3042_v63  ;;  %11378 = vst [vmem:[#allocation44_spill] sm:$0xff] %v9887_v24  ;;  %v5202_v5 = vld [vmem:[#allocation2 + $0x101] sm:$0xff]  ;;  %v11380_v63 = vld [vmem:[#allocation22_spill] sm:$0xff] }
 0x456   :  { %6835 = vmatmul.msk.f32.gmra.mxu3 %vm776_vm2, %v3653_v16  ;;  %v9889_v16 = vld [vmem:[#allocation2 + $0x482] sm:$0xff] }
 0x457   :  { %v11379_v54 = vld [vmem:[#allocation75_spill] sm:$0xff] }
 0x458   :  { %v9879_v48 = vpop.f32.mrf.mxu2  ;;  %v1941_v0 = vadd.f32 %v11380_v63, %v11379_v54  ;;  %v3655_v54 = vld [vmem:[#allocation2 + $0x4a1] sm:$0xff]  ;;  %v11385_v63 = vld [vmem:[#allocation25_spill] sm:$0xff] }
 0x459   :  { %v3994_v25 = vpop.f32.mrf.mxu3  ;;  %v4158_v24 = vld [vmem:[#allocation2 + $0x262] sm:$0xff] }
 0x45a   :  { %v9883_v40 = vadd.f32 %v3994_v25, %v3573_v18  ;;  %v2935_v61 = vpop.f32.mrf.mxu1  ;;  %v11381_v25 = vld [vmem:[#allocation77_spill] sm:$0xff] }
 0x45b   :  { %6872 = vmatmul.msk.f32.gmra.mxu0 %vm776_vm2, %v11377_v15  ;;  %v3043_v46 = vadd.f32 %v2935_v61, %v2512_v17  ;;  %v2513_v50 = vadd.f32 %v11381_v25, %v1941_v0  ;;  %v11386_v25 = vld [vmem:[#allocation80_spill] sm:$0xff] }
 0x45c   :  { %11376 = vst [vmem:[#allocation209_spill] sm:$0xff] %v9883_v40 }
 0x45d   :  { %6706 = vmatmul.msk.f32.gmra.mxu1 %vm776_vm2, %v9889_v16  ;;  %6985 = vmatmul.msk.f32.gmra.mxu2 %vm776_vm2, %v5202_v5  ;;  %v3574_v15 = vadd.f32 %v9585_v12, %v3043_v46  ;;  %v9905_v5 = vld [vmem:[#allocation2 + $0x492] sm:$0xff]  ;;  %v9910_v12 = vpop.f32.mrf.mxu0 }
 0x45e   :  { %6836 = vmatmul.msk.f32.gmra.mxu3 %vm776_vm2, %v3654_v60  ;;  %v5203_v60 = vld [vmem:[#allocation2 + $0x111] sm:$0xff]  ;;  %11383 = vst [vmem:[#allocation45_spill] sm:$0xff] %v9910_v12  ;;  %v9922_v12 = vld [vmem:[#allocation2 + $0x4a2] sm:$0xff] }
 0x45f   :  { %v11384_v46 = vld [vmem:[#allocation78_spill] sm:$0xff]  ;;  %11388 = vst [vmem:[#allocation47_spill] sm:$0xff] %v9922_v12 }
 0x460   :  { %v9897_v4 = vpop.f32.mrf.mxu2  ;;  %v1944_v0 = vadd.f32 %v11385_v63, %v11384_v46  ;;  %v3656_v46 = vld [vmem:[#allocation2 + $0x4b1] sm:$0xff] }
 0x461   :  { %v3997_v18 = vpop.f32.mrf.mxu3 }
 0x462   :  { %v9901_v17 = vadd.f32 %v3997_v18, %v3574_v15  ;;  %v2938_v61 = vpop.f32.mrf.mxu1 }
 0x463   :  { %6873 = vmatmul.msk.f32.gmra.mxu0 %vm776_vm2, %v9420_v28  ;;  %v3044_v40 = vadd.f32 %v2938_v61, %v2513_v50  ;;  %v2514_v50 = vadd.f32 %v11386_v25, %v1944_v0 }
 0x464   :  { %11382 = vst [vmem:[#allocation172_spill] sm:$0xff] %v9901_v17 }
 0x465   :  { %6707 = vmatmul.msk.f32.gmra.mxu1 %vm776_vm2, %v9905_v5  ;;  %6986 = vmatmul.msk.f32.gmra.mxu2 %vm776_vm2, %v5203_v60  ;;  %v3575_v28 = vadd.f32 %v9603_v41, %v3044_v40  ;;  %v11389_v41 = vld [vmem:[#allocation81_spill] sm:$0xff]  ;;  %v11390_v40 = vld [vmem:[#allocation28_spill] sm:$0xff]  ;;  %v9930_v0 = vpop.f32.mrf.mxu0 }
 0x466   :  { %6837 = vmatmul.msk.f32.gmra.mxu3 %vm776_vm2, %v3655_v54  ;;  %v5204_v54 = vld [vmem:[#allocation2 + $0x121] sm:$0xff]  ;;  %v1947_v63 = vadd.f32 %v11390_v40, %v11389_v41  ;;  %11391 = vst [vmem:[#allocation176_spill] sm:$0xff] %v9930_v0 }
 0x467   :  { %v3657_v41 = vld [vmem:[#allocation2 + $0x4c1] sm:$0xff] }
 0x468   :  { %v9915_v15 = vpop.f32.mrf.mxu2  ;;  %v5206_v0 = vld [vmem:[#allocation2 + $0x161] sm:$0xff] }
 0x469   :  { %v4000_v18 = vpop.f32.mrf.mxu3 }
 0x46a   :  { %v9919_v61 = vadd.f32 %v4000_v18, %v3575_v28  ;;  %v2941_v17 = vpop.f32.mrf.mxu1  ;;  %v11392_v18 = vld [vmem:[#allocation83_spill] sm:$0xff] }
 0x46b   :  { %6874 = vmatmul.msk.f32.gmra.mxu0 %vm776_vm2, %v4158_v24  ;;  %v3045_v60 = vadd.f32 %v2941_v17, %v2514_v50  ;;  %v2515_v25 = vadd.f32 %v11392_v18, %v1947_v63 }
 0x46c   :  { %11387 = vst [vmem:[#allocation11_spill] sm:$0xff] %v9919_v61 }
 0x46d   :  { %6708 = vmatmul.msk.f32.gmra.mxu1 %vm776_vm2, %v9922_v12  ;;  %6987 = vmatmul.msk.f32.gmra.mxu2 %vm776_vm2, %v5204_v54  ;;  %v3576_v24 = vadd.f32 %v9621_v7, %v3045_v60  ;;  %v5205_v12 = vld [vmem:[#allocation2 + $0x131] sm:$0xff]  ;;  %v11394_v7 = vld [vmem:[#allocation84_spill] sm:$0xff]  ;;  %v11395_v60 = vld [vmem:[#allocation31_spill] sm:$0xff]  ;;  %v9952_v18 = vpop.f32.mrf.mxu0 }
 0x46e   :  { %6838 = vmatmul.msk.f32.gmra.mxu3 %vm776_vm2, %v3656_v46  ;;  %v9940_v46 = vld [vmem:[#allocation2 + $0x4b2] sm:$0xff]  ;;  %v1950_v40 = vadd.f32 %v11395_v60, %v11394_v7  ;;  %11397 = vst [vmem:[#allocation12_spill] sm:$0xff] %v9952_v18 }
 0x46f   :  { %v3658_v7 = vld [vmem:[#allocation2 + $0x4d1] sm:$0xff] }
 0x470   :  { %v9932_v28 = vpop.f32.mrf.mxu2  ;;  %v5207_v18 = vld [vmem:[#allocation2 + $0x171] sm:$0xff] }
 0x471   :  { %v4003_v17 = vpop.f32.mrf.mxu3 }
 0x472   :  { %v9936_v50 = vadd.f32 %v4003_v17, %v3576_v24  ;;  %v2944_v61 = vpop.f32.mrf.mxu1 }
 0x473   :  { %6875 = vmatmul.msk.f32.gmra.mxu0 %vm776_vm2, %v9453_v35  ;;  %v3046_v54 = vadd.f32 %v2944_v61, %v2515_v25  ;;  %v11396_v35 = vld [vmem:[#allocation86_spill] sm:$0xff] }
 0x474   :  { %11393 = vst [vmem:[#allocation48_spill] sm:$0xff] %v9936_v50  ;;  %v2516_v61 = vadd.f32 %v11396_v35, %v1950_v40 }
 0x475   :  { %6709 = vmatmul.msk.f32.gmra.mxu1 %vm776_vm2, %v9940_v46  ;;  %6988 = vmatmul.msk.f32.gmra.mxu2 %vm776_vm2, %v5205_v12  ;;  %v3577_v24 = vadd.f32 %v9639_v33, %v3046_v54  ;;  %v11399_v33 = vld [vmem:[#allocation87_spill] sm:$0xff]  ;;  %v11400_v54 = vld [vmem:[#allocation34_spill] sm:$0xff] }
 0x476   :  { %6839 = vmatmul.msk.f32.gmra.mxu3 %vm776_vm2, %v3657_v41  ;;  %v9958_v41 = vld [vmem:[#allocation2 + $0x4c2] sm:$0xff]  ;;  %v1953_v60 = vadd.f32 %v11400_v54, %v11399_v33 }
 0x477   :  { %v3659_v33 = vld [vmem:[#allocation2 + $0x4e1] sm:$0xff] }
 0x478   :  { %v9948_v63 = vpop.f32.mrf.mxu2 }
 0x479   :  { %v4006_v17 = vpop.f32.mrf.mxu3 }
 0x47a   :  { %v9954_v25 = vadd.f32 %v4006_v17, %v3577_v24  ;;  %v2947_v50 = vpop.f32.mrf.mxu1 }
 0x47b   :  { %6876 = vmatmul.msk.f32.gmra.mxu0 %vm776_vm2, %v9471_v51  ;;  %v3047_v12 = vadd.f32 %v2947_v50, %v2516_v61  ;;  %v11401_v50 = vld [vmem:[#allocation90_spill] sm:$0xff] }
 0x47c   :  { %11398 = vst [vmem:[#allocation50_spill] sm:$0xff] %v9954_v25  ;;  %v2517_v17 = vadd.f32 %v11401_v50, %v1953_v60  ;;  %v9974_v25 = vpop.f32.mrf.mxu0 }
 0x47d   :  { %6710 = vmatmul.msk.f32.gmra.mxu1 %vm776_vm2, %v9958_v41  ;;  %6989 = vmatmul.msk.f32.gmra.mxu2 %vm776_vm2, %v5206_v0  ;;  %v3578_v40 = vadd.f32 %v9654_v32, %v3047_v12  ;;  %v11403_v32 = vld [vmem:[#allocation91_spill] sm:$0xff]  ;;  %v11404_v12 = vld [vmem:[#allocation37_spill] sm:$0xff] }
 0x47e   :  { %6840 = vmatmul.msk.f32.gmra.mxu3 %vm776_vm2, %v3658_v7  ;;  %v2597_v7 = vld [vmem:[#allocation2 + $0x4d2] sm:$0xff]  ;;  %v1956_v54 = vadd.f32 %v11404_v12, %v11403_v32  ;;  %v11408_v32 = vld [vmem:[#allocation40_spill] sm:$0xff] }
 0x480   :  { %v9967_v24 = vpop.f32.mrf.mxu2 }
 0x481   :  { %v4009_v51 = vpop.f32.mrf.mxu3 }
 0x482   :  { %v9970_v35 = vadd.f32 %v4009_v51, %v3578_v40  ;;  %v2950_v61 = vpop.f32.mrf.mxu1  ;;  %v11405_v51 = vld [vmem:[#allocation94_spill] sm:$0xff] }
 0x483   :  { %6877 = vmatmul.msk.f32.gmra.mxu0 %vm776_vm2, %v9489_v23  ;;  %v3048_v0 = vadd.f32 %v2950_v61, %v2517_v17  ;;  %v2518_v50 = vadd.f32 %v11405_v51, %v1956_v54 }
 0x484   :  { %11402 = vst [vmem:[#allocation180_spill] sm:$0xff] %v9970_v35  ;;  %v5208_v35 = vld [vmem:[#allocation2 + $0x181] sm:$0xff] }
 0x485   :  { %6711 = vmatmul.msk.f32.gmra.mxu1 %vm776_vm2, %v2597_v7  ;;  %6990 = vmatmul.msk.f32.gmra.mxu2 %vm776_vm2, %v5207_v18  ;;  %v3579_v60 = vadd.f32 %v9672_v49, %v3048_v0  ;;  %v4659_v18 = vld [vmem:[#allocation2 + $0x20] sm:$0xff]  ;;  %v9991_v49 = vpop.f32.mrf.mxu0 }
 0x486   :  { %6841 = vmatmul.msk.f32.gmra.mxu3 %vm776_vm2, %v3659_v33  ;;  %v5721_v33 = vld [vmem:[#allocation2 + $0x22] sm:$0xff] }
 0x487   :  { %v11407_v0 = vld [vmem:[#allocation95_spill] sm:$0xff] }
 0x488   :  { %v9982_v40 = vpop.f32.mrf.mxu2  ;;  %v1959_v12 = vadd.f32 %v11408_v32, %v11407_v0 }
 0x489   :  { %v4012_v23 = vpop.f32.mrf.mxu3 }
 0x48a   :  { %v9985_v17 = vadd.f32 %v4012_v23, %v3579_v60  ;;  %v2953_v61 = vpop.f32.mrf.mxu1  ;;  %v11409_v23 = vld [vmem:[#allocation98_spill] sm:$0xff] }
 0x48b   :  { %6878 = vmatmul.msk.f32.gmra.mxu0 %vm776_vm2, %v9506_v53  ;;  %v3049_v7 = vadd.f32 %v2953_v61, %v2518_v50  ;;  %v2519_v51 = vadd.f32 %v11409_v23, %v1959_v12 }
 0x48c   :  { %11406 = vst [vmem:[#allocation51_spill] sm:$0xff] %v9985_v17  ;;  %v5209_v17 = vld [vmem:[#allocation2 + $0x191] sm:$0xff] }
 0x48d   :  { %6908 = vmatmul.msk.f32.vlgmr.msra.gmra.mxu1 %vm776_vm2, %v4659_v18  ;;  %6991 = vmatmul.msk.f32.gmra.mxu2 %vm776_vm2, %v5208_v35  ;;  %v3580_v54 = vadd.f32 %v9690_v27, %v3049_v7  ;;  %v4660_v18 = vld [vmem:[#allocation2 + $0x30] sm:$0xff]  ;;  %v11411_v27 = vld [vmem:[#allocation99_spill] sm:$0xff]  ;;  %v10009_v32 = vpop.f32.mrf.mxu0 }
 0x48e   :  { %7038 = vmatmul.msk.f32.vlgmr.msra.gmra.mxu3 %vm776_vm2, %v5721_v33  ;;  %v5722_v33 = vld [vmem:[#allocation2 + $0x32] sm:$0xff]  ;;  %v11412_v7 = vld [vmem:[#allocation43_spill] sm:$0xff] }
 0x48f   :  { %v1962_v0 = vadd.f32 %v11412_v7, %v11411_v27  ;;  %v5723_v27 = vld [vmem:[#allocation2 + $0x42] sm:$0xff] }
 0x490   :  { %v9997_v60 = vpop.f32.mrf.mxu2 }
 0x491   :  { %v4015_v53 = vpop.f32.mrf.mxu3 }
 0x492   :  { %v10000_v50 = vadd.f32 %v4015_v53, %v3580_v54  ;;  %v2956_v61 = vpop.f32.mrf.mxu1  ;;  %v11413_v53 = vld [vmem:[#allocation102_spill] sm:$0xff] }
 0x493   :  { %6879 = vmatmul.msk.f32.gmra.mxu0 %vm776_vm2, %v9524_v20  ;;  %v3050_v35 = vadd.f32 %v2956_v61, %v2519_v51  ;;  %v2520_v23 = vadd.f32 %v11413_v53, %v1962_v0  ;;  %v11417_v53 = vld [vmem:[#allocation106_spill] sm:$0xff] }
 0x494   :  { %11410 = vst [vmem:[#allocation13_spill] sm:$0xff] %v10000_v50  ;;  %v5212_v50 = vld [vmem:[#allocation2 + $0x1c1] sm:$0xff] }
 0x495   :  { %6909 = vmatmul.msk.f32.gmra.mxu1 %vm776_vm2, %v4660_v18  ;;  %6992 = vmatmul.msk.f32.gmra.mxu2 %vm776_vm2, %v5209_v17  ;;  %v3581_v12 = vadd.f32 %v9708_v56, %v3050_v35  ;;  %v4661_v18 = vld [vmem:[#allocation2 + $0x40] sm:$0xff]  ;;  %v11416_v35 = vld [vmem:[#allocation46_spill] sm:$0xff] }
 0x496   :  { %7039 = vmatmul.msk.f32.gmra.mxu3 %vm776_vm2, %v5722_v33  ;;  %v5210_v33 = vld [vmem:[#allocation2 + $0x1a1] sm:$0xff] }
 0x497   :  { %v11415_v56 = vld [vmem:[#allocation103_spill] sm:$0xff] }
 0x498   :  { %v10012_v54 = vpop.f32.mrf.mxu2  ;;  %v1965_v7 = vadd.f32 %v11416_v35, %v11415_v56  ;;  %v11420_v56 = vld [vmem:[#allocation49_spill] sm:$0xff] }
 0x499   :  { %v4018_v20 = vpop.f32.mrf.mxu3 }
 0x49a   :  { %v10015_v51 = vadd.f32 %v4018_v20, %v3581_v12  ;;  %v2959_v61 = vpop.f32.mrf.mxu1 }
 0x49b   :  { %6880 = vmatmul.msk.f32.gmra.mxu0 %vm776_vm2, %v9542_v58  ;;  %v3051_v17 = vadd.f32 %v2959_v61, %v2520_v23  ;;  %v2521_v58 = vadd.f32 %v11417_v53, %v1965_v7  ;;  %v10028_v23 = vpop.f32.mrf.mxu0  ;;  %v11421_v53 = vld [vmem:[#allocation110_spill] sm:$0xff] }
 0x49c   :  { %11414 = vst [vmem:[#allocation53_spill] sm:$0xff] %v10015_v51  ;;  %v5211_v51 = vld [vmem:[#allocation2 + $0x1b1] sm:$0xff] }
 0x49d   :  { %6910 = vmatmul.msk.f32.gmra.mxu1 %vm776_vm2, %v4661_v18  ;;  %6993 = vmatmul.msk.f32.gmra.mxu2 %vm776_vm2, %v5210_v33  ;;  %v3582_v0 = vadd.f32 %v9723_v57, %v3051_v17  ;;  %v5724_v57 = vld [vmem:[#allocation2 + $0x52] sm:$0xff]  ;;  %v11419_v17 = vld [vmem:[#allocation107_spill] sm:$0xff] }
 0x49e   :  { %7040 = vmatmul.msk.f32.gmra.mxu3 %vm776_vm2, %v5723_v27  ;;  %v4662_v27 = vld [vmem:[#allocation2 + $0x50] sm:$0xff]  ;;  %v1968_v35 = vadd.f32 %v11420_v56, %v11419_v17  ;;  %v11424_v17 = vld [vmem:[#allocation52_spill] sm:$0xff] }
 0x4a0   :  { %v10025_v12 = vpop.f32.mrf.mxu2 }
 0x4a1   :  { %v4021_v20 = vpop.f32.mrf.mxu3 }
 0x4a2   :  { %v10030_v61 = vadd.f32 %v4021_v20, %v3582_v0  ;;  %v2962_v18 = vpop.f32.mrf.mxu1 }
 0x4a3   :  { %6881 = vmatmul.msk.f32.gmra.mxu0 %vm776_vm2, %v9560_v45  ;;  %v3052_v33 = vadd.f32 %v2962_v18, %v2521_v58  ;;  %v2522_v45 = vadd.f32 %v11421_v53, %v1968_v35 }
 0x4a4   :  { %11418 = vst [vmem:[#allocation184_spill] sm:$0xff] %v10030_v61  ;;  %v4166_v61 = vld [vmem:[#allocation2 + $0x302] sm:$0xff] }
 0x4a5   :  { %6911 = vmatmul.msk.f32.gmra.mxu1 %vm776_vm2, %v4662_v27  ;;  %6994 = vmatmul.msk.f32.gmra.mxu2 %vm776_vm2, %v5211_v51  ;;  %v3583_v7 = vadd.f32 %v9741_v13, %v3052_v33  ;;  %v10046_v51 = vpop.f32.mrf.mxu0  ;;  %v5725_v13 = vld [vmem:[#allocation2 + $0x62] sm:$0xff] }
 0x4a6   :  { %7041 = vmatmul.msk.f32.gmra.mxu3 %vm776_vm2, %v5724_v57  ;;  %v4663_v57 = vld [vmem:[#allocation2 + $0x60] sm:$0xff] }
 0x4a7   :  { %v11423_v33 = vld [vmem:[#allocation111_spill] sm:$0xff] }
 0x4a8   :  { %v10040_v0 = vpop.f32.mrf.mxu2  ;;  %v1971_v56 = vadd.f32 %v11424_v17, %v11423_v33  ;;  %v11428_v33 = vld [vmem:[#allocation55_spill] sm:$0xff] }
 0x4a9   :  { %v4024_v20 = vpop.f32.mrf.mxu3 }
 0x4aa   :  { %v10043_v58 = vadd.f32 %v4024_v20, %v3583_v7  ;;  %v2965_v18 = vpop.f32.mrf.mxu1  ;;  %v11425_v20 = vld [vmem:[#allocation114_spill] sm:$0xff] }
 0x4ab   :  { %6882 = vmatmul.msk.f32.gmra.mxu0 %vm776_vm2, %v4166_v61  ;;  %v3053_v27 = vadd.f32 %v2965_v18, %v2522_v45  ;;  %v2523_v53 = vadd.f32 %v11425_v20, %v1971_v56 }
 0x4ac   :  { %11422 = vst [vmem:[#allocation54_spill] sm:$0xff] %v10043_v58  ;;  %v5213_v58 = vld [vmem:[#allocation2 + $0x1d1] sm:$0xff] }
 0x4ad   :  { %6912 = vmatmul.msk.f32.gmra.mxu1 %vm776_vm2, %v4663_v57  ;;  %6995 = vmatmul.msk.f32.gmra.mxu2 %vm776_vm2, %v5212_v50  ;;  %v3584_v35 = vadd.f32 %v9759_v19, %v3053_v27  ;;  %v4664_v57 = vld [vmem:[#allocation2 + $0x70] sm:$0xff]  ;;  %v10063_v19 = vpop.f32.mrf.mxu0  ;;  %v11427_v27 = vld [vmem:[#allocation115_spill] sm:$0xff] }
 0x4ae   :  { %7042 = vmatmul.msk.f32.gmra.mxu3 %vm776_vm2, %v5725_v13  ;;  %v5726_v13 = vld [vmem:[#allocation2 + $0x72] sm:$0xff]  ;;  %v1974_v17 = vadd.f32 %v11428_v33, %v11427_v27 }
 0x4b0   :  { %v10054_v7 = vpop.f32.mrf.mxu2 }
 0x4b1   :  { %v4027_v61 = vpop.f32.mrf.mxu3 }
 0x4b2   :  { %v10057_v45 = vadd.f32 %v4027_v61, %v3584_v35  ;;  %v2968_v18 = vpop.f32.mrf.mxu1 }
 0x4b3   :  { %6883 = vmatmul.msk.f32.gmra.mxu0 %vm776_vm2, %v9593_v10  ;;  %v3054_v50 = vadd.f32 %v2968_v18, %v2523_v53  ;;  %v11429_v10 = vld [vmem:[#allocation118_spill] sm:$0xff] }
 0x4b4   :  { %11426 = vst [vmem:[#allocation14_spill] sm:$0xff] %v10057_v45  ;;  %v2524_v20 = vadd.f32 %v11429_v10, %v1974_v17  ;;  %v5214_v45 = vld [vmem:[#allocation2 + $0x201] sm:$0xff] }
 0x4b5   :  { %6913 = vmatmul.msk.f32.gmra.mxu1 %vm776_vm2, %v4664_v57  ;;  %6996 = vmatmul.msk.f32.gmra.mxu2 %vm776_vm2, %v5213_v58  ;;  %v3585_v56 = vadd.f32 %v9777_v52, %v3054_v50  ;;  %v4665_v57 = vld [vmem:[#allocation2 + $0x80] sm:$0xff]  ;;  %v11432_v50 = vld [vmem:[#allocation58_spill] sm:$0xff]  ;;  %v10081_v33 = vpop.f32.mrf.mxu0 }
 0x4b6   :  { %7043 = vmatmul.msk.f32.gmra.mxu3 %vm776_vm2, %v5726_v13  ;;  %v5727_v13 = vld [vmem:[#allocation2 + $0x82] sm:$0xff] }
 0x4b7   :  { %v11431_v52 = vld [vmem:[#allocation119_spill] sm:$0xff] }
 0x4b8   :  { %v10069_v35 = vpop.f32.mrf.mxu2  ;;  %v1977_v27 = vadd.f32 %v11432_v50, %v11431_v52 }
 0x4b9   :  { %v4030_v61 = vpop.f32.mrf.mxu3 }
 0x4ba   :  { %v10072_v53 = vadd.f32 %v4030_v61, %v3585_v56  ;;  %v2971_v18 = vpop.f32.mrf.mxu1 }
 0x4bb   :  { %6884 = vmatmul.msk.f32.gmra.mxu0 %vm776_vm2, %v9611_v21  ;;  %v3055_v58 = vadd.f32 %v2971_v18, %v2524_v20  ;;  %v11433_v21 = vld [vmem:[#allocation122_spill] sm:$0xff] }
 0x4bc   :  { %11430 = vst [vmem:[#allocation56_spill] sm:$0xff] %v10072_v53  ;;  %v2525_v10 = vadd.f32 %v11433_v21, %v1977_v27  ;;  %v5215_v53 = vld [vmem:[#allocation2 + $0x211] sm:$0xff] }
 0x4bd   :  { %6914 = vmatmul.msk.f32.gmra.mxu1 %vm776_vm2, %v4665_v57  ;;  %6997 = vmatmul.msk.f32.gmra.mxu2 %vm776_vm2, %v5214_v45  ;;  %v3586_v17 = vadd.f32 %v9794_v43, %v3055_v58  ;;  %v4666_v57 = vld [vmem:[#allocation2 + $0x90] sm:$0xff]  ;;  %v11435_v43 = vld [vmem:[#allocation123_spill] sm:$0xff]  ;;  %v10098_v21 = vpop.f32.mrf.mxu0 }
 0x4be   :  { %7044 = vmatmul.msk.f32.gmra.mxu3 %vm776_vm2, %v5727_v13  ;;  %v5728_v45 = vld [vmem:[#allocation2 + $0x92] sm:$0xff] }
 0x4bf   :  { %v11436_v58 = vld [vmem:[#allocation61_spill] sm:$0xff] }
 0x4c0   :  { %v10084_v61 = vpop.f32.mrf.mxu2  ;;  %v1980_v52 = vadd.f32 %v11436_v58, %v11435_v43  ;;  %v11440_v43 = vld [vmem:[#allocation64_spill] sm:$0xff] }
 0x4c1   :  { %v4033_v56 = vpop.f32.mrf.mxu3 }
 0x4c2   :  { %v10087_v20 = vadd.f32 %v4033_v56, %v3586_v17  ;;  %v2974_v18 = vpop.f32.mrf.mxu1  ;;  %v11437_v17 = vld [vmem:[#allocation126_spill] sm:$0xff] }
 0x4c3   :  { %6885 = vmatmul.msk.f32.gmra.mxu0 %vm776_vm2, %v9629_v36  ;;  %v3056_v13 = vadd.f32 %v2974_v18, %v2525_v10  ;;  %v2526_v56 = vadd.f32 %v11437_v17, %v1980_v52 }
 0x4c4   :  { %11434 = vst [vmem:[#allocation57_spill] sm:$0xff] %v10087_v20 }
 0x4c5   :  { %6915 = vmatmul.msk.f32.gmra.mxu1 %vm776_vm2, %v4666_v57  ;;  %6998 = vmatmul.msk.f32.gmra.mxu2 %vm776_vm2, %v5215_v53  ;;  %v3587_v50 = vadd.f32 %v9812_v59, %v3056_v13  ;;  %v4667_v57 = vld [vmem:[#allocation2 + $0xc0] sm:$0xff] }
 0x4c6   :  { %7045 = vmatmul.msk.f32.gmra.mxu3 %vm776_vm2, %v5728_v45  ;;  %v5216_v45 = vld [vmem:[#allocation2 + $0x221] sm:$0xff] }
 0x4c7   :  { %v5729_v59 = vld [vmem:[#allocation2 + $0xc2] sm:$0xff] }
 0x4c8   :  { %v10102_v18 = vpop.f32.mrf.mxu2  ;;  %v11439_v13 = vld [vmem:[#allocation127_spill] sm:$0xff] }
 0x4c9   :  { %v4036_v27 = vpop.f32.mrf.mxu3  ;;  %v1983_v58 = vadd.f32 %v11440_v43, %v11439_v13  ;;  %v11444_v13 = vld [vmem:[#allocation67_spill] sm:$0xff] }
 0x4ca   :  { %v10100_v36 = vadd.f32 %v4036_v27, %v3587_v50  ;;  %v2977_v10 = vpop.f32.mrf.mxu1  ;;  %v11441_v27 = vld [vmem:[#allocation130_spill] sm:$0xff] }
 0x4cb   :  { %6886 = vmatmul.msk.f32.gmra.mxu0 %vm776_vm2, %v9646_v62  ;;  %v3057_v53 = vadd.f32 %v2977_v10, %v2526_v56  ;;  %v2527_v17 = vadd.f32 %v11441_v27, %v1983_v58  ;;  %v10117_v56 = vpop.f32.mrf.mxu0 }
 0x4cc   :  { %11438 = vst [vmem:[#allocation15_spill] sm:$0xff] %v10100_v36 }
 0x4cd   :  { %6916 = vmatmul.msk.f32.gmra.mxu1 %vm776_vm2, %v4667_v57  ;;  %6999 = vmatmul.msk.f32.gmra.mxu2 %vm776_vm2, %v5216_v45  ;;  %v3588_v52 = vadd.f32 %v9830_v22, %v3057_v53  ;;  %v4668_v57 = vld [vmem:[#allocation2 + $0xd0] sm:$0xff]  ;;  %v11443_v53 = vld [vmem:[#allocation131_spill] sm:$0xff] }
 0x4ce   :  { %7046 = vmatmul.msk.f32.gmra.mxu3 %vm776_vm2, %v5729_v59  ;;  %v5217_v45 = vld [vmem:[#allocation2 + $0x231] sm:$0xff]  ;;  %v1986_v43 = vadd.f32 %v11444_v13, %v11443_v53 }
 0x4cf   :  { %v5730_v22 = vld [vmem:[#allocation2 + $0xd2] sm:$0xff] }
 0x4d0   :  { %v10119_v59 = vpop.f32.mrf.mxu2  ;;  %v11448_v13 = vld [vmem:[#allocation70_spill] sm:$0xff] }
 0x4d1   :  { %v4039_v50 = vpop.f32.mrf.mxu3 }
 0x4d2   :  { %v10113_v36 = vadd.f32 %v4039_v50, %v3588_v52  ;;  %v2980_v62 = vpop.f32.mrf.mxu1  ;;  %v11445_v52 = vld [vmem:[#allocation134_spill] sm:$0xff] }
 0x4d3   :  { %6887 = vmatmul.msk.f32.gmra.mxu0 %vm776_vm2, %v9664_v6  ;;  %v3058_v10 = vadd.f32 %v2980_v62, %v2527_v17  ;;  %v2528_v50 = vadd.f32 %v11445_v52, %v1986_v43  ;;  %v10134_v53 = vpop.f32.mrf.mxu0 }
 0x4d4   :  { %11442 = vst [vmem:[#allocation59_spill] sm:$0xff] %v10113_v36  ;;  %v11464_v36 = vld [vmem:[#allocation151_spill] sm:$0xff] }
 0x4d5   :  { %6917 = vmatmul.msk.f32.gmra.mxu1 %vm776_vm2, %v4668_v57  ;;  %7000 = vmatmul.msk.f32.gmra.mxu2 %vm776_vm2, %v5217_v45  ;;  %v3589_v58 = vadd.f32 %v9848_v14, %v3058_v10  ;;  %v4669_v57 = vld [vmem:[#allocation2 + $0xe0] sm:$0xff] }
 0x4d6   :  { %7047 = vmatmul.msk.f32.gmra.mxu3 %vm776_vm2, %v5730_v22  ;;  %v5218_v45 = vld [vmem:[#allocation2 + $0x241] sm:$0xff] }
 0x4d7   :  { %v5731_v22 = vld [vmem:[#allocation2 + $0xe2] sm:$0xff] }
 0x4d8   :  { %v10137_v14 = vpop.f32.mrf.mxu2  ;;  %v11447_v10 = vld [vmem:[#allocation135_spill] sm:$0xff] }
 0x4d9   :  { %v4042_v6 = vpop.f32.mrf.mxu3  ;;  %v1989_v43 = vadd.f32 %v11448_v13, %v11447_v10 }
 0x4da   :  { %v10128_v27 = vadd.f32 %v4042_v6, %v3589_v58  ;;  %v2983_v17 = vpop.f32.mrf.mxu1  ;;  %v11449_v6 = vld [vmem:[#allocation138_spill] sm:$0xff] }
 0x4db   :  { %6888 = vmatmul.msk.f32.gmra.mxu0 %vm776_vm2, %v9682_v38  ;;  %v3059_v62 = vadd.f32 %v2983_v17, %v2528_v50  ;;  %v2529_v52 = vadd.f32 %v11449_v6, %v1989_v43  ;;  %v10152_v13 = vpop.f32.mrf.mxu0 }
 0x4dc   :  { %11446 = vst [vmem:[#allocation191_spill] sm:$0xff] %v10128_v27  ;;  %v5219_v27 = vld [vmem:[#allocation2 + $0x251] sm:$0xff] }
 0x4dd   :  { %6918 = vmatmul.msk.f32.gmra.mxu1 %vm776_vm2, %v4669_v57  ;;  %7001 = vmatmul.msk.f32.gmra.mxu2 %vm776_vm2, %v5218_v45  ;;  %v3590_v58 = vadd.f32 %v9861_v29, %v3059_v62  ;;  %v4670_v45 = vld [vmem:[#allocation2 + $0xf0] sm:$0xff]  ;;  %v11451_v29 = vld [vmem:[#allocation139_spill] sm:$0xff] }
 0x4de   :  { %7048 = vmatmul.msk.f32.gmra.mxu3 %vm776_vm2, %v5731_v22  ;;  %v5732_v22 = vld [vmem:[#allocation2 + $0xf2] sm:$0xff] }
 0x4df   :  { %v11452_v62 = vld [vmem:[#allocation73_spill] sm:$0xff] }
 0x4e0   :  { %v1992_v10 = vadd.f32 %v11452_v62, %v11451_v29  ;;  %v5733_v29 = vld [vmem:[#allocation2 + $0x102] sm:$0xff] }
 0x4e1   :  { %v4045_v38 = vpop.f32.mrf.mxu3 }
 0x4e2   :  { %v10143_v50 = vadd.f32 %v4045_v38, %v3590_v58  ;;  %v2986_v17 = vpop.f32.mrf.mxu1  ;;  %v10155_v58 = vpop.f32.mrf.mxu2  ;;  %v11453_v38 = vld [vmem:[#allocation143_spill] sm:$0xff] }
 0x4e3   :  { %6889 = vmatmul.msk.f32.gmra.mxu0 %vm776_vm2, %v9700_v34  ;;  %v3060_v57 = vadd.f32 %v2986_v17, %v2529_v52  ;;  %v2530_v6 = vadd.f32 %v11453_v38, %v1992_v10 }
 0x4e4   :  { %11450 = vst [vmem:[#allocation60_spill] sm:$0xff] %v10143_v50  ;;  %v5220_v50 = vld [vmem:[#allocation2 + $0x261] sm:$0xff] }
 0x4e5   :  { %6919 = vmatmul.msk.f32.gmra.mxu1 %vm776_vm2, %v4670_v45  ;;  %7002 = vmatmul.msk.f32.gmra.mxu2 %vm776_vm2, %v5219_v27  ;;  %v3591_v43 = vadd.f32 %v9879_v48, %v3060_v57  ;;  %v4174_v45 = vld [vmem:[#allocation2 + $0x3a2] sm:$0xff] }
 0x4e6   :  { %7049 = vmatmul.msk.f32.gmra.mxu3 %vm776_vm2, %v5732_v22  ;;  %v4671_v22 = vld [vmem:[#allocation2 + $0x100] sm:$0xff]  ;;  %v11455_v48 = vld [vmem:[#allocation144_spill] sm:$0xff] }
 0x4e7   :  { %v11456_v57 = vld [vmem:[#allocation76_spill] sm:$0xff] }
 0x4e8   :  { %v1995_v62 = vadd.f32 %v11456_v57, %v11455_v48  ;;  %v11461_v48 = vld [vmem:[#allocation79_spill] sm:$0xff] }
 0x4e9   :  { %v4048_v34 = vpop.f32.mrf.mxu3 }
 0x4ea   :  { %v10158_v52 = vadd.f32 %v4048_v34, %v3591_v43  ;;  %v2989_v17 = vpop.f32.mrf.mxu1  ;;  %v11457_v34 = vld [vmem:[#allocation147_spill] sm:$0xff] }
 0x4eb   :  { %6890 = vmatmul.msk.f32.gmra.mxu0 %vm776_vm2, %v4174_v45  ;;  %v3061_v27 = vadd.f32 %v2989_v17, %v2530_v6  ;;  %v2531_v38 = vadd.f32 %v11457_v34, %v1995_v62  ;;  %v5221_v45 = vld [vmem:[#allocation2 + $0x271] sm:$0xff]  ;;  %v11462_v62 = vld [vmem:[#allocation88_spill] sm:$0xff] }
 0x4ec   :  { %11454 = vst [vmem:[#allocation16_spill] sm:$0xff] %v10158_v52  ;;  %v10168_v52 = vpop.f32.mrf.mxu0 }
 0x4ed   :  { %6920 = vmatmul.msk.f32.gmra.mxu1 %vm776_vm2, %v4671_v22  ;;  %7003 = vmatmul.msk.f32.gmra.mxu2 %vm776_vm2, %v5220_v50  ;;  %v3592_v10 = vadd.f32 %v9897_v4, %v3061_v27  ;;  %11458 = vst [vmem:[#allocation62_spill] sm:$0xff] %v10168_v52  ;;  %v10172_v22 = vpop.f32.mrf.mxu2  ;;  %v5734_v4 = vld [vmem:[#allocation2 + $0x112] sm:$0xff]  ;;  %v11460_v27 = vld [vmem:[#allocation148_spill] sm:$0xff] }
 0x4ee   :  { %7050 = vmatmul.msk.f32.gmra.mxu3 %vm776_vm2, %v5733_v29  ;;  %v4672_v29 = vld [vmem:[#allocation2 + $0x110] sm:$0xff]  ;;  %v1998_v57 = vadd.f32 %v11461_v48, %v11460_v27  ;;  %v4673_v27 = vld [vmem:[#allocation2 + $0x120] sm:$0xff] }
 0x4ef   :  { %v5222_v48 = vld [vmem:[#allocation2 + $0x2a1] sm:$0xff] }
 0x4f1   :  { %v4051_v43 = vpop.f32.mrf.mxu3 }
 0x4f2   :  { %v10170_v6 = vadd.f32 %v4051_v43, %v3592_v10  ;;  %v2992_v17 = vpop.f32.mrf.mxu1  ;;  %v11463_v10 = vld [vmem:[#allocation150_spill] sm:$0xff] }
 0x4f3   :  { %6891 = vmatmul.msk.f32.gmra.mxu0 %vm776_vm2, %v9733_v1  ;;  %v3062_v50 = vadd.f32 %v2992_v17, %v2531_v38  ;;  %v1812_v43 = vadd.f32 %v11463_v10, %v11462_v62  ;;  %v2532_v1 = vadd.f32 %v11464_v36, %v1998_v57  ;;  %v11468_v36 = vld [vmem:[#allocation152_spill] sm:$0xff] }
 0x4f4   :  { %11459 = vst [vmem:[#allocation195_spill] sm:$0xff] %v10170_v6 }
 0x4f5   :  { %6921 = vmatmul.msk.f32.gmra.mxu1 %vm776_vm2, %v4672_v29  ;;  %7004 = vmatmul.msk.f32.gmra.mxu2 %vm776_vm2, %v5221_v45  ;;  %v3593_v34 = vadd.f32 %v9915_v15, %v3062_v50  ;;  %v11466_v45 = vld [vmem:[#allocation208_spill] sm:$0xff]  ;;  %v10192_v52 = vpop.f32.mrf.mxu2 }
 0x4f6   :  { %7051 = vmatmul.msk.f32.gmra.mxu3 %vm776_vm2, %v5734_v4  ;;  %v2470_v29 = vadd.f32 %v11466_v45, %v1812_v43  ;;  %v10190_v4 = vpop.f32.mrf.mxu0  ;;  %v5735_v15 = vld [vmem:[#allocation2 + $0x122] sm:$0xff] }
 0x4f7   :  { %11467 = vst [vmem:[#allocation17_spill] sm:$0xff] %v10190_v4  ;;  %v11471_v43 = vld [vmem:[#allocation92_spill] sm:$0xff]  ;;  %v11474_v4 = vld [vmem:[#allocation213_spill] sm:$0xff] }
 0x4f9   :  { %v4054_v6 = vpop.f32.mrf.mxu3 }
 0x4fa   :  { %v10185_v38 = vadd.f32 %v4054_v6, %v3593_v34  ;;  %v2995_v17 = vpop.f32.mrf.mxu1  ;;  %v11469_v6 = vld [vmem:[#allocation82_spill] sm:$0xff] }
 0x4fb   :  { %6892 = vmatmul.msk.f32.gmra.mxu0 %vm776_vm2, %v9751_v11  ;;  %v3063_v20 = vadd.f32 %v2995_v17, %v2532_v1  ;;  %v2001_v50 = vadd.f32 %v11469_v6, %v11468_v36  ;;  %v11470_v11 = vld [vmem:[#allocation156_spill] sm:$0xff]  ;;  %v11472_v34 = vld [vmem:[#allocation154_spill] sm:$0xff]  ;;  %v11473_v17 = vld [vmem:[#allocation155_spill] sm:$0xff] }
 0x4fc   :  { %11465 = vst [vmem:[#allocation63_spill] sm:$0xff] %v10185_v38  ;;  %v3001_v57 = vadd.f32 %v11470_v11, %v2470_v29  ;;  %v1815_v1 = vadd.f32 %v11472_v34, %v11471_v43  ;;  %v11475_v6 = vld [vmem:[#allocation85_spill] sm:$0xff] }
 0x4fd   :  { %6922 = vmatmul.msk.f32.gmra.mxu1 %vm776_vm2, %v4673_v27  ;;  %7005 = vmatmul.msk.f32.gmra.mxu2 %vm776_vm2, %v5222_v48  ;;  %v3594_v62 = vadd.f32 %v9932_v28, %v3063_v20  ;;  %v2533_v45 = vadd.f32 %v11473_v17, %v2001_v50  ;;  %v4674_v48 = vld [vmem:[#allocation2 + $0x130] sm:$0xff]  ;;  %v10215_v50 = vpop.f32.mrf.mxu2 }
 0x4fe   :  { %7052 = vmatmul.msk.f32.gmra.mxu3 %vm776_vm2, %v5735_v15  ;;  %v5736_v15 = vld [vmem:[#allocation2 + $0x132] sm:$0xff]  ;;  %v2471_v36 = vadd.f32 %v11474_v4, %v1815_v1  ;;  %v3532_v29 = vadd.f32 %v11475_v6, %v3001_v57  ;;  %v10212_v20 = vpop.f32.mrf.mxu0  ;;  %v11478_v57 = vld [vmem:[#allocation96_spill] sm:$0xff] }
 0x4ff   :  { %v5223_v28 = vld [vmem:[#allocation2 + $0x2b1] sm:$0xff] }
 0x500   :  { %v11479_v1 = vld [vmem:[#allocation157_spill] sm:$0xff] }
 0x501   :  { %v4057_v10 = vpop.f32.mrf.mxu3  ;;  %v1818_v17 = vadd.f32 %v11479_v1, %v11478_v57  ;;  %v11480_v6 = vld [vmem:[#allocation89_spill] sm:$0xff]  ;;  %v11483_v57 = vld [vmem:[#allocation100_spill] sm:$0xff] }
 0x502   :  { %v10204_v38 = vadd.f32 %v4057_v10, %v3594_v62  ;;  %v2998_v27 = vpop.f32.mrf.mxu1  ;;  %v11476_v62 = vld [vmem:[#allocation159_spill] sm:$0xff]  ;;  %v11484_v1 = vld [vmem:[#allocation161_spill] sm:$0xff] }
 0x503   :  { %6893 = vmatmul.msk.f32.gmra.mxu0 %vm776_vm2, %v9769_v31  ;;  %v3064_v11 = vadd.f32 %v2998_v27, %v2533_v45  ;;  %v3002_v10 = vadd.f32 %v11476_v62, %v2471_v36  ;;  %v11477_v31 = vld [vmem:[#allocation158_spill] sm:$0xff]  ;;  %v5224_v62 = vld [vmem:[#allocation2 + $0x2c1] sm:$0xff] }
 0x504   :  { %v4063_v43 = vadd.f32 %v11477_v31, %v3532_v29  ;;  %v4675_v29 = vld [vmem:[#allocation2 + $0x160] sm:$0xff]  ;;  %v11482_v31 = vld [vmem:[#allocation162_spill] sm:$0xff] }
 0x505   :  { %6923 = vmatmul.msk.f32.gmra.mxu1 %vm776_vm2, %v4674_v48  ;;  %7006 = vmatmul.msk.f32.gmra.mxu2 %vm776_vm2, %v5223_v28  ;;  %v3595_v4 = vadd.f32 %v9948_v63, %v3064_v11  ;;  %v3533_v36 = vadd.f32 %v11480_v6, %v3002_v10  ;;  %v5737_v63 = vld [vmem:[#allocation2 + $0x162] sm:$0xff]  ;;  %v10242_v10 = vpop.f32.mrf.mxu2  ;;  %v11485_v6 = vld [vmem:[#allocation93_spill] sm:$0xff] }
 0x506   :  { %7053 = vmatmul.msk.f32.gmra.mxu3 %vm776_vm2, %v5736_v15  ;;  %v4594_v45 = vadd.f32 %v9657_v39, %v4063_v43  ;;  %v2472_v15 = vadd.f32 %v9428_v55, %v1818_v17  ;;  %v11481_v39 = vld [vmem:[#allocation163_spill] sm:$0xff]  ;;  %v1821_v17 = vadd.f32 %v11484_v1, %v11483_v57 }
 0x507   :  { %v4064_v43 = vadd.f32 %v11482_v31, %v3533_v36 }
 0x508   :  { %v3003_v11 = vadd.f32 %v11481_v39, %v2472_v15  ;;  %v5738_v39 = vld [vmem:[#allocation2 + $0x172] sm:$0xff] }
 0x509   :  { %v4060_v34 = vpop.f32.mrf.mxu3 }
 0x50a   :  { %v10223_v27 = vadd.f32 %v4060_v34, %v3595_v4  ;;  %v4934_v48 = vpop.f32.mrf.mxu1  ;;  %v10234_v4 = vpop.f32.mrf.mxu0  ;;  %v3534_v36 = vadd.f32 %v11485_v6, %v3003_v11  ;;  %v11490_v6 = vld [vmem:[#allocation97_spill] sm:$0xff] }
 0x50b   :  { %6894 = vmatmul.msk.f32.gmra.mxu0 %vm776_vm2, %v9786_v37  ;;  %v5126_v28 = vadd.f32 %v4934_v48, %v4594_v45  ;;  %v10240_v37 = vld [vmem:[%s11028_s7] ss:$0 sm:$0xff]  ;;  %v4595_v45 = vadd.f32 %v9675_v42, %v4064_v43  ;;  %v11487_v42 = vld [vmem:[#allocation166_spill] sm:$0xff] }
 0x50c   :  { %v4065_v11 = vadd.f32 %v11487_v42, %v3534_v36  ;;  %v11493_v42 = vld [vmem:[#allocation108_spill] sm:$0xff] }
 0x50d   :  { %6924 = vmatmul.msk.f32.gmra.mxu1 %vm776_vm2, %v4675_v29  ;;  %7007 = vmatmul.msk.f32.gmra.mxu2 %vm776_vm2, %v5224_v62  ;;  %v5657_v55 = vadd.f32 %v9967_v24, %v5126_v28  ;;  %v2473_v24 = vadd.f32 %v9443_v26, %v1821_v17  ;;  %v4676_v62 = vld [vmem:[#allocation2 + $0x170] sm:$0xff]  ;;  %v11486_v26 = vld [vmem:[#allocation167_spill] sm:$0xff] }
 0x50e   :  { %7054 = vmatmul.msk.f32.gmra.mxu3 %vm776_vm2, %v5737_v63  ;;  %v5225_v63 = vld [vmem:[#allocation2 + $0x2d1] sm:$0xff]  ;;  %v4596_v1 = vadd.f32 %v9693_v3, %v4065_v11  ;;  %v5739_v3 = vld [vmem:[#allocation2 + $0x182] sm:$0xff] }
 0x50f   :  { %v11494_v11 = vld [vmem:[#allocation169_spill] sm:$0xff] }
 0x511   :  { %v5996_v34 = vpop.f32.mrf.mxu3 }
 0x512   :  { %v6188_v48 = vadd.f32 %v5996_v34, %v5657_v55  ;;  %v4937_v15 = vpop.f32.mrf.mxu1  ;;  %v11488_v55 = vld [vmem:[#allocation104_spill] sm:$0xff]  ;;  %v11489_v34 = vld [vmem:[#allocation165_spill] sm:$0xff]  ;;  %v10265_v17 = vpop.f32.mrf.mxu0 }
 0x513   :  { %6895 = vmatmul.msk.f32.gmra.mxu0 %vm776_vm2, %v9804_v9  ;;  %v5127_v29 = vadd.f32 %v4937_v15, %v4595_v45  ;;  %v3004_v9 = vadd.f32 %v11486_v26, %v2473_v24  ;;  %v1824_v57 = vadd.f32 %v11489_v34, %v11488_v55  ;;  %v10267_v15 = vpop.f32.mrf.mxu2 }
 0x514   :  { %v6256_v28 = vadd.f32 %v10240_v37, %v6188_v48 }
 0x515   :  { %6925 = vmatmul.msk.f32.gmra.mxu1 %vm776_vm2, %v4676_v62  ;;  %7008 = vmatmul.msk.f32.gmra.mxu2 %vm776_vm2, %v5225_v63  ;;  %v5658_v31 = vadd.f32 %v9982_v40, %v5127_v29  ;;  %v2474_v24 = vadd.f32 %v9461_v8, %v1824_v57  ;;  %v3535_v36 = vadd.f32 %v11490_v6, %v3004_v9  ;;  %v4677_v29 = vld [vmem:[#allocation2 + $0x180] sm:$0xff]  ;;  %v11492_v63 = vld [vmem:[#allocation170_spill] sm:$0xff]  ;;  %v4678_v6 = vld [vmem:[#allocation2 + $0x190] sm:$0xff] }
 0x516   :  { %6320 = vst.msk [vmem:[%s11029_s8] sm:$0xff] %vm776_vm2, %v6256_v28  ;;  %7055 = vmatmul.msk.f32.gmra.mxu3 %vm776_vm2, %v5738_v39  ;;  %v5226_v62 = vld [vmem:[#allocation2 + $0x2e1] sm:$0xff] }
 0x517   :  { %v11491_v8 = vld [vmem:[#allocation171_spill] sm:$0xff]  ;;  %v4066_v39 = vadd.f32 %v11492_v63, %v3535_v36  ;;  %v5227_v36 = vld [vmem:[#allocation2 + $0x2f1] sm:$0xff] }
 0x519   :  { %v5999_v43 = vpop.f32.mrf.mxu3 }
 0x51a   :  { %v6189_v45 = vadd.f32 %v5999_v43, %v5658_v31  ;;  %v4940_v48 = vpop.f32.mrf.mxu1  ;;  %v1827_v31 = vadd.f32 %v11494_v11, %v11493_v42  ;;  %v4597_v43 = vadd.f32 %v9711_v30, %v4066_v39  ;;  %v5740_v30 = vld [vmem:[#allocation2 + $0x192] sm:$0xff]  ;;  %v4182_v11 = vld [vmem:[#allocation2 + $0x442] sm:$0xff] }
 0x51b   :  { %6896 = vmatmul.msk.f32.gmra.mxu0 %vm776_vm2, %v9820_v47  ;;  %v5128_v28 = vadd.f32 %v4940_v48, %v4596_v1  ;;  %v3005_v47 = vadd.f32 %v11491_v8, %v2474_v24  ;;  %v11495_v1 = vld [vmem:[#allocation101_spill] sm:$0xff]  ;;  %v10291_v48 = vpop.f32.mrf.mxu0  ;;  %v11498_v8 = vld [vmem:[#allocation112_spill] sm:$0xff] }
 0x51c   :  { %v6257_v40 = vadd.f32 %v10240_v37, %v6189_v45  ;;  %v2475_v57 = vadd.f32 %v9479_v2, %v1827_v31  ;;  %v11496_v2 = vld [vmem:[#allocation175_spill] sm:$0xff]  ;;  %v11500_v39 = vld [vmem:[#allocation153_spill] sm:$0xff] }
 0x51d   :  { %6926 = vmatmul.msk.f32.gmra.mxu1 %vm776_vm2, %v4677_v29  ;;  %7009 = vmatmul.msk.f32.gmra.mxu2 %vm776_vm2, %v5226_v62  ;;  %v5659_v26 = vadd.f32 %v9997_v60, %v5128_v28  ;;  %v3536_v45 = vadd.f32 %v11495_v1, %v3005_v47  ;;  %v11497_v28 = vld [vmem:[#allocation174_spill] sm:$0xff]  ;;  %v11499_v47 = vld [vmem:[#allocation173_spill] sm:$0xff]  ;;  %v11501_v31 = vld [vmem:[#allocation219_spill] sm:$0xff] }
 0x51e   :  { %6321 = vst.msk [vmem:[%s11029_s8 + $0x8] sm:$0xff] %vm776_vm2, %v6257_v40  ;;  %7056 = vmatmul.msk.f32.gmra.mxu3 %vm776_vm2, %v5739_v3  ;;  %v10294_v40 = vpop.f32.mrf.mxu2  ;;  %v1830_v63 = vadd.f32 %v11499_v47, %v11498_v8  ;;  %v11507_v47 = vld [vmem:[#allocation6_spill] sm:$0xff] }
 0x51f   :  { %v4067_v29 = vadd.f32 %v11497_v28, %v3536_v45  ;;  %v4679_v45 = vld [vmem:[#allocation2 + $0x1a0] sm:$0xff] }
 0x521   :  { %v6002_v9 = vpop.f32.mrf.mxu3 }
 0x522   :  { %v6190_v55 = vadd.f32 %v6002_v9, %v5659_v26  ;;  %v4943_v34 = vpop.f32.mrf.mxu1  ;;  %v4598_v26 = vadd.f32 %v11500_v39, %v4067_v29 }
 0x523   :  { %6897 = vmatmul.msk.f32.gmra.mxu0 %vm776_vm2, %v9838_v44  ;;  %v5129_v60 = vadd.f32 %v4943_v34, %v4597_v43  ;;  %v3006_v44 = vadd.f32 %v11496_v2, %v2475_v57  ;;  %v2476_v43 = vadd.f32 %v11501_v31, %v1830_v63  ;;  %v11504_v2 = vld [vmem:[#allocation178_spill] sm:$0xff] }
 0x524   :  { %v6258_v24 = vadd.f32 %v10240_v37, %v6190_v55  ;;  %v11502_v55 = vld [vmem:[#allocation105_spill] sm:$0xff] }
 0x525   :  { %6927 = vmatmul.msk.f32.gmra.mxu1 %vm776_vm2, %v4678_v6  ;;  %7010 = vmatmul.msk.f32.gmra.mxu2 %vm776_vm2, %v5227_v36  ;;  %v5660_v62 = vadd.f32 %v10012_v54, %v5129_v60  ;;  %v3537_v34 = vadd.f32 %v11502_v55, %v3006_v44  ;;  %v5228_v54 = vld [vmem:[#allocation2 + $0x301] sm:$0xff]  ;;  %v10315_v60 = vpop.f32.mrf.mxu0  ;;  %v11510_v55 = vld [vmem:[#allocation109_spill] sm:$0xff] }
 0x526   :  { %6322 = vst.msk [vmem:[%s11029_s8 + $0x10] sm:$0xff] %vm776_vm2, %v6258_v24  ;;  %7057 = vmatmul.msk.f32.gmra.mxu3 %vm776_vm2, %v5740_v30  ;;  %v5741_v24 = vld [vmem:[#allocation2 + $0x1a2] sm:$0xff]  ;;  %v10322_v6 = vpop.f32.mrf.mxu2 }
 0x527   :  { %v11503_v36 = vld [vmem:[#allocation179_spill] sm:$0xff]  ;;  %v4068_v44 = vadd.f32 %v11504_v2, %v3537_v34  ;;  %v11514_v2 = vld [vmem:[#allocation182_spill] sm:$0xff] }
 0x528   :  { %v3007_v30 = vadd.f32 %v11503_v36, %v2476_v43  ;;  %v11513_v36 = vld [vmem:[#allocation183_spill] sm:$0xff] }
 0x529   :  { %v6005_v3 = vpop.f32.mrf.mxu3  ;;  %v4599_v63 = vadd.f32 %v11507_v47, %v4068_v44 }
 0x52a   :  { %v6191_v9 = vadd.f32 %v6005_v3, %v5660_v62  ;;  %v4946_v42 = vpop.f32.mrf.mxu1  ;;  %v11505_v62 = vld [vmem:[#allocation116_spill] sm:$0xff]  ;;  %v11506_v3 = vld [vmem:[#allocation177_spill] sm:$0xff]  ;;  %v3538_v43 = vadd.f32 %v11510_v55, %v3007_v30 }
 0x52b   :  { %6898 = vmatmul.msk.f32.gmra.mxu0 %vm776_vm2, %v4182_v11  ;;  %v5130_v1 = vadd.f32 %v4946_v42, %v4598_v26  ;;  %v1833_v8 = vadd.f32 %v11506_v3, %v11505_v62  ;;  %v11508_v42 = vld [vmem:[#allocation10_spill] sm:$0xff]  ;;  %v11509_v11 = vld [vmem:[#allocation221_spill] sm:$0xff] }
 0x52c   :  { %v6259_v57 = vadd.f32 %v10240_v37, %v6191_v9  ;;  %v5229_v9 = vld [vmem:[#allocation2 + $0x311] sm:$0xff]  ;;  %v4069_v44 = vadd.f32 %v11514_v2, %v3538_v43  ;;  %v4681_v43 = vld [vmem:[#allocation2 + $0x1c0] sm:$0xff]  ;;  %v11522_v2 = vld [vmem:[#allocation160_spill] sm:$0xff] }
 0x52d   :  { %6928 = vmatmul.msk.f32.gmra.mxu1 %vm776_vm2, %v4679_v45  ;;  %7011 = vmatmul.msk.f32.gmra.mxu2 %vm776_vm2, %v5228_v54  ;;  %v5661_v28 = vadd.f32 %v10025_v12, %v5130_v1  ;;  %v2477_v31 = vadd.f32 %v11509_v11, %v1833_v8  ;;  %v4680_v12 = vld [vmem:[#allocation2 + $0x1b0] sm:$0xff]  ;;  %v11511_v45 = vld [vmem:[#allocation120_spill] sm:$0xff] }
 0x52e   :  { %6323 = vst.msk [vmem:[%s11029_s8 + $0x18] sm:$0xff] %vm776_vm2, %v6259_v57  ;;  %7058 = vmatmul.msk.f32.gmra.mxu3 %vm776_vm2, %v5741_v24  ;;  %v5742_v1 = vld [vmem:[#allocation2 + $0x1b2] sm:$0xff]  ;;  %v10349_v62 = vpop.f32.mrf.mxu2 }
 0x52f   :  { %v11512_v54 = vld [vmem:[#allocation181_spill] sm:$0xff]  ;;  %v3008_v30 = vadd.f32 %v11513_v36, %v2477_v31 }
 0x530   :  { %v1836_v24 = vadd.f32 %v11512_v54, %v11511_v45  ;;  %v11515_v8 = vld [vmem:[#allocation33_spill] sm:$0xff] }
 0x531   :  { %v6008_v29 = vpop.f32.mrf.mxu3  ;;  %v4600_v47 = vadd.f32 %v11515_v8, %v4069_v44  ;;  %v11521_v36 = vld [vmem:[#allocation185_spill] sm:$0xff] }
 0x532   :  { %v6192_v39 = vadd.f32 %v6008_v29, %v5661_v28  ;;  %v4949_v26 = vpop.f32.mrf.mxu1  ;;  %v10346_v28 = vpop.f32.mrf.mxu0 }
 0x533   :  { %6899 = vmatmul.msk.f32.gmra.mxu0 %vm776_vm2, %v11508_v42  ;;  %v5131_v57 = vadd.f32 %v4949_v26, %v4599_v63  ;;  %v11516_v26 = vld [vmem:[#allocation223_spill] sm:$0xff]  ;;  %v11517_v42 = vld [vmem:[#allocation113_spill] sm:$0xff] }
 0x534   :  { %v6260_v34 = vadd.f32 %v10240_v37, %v6192_v39  ;;  %v3539_v11 = vadd.f32 %v11517_v42, %v3008_v30 }
 0x535   :  { %6929 = vmatmul.msk.f32.gmra.mxu1 %vm776_vm2, %v4680_v12  ;;  %7012 = vmatmul.msk.f32.gmra.mxu2 %vm776_vm2, %v5229_v9  ;;  %v5662_v29 = vadd.f32 %v10040_v0, %v5131_v57  ;;  %v2478_v9 = vadd.f32 %v11516_v26, %v1836_v24  ;;  %v5743_v0 = vld [vmem:[#allocation2 + $0x1c2] sm:$0xff]  ;;  %v11519_v12 = vld [vmem:[#allocation186_spill] sm:$0xff]  ;;  %v11523_v26 = vld [vmem:[#allocation225_spill] sm:$0xff] }
 0x536   :  { %6324 = vst.msk [vmem:[%s11029_s8 + $0x20] sm:$0xff] %vm776_vm2, %v6260_v34  ;;  %7059 = vmatmul.msk.f32.gmra.mxu3 %vm776_vm2, %v5742_v1  ;;  %v5230_v34 = vld [vmem:[#allocation2 + $0x341] sm:$0xff]  ;;  %v4070_v1 = vadd.f32 %v11519_v12, %v3539_v11 }
 0x537   :  { %v11520_v24 = vld [vmem:[#allocation124_spill] sm:$0xff] }
 0x538   :  { %v1839_v30 = vadd.f32 %v11521_v36, %v11520_v24  ;;  %v4601_v44 = vadd.f32 %v11522_v2, %v4070_v1  ;;  %v11527_v12 = vld [vmem:[#allocation128_spill] sm:$0xff]  ;;  %v11530_v2 = vld [vmem:[#allocation47_spill] sm:$0xff] }
 0x539   :  { %v6011_v3 = vpop.f32.mrf.mxu3  ;;  %v11528_v1 = vld [vmem:[#allocation188_spill] sm:$0xff] }
 0x53a   :  { %v6193_v63 = vadd.f32 %v6011_v3, %v5662_v29  ;;  %v4952_v39 = vpop.f32.mrf.mxu1  ;;  %v10370_v29 = vpop.f32.mrf.mxu0 }
 0x53b   :  { %6900 = vmatmul.msk.f32.gmra.mxu0 %vm776_vm2, %v9889_v16  ;;  %v5132_v55 = vadd.f32 %v4952_v39, %v4600_v47  ;;  %v11518_v16 = vld [vmem:[#allocation187_spill] sm:$0xff]  ;;  %v4682_v47 = vld [vmem:[#allocation2 + $0x1d0] sm:$0xff] }
 0x53c   :  { %v6261_v31 = vadd.f32 %v10240_v37, %v6193_v63  ;;  %v3009_v57 = vadd.f32 %v11518_v16, %v2478_v9  ;;  %v10372_v63 = vpop.f32.mrf.mxu2  ;;  %v5744_v39 = vld [vmem:[#allocation2 + $0x1d2] sm:$0xff]  ;;  %v2479_v9 = vadd.f32 %v11523_v26, %v1839_v30 }
 0x53d   :  { %6930 = vmatmul.msk.f32.gmra.mxu1 %vm776_vm2, %v4681_v43  ;;  %7013 = vmatmul.msk.f32.gmra.mxu2 %vm776_vm2, %v5230_v34  ;;  %v5663_v45 = vadd.f32 %v10054_v7, %v5132_v55  ;;  %v11524_v7 = vld [vmem:[#allocation117_spill] sm:$0xff] }
 0x53e   :  { %6325 = vst.msk [vmem:[%s11029_s8 + $0x28] sm:$0xff] %vm776_vm2, %v6261_v31  ;;  %7060 = vmatmul.msk.f32.gmra.mxu3 %vm776_vm2, %v5743_v0  ;;  %v3540_v42 = vadd.f32 %v11524_v7, %v3009_v57  ;;  %v5231_v55 = vld [vmem:[#allocation2 + $0x351] sm:$0xff]  ;;  %v5232_v7 = vld [vmem:[#allocation2 + $0x361] sm:$0xff] }
 0x53f   :  { %v11526_v34 = vld [vmem:[#allocation189_spill] sm:$0xff] }
 0x540   :  { %v4071_v0 = vadd.f32 %v11526_v34, %v3540_v42 }
 0x541   :  { %v6014_v54 = vpop.f32.mrf.mxu3 }
 0x542   :  { %v6194_v3 = vadd.f32 %v6014_v54, %v5663_v45  ;;  %v4955_v8 = vpop.f32.mrf.mxu1  ;;  %v1842_v45 = vadd.f32 %v11528_v1, %v11527_v12  ;;  %v11529_v54 = vld [vmem:[#allocation8_spill] sm:$0xff] }
 0x543   :  { %6901 = vmatmul.msk.f32.gmra.mxu0 %vm776_vm2, %v9905_v5  ;;  %v5133_v31 = vadd.f32 %v4955_v8, %v4601_v44  ;;  %v11525_v5 = vld [vmem:[#allocation190_spill] sm:$0xff]  ;;  %v4602_v24 = vadd.f32 %v11529_v54, %v4071_v0  ;;  %v11531_v44 = vld [vmem:[#allocation227_spill] sm:$0xff]  ;;  %v11532_v8 = vld [vmem:[#allocation121_spill] sm:$0xff] }
 0x544   :  { %v6262_v11 = vadd.f32 %v10240_v37, %v6194_v3  ;;  %v3010_v43 = vadd.f32 %v11525_v5, %v2479_v9  ;;  %v2480_v3 = vadd.f32 %v11531_v44, %v1842_v45  ;;  %v4683_v9 = vld [vmem:[#allocation2 + $0x200] sm:$0xff]  ;;  %v10399_v42 = vpop.f32.mrf.mxu2  ;;  %v11534_v5 = vld [vmem:[#allocation193_spill] sm:$0xff]  ;;  %v11537_v1 = vld [vmem:[#allocation164_spill] sm:$0xff] }
 0x545   :  { %6931 = vmatmul.msk.f32.gmra.mxu1 %vm776_vm2, %v4682_v47  ;;  %7014 = vmatmul.msk.f32.gmra.mxu2 %vm776_vm2, %v5231_v55  ;;  %v5664_v16 = vadd.f32 %v10069_v35, %v5133_v31  ;;  %v11533_v31 = vld [vmem:[#allocation194_spill] sm:$0xff] }
 0x546   :  { %6326 = vst.msk [vmem:[%s11029_s8 + $0x30] sm:$0xff] %vm776_vm2, %v6262_v11  ;;  %7061 = vmatmul.msk.f32.gmra.mxu3 %vm776_vm2, %v5744_v39  ;;  %v3541_v47 = vadd.f32 %v11532_v8, %v3010_v43  ;;  %v10396_v39 = vpop.f32.mrf.mxu0  ;;  %v5745_v11 = vld [vmem:[#allocation2 + $0x202] sm:$0xff]  ;;  %v3011_v55 = vadd.f32 %v11533_v31, %v2480_v3 }
 0x548   :  { %v4072_v43 = vadd.f32 %v11534_v5, %v3541_v47  ;;  %v4684_v47 = vld [vmem:[#allocation2 + $0x210] sm:$0xff] }
 0x549   :  { %v6017_v57 = vpop.f32.mrf.mxu3 }
 0x54a   :  { %v6195_v36 = vadd.f32 %v6017_v57, %v5664_v16  ;;  %v4958_v30 = vpop.f32.mrf.mxu1  ;;  %v11535_v16 = vld [vmem:[#allocation132_spill] sm:$0xff]  ;;  %v4603_v45 = vadd.f32 %v11537_v1, %v4072_v43 }
 0x54b   :  { %6902 = vmatmul.msk.f32.gmra.mxu0 %vm776_vm2, %v11530_v2  ;;  %v5134_v35 = vadd.f32 %v4958_v30, %v4602_v24  ;;  %v11536_v57 = vld [vmem:[#allocation192_spill] sm:$0xff]  ;;  %v11539_v2 = vld [vmem:[#allocation125_spill] sm:$0xff] }
 0x54c   :  { %v6263_v26 = vadd.f32 %v10240_v37, %v6195_v36  ;;  %v1845_v12 = vadd.f32 %v11536_v57, %v11535_v16  ;;  %v11538_v36 = vld [vmem:[#allocation140_spill] sm:$0xff]  ;;  %v3542_v44 = vadd.f32 %v11539_v2, %v3011_v55  ;;  %v11544_v16 = vld [vmem:[#allocation9_spill] sm:$0xff] }
 0x54d   :  { %6932 = vmatmul.msk.f32.gmra.mxu1 %vm776_vm2, %v4683_v9  ;;  %7015 = vmatmul.msk.f32.gmra.mxu2 %vm776_vm2, %v5232_v7  ;;  %v5665_v34 = vadd.f32 %v10084_v61, %v5134_v35  ;;  %v5233_v61 = vld [vmem:[#allocation2 + $0x371] sm:$0xff]  ;;  %v11542_v43 = vld [vmem:[#allocation136_spill] sm:$0xff] }
 0x54e   :  { %6327 = vst.msk [vmem:[%s11029_s8 + $0x38] sm:$0xff] %vm776_vm2, %v6263_v26  ;;  %7062 = vmatmul.msk.f32.gmra.mxu3 %vm776_vm2, %v5745_v11  ;;  %v2481_v30 = vadd.f32 %v11538_v36, %v1845_v12  ;;  %v5746_v26 = vld [vmem:[#allocation2 + $0x212] sm:$0xff]  ;;  %v10421_v35 = vpop.f32.mrf.mxu0 }
 0x54f   :  { %v11540_v9 = vld [vmem:[#allocation198_spill] sm:$0xff]  ;;  %v11541_v11 = vld [vmem:[#allocation197_spill] sm:$0xff] }
 0x550   :  { %v3012_v7 = vadd.f32 %v11540_v9, %v2481_v30  ;;  %v4073_v31 = vadd.f32 %v11541_v11, %v3542_v44  ;;  %v4685_v44 = vld [vmem:[#allocation2 + $0x220] sm:$0xff] }
 0x551   :  { %v6020_v0 = vpop.f32.mrf.mxu3 }
 0x552   :  { %v6196_v54 = vadd.f32 %v6020_v0, %v5665_v34  ;;  %v4961_v24 = vpop.f32.mrf.mxu1  ;;  %v11543_v34 = vld [vmem:[#allocation196_spill] sm:$0xff]  ;;  %v4604_v57 = vadd.f32 %v11544_v16, %v4073_v31  ;;  %v11549_v31 = vld [vmem:[#allocation141_spill] sm:$0xff] }
 0x553   :  { %6903 = vmatmul.msk.f32.gmra.mxu0 %vm776_vm2, %v9940_v46  ;;  %v5135_v8 = vadd.f32 %v4961_v24, %v4603_v45  ;;  %v10428_v46 = vpop.f32.mrf.mxu2  ;;  %v1848_v0 = vadd.f32 %v11543_v34, %v11542_v43  ;;  %v11545_v45 = vld [vmem:[#allocation3_spill] sm:$0xff]  ;;  %v11546_v24 = vld [vmem:[#allocation129_spill] sm:$0xff]  ;;  %v11551_v43 = vld [vmem:[#allocation168_spill] sm:$0xff] }
 0x554   :  { %v6264_v3 = vadd.f32 %v10240_v37, %v6196_v54  ;;  %v3543_v36 = vadd.f32 %v11546_v24, %v3012_v7 }
 0x555   :  { %6933 = vmatmul.msk.f32.gmra.mxu1 %vm776_vm2, %v4684_v47  ;;  %7016 = vmatmul.msk.f32.gmra.mxu2 %vm776_vm2, %v5233_v61  ;;  %v5666_v55 = vadd.f32 %v10102_v18, %v5135_v8  ;;  %v2482_v54 = vadd.f32 %v11545_v45, %v1848_v0  ;;  %v5234_v18 = vld [vmem:[#allocation2 + $0x381] sm:$0xff]  ;;  %v11548_v47 = vld [vmem:[#allocation201_spill] sm:$0xff] }
 0x556   :  { %6328 = vst.msk [vmem:[%s11029_s8 + $0x40] sm:$0xff] %vm776_vm2, %v6264_v3  ;;  %7063 = vmatmul.msk.f32.gmra.mxu3 %vm776_vm2, %v5746_v26  ;;  %v5747_v3 = vld [vmem:[#allocation2 + $0x222] sm:$0xff]  ;;  %v4074_v61 = vadd.f32 %v11548_v47, %v3543_v36  ;;  %v10450_v26 = vpop.f32.mrf.mxu0  ;;  %v11553_v45 = vld [vmem:[#allocation133_spill] sm:$0xff] }
 0x557   :  { %v4686_v36 = vld [vmem:[#allocation2 + $0x230] sm:$0xff] }
 0x558   :  { %v4605_v34 = vadd.f32 %v11551_v43, %v4074_v61  ;;  %v11556_v61 = vld [vmem:[#allocation146_spill] sm:$0xff] }
 0x559   :  { %v6023_v5 = vpop.f32.mrf.mxu3 }
 0x55a   :  { %v6197_v12 = vadd.f32 %v6023_v5, %v5666_v55  ;;  %v4964_v1 = vpop.f32.mrf.mxu1  ;;  %v11550_v55 = vld [vmem:[#allocation200_spill] sm:$0xff] }
 0x55b   :  { %6904 = vmatmul.msk.f32.gmra.mxu0 %vm776_vm2, %v9958_v41  ;;  %v5136_v2 = vadd.f32 %v4964_v1, %v4604_v57  ;;  %v11547_v41 = vld [vmem:[#allocation202_spill] sm:$0xff]  ;;  %v10453_v7 = vpop.f32.mrf.mxu2  ;;  %v1851_v5 = vadd.f32 %v11550_v55, %v11549_v31  ;;  %v11558_v31 = vld [vmem:[#allocation44_spill] sm:$0xff] }
 0x55c   :  { %v6265_v30 = vadd.f32 %v10240_v37, %v6197_v12  ;;  %v3013_v8 = vadd.f32 %v11547_v41, %v2482_v54  ;;  %v7138_v57 = vld [vmem:[#allocation2 + $0x4d2] sm:$0xff] }
 0x55d   :  { %6934 = vmatmul.msk.f32.gmra.mxu1 %vm776_vm2, %v4685_v44  ;;  %7017 = vmatmul.msk.f32.gmra.mxu2 %vm776_vm2, %v5234_v18  ;;  %v5667_v9 = vadd.f32 %v10119_v59, %v5136_v2  ;;  %v11552_v12 = vld [vmem:[#allocation145_spill] sm:$0xff]  ;;  %v11554_v44 = vld [vmem:[#allocation206_spill] sm:$0xff] }
 0x55e   :  { %6329 = vst.msk [vmem:[%s11029_s8 + $0x48] sm:$0xff] %vm776_vm2, %v6265_v30  ;;  %7064 = vmatmul.msk.f32.gmra.mxu3 %vm776_vm2, %v5747_v3  ;;  %v2483_v1 = vadd.f32 %v11552_v12, %v1851_v5  ;;  %v3544_v54 = vadd.f32 %v11553_v45, %v3013_v8  ;;  %v5235_v30 = vld [vmem:[#allocation2 + $0x391] sm:$0xff] }
 0x55f   :  { %v5748_v2 = vld [vmem:[#allocation2 + $0x232] sm:$0xff] }
 0x560   :  { %v3014_v18 = vadd.f32 %v11554_v44, %v2483_v1  ;;  %v11555_v3 = vld [vmem:[#allocation205_spill] sm:$0xff]  ;;  %v11562_v44 = vld [vmem:[#allocation210_spill] sm:$0xff] }
 0x561   :  { %v6026_v11 = vpop.f32.mrf.mxu3  ;;  %v4075_v41 = vadd.f32 %v11555_v3, %v3544_v54 }
 0x562   :  { %v6198_v0 = vadd.f32 %v6026_v11, %v5667_v9  ;;  %v4967_v16 = vpop.f32.mrf.mxu1  ;;  %v11557_v9 = vld [vmem:[#allocation204_spill] sm:$0xff] }
 0x563   :  { %6905 = vmatmul.msk.f32.gmra.mxu0 %vm776_vm2, %v7138_v57  ;;  %v5137_v59 = vadd.f32 %v4967_v16, %v4605_v34  ;;  %v1854_v11 = vadd.f32 %v11557_v9, %v11556_v61  ;;  %v4606_v55 = vadd.f32 %v11558_v31, %v4075_v41  ;;  %v10475_v34 = vld [vmem:[#allocation2 + $0x4e2] sm:$0xff]  ;;  %v10479_v16 = vpop.f32.mrf.mxu2  ;;  %v11564_v31 = vld [vmem:[#allocation142_spill] sm:$0xff] }
 0x564   :  { %v6266_v24 = vadd.f32 %v10240_v37, %v6198_v0  ;;  %v10477_v0 = vpop.f32.mrf.mxu0  ;;  %v11559_v57 = vld [vmem:[#allocation4_spill] sm:$0xff] }
 0x565   :  { %6935 = vmatmul.msk.f32.gmra.mxu1 %vm776_vm2, %v4686_v36  ;;  %7018 = vmatmul.msk.f32.gmra.mxu2 %vm776_vm2, %v5235_v30  ;;  %v5668_v8 = vadd.f32 %v10137_v14, %v5137_v59  ;;  %v2484_v12 = vadd.f32 %v11559_v57, %v1854_v11  ;;  %v11560_v14 = vld [vmem:[#allocation137_spill] sm:$0xff]  ;;  %v5236_v59 = vld [vmem:[#allocation2 + $0x3a1] sm:$0xff] }
 0x566   :  { %6330 = vst.msk [vmem:[%s11029_s8 + $0x50] sm:$0xff] %vm776_vm2, %v6266_v24  ;;  %7065 = vmatmul.msk.f32.gmra.mxu3 %vm776_vm2, %v5748_v2  ;;  %v3545_v1 = vadd.f32 %v11560_v14, %v3014_v18  ;;  %v4687_v24 = vld [vmem:[#allocation2 + $0x240] sm:$0xff]  ;;  %v5237_v11 = vld [vmem:[#allocation2 + $0x3b1] sm:$0xff] }
 0x567   :  { %v5749_v36 = vld [vmem:[#allocation2 + $0x242] sm:$0xff]  ;;  %v4688_v57 = vld [vmem:[#allocation2 + $0x250] sm:$0xff] }
 0x568   :  { %v11561_v30 = vld [vmem:[#allocation211_spill] sm:$0xff]  ;;  %v4076_v18 = vadd.f32 %v11562_v44, %v3545_v1 }
 0x569   :  { %v6029_v47 = vpop.f32.mrf.mxu3  ;;  %v3015_v2 = vadd.f32 %v11561_v30, %v2484_v12  ;;  %v5750_v12 = vld [vmem:[#allocation2 + $0x252] sm:$0xff] }
 0x56a   :  { %v6199_v5 = vadd.f32 %v6029_v47, %v5668_v8  ;;  %v4970_v43 = vpop.f32.mrf.mxu1  ;;  %v11563_v8 = vld [vmem:[#allocation45_spill] sm:$0xff] }
 0x56b   :  { %6906 = vmatmul.msk.f32.gmra.mxu0 %vm776_vm2, %v10475_v34  ;;  %v5138_v54 = vadd.f32 %v4970_v43, %v4606_v55  ;;  %v4607_v47 = vadd.f32 %v11563_v8, %v4076_v18  ;;  %v3546_v55 = vadd.f32 %v11564_v31, %v3015_v2  ;;  %v10499_v14 = vpop.f32.mrf.mxu2  ;;  %v4689_v18 = vld [vmem:[#allocation2 + $0x260] sm:$0xff] }
 0x56c   :  { %v6267_v45 = vadd.f32 %v10240_v37, %v6199_v5 }
 0x56d   :  { %6936 = vmatmul.msk.f32.gmra.mxu1 %vm776_vm2, %v4687_v24  ;;  %7019 = vmatmul.msk.f32.gmra.mxu2 %vm776_vm2, %v5236_v59  ;;  %v5669_v3 = vadd.f32 %v10155_v58, %v5138_v54  ;;  %v11565_v58 = vld [vmem:[#allocation214_spill] sm:$0xff]  ;;  %v11566_v24 = vld [vmem:[#allocation176_spill] sm:$0xff] }
 0x56e   :  { %6331 = vst.msk [vmem:[%s11029_s8 + $0x58] sm:$0xff] %vm776_vm2, %v6267_v45  ;;  %7066 = vmatmul.msk.f32.gmra.mxu3 %vm776_vm2, %v5749_v36  ;;  %v4077_v1 = vadd.f32 %v11565_v58, %v3546_v55  ;;  %v5239_v58 = vld [vmem:[#allocation2 + $0x3f1] sm:$0xff] }
 0x570   :  { %v4608_v59 = vadd.f32 %v11566_v24, %v4077_v1 }
 0x571   :  { %v6032_v41 = vpop.f32.mrf.mxu3 }
 0x572   :  { %v6200_v61 = vadd.f32 %v6032_v41, %v5669_v3  ;;  %v4973_v9 = vpop.f32.mrf.mxu1  ;;  %v5238_v3 = vld [vmem:[#allocation2 + $0x3e1] sm:$0xff] }
 0x573   :  { %v5139_v43 = vadd.f32 %v4973_v9, %v4607_v47  ;;  %v5751_v41 = vld [vmem:[#allocation2 + $0x262] sm:$0xff] }
 0x574   :  { %v6268_v5 = vadd.f32 %v10240_v37, %v6200_v61  ;;  %v11567_v61 = vld [vmem:[#allocation215_spill] sm:$0xff]  ;;  %v11568_v9 = vld [vmem:[#allocation12_spill] sm:$0xff] }
 0x575   :  { %6937 = vmatmul.msk.f32.gmra.mxu1 %vm776_vm2, %v4688_v57  ;;  %7020 = vmatmul.msk.f32.gmra.mxu2 %vm776_vm2, %v5237_v11  ;;  %v5670_v45 = vadd.f32 %v10172_v22, %v5139_v43  ;;  %v10519_v22 = vpop.f32.mrf.mxu2  ;;  %v4609_v11 = vadd.f32 %v11568_v9, %v11567_v61  ;;  %v5752_v43 = vld [vmem:[#allocation2 + $0x272] sm:$0xff] }
 0x576   :  { %6332 = vst.msk [vmem:[%s11029_s8 + $0x60] sm:$0xff] %vm776_vm2, %v6268_v5  ;;  %7067 = vmatmul.msk.f32.gmra.mxu3 %vm776_vm2, %v5750_v12  ;;  %v4690_v5 = vld [vmem:[#allocation2 + $0x270] sm:$0xff] }
 0x579   :  { %v6035_v54 = vpop.f32.mrf.mxu3 }
 0x57a   :  { %v6201_v36 = vadd.f32 %v6035_v54, %v5670_v45  ;;  %v4976_v30 = vpop.f32.mrf.mxu1  ;;  %v11569_v54 = vld [vmem:[#allocation216_spill] sm:$0xff] }
 0x57b   :  { %v5140_v44 = vadd.f32 %v4976_v30, %v4608_v59  ;;  %v4610_v24 = vadd.f32 %v9974_v25, %v11569_v54 }
 0x57c   :  { %v6269_v2 = vadd.f32 %v10240_v37, %v6201_v36 }
 0x57d   :  { %6938 = vmatmul.msk.f32.gmra.mxu1 %vm776_vm2, %v4689_v18  ;;  %7021 = vmatmul.msk.f32.gmra.mxu2 %vm776_vm2, %v5238_v3  ;;  %v5671_v8 = vadd.f32 %v10192_v52, %v5140_v44  ;;  %v10533_v1 = vpop.f32.mrf.mxu2  ;;  %v4691_v44 = vld [vmem:[#allocation2 + $0x2a0] sm:$0xff] }
 0x57e   :  { %6333 = vst.msk [vmem:[%s11029_s8 + $0x68] sm:$0xff] %vm776_vm2, %v6269_v2  ;;  %7068 = vmatmul.msk.f32.gmra.mxu3 %vm776_vm2, %v5751_v41  ;;  %v5240_v18 = vld [vmem:[#allocation2 + $0x401] sm:$0xff]  ;;  %v11570_v41 = vld [vmem:[#allocation217_spill] sm:$0xff] }
 0x57f   :  { %v5753_v3 = vld [vmem:[#allocation2 + $0x2a2] sm:$0xff] }
 0x581   :  { %v6038_v47 = vpop.f32.mrf.mxu3 }
 0x582   :  { %v6202_v31 = vadd.f32 %v6038_v47, %v5671_v8  ;;  %v4979_v55 = vpop.f32.mrf.mxu1  ;;  %v4611_v8 = vadd.f32 %v9991_v49, %v11570_v41  ;;  %v4694_v41 = vld [vmem:[#allocation2 + $0x2d0] sm:$0xff] }
 0x583   :  { %v5141_v12 = vadd.f32 %v4979_v55, %v4609_v11  ;;  %v4692_v55 = vld [vmem:[#allocation2 + $0x2b0] sm:$0xff] }
 0x584   :  { %v6270_v57 = vadd.f32 %v10240_v37, %v6202_v31 }
 0x585   :  { %6939 = vmatmul.msk.f32.gmra.mxu1 %vm776_vm2, %v4690_v5  ;;  %7022 = vmatmul.msk.f32.gmra.mxu2 %vm776_vm2, %v5239_v58  ;;  %v5672_v52 = vadd.f32 %v10215_v50, %v5141_v12  ;;  %v10548_v9 = vpop.f32.mrf.mxu2  ;;  %v5241_v5 = vld [vmem:[#allocation2 + $0x411] sm:$0xff] }
 0x586   :  { %6334 = vst.msk [vmem:[%s11029_s8 + $0x70] sm:$0xff] %vm776_vm2, %v6270_v57  ;;  %7069 = vmatmul.msk.f32.gmra.mxu3 %vm776_vm2, %v5752_v43  ;;  %v5754_v43 = vld [vmem:[#allocation2 + $0x2b2] sm:$0xff] }
 0x587   :  { %v11571_v57 = vld [vmem:[#allocation218_spill] sm:$0xff] }
 0x588   :  { %v4612_v12 = vadd.f32 %v10009_v32, %v11571_v57  ;;  %v5244_v57 = vld [vmem:[#allocation2 + $0x441] sm:$0xff] }
 0x589   :  { %v6041_v45 = vpop.f32.mrf.mxu3 }
 0x58a   :  { %v6203_v59 = vadd.f32 %v6041_v45, %v5672_v52  ;;  %v4982_v36 = vpop.f32.mrf.mxu1 }
 0x58b   :  { %v5142_v2 = vadd.f32 %v4982_v36, %v4610_v24  ;;  %v4693_v24 = vld [vmem:[#allocation2 + $0x2c0] sm:$0xff] }
 0x58c   :  { %v6271_v30 = vadd.f32 %v10240_v37, %v6203_v59  ;;  %v5242_v59 = vld [vmem:[#allocation2 + $0x421] sm:$0xff] }
 0x58d   :  { %6940 = vmatmul.msk.f32.gmra.mxu1 %vm776_vm2, %v4691_v44  ;;  %7023 = vmatmul.msk.f32.gmra.mxu2 %vm776_vm2, %v5240_v18  ;;  %v5673_v25 = vadd.f32 %v10242_v10, %v5142_v2  ;;  %v10562_v36 = vpop.f32.mrf.mxu2  ;;  %v11572_v2 = vld [vmem:[#allocation220_spill] sm:$0xff] }
 0x58e   :  { %6335 = vst.msk [vmem:[%s11029_s8 + $0x78] sm:$0xff] %vm776_vm2, %v6271_v30  ;;  %7070 = vmatmul.msk.f32.gmra.mxu3 %vm776_vm2, %v5753_v3  ;;  %v5755_v30 = vld [vmem:[#allocation2 + $0x2c2] sm:$0xff]  ;;  %v4613_v44 = vadd.f32 %v10028_v23, %v11572_v2  ;;  %v5758_v2 = vld [vmem:[#allocation2 + $0x2f2] sm:$0xff] }
 0x591   :  { %v6044_v50 = vpop.f32.mrf.mxu3 }
 0x592   :  { %v6204_v47 = vadd.f32 %v6044_v50, %v5673_v25  ;;  %v4985_v61 = vpop.f32.mrf.mxu1 }
 0x593   :  { %v5143_v31 = vadd.f32 %v4985_v61, %v4611_v8  ;;  %v5243_v8 = vld [vmem:[#allocation2 + $0x431] sm:$0xff] }
 0x594   :  { %v6272_v11 = vadd.f32 %v10240_v37, %v6204_v47  ;;  %v5756_v47 = vld [vmem:[#allocation2 + $0x2d2] sm:$0xff] }
 0x595   :  { %6941 = vmatmul.msk.f32.gmra.mxu1 %vm776_vm2, %v4692_v55  ;;  %7024 = vmatmul.msk.f32.gmra.mxu2 %vm776_vm2, %v5241_v5  ;;  %v5674_v49 = vadd.f32 %v10267_v15, %v5143_v31  ;;  %v10582_v23 = vpop.f32.mrf.mxu2 }
 0x596   :  { %6336 = vst.msk [vmem:[%s11029_s8 + $0x80] sm:$0xff] %vm776_vm2, %v6272_v11  ;;  %7071 = vmatmul.msk.f32.gmra.mxu3 %vm776_vm2, %v5754_v43  ;;  %v11573_v11 = vld [vmem:[#allocation222_spill] sm:$0xff] }
 0x597   :  { %v4614_v31 = vadd.f32 %v10046_v51, %v11573_v11  ;;  %v11576_v11 = vld [vmem:[#allocation228_spill] sm:$0xff] }
 0x599   :  { %v6047_v10 = vpop.f32.mrf.mxu3 }
 0x59a   :  { %v6205_v58 = vadd.f32 %v6047_v10, %v5674_v49  ;;  %v4988_v52 = vpop.f32.mrf.mxu1  ;;  %v4695_v10 = vld [vmem:[#allocation2 + $0x2e0] sm:$0xff] }
 0x59b   :  { %v5144_v54 = vadd.f32 %v4988_v52, %v4612_v12  ;;  %v5757_v12 = vld [vmem:[#allocation2 + $0x2e2] sm:$0xff] }
 0x59c   :  { %v6273_v45 = vadd.f32 %v10240_v37, %v6205_v58  ;;  %v11574_v52 = vld [vmem:[#allocation224_spill] sm:$0xff] }
 0x59d   :  { %6942 = vmatmul.msk.f32.gmra.mxu1 %vm776_vm2, %v4693_v24  ;;  %7025 = vmatmul.msk.f32.gmra.mxu2 %vm776_vm2, %v5242_v59  ;;  %v5675_v32 = vadd.f32 %v10294_v40, %v5144_v54  ;;  %v5245_v59 = vld [vmem:[#allocation2 + $0x451] sm:$0xff] }
 0x59e   :  { %6337 = vst.msk [vmem:[%s11029_s8 + $0x88] sm:$0xff] %vm776_vm2, %v6273_v45  ;;  %7072 = vmatmul.msk.f32.gmra.mxu3 %vm776_vm2, %v5755_v30  ;;  %v4615_v45 = vadd.f32 %v10063_v19, %v11574_v52 }
 0x5a1   :  { %v6050_v15 = vpop.f32.mrf.mxu3 }
 0x5a2   :  { %v6206_v18 = vadd.f32 %v6050_v15, %v5675_v32  ;;  %v4991_v3 = vpop.f32.mrf.mxu1  ;;  %v4696_v15 = vld [vmem:[#allocation2 + $0x2f0] sm:$0xff] }
 0x5a3   :  { %v5145_v50 = vadd.f32 %v4991_v3, %v4613_v44  ;;  %v11575_v44 = vld [vmem:[#allocation226_spill] sm:$0xff] }
 0x5a4   :  { %v6274_v25 = vadd.f32 %v10240_v37, %v6206_v18  ;;  %v4616_v18 = vadd.f32 %v10081_v33, %v11575_v44 }
 0x5a5   :  { %6943 = vmatmul.msk.f32.gmra.mxu1 %vm776_vm2, %v4694_v41  ;;  %7026 = vmatmul.msk.f32.gmra.mxu2 %vm776_vm2, %v5243_v8  ;;  %v5676_v40 = vadd.f32 %v10322_v6, %v5145_v50  ;;  %v10596_v6 = vpop.f32.mrf.mxu2 }
 0x5a6   :  { %6338 = vst.msk [vmem:[%s11029_s8 + $0x90] sm:$0xff] %vm776_vm2, %v6274_v25  ;;  %7073 = vmatmul.msk.f32.gmra.mxu3 %vm776_vm2, %v5756_v47  ;;  %v4697_v47 = vld [vmem:[#allocation2 + $0x300] sm:$0xff] }
 0x5a9   :  { %v6053_v61 = vpop.f32.mrf.mxu3 }
 0x5aa   :  { %v6207_v55 = vadd.f32 %v6053_v61, %v5676_v40  ;;  %v4994_v5 = vpop.f32.mrf.mxu1  ;;  %v5246_v40 = vld [vmem:[#allocation2 + $0x481] sm:$0xff] }
 0x5ab   :  { %v5146_v49 = vadd.f32 %v4994_v5, %v4614_v31  ;;  %v5759_v61 = vld [vmem:[#allocation2 + $0x302] sm:$0xff]  ;;  %v4617_v31 = vadd.f32 %v10098_v21, %v11576_v11 }
 0x5ac   :  { %v6275_v43 = vadd.f32 %v10240_v37, %v6207_v55 }
 0x5ad   :  { %6944 = vmatmul.msk.f32.gmra.mxu1 %vm776_vm2, %v4695_v10  ;;  %7027 = vmatmul.msk.f32.gmra.mxu2 %vm776_vm2, %v5244_v57  ;;  %v5677_v51 = vadd.f32 %v10349_v62, %v5146_v49  ;;  %v10611_v50 = vpop.f32.mrf.mxu2  ;;  %v5760_v49 = vld [vmem:[#allocation2 + $0x312] sm:$0xff] }
 0x5ae   :  { %6339 = vst.msk [vmem:[%s11029_s8 + $0x98] sm:$0xff] %vm776_vm2, %v6275_v43  ;;  %7074 = vmatmul.msk.f32.gmra.mxu3 %vm776_vm2, %v5757_v12  ;;  %v4698_v43 = vld [vmem:[#allocation2 + $0x310] sm:$0xff] }
 0x5af   :  { %v5247_v12 = vld [vmem:[#allocation2 + $0x491] sm:$0xff] }
 0x5b1   :  { %v6056_v58 = vpop.f32.mrf.mxu3 }
 0x5b2   :  { %v6208_v54 = vadd.f32 %v6056_v58, %v5677_v51  ;;  %v4997_v24 = vpop.f32.mrf.mxu1  ;;  %v11577_v58 = vld [vmem:[#allocation21_spill] sm:$0xff] }
 0x5b3   :  { %v5147_v32 = vadd.f32 %v4997_v24, %v4615_v45  ;;  %v4618_v52 = vadd.f32 %v10117_v56, %v11577_v58 }
 0x5b4   :  { %v6276_v30 = vadd.f32 %v10240_v37, %v6208_v54 }
 0x5b5   :  { %6945 = vmatmul.msk.f32.gmra.mxu1 %vm776_vm2, %v4696_v15  ;;  %7028 = vmatmul.msk.f32.gmra.mxu2 %vm776_vm2, %v5245_v59  ;;  %v5678_v19 = vadd.f32 %v10372_v63, %v5147_v32  ;;  %v10625_v51 = vpop.f32.mrf.mxu2  ;;  %v5248_v32 = vld [vmem:[#allocation2 + $0x4a1] sm:$0xff] }
 0x5b6   :  { %6340 = vst.msk [vmem:[%s11029_s8 + $0xa0] sm:$0xff] %vm776_vm2, %v6276_v30  ;;  %7075 = vmatmul.msk.f32.gmra.mxu3 %vm776_vm2, %v5758_v2  ;;  %v4699_v30 = vld [vmem:[#allocation2 + $0x340] sm:$0xff] }
 0x5b7   :  { %v5761_v15 = vld [vmem:[#allocation2 + $0x342] sm:$0xff] }
 0x5b9   :  { %v6059_v62 = vpop.f32.mrf.mxu3 }
 0x5ba   :  { %v6209_v3 = vadd.f32 %v6059_v62, %v5678_v19  ;;  %v5000_v25 = vpop.f32.mrf.mxu1  ;;  %v11578_v19 = vld [vmem:[#allocation23_spill] sm:$0xff] }
 0x5bb   :  { %v5148_v8 = vadd.f32 %v5000_v25, %v4616_v18  ;;  %v4619_v62 = vadd.f32 %v10134_v53, %v11578_v19 }
 0x5bc   :  { %v6277_v41 = vadd.f32 %v10240_v37, %v6209_v3 }
 0x5bd   :  { %6946 = vmatmul.msk.f32.gmra.mxu1 %vm776_vm2, %v4697_v47  ;;  %7029 = vmatmul.msk.f32.gmra.mxu2 %vm776_vm2, %v5246_v40  ;;  %v5679_v33 = vadd.f32 %v10399_v42, %v5148_v8  ;;  %v10645_v56 = vpop.f32.mrf.mxu2  ;;  %v5249_v8 = vld [vmem:[#allocation2 + $0x4b1] sm:$0xff] }
 0x5be   :  { %6341 = vst.msk [vmem:[%s11029_s8 + $0xa8] sm:$0xff] %vm776_vm2, %v6277_v41  ;;  %7076 = vmatmul.msk.f32.gmra.mxu3 %vm776_vm2, %v5759_v61  ;;  %v4700_v41 = vld [vmem:[#allocation2 + $0x350] sm:$0xff]  ;;  %v11579_v61 = vld [vmem:[#allocation24_spill] sm:$0xff] }
 0x5bf   :  { %v5762_v47 = vld [vmem:[#allocation2 + $0x352] sm:$0xff] }
 0x5c1   :  { %v6062_v63 = vpop.f32.mrf.mxu3 }
 0x5c2   :  { %v6210_v55 = vadd.f32 %v6062_v63, %v5679_v33  ;;  %v5003_v5 = vpop.f32.mrf.mxu1  ;;  %v4620_v33 = vadd.f32 %v10152_v13, %v11579_v61 }
 0x5c3   :  { %v5149_v57 = vadd.f32 %v5003_v5, %v4617_v31  ;;  %v4701_v5 = vld [vmem:[#allocation2 + $0x360] sm:$0xff] }
 0x5c4   :  { %v6278_v10 = vadd.f32 %v10240_v37, %v6210_v55 }
 0x5c5   :  { %6947 = vmatmul.msk.f32.gmra.mxu1 %vm776_vm2, %v4698_v43  ;;  %7030 = vmatmul.msk.f32.gmra.mxu2 %vm776_vm2, %v5247_v12  ;;  %v5680_v21 = vadd.f32 %v10428_v46, %v5149_v57  ;;  %v5250_v43 = vld [vmem:[#allocation2 + $0x4c1] sm:$0xff]  ;;  %v11581_v57 = vld [vmem:[#allocation62_spill] sm:$0xff] }
 0x5c6   :  { %6342 = vst.msk [vmem:[%s11029_s8 + $0xb0] sm:$0xff] %vm776_vm2, %v6278_v10  ;;  %7077 = vmatmul.msk.f32.gmra.mxu3 %vm776_vm2, %v5760_v49  ;;  %v5763_v49 = vld [vmem:[#allocation2 + $0x362] sm:$0xff]  ;;  %v11580_v10 = vld [vmem:[#allocation26_spill] sm:$0xff] }
 0x5c7   :  { %v4621_v12 = vadd.f32 %v11581_v57, %v11580_v10  ;;  %v4705_v10 = vld [vmem:[#allocation2 + $0x3a0] sm:$0xff] }
 0x5c8   :  { %v5767_v57 = vld [vmem:[#allocation2 + $0x3a2] sm:$0xff] }
 0x5c9   :  { %v6065_v42 = vpop.f32.mrf.mxu3 }
 0x5ca   :  { %v6211_v45 = vadd.f32 %v6065_v42, %v5680_v21  ;;  %v5006_v54 = vpop.f32.mrf.mxu1 }
 0x5cb   :  { %v5150_v59 = vadd.f32 %v5006_v54, %v4618_v52  ;;  %v4702_v54 = vld [vmem:[#allocation2 + $0x370] sm:$0xff] }
 0x5cc   :  { %v6279_v24 = vadd.f32 %v10240_v37, %v6211_v45 }
 0x5cd   :  { %6948 = vmatmul.msk.f32.gmra.mxu1 %vm776_vm2, %v4699_v30  ;;  %7031 = vmatmul.msk.f32.gmra.mxu2 %vm776_vm2, %v5248_v32  ;;  %v5681_v46 = vadd.f32 %v10453_v7, %v5150_v59  ;;  %v10659_v7 = vpop.f32.mrf.mxu2  ;;  %v5764_v59 = vld [vmem:[#allocation2 + $0x372] sm:$0xff] }
 0x5ce   :  { %6343 = vst.msk [vmem:[%s11029_s8 + $0xb8] sm:$0xff] %vm776_vm2, %v6279_v24  ;;  %7078 = vmatmul.msk.f32.gmra.mxu3 %vm776_vm2, %v5761_v15  ;;  %v5251_v24 = vld [vmem:[#allocation2 + $0x4d1] sm:$0xff] }
 0x5cf   :  { %v11582_v32 = vld [vmem:[#allocation149_spill] sm:$0xff] }
 0x5d0   :  { %v11583_v15 = vld [vmem:[#allocation17_spill] sm:$0xff] }
 0x5d1   :  { %v6068_v2 = vpop.f32.mrf.mxu3 }
 0x5d2   :  { %v6212_v44 = vadd.f32 %v6068_v2, %v5681_v46  ;;  %v5009_v18 = vpop.f32.mrf.mxu1  ;;  %v4622_v46 = vadd.f32 %v11583_v15, %v11582_v32 }
 0x5d3   :  { %v5151_v25 = vadd.f32 %v5009_v18, %v4619_v62  ;;  %v4703_v18 = vld [vmem:[#allocation2 + $0x380] sm:$0xff] }
 0x5d4   :  { %v6280_v3 = vadd.f32 %v10240_v37, %v6212_v44 }
 0x5d5   :  { %6949 = vmatmul.msk.f32.gmra.mxu1 %vm776_vm2, %v4700_v41  ;;  %7032 = vmatmul.msk.f32.gmra.mxu2 %vm776_vm2, %v5249_v8  ;;  %v5682_v53 = vadd.f32 %v10479_v16, %v5151_v25  ;;  %v10674_v58 = vpop.f32.mrf.mxu2  ;;  %v5765_v41 = vld [vmem:[#allocation2 + $0x382] sm:$0xff] }
 0x5d6   :  { %6344 = vst.msk [vmem:[%s11029_s8 + $0xc0] sm:$0xff] %vm776_vm2, %v6280_v3  ;;  %7079 = vmatmul.msk.f32.gmra.mxu3 %vm776_vm2, %v5762_v47  ;;  %v5252_v3 = vld [vmem:[#allocation2 + $0x4e1] sm:$0xff] }
 0x5d7   :  { %v11584_v47 = vld [vmem:[#allocation27_spill] sm:$0xff] }
 0x5d9   :  { %v6071_v40 = vpop.f32.mrf.mxu3 }
 0x5da   :  { %v6213_v63 = vadd.f32 %v6071_v40, %v5682_v53  ;;  %v5012_v11 = vpop.f32.mrf.mxu1  ;;  %v4623_v53 = vadd.f32 %v10212_v20, %v11584_v47  ;;  %v11585_v20 = vld [vmem:[#allocation5_spill] sm:$0xff] }
 0x5db   :  { %v5152_v55 = vadd.f32 %v5012_v11, %v4620_v33  ;;  %v4704_v11 = vld [vmem:[#allocation2 + $0x390] sm:$0xff] }
 0x5dc   :  { %v6281_v31 = vadd.f32 %v10240_v37, %v6213_v63  ;;  %v4708_v47 = vld [vmem:[#allocation2 + $0x3f0] sm:$0xff] }
 0x5dd   :  { %6950 = vmatmul.msk.f32.gmra.mxu1 %vm776_vm2, %v4701_v5  ;;  %7033 = vmatmul.msk.f32.gmra.mxu2 %vm776_vm2, %v5250_v43  ;;  %v5683_v13 = vadd.f32 %v10499_v14, %v5152_v55  ;;  %v10688_v25 = vpop.f32.mrf.mxu2  ;;  %v4624_v5 = vadd.f32 %v10234_v4, %v11585_v20  ;;  %v4709_v20 = vld [vmem:[#allocation2 + $0x400] sm:$0xff] }
 0x5de   :  { %6345 = vst.msk [vmem:[%s11029_s8 + $0xc8] sm:$0xff] %vm776_vm2, %v6281_v31  ;;  %7080 = vmatmul.msk.f32.gmra.mxu3 %vm776_vm2, %v5763_v49  ;;  %v5766_v31 = vld [vmem:[#allocation2 + $0x392] sm:$0xff]  ;;  %v10713_v49 = vld [vmem:[%s11028_s7] ss:$0 sm:$0xff] }
 0x5e1   :  { %v6074_v16 = vpop.f32.mrf.mxu3 }
 0x5e2   :  { %v6214_v21 = vadd.f32 %v6074_v16, %v5683_v13  ;;  %v5015_v42 = vpop.f32.mrf.mxu1 }
 0x5e3   :  { %v5153_v45 = vadd.f32 %v5015_v42, %v4621_v12  ;;  %v11586_v12 = vld [vmem:[#allocation29_spill] sm:$0xff] }
 0x5e4   :  { %v6282_v52 = vadd.f32 %v10240_v37, %v6214_v21  ;;  %v4625_v21 = vadd.f32 %v10265_v17, %v11586_v12  ;;  %v11587_v17 = vld [vmem:[#allocation30_spill] sm:$0xff]  ;;  %v4710_v12 = vld [vmem:[#allocation2 + $0x410] sm:$0xff] }
 0x5e5   :  { %6951 = vmatmul.msk.f32.gmra.mxu1 %vm776_vm2, %v4702_v54  ;;  %7034 = vmatmul.msk.f32.gmra.mxu2 %vm776_vm2, %v5251_v24  ;;  %v5684_v14 = vadd.f32 %v10519_v22, %v5153_v45  ;;  %v4706_v45 = vld [vmem:[#allocation2 + $0x3b0] sm:$0xff] }
 0x5e6   :  { %6346 = vst.msk [vmem:[%s11029_s8 + $0xd0] sm:$0xff] %vm776_vm2, %v6282_v52  ;;  %7081 = vmatmul.msk.f32.gmra.mxu3 %vm776_vm2, %v5764_v59  ;;  %v5768_v54 = vld [vmem:[#allocation2 + $0x3b2] sm:$0xff] }
 0x5e9   :  { %v6077_v30 = vpop.f32.mrf.mxu3 }
 0x5ea   :  { %v6215_v2 = vadd.f32 %v6077_v30, %v5684_v14  ;;  %v5018_v19 = vpop.f32.mrf.mxu1  ;;  %v4626_v30 = vadd.f32 %v10291_v48, %v11587_v17  ;;  %v11588_v48 = vld [vmem:[#allocation32_spill] sm:$0xff] }
 0x5eb   :  { %v5154_v44 = vadd.f32 %v5018_v19, %v4622_v46  ;;  %v4707_v19 = vld [vmem:[#allocation2 + $0x3e0] sm:$0xff] }
 0x5ec   :  { %v6283_v62 = vadd.f32 %v10240_v37, %v6215_v2 }
 0x5ed   :  { %6952 = vmatmul.msk.f32.gmra.mxu1 %vm776_vm2, %v4703_v18  ;;  %7035 = vmatmul.msk.f32.gmra.mxu2 %vm776_vm2, %v5252_v3  ;;  %v5685_v22 = vadd.f32 %v10533_v1, %v5154_v44  ;;  %v4627_v18 = vadd.f32 %v10315_v60, %v11588_v48  ;;  %v5774_v48 = vld [vmem:[#allocation2 + $0x432] sm:$0xff] }
 0x5ee   :  { %6347 = vst.msk [vmem:[%s11029_s8 + $0xd8] sm:$0xff] %vm776_vm2, %v6283_v62  ;;  %7082 = vmatmul.msk.f32.gmra.mxu3 %vm776_vm2, %v5765_v41  ;;  %v5769_v62 = vld [vmem:[#allocation2 + $0x3e2] sm:$0xff] }
 0x5f1   :  { %v6080_v8 = vpop.f32.mrf.mxu3 }
 0x5f2   :  { %v6216_v40 = vadd.f32 %v6080_v8, %v5685_v22  ;;  %v5021_v61 = vpop.f32.mrf.mxu1 }
 0x5f3   :  { %v5155_v63 = vadd.f32 %v5021_v61, %v4623_v53  ;;  %v5770_v53 = vld [vmem:[#allocation2 + $0x3f2] sm:$0xff] }
 0x5f4   :  { %v6284_v33 = vadd.f32 %v10240_v37, %v6216_v40  ;;  %v10755_v40 = vpop.f32.mrf.mxu0 }
 0x5f5   :  { %6953 = vmatmul.msk.f32.gmra.mxu1 %vm776_vm2, %v4704_v11  ;;  %v5686_v1 = vadd.f32 %v10548_v9, %v5155_v63 }
 0x5f6   :  { %6348 = vst.msk [vmem:[%s11029_s8 + $0xe0] sm:$0xff] %vm776_vm2, %v6284_v33  ;;  %7083 = vmatmul.msk.f32.gmra.mxu3 %vm776_vm2, %v5766_v31  ;;  %v11589_v33 = vld [vmem:[#allocation7_spill] sm:$0xff] }
 0x5f7   :  { %v4628_v63 = vadd.f32 %v10346_v28, %v11589_v33 }
 0x5f9   :  { %v6083_v55 = vpop.f32.mrf.mxu3 }
 0x5fa   :  { %v6217_v43 = vadd.f32 %v6083_v55, %v5686_v1  ;;  %v5024_v37 = vpop.f32.mrf.mxu1 }
 0x5fb   :  { %v5156_v16 = vadd.f32 %v5024_v37, %v4624_v5  ;;  %v5771_v5 = vld [vmem:[#allocation2 + $0x402] sm:$0xff] }
 0x5fc   :  { %v6285_v13 = vadd.f32 %v10713_v49, %v6217_v43  ;;  %v11590_v37 = vld [vmem:[#allocation35_spill] sm:$0xff] }
 0x5fd   :  { %6954 = vmatmul.msk.f32.gmra.mxu1 %vm776_vm2, %v4705_v10  ;;  %v5687_v4 = vadd.f32 %v10562_v36, %v5156_v16 }
 0x5fe   :  { %6349 = vst.msk [vmem:[%s11029_s8 + $0xe8] sm:$0xff] %vm776_vm2, %v6285_v13  ;;  %7084 = vmatmul.msk.f32.gmra.mxu3 %vm776_vm2, %v5767_v57  ;;  %v4629_v13 = vadd.f32 %v10370_v29, %v11590_v37  ;;  %v10771_v57 = vpop.f32.mrf.mxu0 }
 0x601   :  { %v6086_v9 = vpop.f32.mrf.mxu3 }
 0x602   :  { %v6218_v42 = vadd.f32 %v6086_v9, %v5687_v4  ;;  %v5027_v52 = vpop.f32.mrf.mxu1 }
 0x603   :  { %v5157_v59 = vadd.f32 %v5027_v52, %v4625_v21  ;;  %v5772_v21 = vld [vmem:[#allocation2 + $0x412] sm:$0xff] }
 0x604   :  { %v6286_v24 = vadd.f32 %v10713_v49, %v6218_v42  ;;  %v11591_v42 = vld [vmem:[#allocation36_spill] sm:$0xff] }
 0x605   :  { %6955 = vmatmul.msk.f32.gmra.mxu1 %vm776_vm2, %v4706_v45  ;;  %v5688_v36 = vadd.f32 %v10582_v23, %v5157_v59  ;;  %v4630_v52 = vadd.f32 %v10396_v39, %v11591_v42  ;;  %v11596_v42 = vld [vmem:[#allocation209_spill] sm:$0xff] }
 0x606   :  { %6350 = vst.msk [vmem:[%s11029_s8 + $0xf0] sm:$0xff] %vm776_vm2, %v6286_v24  ;;  %7085 = vmatmul.msk.f32.gmra.mxu3 %vm776_vm2, %v5768_v54  ;;  %v10786_v17 = vpop.f32.mrf.mxu0 }
 0x609   :  { %v6089_v14 = vpop.f32.mrf.mxu3 }
 0x60a   :  { %v6219_v32 = vadd.f32 %v6089_v14, %v5688_v36  ;;  %v5030_v15 = vpop.f32.mrf.mxu1  ;;  %v4711_v14 = vld [vmem:[#allocation2 + $0x420] sm:$0xff] }
 0x60b   :  { %v5158_v2 = vadd.f32 %v5030_v15, %v4626_v30  ;;  %v5773_v30 = vld [vmem:[#allocation2 + $0x422] sm:$0xff] }
 0x60c   :  { %v6287_v46 = vadd.f32 %v10713_v49, %v6219_v32  ;;  %v11592_v32 = vld [vmem:[#allocation38_spill] sm:$0xff] }
 0x60d   :  { %6956 = vmatmul.msk.f32.gmra.mxu1 %vm776_vm2, %v4707_v19  ;;  %v5689_v23 = vadd.f32 %v10596_v6, %v5158_v2  ;;  %v10752_v6 = vpop.f32.mrf.mxu2  ;;  %v4631_v15 = vadd.f32 %v10421_v35, %v11592_v32  ;;  %v11597_v32 = vld [vmem:[#allocation172_spill] sm:$0xff] }
 0x60e   :  { %6351 = vst.msk [vmem:[%s11029_s8 + $0xf8] sm:$0xff] %vm776_vm2, %v6287_v46  ;;  %7086 = vmatmul.msk.f32.gmra.mxu3 %vm776_vm2, %v5769_v62 }
 0x611   :  { %v6092_v44 = vpop.f32.mrf.mxu3 }
 0x612   :  { %v6220_v3 = vadd.f32 %v6092_v44, %v5689_v23  ;;  %v5033_v41 = vpop.f32.mrf.mxu1  ;;  %v4712_v23 = vld [vmem:[#allocation2 + $0x430] sm:$0xff] }
 0x613   :  { %v5159_v8 = vadd.f32 %v5033_v41, %v4627_v18 }
 0x614   :  { %v6288_v22 = vadd.f32 %v10713_v49, %v6220_v3  ;;  %v11593_v3 = vld [vmem:[#allocation39_spill] sm:$0xff] }
 0x615   :  { %6957 = vmatmul.msk.f32.gmra.mxu1 %vm776_vm2, %v4708_v47  ;;  %v5690_v60 = vadd.f32 %v10611_v50, %v5159_v8  ;;  %v10767_v43 = vpop.f32.mrf.mxu2  ;;  %v4632_v41 = vadd.f32 %v10450_v26, %v11593_v3  ;;  %v11598_v3 = vld [vmem:[#allocation11_spill] sm:$0xff] }
 0x616   :  { %6352 = vst.msk [vmem:[%s11029_s8 + $0x100] sm:$0xff] %vm776_vm2, %v6288_v22  ;;  %7087 = vmatmul.msk.f32.gmra.mxu3 %vm776_vm2, %v5770_v53 }
 0x619   :  { %v6095_v61 = vpop.f32.mrf.mxu3 }
 0x61a   :  { %v6221_v11 = vadd.f32 %v6095_v61, %v5690_v60  ;;  %v5036_v31 = vpop.f32.mrf.mxu1  ;;  %v4713_v60 = vld [vmem:[#allocation2 + $0x440] sm:$0xff] }
 0x61b   :  { %v5160_v55 = vadd.f32 %v5036_v31, %v4628_v63  ;;  %v5775_v61 = vld [vmem:[#allocation2 + $0x442] sm:$0xff] }
 0x61c   :  { %v6289_v1 = vadd.f32 %v10713_v49, %v6221_v11  ;;  %v11594_v11 = vld [vmem:[#allocation41_spill] sm:$0xff] }
 0x61d   :  { %6958 = vmatmul.msk.f32.gmra.mxu1 %vm776_vm2, %v4709_v20  ;;  %v5691_v50 = vadd.f32 %v10625_v51, %v5160_v55  ;;  %v10783_v24 = vpop.f32.mrf.mxu2  ;;  %v4633_v31 = vadd.f32 %v10477_v0, %v11594_v11  ;;  %v4714_v20 = vld [vmem:[#allocation2 + $0x450] sm:$0xff] }
 0x61e   :  { %6353 = vst.msk [vmem:[%s11029_s8 + $0x108] sm:$0xff] %vm776_vm2, %v6289_v1  ;;  %7088 = vmatmul.msk.f32.gmra.mxu3 %vm776_vm2, %v5771_v5  ;;  %v5776_v5 = vld [vmem:[#allocation2 + $0x452] sm:$0xff] }
 0x621   :  { %v6098_v28 = vpop.f32.mrf.mxu3 }
 0x622   :  { %v6222_v16 = vadd.f32 %v6098_v28, %v5691_v50  ;;  %v5039_v10 = vpop.f32.mrf.mxu1 }
 0x623   :  { %v5161_v9 = vadd.f32 %v5039_v10, %v4629_v13  ;;  %v11595_v13 = vld [vmem:[#allocation42_spill] sm:$0xff] }
 0x624   :  { %v6290_v4 = vadd.f32 %v10713_v49, %v6222_v16  ;;  %v4634_v16 = vadd.f32 %v10755_v40, %v11595_v13  ;;  %v11600_v13 = vld [vmem:[#allocation50_spill] sm:$0xff] }
 0x625   :  { %6959 = vmatmul.msk.f32.gmra.mxu1 %vm776_vm2, %v4710_v12  ;;  %v5692_v29 = vadd.f32 %v10645_v56, %v5161_v9  ;;  %v10798_v44 = vpop.f32.mrf.mxu2 }
 0x626   :  { %6354 = vst.msk [vmem:[%s11029_s8 + $0x110] sm:$0xff] %vm776_vm2, %v6290_v4  ;;  %7089 = vmatmul.msk.f32.gmra.mxu3 %vm776_vm2, %v5772_v21 }
 0x629   :  { %v6101_v51 = vpop.f32.mrf.mxu3 }
 0x62a   :  { %v6223_v45 = vadd.f32 %v6101_v51, %v5692_v29  ;;  %v5042_v54 = vpop.f32.mrf.mxu1  ;;  %v4715_v29 = vld [vmem:[#allocation2 + $0x480] sm:$0xff] }
 0x62b   :  { %v5162_v36 = vadd.f32 %v5042_v54, %v4630_v52  ;;  %v5777_v51 = vld [vmem:[#allocation2 + $0x482] sm:$0xff]  ;;  %v4635_v52 = vadd.f32 %v10771_v57, %v11596_v42 }
 0x62c   :  { %v6291_v59 = vadd.f32 %v10713_v49, %v6223_v45 }
 0x62d   :  { %6960 = vmatmul.msk.f32.gmra.mxu1 %vm776_vm2, %v4711_v14  ;;  %v5693_v39 = vadd.f32 %v10659_v7, %v5162_v36  ;;  %v10806_v7 = vpop.f32.mrf.mxu0 }
 0x62e   :  { %6355 = vst.msk [vmem:[%s11029_s8 + $0x118] sm:$0xff] %vm776_vm2, %v6291_v59  ;;  %7090 = vmatmul.msk.f32.gmra.mxu3 %vm776_vm2, %v5773_v30  ;;  %v4716_v30 = vld [vmem:[#allocation2 + $0x490] sm:$0xff] }
 0x631   :  { %v6104_v56 = vpop.f32.mrf.mxu3 }
 0x632   :  { %v6224_v46 = vadd.f32 %v6104_v56, %v5693_v39  ;;  %v5045_v2 = vpop.f32.mrf.mxu1  ;;  %v5778_v56 = vld [vmem:[#allocation2 + $0x492] sm:$0xff] }
 0x633   :  { %v5163_v62 = vadd.f32 %v5045_v2, %v4631_v15  ;;  %v4636_v15 = vadd.f32 %v10786_v17, %v11597_v32 }
 0x634   :  { %v6292_v19 = vadd.f32 %v10713_v49, %v6224_v46 }
 0x635   :  { %6961 = vmatmul.msk.f32.gmra.mxu1 %vm776_vm2, %v4712_v23  ;;  %v5694_v35 = vadd.f32 %v10674_v58, %v5163_v62  ;;  %v10818_v58 = vpop.f32.mrf.mxu2  ;;  %v10821_v33 = vpop.f32.mrf.mxu0  ;;  %v4717_v23 = vld [vmem:[#allocation2 + $0x4a0] sm:$0xff] }
 0x636   :  { %6356 = vst.msk [vmem:[%s11029_s8 + $0x120] sm:$0xff] %vm776_vm2, %v6292_v19  ;;  %7091 = vmatmul.msk.f32.gmra.mxu3 %vm776_vm2, %v5774_v48 }
 0x639   :  { %v6107_v18 = vpop.f32.mrf.mxu3 }
 0x63a   :  { %v6225_v22 = vadd.f32 %v6107_v18, %v5694_v35  ;;  %v5048_v8 = vpop.f32.mrf.mxu1  ;;  %v5779_v35 = vld [vmem:[#allocation2 + $0x4a2] sm:$0xff] }
 0x63b   :  { %v5164_v53 = vadd.f32 %v5048_v8, %v4632_v41  ;;  %v4637_v41 = vadd.f32 %v10806_v7, %v11598_v3 }
 0x63c   :  { %v6293_v47 = vadd.f32 %v10713_v49, %v6225_v22 }
 0x63d   :  { %6962 = vmatmul.msk.f32.gmra.mxu1 %vm776_vm2, %v4713_v60  ;;  %v5695_v26 = vadd.f32 %v10688_v25, %v5164_v53  ;;  %v10833_v37 = vpop.f32.mrf.mxu2  ;;  %v10837_v9 = vpop.f32.mrf.mxu0  ;;  %v4718_v60 = vld [vmem:[#allocation2 + $0x4b0] sm:$0xff] }
 0x63e   :  { %6357 = vst.msk [vmem:[%s11029_s8 + $0x128] sm:$0xff] %vm776_vm2, %v6293_v47  ;;  %7092 = vmatmul.msk.f32.gmra.mxu3 %vm776_vm2, %v5775_v61  ;;  %v5780_v61 = vld [vmem:[#allocation2 + $0x4b2] sm:$0xff] }
 0x641   :  { %v6110_v63 = vpop.f32.mrf.mxu3 }
 0x642   :  { %v6226_v1 = vadd.f32 %v6110_v63, %v5695_v26  ;;  %v5051_v55 = vpop.f32.mrf.mxu1 }
 0x643   :  { %v5165_v28 = vadd.f32 %v5051_v55, %v4633_v31  ;;  %v11599_v31 = vld [vmem:[#allocation48_spill] sm:$0xff] }
 0x644   :  { %v6294_v50 = vadd.f32 %v10713_v49, %v6226_v1  ;;  %v4638_v1 = vadd.f32 %v10821_v33, %v11599_v31 }
 0x645   :  { %6963 = vmatmul.msk.f32.gmra.mxu1 %vm776_vm2, %v4714_v20  ;;  %v5696_v25 = vadd.f32 %v10752_v6, %v5165_v28  ;;  %v10849_v59 = vpop.f32.mrf.mxu2  ;;  %v10852_v39 = vpop.f32.mrf.mxu0  ;;  %v4719_v28 = vld [vmem:[#allocation2 + $0x4c0] sm:$0xff] }
 0x646   :  { %6358 = vst.msk [vmem:[%s11029_s8 + $0x130] sm:$0xff] %vm776_vm2, %v6294_v50  ;;  %7093 = vmatmul.msk.f32.gmra.mxu3 %vm776_vm2, %v5776_v5 }
 0x649   :  { %v6113_v0 = vpop.f32.mrf.mxu3 }
 0x64a   :  { %v6227_v10 = vadd.f32 %v6113_v0, %v5696_v25  ;;  %v5054_v4 = vpop.f32.mrf.mxu1  ;;  %v5781_v25 = vld [vmem:[#allocation2 + $0x4c2] sm:$0xff] }
 0x64b   :  { %v5166_v21 = vadd.f32 %v5054_v4, %v4634_v16  ;;  %v4639_v16 = vadd.f32 %v10837_v9, %v11600_v13 }
 0x64c   :  { %v6295_v12 = vadd.f32 %v10713_v49, %v6227_v10 }
 0x64d   :  { %6964 = vmatmul.msk.f32.gmra.mxu1 %vm776_vm2, %v4715_v29  ;;  %v5697_v6 = vadd.f32 %v10767_v43, %v5166_v21  ;;  %v5603_v48 = vpop.f32.mrf.mxu2 }
 0x64e   :  { %6359 = vst.msk [vmem:[%s11029_s8 + $0x138] sm:$0xff] %vm776_vm2, %v6295_v12  ;;  %7094 = vmatmul.msk.f32.gmra.mxu3 %vm776_vm2, %v5777_v51  ;;  %v4720_v51 = vld [vmem:[#allocation2 + $0x4d0] sm:$0xff] }
 0x651   :  { %v6116_v40 = vpop.f32.mrf.mxu3 }
 0x652   :  { %v6228_v45 = vadd.f32 %v6116_v40, %v5697_v6  ;;  %v5057_v54 = vpop.f32.mrf.mxu1  ;;  %v5782_v6 = vld [vmem:[#allocation2 + $0x4d2] sm:$0xff]  ;;  %v11601_v40 = vld [vmem:[#allocation180_spill] sm:$0xff] }
 0x653   :  { %v5167_v14 = vadd.f32 %v5057_v54, %v4635_v52  ;;  %v4640_v42 = vadd.f32 %v10852_v39, %v11601_v40  ;;  %v11607_v40 = vld [vmem:[#allocation14_spill] sm:$0xff] }
 0x654   :  { %v6296_v36 = vadd.f32 %v10713_v49, %v6228_v45 }
 0x655   :  { %6965 = vmatmul.msk.f32.gmra.mxu1 %vm776_vm2, %v4716_v30  ;;  %v5698_v43 = vadd.f32 %v10783_v24, %v5167_v14  ;;  %v4543_v24 = vpop.f32.mrf.mxu0  ;;  %v5606_v26 = vpop.f32.mrf.mxu2  ;;  %v4721_v30 = vld [vmem:[#allocation2 + $0x4e0] sm:$0xff] }
 0x656   :  { %6360 = vst.msk [vmem:[%s11029_s8 + $0x140] sm:$0xff] %vm776_vm2, %v6296_v36  ;;  %7095 = vmatmul.msk.f32.gmra.mxu3 %vm776_vm2, %v5778_v56 }
 0x659   :  { %v6119_v57 = vpop.f32.mrf.mxu3 }
 0x65a   :  { %v6229_v46 = vadd.f32 %v6119_v57, %v5698_v43  ;;  %v5060_v2 = vpop.f32.mrf.mxu1  ;;  %v11602_v43 = vld [vmem:[#allocation51_spill] sm:$0xff] }
 0x65b   :  { %v5168_v62 = vadd.f32 %v5060_v2, %v4636_v15  ;;  %v4641_v57 = vadd.f32 %v4543_v24, %v11602_v43  ;;  %v5784_v2 = vld [vmem:[#allocation2 + $0x4f2] sm:$0xff] }
 0x65c   :  { %v6297_v19 = vadd.f32 %v10713_v49, %v6229_v46  ;;  %v4722_v46 = vld [vmem:[#allocation2 + $0x4f0] sm:$0xff] }
 0x65d   :  { %6966 = vmatmul.msk.f32.gmra.mxu1 %vm776_vm2, %v4717_v23  ;;  %v5699_v17 = vadd.f32 %v10798_v44, %v5168_v62  ;;  %v5253_v44 = vld [vmem:[#allocation2 + $0x4f1] sm:$0xff]  ;;  %v4546_v63 = vpop.f32.mrf.mxu0  ;;  %v5609_v0 = vpop.f32.mrf.mxu2 }
 0x65e   :  { %6361 = vst.msk [vmem:[%s11029_s8 + $0x148] sm:$0xff] %vm776_vm2, %v6297_v19  ;;  %7096 = vmatmul.msk.f32.gmra.mxu3 %vm776_vm2, %v5779_v35  ;;  %7036 = vmatmul.msk.f32.gmra.mxu2 %vm776_vm2, %v5253_v44  ;;  %v11603_v24 = vld [vmem:[#allocation13_spill] sm:$0xff] }
 0x661   :  { %v6122_v18 = vpop.f32.mrf.mxu3 }
 0x662   :  { %v6230_v22 = vadd.f32 %v6122_v18, %v5699_v17  ;;  %v5063_v8 = vpop.f32.mrf.mxu1  ;;  %v4642_v17 = vadd.f32 %v4546_v63, %v11603_v24 }
 0x663   :  { %v5169_v53 = vadd.f32 %v5063_v8, %v4637_v41 }
 0x664   :  { %v6298_v47 = vadd.f32 %v10713_v49, %v6230_v22 }
 0x665   :  { %6967 = vmatmul.msk.f32.gmra.mxu1 %vm776_vm2, %v4718_v60  ;;  %v5700_v7 = vadd.f32 %v10818_v58, %v5169_v53  ;;  %v4549_v12 = vpop.f32.mrf.mxu0  ;;  %v5612_v54 = vpop.f32.mrf.mxu2 }
 0x666   :  { %6362 = vst.msk [vmem:[%s11029_s8 + $0x150] sm:$0xff] %vm776_vm2, %v6298_v47  ;;  %7097 = vmatmul.msk.f32.gmra.mxu3 %vm776_vm2, %v5780_v61  ;;  %v11604_v61 = vld [vmem:[#allocation53_spill] sm:$0xff] }
 0x667   :  { %v4643_v44 = vadd.f32 %v4549_v12, %v11604_v61 }
 0x669   :  { %v6125_v11 = vpop.f32.mrf.mxu3 }
 0x66a   :  { %v6231_v55 = vadd.f32 %v6125_v11, %v5700_v7  ;;  %v5066_v20 = vpop.f32.mrf.mxu1 }
 0x66b   :  { %v5170_v50 = vadd.f32 %v5066_v20, %v4638_v1  ;;  %v11605_v20 = vld [vmem:[#allocation184_spill] sm:$0xff] }
 0x66c   :  { %v6299_v5 = vadd.f32 %v10713_v49, %v6231_v55 }
 0x66d   :  { %6968 = vmatmul.msk.f32.gmra.mxu1 %vm776_vm2, %v4719_v28  ;;  %v5701_v58 = vadd.f32 %v10833_v37, %v5170_v50  ;;  %v4552_v56 = vpop.f32.mrf.mxu0  ;;  %v5615_v23 = vpop.f32.mrf.mxu2 }
 0x66e   :  { %6363 = vst.msk [vmem:[%s11029_s8 + $0x158] sm:$0xff] %vm776_vm2, %v6299_v5  ;;  %7098 = vmatmul.msk.f32.gmra.mxu3 %vm776_vm2, %v5781_v25  ;;  %v4644_v5 = vadd.f32 %v4552_v56, %v11605_v20 }
 0x671   :  { %v6128_v33 = vpop.f32.mrf.mxu3 }
 0x672   :  { %v6232_v10 = vadd.f32 %v6128_v33, %v5701_v58  ;;  %v5069_v4 = vpop.f32.mrf.mxu1 }
 0x673   :  { %v5171_v29 = vadd.f32 %v5069_v4, %v4639_v16  ;;  %v11606_v16 = vld [vmem:[#allocation54_spill] sm:$0xff] }
 0x674   :  { %v6300_v21 = vadd.f32 %v10713_v49, %v6232_v10 }
 0x675   :  { %6969 = vmatmul.msk.f32.gmra.mxu1 %vm776_vm2, %v4720_v51  ;;  %v5702_v37 = vadd.f32 %v10849_v59, %v5171_v29  ;;  %v5618_v8 = vpop.f32.mrf.mxu2 }
 0x676   :  { %6364 = vst.msk [vmem:[%s11029_s8 + $0x160] sm:$0xff] %vm776_vm2, %v6300_v21  ;;  %7099 = vmatmul.msk.f32.gmra.mxu3 %vm776_vm2, %v5782_v6 }
 0x679   :  { %v6131_v9 = vpop.f32.mrf.mxu3 }
 0x67a   :  { %v6233_v52 = vadd.f32 %v6131_v9, %v5702_v37  ;;  %v5072_v45 = vpop.f32.mrf.mxu1 }
 0x67b   :  { %v5172_v14 = vadd.f32 %v5072_v45, %v4640_v42 }
 0x67c   :  { %v6301_v36 = vadd.f32 %v10713_v49, %v6233_v52 }
 0x67d   :  { %6970 = vmatmul.msk.f32.gmra.mxu1 %vm776_vm2, %v4721_v30  ;;  %v5703_v59 = vadd.f32 %v5603_v48, %v5172_v14  ;;  %v5621_v1 = vpop.f32.mrf.mxu2 }
 0x67e   :  { %6365 = vst.msk [vmem:[%s11029_s8 + $0x168] sm:$0xff] %vm776_vm2, %v6301_v36  ;;  %7100 = vmatmul.msk.f32.gmra.mxu3 %vm776_vm2, %v10475_v34  ;;  %v4555_v34 = vpop.f32.mrf.mxu0 }
 0x67f   :  { %v4645_v10 = vadd.f32 %v4555_v34, %v11606_v16  ;;  %v11609_v34 = vld [vmem:[#allocation57_spill] sm:$0xff] }
 0x681   :  { %v6134_v39 = vpop.f32.mrf.mxu3 }
 0x682   :  { %v6234_v32 = vadd.f32 %v6134_v39, %v5703_v59  ;;  %v5075_v15 = vpop.f32.mrf.mxu1  ;;  %v11608_v39 = vld [vmem:[#allocation56_spill] sm:$0xff] }
 0x683   :  { %v5173_v62 = vadd.f32 %v5075_v15, %v4641_v57 }
 0x684   :  { %v6302_v19 = vadd.f32 %v10713_v49, %v6234_v32 }
 0x685   :  { %6971 = vmatmul.msk.f32.gmra.mxu1 %vm776_vm2, %v4722_v46  ;;  %v5704_v48 = vadd.f32 %v5606_v26, %v5173_v62  ;;  %v5624_v21 = vpop.f32.mrf.mxu2 }
 0x686   :  { %6366 = vst.msk [vmem:[%s11029_s8 + $0x170] sm:$0xff] %vm776_vm2, %v6302_v19  ;;  %7101 = vmatmul.msk.f32.gmra.mxu3 %vm776_vm2, %v5784_v2  ;;  %v4558_v53 = vpop.f32.mrf.mxu0 }
 0x687   :  { %v4646_v42 = vadd.f32 %v4558_v53, %v11607_v40 }
 0x689   :  { %v6137_v35 = vpop.f32.mrf.mxu3 }
 0x68a   :  { %v6235_v18 = vadd.f32 %v6137_v35, %v5704_v48  ;;  %v5078_v3 = vpop.f32.mrf.mxu1 }
 0x68b   :  { %v5174_v22 = vadd.f32 %v5078_v3, %v4642_v17 }
 0x68c   :  { %v6303_v41 = vadd.f32 %v10713_v49, %v6235_v18 }
 0x68d   :  { %v5705_v47 = vadd.f32 %v5609_v0, %v5174_v22  ;;  %v5627_v14 = vpop.f32.mrf.mxu2 }
 0x68e   :  { %6367 = vst.msk [vmem:[%s11029_s8 + $0x178] sm:$0xff] %vm776_vm2, %v6303_v41  ;;  %v4561_v25 = vpop.f32.mrf.mxu0 }
 0x68f   :  { %v4647_v43 = vadd.f32 %v4561_v25, %v11608_v39 }
 0x691   :  { %v6140_v60 = vpop.f32.mrf.mxu3 }
 0x692   :  { %v6236_v26 = vadd.f32 %v6140_v60, %v5705_v47  ;;  %v5081_v7 = vpop.f32.mrf.mxu1 }
 0x693   :  { %v5175_v11 = vadd.f32 %v5081_v7, %v4643_v44 }
 0x694   :  { %v6304_v63 = vadd.f32 %v10713_v49, %v6236_v26 }
 0x695   :  { %v5706_v31 = vadd.f32 %v5612_v54, %v5175_v11  ;;  %v5630_v2 = vpop.f32.mrf.mxu2  ;;  %v11611_v11 = vld [vmem:[#allocation59_spill] sm:$0xff] }
 0x696   :  { %6368 = vst.msk [vmem:[%s11029_s8 + $0x180] sm:$0xff] %vm776_vm2, %v6304_v63  ;;  %v4564_v6 = vpop.f32.mrf.mxu0 }
 0x697   :  { %v4648_v48 = vadd.f32 %v4564_v6, %v11609_v34  ;;  %v11613_v6 = vld [vmem:[#allocation60_spill] sm:$0xff] }
 0x699   :  { %v6143_v55 = vpop.f32.mrf.mxu3 }
 0x69a   :  { %v6237_v50 = vadd.f32 %v6143_v55, %v5706_v31  ;;  %v5084_v28 = vpop.f32.mrf.mxu1 }
 0x69b   :  { %v5176_v0 = vadd.f32 %v5084_v28, %v4644_v5 }
 0x69c   :  { %v6305_v58 = vadd.f32 %v10713_v49, %v6237_v50 }
 0x69d   :  { %v5707_v33 = vadd.f32 %v5615_v23, %v5176_v0  ;;  %v5633_v41 = vpop.f32.mrf.mxu2  ;;  %v11612_v0 = vld [vmem:[#allocation191_spill] sm:$0xff] }
 0x69e   :  { %6369 = vst.msk [vmem:[%s11029_s8 + $0x188] sm:$0xff] %vm776_vm2, %v6305_v58  ;;  %v4567_v30 = vpop.f32.mrf.mxu0 }
 0x6a1   :  { %v6146_v13 = vpop.f32.mrf.mxu3 }
 0x6a2   :  { %v6238_v4 = vadd.f32 %v6146_v13, %v5707_v33  ;;  %v5087_v12 = vpop.f32.mrf.mxu1 }
 0x6a3   :  { %v5177_v51 = vadd.f32 %v5087_v12, %v4645_v10 }
 0x6a4   :  { %v6306_v29 = vadd.f32 %v10713_v49, %v6238_v4 }
 0x6a5   :  { %v5708_v37 = vadd.f32 %v5618_v8, %v5177_v51  ;;  %v11610_v8 = vld [vmem:[#allocation15_spill] sm:$0xff]  ;;  %v5636_v20 = vpop.f32.mrf.mxu2 }
 0x6a6   :  { %6370 = vst.msk [vmem:[%s11029_s8 + $0x190] sm:$0xff] %vm776_vm2, %v6306_v29  ;;  %v4570_v62 = vpop.f32.mrf.mxu0  ;;  %v4649_v47 = vadd.f32 %v4567_v30, %v11610_v8  ;;  %v11614_v30 = vld [vmem:[#allocation16_spill] sm:$0xff] }
 0x6a7   :  { %v4650_v31 = vadd.f32 %v4570_v62, %v11611_v11 }
 0x6a9   :  { %v6149_v9 = vpop.f32.mrf.mxu3 }
 0x6aa   :  { %v6239_v52 = vadd.f32 %v6149_v9, %v5708_v37  ;;  %v5090_v45 = vpop.f32.mrf.mxu1 }
 0x6ab   :  { %v5178_v36 = vadd.f32 %v5090_v45, %v4646_v42 }
 0x6ac   :  { %v6307_v54 = vadd.f32 %v10713_v49, %v6239_v52 }
 0x6ad   :  { %v5709_v56 = vadd.f32 %v5621_v1, %v5178_v36  ;;  %v5639_v12 = vpop.f32.mrf.mxu2 }
 0x6ae   :  { %6371 = vst.msk [vmem:[%s11029_s8 + $0x198] sm:$0xff] %vm776_vm2, %v6307_v54  ;;  %v4573_v61 = vpop.f32.mrf.mxu0 }
 0x6af   :  { %v4651_v33 = vadd.f32 %v4573_v61, %v11612_v0 }
 0x6b1   :  { %v6152_v59 = vpop.f32.mrf.mxu3 }
 0x6b2   :  { %v6240_v57 = vadd.f32 %v6152_v59, %v5709_v56  ;;  %v5093_v32 = vpop.f32.mrf.mxu1 }
 0x6b3   :  { %v5179_v46 = vadd.f32 %v5093_v32, %v4647_v43 }
 0x6b4   :  { %v6308_v15 = vadd.f32 %v10713_v49, %v6240_v57 }
 0x6b5   :  { %v5710_v19 = vadd.f32 %v5624_v21, %v5179_v46  ;;  %v5642_v45 = vpop.f32.mrf.mxu2 }
 0x6b6   :  { %6372 = vst.msk [vmem:[%s11029_s8 + $0x1a0] sm:$0xff] %vm776_vm2, %v6308_v15  ;;  %v4576_v28 = vpop.f32.mrf.mxu0 }
 0x6b7   :  { %v4652_v37 = vadd.f32 %v4576_v28, %v11613_v6 }
 0x6b9   :  { %v6155_v23 = vpop.f32.mrf.mxu3 }
 0x6ba   :  { %v6241_v35 = vadd.f32 %v6155_v23, %v5710_v19  ;;  %v5096_v24 = vpop.f32.mrf.mxu1 }
 0x6bb   :  { %v5180_v18 = vadd.f32 %v5096_v24, %v4648_v48 }
 0x6bc   :  { %v6309_v17 = vadd.f32 %v10713_v49, %v6241_v35 }
 0x6bd   :  { %v5711_v3 = vadd.f32 %v5627_v14, %v5180_v18  ;;  %v5645_v15 = vpop.f32.mrf.mxu2  ;;  %v11616_v18 = vld [vmem:[#allocation63_spill] sm:$0xff] }
 0x6be   :  { %6373 = vst.msk [vmem:[%s11029_s8 + $0x1a8] sm:$0xff] %vm776_vm2, %v6309_v17  ;;  %v4579_v21 = vpop.f32.mrf.mxu0 }
 0x6bf   :  { %v4653_v56 = vadd.f32 %v4579_v21, %v11614_v30 }
 0x6c1   :  { %v6158_v22 = vpop.f32.mrf.mxu3 }
 0x6c2   :  { %v6242_v53 = vadd.f32 %v6158_v22, %v5711_v3  ;;  %v5099_v60 = vpop.f32.mrf.mxu1 }
 0x6c3   :  { %v5181_v26 = vadd.f32 %v5099_v60, %v4649_v47 }
 0x6c4   :  { %v6310_v44 = vadd.f32 %v10713_v49, %v6242_v53 }
 0x6c5   :  { %v5712_v7 = vadd.f32 %v5630_v2, %v5181_v26  ;;  %v11615_v2 = vld [vmem:[#allocation195_spill] sm:$0xff]  ;;  %v5648_v8 = vpop.f32.mrf.mxu2 }
 0x6c6   :  { %6374 = vst.msk [vmem:[%s11029_s8 + $0x1b0] sm:$0xff] %vm776_vm2, %v6310_v44  ;;  %v4582_v36 = vpop.f32.mrf.mxu0 }
 0x6c7   :  { %v4654_v19 = vadd.f32 %v4582_v36, %v11615_v2 }
 0x6c9   :  { %v6161_v63 = vpop.f32.mrf.mxu3 }
 0x6ca   :  { %v6243_v1 = vadd.f32 %v6161_v63, %v5712_v7  ;;  %v5102_v55 = vpop.f32.mrf.mxu1 }
 0x6cb   :  { %v5182_v50 = vadd.f32 %v5102_v55, %v4650_v31 }
 0x6cc   :  { %v6311_v5 = vadd.f32 %v10713_v49, %v6243_v1 }
 0x6cd   :  { %v5713_v25 = vadd.f32 %v5633_v41, %v5182_v50  ;;  %v5651_v1 = vpop.f32.mrf.mxu2 }
 0x6ce   :  { %6375 = vst.msk [vmem:[%s11029_s8 + $0x1b8] sm:$0xff] %vm776_vm2, %v6311_v5  ;;  %v4585_v34 = vpop.f32.mrf.mxu0 }
 0x6cf   :  { %v4655_v3 = vadd.f32 %v4585_v34, %v11616_v18 }
 0x6d1   :  { %v6164_v58 = vpop.f32.mrf.mxu3 }
 0x6d2   :  { %v6244_v13 = vadd.f32 %v6164_v58, %v5713_v25  ;;  %v5105_v16 = vpop.f32.mrf.mxu1 }
 0x6d3   :  { %v5183_v4 = vadd.f32 %v5105_v16, %v4651_v33 }
 0x6d4   :  { %v6312_v10 = vadd.f32 %v10713_v49, %v6244_v13 }
 0x6d5   :  { %v5714_v29 = vadd.f32 %v5636_v20, %v5183_v4 }
 0x6d6   :  { %6376 = vst.msk [vmem:[%s11029_s8 + $0x1c0] sm:$0xff] %vm776_vm2, %v6312_v10  ;;  %v4588_v60 = vpop.f32.mrf.mxu0 }
 0x6d7   :  { %v4656_v26 = vadd.f32 %v4588_v60, %v10204_v38 }
 0x6d9   :  { %v6167_v51 = vpop.f32.mrf.mxu3 }
 0x6da   :  { %v6245_v9 = vadd.f32 %v6167_v51, %v5714_v29  ;;  %v5108_v40 = vpop.f32.mrf.mxu1 }
 0x6db   :  { %v5184_v52 = vadd.f32 %v5108_v40, %v4652_v37 }
 0x6dc   :  { %v6313_v42 = vadd.f32 %v10713_v49, %v6245_v9 }
 0x6dd   :  { %v5715_v54 = vadd.f32 %v5639_v12, %v5184_v52 }
 0x6de   :  { %6377 = vst.msk [vmem:[%s11029_s8 + $0x1c8] sm:$0xff] %vm776_vm2, %v6313_v42  ;;  %v4591_v55 = vpop.f32.mrf.mxu0 }
 0x6df   :  { %v4657_v50 = vadd.f32 %v4591_v55, %v10223_v27 }
 0x6e1   :  { %v6170_v14 = vpop.f32.mrf.mxu3  ;;  %v5654_v0 = vpop.f32.mrf.mxu2 }
 0x6e2   :  { %v6246_v59 = vadd.f32 %v6170_v14, %v5715_v54  ;;  %v5111_v39 = vpop.f32.mrf.mxu1 }
 0x6e3   :  { %v5185_v57 = vadd.f32 %v5111_v39, %v4653_v56 }
 0x6e4   :  { %v6314_v43 = vadd.f32 %v10713_v49, %v6246_v59 }
 0x6e5   :  { %v5716_v32 = vadd.f32 %v5642_v45, %v5185_v57 }
 0x6e6   :  { %6378 = vst.msk [vmem:[%s11029_s8 + $0x1d0] sm:$0xff] %vm776_vm2, %v6314_v43 }
 0x6e9   :  { %v6173_v46 = vpop.f32.mrf.mxu3 }
 0x6ea   :  { %v6247_v62 = vadd.f32 %v6173_v46, %v5716_v32  ;;  %v5114_v23 = vpop.f32.mrf.mxu1 }
 0x6eb   :  { %v5186_v35 = vadd.f32 %v5114_v23, %v4654_v19 }
 0x6ec   :  { %v6315_v48 = vadd.f32 %v10713_v49, %v6247_v62 }
 0x6ed   :  { %v5717_v24 = vadd.f32 %v5645_v15, %v5186_v35 }
 0x6ee   :  { %6379 = vst.msk [vmem:[%s11029_s8 + $0x1d8] sm:$0xff] %vm776_vm2, %v6315_v48 }
 0x6f1   :  { %v6176_v17 = vpop.f32.mrf.mxu3 }
 0x6f2   :  { %v6248_v41 = vadd.f32 %v6176_v17, %v5717_v24  ;;  %v5117_v22 = vpop.f32.mrf.mxu1 }
 0x6f3   :  { %v5187_v53 = vadd.f32 %v5117_v22, %v4655_v3 }
 0x6f4   :  { %v6316_v47 = vadd.f32 %v10713_v49, %v6248_v41 }
 0x6f5   :  { %v5718_v61 = vadd.f32 %v5648_v8, %v5187_v53 }
 0x6f6   :  { %6380 = vst.msk [vmem:[%s11029_s8 + $0x1e0] sm:$0xff] %vm776_vm2, %v6316_v47 }
 0x6f9   :  { %v6179_v44 = vpop.f32.mrf.mxu3 }
 0x6fa   :  { %v6249_v7 = vadd.f32 %v6179_v44, %v5718_v61  ;;  %v5120_v63 = vpop.f32.mrf.mxu1 }
 0x6fb   :  { %v5188_v31 = vadd.f32 %v5120_v63, %v4656_v26 }
 0x6fc   :  { %v6317_v11 = vadd.f32 %v10713_v49, %v6249_v7 }
 0x6fd   :  { %v5719_v20 = vadd.f32 %v5651_v1, %v5188_v31 }
 0x6fe   :  { %6381 = vst.msk [vmem:[%s11029_s8 + $0x1e8] sm:$0xff] %vm776_vm2, %v6317_v11 }
 0x701   :  { %v6182_v5 = vpop.f32.mrf.mxu3 }
 0x702   :  { %v6250_v28 = vadd.f32 %v6182_v5, %v5719_v20  ;;  %v5123_v25 = vpop.f32.mrf.mxu1 }
 0x703   :  { %v5189_v58 = vadd.f32 %v5123_v25, %v4657_v50 }
 0x704   :  { %v6318_v38 = vadd.f32 %v10713_v49, %v6250_v28 }
 0x705   :  { %v5720_v33 = vadd.f32 %v5654_v0, %v5189_v58 }
 0x706   :  { %6382 = vst.msk [vmem:[%s11029_s8 + $0x1f0] sm:$0xff] %vm776_vm2, %v6318_v38 }
 0x709   :  { %v6185_v13 = vpop.f32.mrf.mxu3 }
 0x70a   :  { %v6251_v16 = vadd.f32 %v6185_v13, %v5720_v33 }
 0x70c   :  { %v6319_v10 = vadd.f32 %v10713_v49, %v6251_v16 }
 0x70e   :  { %6383 = vst.msk [vmem:[%s11029_s8 + $0x1f8] sm:$0xff] %vm776_vm2, %v6319_v10 }

</bundles_post_ra>
